<compile_context>
chip_gen: v7x
topology: tpu7x:2x2x1
jax: 0.10.0
libtpu: 0.0.40
codegen_flags: <defaults>
</compile_context>

<pallas_src>
import functools

import jax
import jax.numpy as jnp
from jax import lax
from jax.experimental import pallas as pl
from jax.experimental.pallas import tpu as pltpu

_MiB = 1024 * 1024


def _bottleneck_kernel(x_ref, w1_ref, w2_ref, w3_ref, sb_ref, out_ref, halo_ref,
                       *, Bt, H, W, Cp, Cout, mm_dtype):
    """One grid step = Bt images; all matmuls are bf16 x bf16 -> f32 on the MXU."""
    x = x_ref[...]                                     # (Bt, H, W, Cout) f32
    xm = x.reshape(Bt * H * W, Cout)                   # residual rows / conv1 input

    # BN scale/bias, packed into one lane-aligned buffer (rows: s1,b1,s2,b2,s3,b3).
    s1 = sb_ref[0:1, :Cp]
    b1 = sb_ref[1:2, :Cp]
    s2 = sb_ref[2:3, :Cp]
    b2 = sb_ref[3:4, :Cp]
    s3 = sb_ref[4:5, :Cout]
    b3 = sb_ref[5:6, :Cout]

    # ---- conv1 (1x1, no bias) + bn1 + ReLU :  (M, Cout) @ (Cout, Cp) ----
    a1 = jnp.dot(xm.astype(mm_dtype), w1_ref[...],
                 preferred_element_type=jnp.float32)
    h1 = jnp.maximum(a1 * s1 + b1, 0.0)                # (M, Cp) f32

    # ---- conv2 (3x3, pad 1, no bias): persistent bf16 halo scratch + 9
    #      accumulating dots.  No concatenate-built pads, no (M, 9*Cp) patch
    #      tensor.  The scratch is fully rewritten every step (stateless ->
    #      megacore-safe); the zero fill beyond the 1-pixel ring is negligible. ----
    halo_ref[...] = jnp.zeros((Bt, H + 2, W + 2, Cp), mm_dtype)
    halo_ref[:, 1:H + 1, 1:W + 1, :] = h1.astype(mm_dtype).reshape(Bt, H, W, Cp)

    acc = jnp.zeros((Bt * H * W, Cp), jnp.float32)
    for t in range(9):                                  # static unroll (9 taps)
        dy, dx = t // 3, t % 3
        tap = halo_ref[:, dy:dy + H, dx:dx + W, :].reshape(Bt * H * W, Cp)
        acc = acc + jnp.dot(tap, w2_ref[t], preferred_element_type=jnp.float32)
    h2 = jnp.maximum(acc * s2 + b2, 0.0)                # (M, Cp) f32

    # ---- conv3 (1x1, no bias) + bn3 :  (M, Cp) @ (Cp, Cout) ----
    a3 = jnp.dot(h2.astype(mm_dtype), w3_ref[...],
                 preferred_element_type=jnp.float32)
    h3 = a3 * s3 + b3                                   # (M, Cout) f32

    # ---- identity residual + ReLU (lane-dense store: last dim = Cout) ----
    out = jnp.maximum(h3 + xm, 0.0)
    out_ref[...] = out.reshape(Bt, H, W, Cout).astype(out_ref.dtype)


def _tpu_config():
    """Return (vmem_limit_bytes, prefer_multi_step) for the current TPU generation.

    v5e/v6e: 128 MiB VMEM, 1 TensorCore  -> big single-step tiles, ~100 MiB cap.
    v7x:     64  MiB VMEM, 2 TensorCores -> keep an even >=2-step grid, ~48 MiB cap.
    """
    vmem_cap = None
    try:
        vmem_cap = int(pltpu.get_tpu_info().vmem_capacity_bytes)
    except Exception:
        pass
    kind = ""
    try:
        kind = jax.devices()[0].device_kind.lower()
    except Exception:
        pass
    multi_core = "v7" in kind
    if vmem_cap is None:
        vmem_cap = (64 if multi_core else 128) * _MiB
    if multi_core or vmem_cap <= 64 * _MiB:
        return int(min(48 * _MiB, (vmem_cap * 3) // 4)), True
    return int(min(100 * _MiB, max(vmem_cap - 28 * _MiB, 32 * _MiB))), False


def _pick_batch_tile(B, H, W, Cp, Cout, *, tile_budget_bytes, prefer_multi_step):
    """Largest batch tile whose estimated VMEM footprint fits the budget.

    On 2-TensorCore chips (v7x) prefer a grid with an even number of >=2 steps so
    dimension_semantics=("parallel",) actually splits work across both cores.
    """
    # Approximate per-image footprint (bytes):
    halo = (H + 2) * (W + 2) * Cp * 2                       # bf16 halo scratch
    io = 2 * 2 * H * W * Cout * 4                           # x + out, f32, double-buffered
    tmp = H * W * (3 * Cp * 4 + 2 * Cout * 4 + 2 * Cp * 2)  # h1/acc/h2 f32, a3/xm f32, bf16 casts
    per_image = halo + io + tmp
    max_bt = max(1, tile_budget_bytes // per_image)

    divisors = [d for d in range(1, B + 1) if B % d == 0]
    fitting = [d for d in divisors if d <= max_bt] or [1]
    if prefer_multi_step:
        even = [d for d in fitting if (B // d) >= 2 and (B // d) % 2 == 0]
        if even:
            return max(even)
        multi = [d for d in fitting if (B // d) >= 2]
        if multi:
            return max(multi)
    return max(fitting)


def bottleneck_forward_nhwc(x, params, *, eps=1e-5, mm_dtype=jnp.bfloat16,
                            batch_tile=None):
    """Pallas forward. x: (B, H, W, Cin) float32, NHWC (channels-last)."""
    B, H, W, Cin = x.shape
    Cp = params["conv1_w"].shape[0]          # planes
    Cout = params["conv3_w"].shape[0]        # planes * expansion
    assert Cin == Cout, "identity residual requires inplanes == planes*expansion"
    # TODO(synk): stride>1 / downsample branch not implemented (reference config
    #             is stride=1, downsample=None).

    def fuse_bn(g, b, m, v):
        s = g / jnp.sqrt(v + eps)
        return s.astype(jnp.float32), (b - m * s).astype(jnp.float32)

    s1, b1 = fuse_bn(params["bn1_gamma"], params["bn1_beta"],
                     params["bn1_mean"], params["bn1_var"])
    s2, b2 = fuse_bn(params["bn2_gamma"], params["bn2_beta"],
                     params["bn2_mean"], params["bn2_var"])
    s3, b3 = fuse_bn(params["bn3_gamma"], params["bn3_beta"],
                     params["bn3_mean"], params["bn3_var"])

    # Pack the six tiny scale/bias vectors into ONE (6, Cpad) f32 buffer.
    Cpad = max(Cp, Cout)

    def _row(v):
        return jnp.pad(v, (0, Cpad - v.shape[0]))

    sb = jnp.stack([_row(s1), _row(b1), _row(s2), _row(b2), _row(s3), _row(b3)],
                   axis=0)                                                  # (6, Cpad)

    # PyTorch OIHW weights -> matmul-friendly layouts, bf16 MXU operands only
    # (accumulation and all elementwise BN/ReLU math stay f32).
    w1 = params["conv1_w"][:, :, 0, 0].T.astype(mm_dtype)                   # (Cin, Cp)
    w2 = jnp.transpose(params["conv2_w"], (2, 3, 1, 0)) \
            .reshape(9, Cp, Cp).astype(mm_dtype)                             # (9, Cp, Cp)
    w3 = params["conv3_w"][:, :, 0, 0].T.astype(mm_dtype)                   # (Cp, Cout)

    vmem_limit, prefer_multi_step = _tpu_config()
    Bt = batch_tile or _pick_batch_tile(
        B, H, W, Cp, Cout, tile_budget_bytes=vmem_limit // 2,
        prefer_multi_step=prefer_multi_step)
    assert B % Bt == 0, "batch_tile must divide the batch size"
    grid = (B // Bt,)

    kernel = functools.partial(_bottleneck_kernel, Bt=Bt, H=H, W=W,
                               Cp=Cp, Cout=Cout, mm_dtype=mm_dtype)

    def full(shape):
        nd = len(shape)
        return pl.BlockSpec(shape, lambda b, _nd=nd: (0,) * _nd)

    out = pl.pallas_call(
        kernel,
        out_shape=jax.ShapeDtypeStruct((B, H, W, Cout), jnp.float32),
        grid=grid,
        in_specs=[
            pl.BlockSpec((Bt, H, W, Cin), lambda b: (b, 0, 0, 0)),   # activations
            full(w1.shape), full(w2.shape), full(w3.shape),          # weights (resident)
            full(sb.shape),                                          # packed BN scale/bias
        ],
        out_specs=pl.BlockSpec((Bt, H, W, Cout), lambda b: (b, 0, 0, 0)),
        scratch_shapes=[pltpu.VMEM((Bt, H + 2, W + 2, Cp), mm_dtype)],   # conv2 halo
        compiler_params=pltpu.CompilerParams(
            dimension_semantics=("parallel",),
            vmem_limit_bytes=int(vmem_limit),
        ),
    )(x.astype(jnp.float32), w1, w2, w3, sb)
    return out


def bottleneck_forward_nchw(x_nchw, params, **kw):
    """Convenience wrapper matching the PyTorch NCHW interface."""
    x = jnp.transpose(x_nchw, (0, 2, 3, 1))
    out = bottleneck_forward_nhwc(x, params, **kw)
    return jnp.transpose(out, (0, 3, 1, 2))


def ref_forward_nhwc(x, params, eps=1e-5, mm_dtype=jnp.float32):
    """Pure-JAX NHWC reference matching the PyTorch Bottleneck (eval-mode BN).
    mm_dtype controls the conv operand precision (bf16 to mirror the kernel)."""
    def conv(a, w_oihw, pad):
        w = jnp.transpose(w_oihw, (2, 3, 1, 0))                       # HWIO
        return lax.conv_general_dilated(
            a.astype(mm_dtype), w.astype(mm_dtype), (1, 1),
            ((pad, pad), (pad, pad)),
            dimension_numbers=("NHWC", "HWIO", "NHWC"),
            preferred_element_type=jnp.float32)

    def bn(a, g, b, m, v):
        return (a - m) / jnp.sqrt(v + eps) * g + b

    out = jnp.maximum(bn(conv(x, params["conv1_w"], 0), params["bn1_gamma"],
                         params["bn1_beta"], params["bn1_mean"], params["bn1_var"]), 0.0)
    out = jnp.maximum(bn(conv(out, params["conv2_w"], 1), params["bn2_gamma"],
                         params["bn2_beta"], params["bn2_mean"], params["bn2_var"]), 0.0)
    out = bn(conv(out, params["conv3_w"], 0), params["bn3_gamma"],
             params["bn3_beta"], params["bn3_mean"], params["bn3_var"])
    return jnp.maximum(out + x, 0.0)


def make_params(key, planes, expansion=4):
    Cp = planes
    Cout = planes * expansion
    ks = jax.random.split(key, 16)
    return {
        "conv1_w": 0.1 * jax.random.normal(ks[0], (Cp, Cout, 1, 1), jnp.float32),
        "conv2_w": 0.1 * jax.random.normal(ks[1], (Cp, Cp, 3, 3), jnp.float32),
        "conv3_w": 0.1 * jax.random.normal(ks[2], (Cout, Cp, 1, 1), jnp.float32),
        "bn1_gamma": 1.0 + 0.1 * jax.random.normal(ks[3], (Cp,), jnp.float32),
        "bn1_beta": 0.1 * jax.random.normal(ks[4], (Cp,), jnp.float32),
        "bn1_mean": 0.1 * jax.random.normal(ks[5], (Cp,), jnp.float32),
        "bn1_var": 0.5 + jnp.abs(jax.random.normal(ks[6], (Cp,), jnp.float32)),
        "bn2_gamma": 1.0 + 0.1 * jax.random.normal(ks[7], (Cp,), jnp.float32),
        "bn2_beta": 0.1 * jax.random.normal(ks[8], (Cp,), jnp.float32),
        "bn2_mean": 0.1 * jax.random.normal(ks[9], (Cp,), jnp.float32),
        "bn2_var": 0.5 + jnp.abs(jax.random.normal(ks[10], (Cp,), jnp.float32)),
        "bn3_gamma": 1.0 + 0.1 * jax.random.normal(ks[11], (Cout,), jnp.float32),
        "bn3_beta": 0.1 * jax.random.normal(ks[12], (Cout,), jnp.float32),
        "bn3_mean": 0.1 * jax.random.normal(ks[13], (Cout,), jnp.float32),
        "bn3_var": 0.5 + jnp.abs(jax.random.normal(ks[14], (Cout,), jnp.float32)),
    }


if __name__ == "__main__":
    # Bottleneck with inplanes == planes*4, stride=1, downsample=None (identity valid).
    B, H, W = 8, 8, 8
    planes, expansion = 32, 4
    Cin = planes * expansion                       # 128 -> lane-dense activations

    key = jax.random.PRNGKey(0)
    kx, kp = jax.random.split(key)
    x = jax.random.normal(kx, (B, H, W, Cin), jnp.float32)      # NHWC
    params = make_params(kp, planes, expansion)

    out = jax.block_until_ready(bottleneck_forward_nhwc(x, params))

    # Tight check vs a reference with the same bf16 MXU-operand rounding,
    # plus a sanity check vs the full-f32 PyTorch-equivalent reference.
    ref_match = jax.block_until_ready(ref_forward_nhwc(x, params, mm_dtype=jnp.bfloat16))
    ref_f32 = jax.block_until_ready(ref_forward_nhwc(x, params, mm_dtype=jnp.float32))

    assert out.shape == (B, H, W, Cin) and out.dtype == jnp.float32
    if not jnp.allclose(out, ref_match, atol=2e-3, rtol=2e-3):
        raise AssertionError("Pallas output does not match bf16-matched JAX reference")
    if not jnp.allclose(out, ref_f32, atol=5e-2, rtol=5e-2):
        raise AssertionError("Pallas output drifts too far from f32 JAX reference")
    print("KERNEL_OK")
</pallas_src>

<mosaic_0001>
module attributes {stable_mosaic.version = 11 : i64} {
  func.func @_bottleneck_kernel(%arg0: i32, %arg1: memref<8x8x8x128xf32, #tpu.memory_space<vmem>>, %arg2: memref<128x32xbf16, #tpu.memory_space<vmem>>, %arg3: memref<9x32x32xbf16, #tpu.memory_space<vmem>>, %arg4: memref<32x128xbf16, #tpu.memory_space<vmem>>, %arg5: memref<6x128xf32, #tpu.memory_space<vmem>>, %arg6: memref<8x8x8x128xf32, #tpu.memory_space<vmem>>, %arg7: memref<8x10x10x32xbf16, #tpu.memory_space<vmem>>) attributes {dimension_semantics = [#tpu.dimension_semantics<parallel>], iteration_bounds = array<i64: 1>, scalar_prefetch = 0 : i64, scratch_operands = 1 : i64, tpu.core_type = #tpu.core_type<tc>, window_params = [{transform_indices = @transform_0, window_bounds = array<i64: 8, 8, 8, 128>}, {pipeline_mode = #tpu.pipeline_mode<synchronous>, transform_indices = @transform_1, window_bounds = array<i64: 128, 32>}, {pipeline_mode = #tpu.pipeline_mode<synchronous>, transform_indices = @transform_2, window_bounds = array<i64: 9, 32, 32>}, {pipeline_mode = #tpu.pipeline_mode<synchronous>, transform_indices = @transform_3, window_bounds = array<i64: 32, 128>}, {pipeline_mode = #tpu.pipeline_mode<synchronous>, transform_indices = @transform_4, window_bounds = array<i64: 6, 128>}, {transform_indices = @transform_5, window_bounds = array<i64: 8, 8, 8, 128>}]} {
    %c0 = arith.constant 0 : index
    %c0_0 = arith.constant 0 : index
    %c0_1 = arith.constant 0 : index
    %c0_2 = arith.constant 0 : index
    %0 = vector.load %arg1[%c0, %c0_0, %c0_1, %c0_2] : memref<8x8x8x128xf32, #tpu.memory_space<vmem>>, vector<8x8x8x128xf32>
    %1 = vector.shape_cast %0 : vector<8x8x8x128xf32> to vector<512x128xf32>
    %c0_3 = arith.constant 0 : index
    %c0_4 = arith.constant 0 : index
    %2 = vector.load %arg5[%c0_3, %c0_4] : memref<6x128xf32, #tpu.memory_space<vmem>>, vector<1x32xf32>
    %c1 = arith.constant 1 : index
    %c0_5 = arith.constant 0 : index
    %3 = vector.load %arg5[%c1, %c0_5] : memref<6x128xf32, #tpu.memory_space<vmem>>, vector<1x32xf32>
    %c2 = arith.constant 2 : index
    %c0_6 = arith.constant 0 : index
    %4 = vector.load %arg5[%c2, %c0_6] : memref<6x128xf32, #tpu.memory_space<vmem>>, vector<1x32xf32>
    %c3 = arith.constant 3 : index
    %c0_7 = arith.constant 0 : index
    %5 = vector.load %arg5[%c3, %c0_7] : memref<6x128xf32, #tpu.memory_space<vmem>>, vector<1x32xf32>
    %c4 = arith.constant 4 : index
    %c0_8 = arith.constant 0 : index
    %6 = vector.load %arg5[%c4, %c0_8] : memref<6x128xf32, #tpu.memory_space<vmem>>, vector<1x128xf32>
    %c5 = arith.constant 5 : index
    %c0_9 = arith.constant 0 : index
    %7 = vector.load %arg5[%c5, %c0_9] : memref<6x128xf32, #tpu.memory_space<vmem>>, vector<1x128xf32>
    %8 = arith.truncf %1 : vector<512x128xf32> to vector<512x128xbf16>
    %c0_10 = arith.constant 0 : index
    %c0_11 = arith.constant 0 : index
    %9 = vector.load %arg2[%c0_10, %c0_11] : memref<128x32xbf16, #tpu.memory_space<vmem>>, vector<128x32xbf16>
    %cst = arith.constant dense<0.000000e+00> : vector<512x32xf32>
    %10 = tpu.matmul %8, %9, %cst {dimension_numbers = #tpu.dot_dimension_numbers<[1], [0], [0], [1], [0, 0, 1, 1], [], []>} : vector<512x128xbf16>, vector<128x32xbf16>, vector<512x32xf32> -> vector<512x32xf32>
    %11 = vector.broadcast %2 : vector<1x32xf32> to vector<512x32xf32>
    %12 = arith.mulf %10, %11 : vector<512x32xf32>
    %13 = vector.broadcast %3 : vector<1x32xf32> to vector<512x32xf32>
    %14 = arith.addf %12, %13 : vector<512x32xf32>
    %cst_12 = arith.constant 0.000000e+00 : f32
    %15 = vector.broadcast %cst_12 : f32 to vector<512x32xf32>
    %16 = arith.maximumf %14, %15 : vector<512x32xf32>
    %cst_13 = arith.constant 0.000000e+00 : bf16
    %17 = vector.broadcast %cst_13 : bf16 to vector<8x10x10x32xbf16>
    %c0_14 = arith.constant 0 : index
    %c0_15 = arith.constant 0 : index
    %c0_16 = arith.constant 0 : index
    %c0_17 = arith.constant 0 : index
    %18 = vector.load %arg7[%c0_14, %c0_15, %c0_16, %c0_17] : memref<8x10x10x32xbf16, #tpu.memory_space<vmem>>, vector<8x10x10x32xbf16>
    tpu.vector_store %arg7[%c0_14, %c0_15, %c0_16, %c0_17], %17 {strides = array<i32>} : memref<8x10x10x32xbf16, #tpu.memory_space<vmem>>, vector<8x10x10x32xbf16>,
    %19 = arith.truncf %16 : vector<512x32xf32> to vector<512x32xbf16>
    %20 = vector.shape_cast %19 : vector<512x32xbf16> to vector<8x8x8x32xbf16>
    %c0_18 = arith.constant 0 : index
    %c1_19 = arith.constant 1 : index
    %c1_20 = arith.constant 1 : index
    %c0_21 = arith.constant 0 : index
    %21 = vector.load %arg7[%c0_18, %c1_19, %c1_20, %c0_21] : memref<8x10x10x32xbf16, #tpu.memory_space<vmem>>, vector<8x8x8x32xbf16>
    tpu.vector_store %arg7[%c0_18, %c1_19, %c1_20, %c0_21], %20 {strides = array<i32>} : memref<8x10x10x32xbf16, #tpu.memory_space<vmem>>, vector<8x8x8x32xbf16>,
    %cst_22 = arith.constant 0.000000e+00 : f32
    %22 = vector.broadcast %cst_22 : f32 to vector<512x32xf32>
    %c0_23 = arith.constant 0 : index
    %c0_24 = arith.constant 0 : index
    %c0_25 = arith.constant 0 : index
    %c0_26 = arith.constant 0 : index
    %23 = vector.load %arg7[%c0_23, %c0_24, %c0_25, %c0_26] : memref<8x10x10x32xbf16, #tpu.memory_space<vmem>>, vector<8x8x8x32xbf16>
    %24 = vector.shape_cast %23 : vector<8x8x8x32xbf16> to vector<512x32xbf16>
    %c0_27 = arith.constant 0 : index
    %c0_28 = arith.constant 0 : index
    %c0_29 = arith.constant 0 : index
    %25 = vector.load %arg3[%c0_27, %c0_28, %c0_29] : memref<9x32x32xbf16, #tpu.memory_space<vmem>>, vector<1x32x32xbf16>
    %26 = vector.shape_cast %25 : vector<1x32x32xbf16> to vector<32x32xbf16>
    %cst_30 = arith.constant dense<0.000000e+00> : vector<512x32xf32>
    %27 = tpu.matmul %24, %26, %cst_30 {dimension_numbers = #tpu.dot_dimension_numbers<[1], [0], [0], [1], [0, 0, 1, 1], [], []>} : vector<512x32xbf16>, vector<32x32xbf16>, vector<512x32xf32> -> vector<512x32xf32>
    %28 = arith.addf %22, %27 : vector<512x32xf32>
    %c0_31 = arith.constant 0 : index
    %c0_32 = arith.constant 0 : index
    %c1_33 = arith.constant 1 : index
    %c0_34 = arith.constant 0 : index
    %29 = vector.load %arg7[%c0_31, %c0_32, %c1_33, %c0_34] : memref<8x10x10x32xbf16, #tpu.memory_space<vmem>>, vector<8x8x8x32xbf16>
    %30 = vector.shape_cast %29 : vector<8x8x8x32xbf16> to vector<512x32xbf16>
    %c1_35 = arith.constant 1 : index
    %c0_36 = arith.constant 0 : index
    %c0_37 = arith.constant 0 : index
    %31 = vector.load %arg3[%c1_35, %c0_36, %c0_37] : memref<9x32x32xbf16, #tpu.memory_space<vmem>>, vector<1x32x32xbf16>
    %32 = vector.shape_cast %31 : vector<1x32x32xbf16> to vector<32x32xbf16>
    %cst_38 = arith.constant dense<0.000000e+00> : vector<512x32xf32>
    %33 = tpu.matmul %30, %32, %cst_38 {dimension_numbers = #tpu.dot_dimension_numbers<[1], [0], [0], [1], [0, 0, 1, 1], [], []>} : vector<512x32xbf16>, vector<32x32xbf16>, vector<512x32xf32> -> vector<512x32xf32>
    %34 = arith.addf %28, %33 : vector<512x32xf32>
    %c0_39 = arith.constant 0 : index
    %c0_40 = arith.constant 0 : index
    %c2_41 = arith.constant 2 : index
    %c0_42 = arith.constant 0 : index
    %35 = vector.load %arg7[%c0_39, %c0_40, %c2_41, %c0_42] : memref<8x10x10x32xbf16, #tpu.memory_space<vmem>>, vector<8x8x8x32xbf16>
    %36 = vector.shape_cast %35 : vector<8x8x8x32xbf16> to vector<512x32xbf16>
    %c2_43 = arith.constant 2 : index
    %c0_44 = arith.constant 0 : index
    %c0_45 = arith.constant 0 : index
    %37 = vector.load %arg3[%c2_43, %c0_44, %c0_45] : memref<9x32x32xbf16, #tpu.memory_space<vmem>>, vector<1x32x32xbf16>
    %38 = vector.shape_cast %37 : vector<1x32x32xbf16> to vector<32x32xbf16>
    %cst_46 = arith.constant dense<0.000000e+00> : vector<512x32xf32>
    %39 = tpu.matmul %36, %38, %cst_46 {dimension_numbers = #tpu.dot_dimension_numbers<[1], [0], [0], [1], [0, 0, 1, 1], [], []>} : vector<512x32xbf16>, vector<32x32xbf16>, vector<512x32xf32> -> vector<512x32xf32>
    %40 = arith.addf %34, %39 : vector<512x32xf32>
    %c0_47 = arith.constant 0 : index
    %c1_48 = arith.constant 1 : index
    %c0_49 = arith.constant 0 : index
    %c0_50 = arith.constant 0 : index
    %41 = vector.load %arg7[%c0_47, %c1_48, %c0_49, %c0_50] : memref<8x10x10x32xbf16, #tpu.memory_space<vmem>>, vector<8x8x8x32xbf16>
    %42 = vector.shape_cast %41 : vector<8x8x8x32xbf16> to vector<512x32xbf16>
    %c3_51 = arith.constant 3 : index
    %c0_52 = arith.constant 0 : index
    %c0_53 = arith.constant 0 : index
    %43 = vector.load %arg3[%c3_51, %c0_52, %c0_53] : memref<9x32x32xbf16, #tpu.memory_space<vmem>>, vector<1x32x32xbf16>
    %44 = vector.shape_cast %43 : vector<1x32x32xbf16> to vector<32x32xbf16>
    %cst_54 = arith.constant dense<0.000000e+00> : vector<512x32xf32>
    %45 = tpu.matmul %42, %44, %cst_54 {dimension_numbers = #tpu.dot_dimension_numbers<[1], [0], [0], [1], [0, 0, 1, 1], [], []>} : vector<512x32xbf16>, vector<32x32xbf16>, vector<512x32xf32> -> vector<512x32xf32>
    %46 = arith.addf %40, %45 : vector<512x32xf32>
    %c0_55 = arith.constant 0 : index
    %c1_56 = arith.constant 1 : index
    %c1_57 = arith.constant 1 : index
    %c0_58 = arith.constant 0 : index
    %47 = vector.load %arg7[%c0_55, %c1_56, %c1_57, %c0_58] : memref<8x10x10x32xbf16, #tpu.memory_space<vmem>>, vector<8x8x8x32xbf16>
    %48 = vector.shape_cast %47 : vector<8x8x8x32xbf16> to vector<512x32xbf16>
    %c4_59 = arith.constant 4 : index
    %c0_60 = arith.constant 0 : index
    %c0_61 = arith.constant 0 : index
    %49 = vector.load %arg3[%c4_59, %c0_60, %c0_61] : memref<9x32x32xbf16, #tpu.memory_space<vmem>>, vector<1x32x32xbf16>
    %50 = vector.shape_cast %49 : vector<1x32x32xbf16> to vector<32x32xbf16>
    %cst_62 = arith.constant dense<0.000000e+00> : vector<512x32xf32>
    %51 = tpu.matmul %48, %50, %cst_62 {dimension_numbers = #tpu.dot_dimension_numbers<[1], [0], [0], [1], [0, 0, 1, 1], [], []>} : vector<512x32xbf16>, vector<32x32xbf16>, vector<512x32xf32> -> vector<512x32xf32>
    %52 = arith.addf %46, %51 : vector<512x32xf32>
    %c0_63 = arith.constant 0 : index
    %c1_64 = arith.constant 1 : index
    %c2_65 = arith.constant 2 : index
    %c0_66 = arith.constant 0 : index
    %53 = vector.load %arg7[%c0_63, %c1_64, %c2_65, %c0_66] : memref<8x10x10x32xbf16, #tpu.memory_space<vmem>>, vector<8x8x8x32xbf16>
    %54 = vector.shape_cast %53 : vector<8x8x8x32xbf16> to vector<512x32xbf16>
    %c5_67 = arith.constant 5 : index
    %c0_68 = arith.constant 0 : index
    %c0_69 = arith.constant 0 : index
    %55 = vector.load %arg3[%c5_67, %c0_68, %c0_69] : memref<9x32x32xbf16, #tpu.memory_space<vmem>>, vector<1x32x32xbf16>
    %56 = vector.shape_cast %55 : vector<1x32x32xbf16> to vector<32x32xbf16>
    %cst_70 = arith.constant dense<0.000000e+00> : vector<512x32xf32>
    %57 = tpu.matmul %54, %56, %cst_70 {dimension_numbers = #tpu.dot_dimension_numbers<[1], [0], [0], [1], [0, 0, 1, 1], [], []>} : vector<512x32xbf16>, vector<32x32xbf16>, vector<512x32xf32> -> vector<512x32xf32>
    %58 = arith.addf %52, %57 : vector<512x32xf32>
    %c0_71 = arith.constant 0 : index
    %c2_72 = arith.constant 2 : index
    %c0_73 = arith.constant 0 : index
    %c0_74 = arith.constant 0 : index
    %59 = vector.load %arg7[%c0_71, %c2_72, %c0_73, %c0_74] : memref<8x10x10x32xbf16, #tpu.memory_space<vmem>>, vector<8x8x8x32xbf16>
    %60 = vector.shape_cast %59 : vector<8x8x8x32xbf16> to vector<512x32xbf16>
    %c6 = arith.constant 6 : index
    %c0_75 = arith.constant 0 : index
    %c0_76 = arith.constant 0 : index
    %61 = vector.load %arg3[%c6, %c0_75, %c0_76] : memref<9x32x32xbf16, #tpu.memory_space<vmem>>, vector<1x32x32xbf16>
    %62 = vector.shape_cast %61 : vector<1x32x32xbf16> to vector<32x32xbf16>
    %cst_77 = arith.constant dense<0.000000e+00> : vector<512x32xf32>
    %63 = tpu.matmul %60, %62, %cst_77 {dimension_numbers = #tpu.dot_dimension_numbers<[1], [0], [0], [1], [0, 0, 1, 1], [], []>} : vector<512x32xbf16>, vector<32x32xbf16>, vector<512x32xf32> -> vector<512x32xf32>
    %64 = arith.addf %58, %63 : vector<512x32xf32>
    %c0_78 = arith.constant 0 : index
    %c2_79 = arith.constant 2 : index
    %c1_80 = arith.constant 1 : index
    %c0_81 = arith.constant 0 : index
    %65 = vector.load %arg7[%c0_78, %c2_79, %c1_80, %c0_81] : memref<8x10x10x32xbf16, #tpu.memory_space<vmem>>, vector<8x8x8x32xbf16>
    %66 = vector.shape_cast %65 : vector<8x8x8x32xbf16> to vector<512x32xbf16>
    %c7 = arith.constant 7 : index
    %c0_82 = arith.constant 0 : index
    %c0_83 = arith.constant 0 : index
    %67 = vector.load %arg3[%c7, %c0_82, %c0_83] : memref<9x32x32xbf16, #tpu.memory_space<vmem>>, vector<1x32x32xbf16>
    %68 = vector.shape_cast %67 : vector<1x32x32xbf16> to vector<32x32xbf16>
    %cst_84 = arith.constant dense<0.000000e+00> : vector<512x32xf32>
    %69 = tpu.matmul %66, %68, %cst_84 {dimension_numbers = #tpu.dot_dimension_numbers<[1], [0], [0], [1], [0, 0, 1, 1], [], []>} : vector<512x32xbf16>, vector<32x32xbf16>, vector<512x32xf32> -> vector<512x32xf32>
    %70 = arith.addf %64, %69 : vector<512x32xf32>
    %c0_85 = arith.constant 0 : index
    %c2_86 = arith.constant 2 : index
    %c2_87 = arith.constant 2 : index
    %c0_88 = arith.constant 0 : index
    %71 = vector.load %arg7[%c0_85, %c2_86, %c2_87, %c0_88] : memref<8x10x10x32xbf16, #tpu.memory_space<vmem>>, vector<8x8x8x32xbf16>
    %72 = vector.shape_cast %71 : vector<8x8x8x32xbf16> to vector<512x32xbf16>
    %c8 = arith.constant 8 : index
    %c0_89 = arith.constant 0 : index
    %c0_90 = arith.constant 0 : index
    %73 = vector.load %arg3[%c8, %c0_89, %c0_90] : memref<9x32x32xbf16, #tpu.memory_space<vmem>>, vector<1x32x32xbf16>
    %74 = vector.shape_cast %73 : vector<1x32x32xbf16> to vector<32x32xbf16>
    %cst_91 = arith.constant dense<0.000000e+00> : vector<512x32xf32>
    %75 = tpu.matmul %72, %74, %cst_91 {dimension_numbers = #tpu.dot_dimension_numbers<[1], [0], [0], [1], [0, 0, 1, 1], [], []>} : vector<512x32xbf16>, vector<32x32xbf16>, vector<512x32xf32> -> vector<512x32xf32>
    %76 = arith.addf %70, %75 : vector<512x32xf32>
    %77 = vector.broadcast %4 : vector<1x32xf32> to vector<512x32xf32>
    %78 = arith.mulf %76, %77 : vector<512x32xf32>
    %79 = vector.broadcast %5 : vector<1x32xf32> to vector<512x32xf32>
    %80 = arith.addf %78, %79 : vector<512x32xf32>
    %cst_92 = arith.constant 0.000000e+00 : f32
    %81 = vector.broadcast %cst_92 : f32 to vector<512x32xf32>
    %82 = arith.maximumf %80, %81 : vector<512x32xf32>
    %83 = arith.truncf %82 : vector<512x32xf32> to vector<512x32xbf16>
    %c0_93 = arith.constant 0 : index
    %c0_94 = arith.constant 0 : index
    %84 = vector.load %arg4[%c0_93, %c0_94] : memref<32x128xbf16, #tpu.memory_space<vmem>>, vector<32x128xbf16>
    %cst_95 = arith.constant dense<0.000000e+00> : vector<512x128xf32>
    %85 = tpu.matmul %83, %84, %cst_95 {dimension_numbers = #tpu.dot_dimension_numbers<[1], [0], [0], [1], [0, 0, 1, 1], [], []>} : vector<512x32xbf16>, vector<32x128xbf16>, vector<512x128xf32> -> vector<512x128xf32>
    %86 = vector.broadcast %6 : vector<1x128xf32> to vector<512x128xf32>
    %87 = arith.mulf %85, %86 : vector<512x128xf32>
    %88 = vector.broadcast %7 : vector<1x128xf32> to vector<512x128xf32>
    %89 = arith.addf %87, %88 : vector<512x128xf32>
    %90 = arith.addf %89, %1 : vector<512x128xf32>
    %cst_96 = arith.constant 0.000000e+00 : f32
    %91 = vector.broadcast %cst_96 : f32 to vector<512x128xf32>
    %92 = arith.maximumf %90, %91 : vector<512x128xf32>
    %93 = vector.shape_cast %92 : vector<512x128xf32> to vector<8x8x8x128xf32>
    %c0_97 = arith.constant 0 : index
    %c0_98 = arith.constant 0 : index
    %c0_99 = arith.constant 0 : index
    %c0_100 = arith.constant 0 : index
    %94 = vector.load %arg6[%c0_97, %c0_98, %c0_99, %c0_100] : memref<8x8x8x128xf32, #tpu.memory_space<vmem>>, vector<8x8x8x128xf32>
    tpu.vector_store %arg6[%c0_97, %c0_98, %c0_99, %c0_100], %93 {strides = array<i32>} : memref<8x8x8x128xf32, #tpu.memory_space<vmem>>, vector<8x8x8x128xf32>,
    return
  }
  func.func @transform_0(%arg0: i32) -> (i32, i32, i32, i32) {
    %c0_i32 = arith.constant 0 : i32
    %c0_i32_0 = arith.constant 0 : i32
    %c0_i32_1 = arith.constant 0 : i32
    %c0_i32_2 = arith.constant 0 : i32
    return %arg0, %c0_i32, %c0_i32_0, %c0_i32_1 : i32, i32, i32, i32
  }
  func.func @transform_1(%arg0: i32) -> (i32, i32) {
    %c0_i32 = arith.constant 0 : i32
    %c0_i32_0 = arith.constant 0 : i32
    %c0_i32_1 = arith.constant 0 : i32
    return %c0_i32, %c0_i32_0 : i32, i32
  }
  func.func @transform_2(%arg0: i32) -> (i32, i32, i32) {
    %c0_i32 = arith.constant 0 : i32
    %c0_i32_0 = arith.constant 0 : i32
    %c0_i32_1 = arith.constant 0 : i32
    %c0_i32_2 = arith.constant 0 : i32
    return %c0_i32, %c0_i32_0, %c0_i32_1 : i32, i32, i32
  }
  func.func @transform_3(%arg0: i32) -> (i32, i32) {
    %c0_i32 = arith.constant 0 : i32
    %c0_i32_0 = arith.constant 0 : i32
    %c0_i32_1 = arith.constant 0 : i32
    return %c0_i32, %c0_i32_0 : i32, i32
  }
  func.func @transform_4(%arg0: i32) -> (i32, i32) {
    %c0_i32 = arith.constant 0 : i32
    %c0_i32_0 = arith.constant 0 : i32
    %c0_i32_1 = arith.constant 0 : i32
    return %c0_i32, %c0_i32_0 : i32, i32
  }
  func.func @transform_5(%arg0: i32) -> (i32, i32, i32, i32) {
    %c0_i32 = arith.constant 0 : i32
    %c0_i32_0 = arith.constant 0 : i32
    %c0_i32_1 = arith.constant 0 : i32
    %c0_i32_2 = arith.constant 0 : i32
    return %arg0, %c0_i32, %c0_i32_0, %c0_i32_1 : i32, i32, i32, i32
  }
}

</mosaic_0001>

<bundles_post_ra>
// kernel: tpu_custom_call.1
= control target key start
LH: loop header
LB: loop body
LE: loop exit
PB: predicated region body
PF: predicated region fallthrough
CT: control target
= control target key end

     0   :  { %10 = vsyncpa [#allocation4], 0  ;;  %s18920_s0 = inlined_call_operand.hbm [shape: f32[8,8,8,128], index: 0, kind: input, shape index: {}]   ;;  %s18921_s1 = inlined_call_operand.hbm [shape: bf16[128,32], index: 1, kind: input, shape index: {}]   ;;  %s18922_s2 = inlined_call_operand.hbm [shape: bf16[9,32,32], index: 2, kind: input, shape index: {}]   ;;  %s18923_s3 = inlined_call_operand.hbm [shape: bf16[32,128], index: 3, kind: input, shape index: {}]   ;;  %s18924_s4 = inlined_call_operand.hbm [shape: f32[6,128], index: 4, kind: input, shape index: {}]   ;;  %s18925_s5 = inlined_call_operand.hbm [shape: f32[8,8,8,128], index: 5, kind: output, shape index: {}]  }
   0x1   :  { %11 = vsyncpa [#allocation7], 0 }
   0x2   :  { %12 = vsyncpa [#allocation10], 0 }
   0x3   :  { %13 = vsyncpa [#allocation5], 0  ;;  %s15985_s18 = smov [#allocation6]   ;;  %s15845_s22 = scalar_lea.hbm %s18921_s1, 1024 }
   0x4   :  { %s31_s19 = sshll.u32 %s15985_s18, 4  ;;  %p15846_p0 = scmp.ne.s32.totalorder %s18921_s1, %s15845_s22  ;;  %s32_s19 = int_to_ptr.vmem [resolvable:$true] %s31_s19 }
   0x5   :  { %p15849_p1 = scmp.lt.u32.totalorder %s15845_s22, %s18921_s1 }
   0x7   :  { %p15851_p2 = pnand %p15849_p1, %p15846_p0 }
   0x9   :  { %15854 = shalt.err (!%p15851_p2)
}
   0xa   :  { %s15855_s27 = scalar_lea.vmem %s32_s19, 1024  ;;  %p15860_p4 = scmp.lt.s32.totalorder %s32_s19, %s32_s19 }
   0xb   :  { %p15856_p3 = scmp.ne.s32.totalorder %s32_s19, %s15855_s27  ;;  %p15861_p5 = scmp.lt.s32.totalorder %s15855_s27, %s15855_s27 }
   0xd   :  { %p15862_p6 = por %p15861_p5, %p15860_p4 }
   0xf   :  { %p15863_p7 = pnand %p15862_p6, %p15856_p3 }
  0x11   :  { %15866 = shalt.err (!%p15863_p7)
}
  0x12   :  { %s15986_s28 = smov 64   ;;  %s15987_s29 = smov 4  }
  0x13   :  { %37 = dma.hbm_to_vmem [thread:$0]  %s18921_s1, 1024, %s32_s19, [#allocation7], %s15986_s28, %s15986_s28, %s15987_s29  }
  0x14   :  { %s15988_s7 = smov [#allocation9]   ;;  %s15989_s9 = smov [#allocation3]  }
  0x15   :  { %s55_s8 = sshll.u32 %s15988_s7, 4  ;;  %s19_s10 = sshll.u32 %s15989_s9, 4  ;;  %s56_s8 = int_to_ptr.vmem [resolvable:$true] %s55_s8  ;;  %s20_s10 = int_to_ptr.vmem [resolvable:$true] %s19_s10 }
  0x16   :  { %s15867_s13 = scalar_lea.hbm %s18923_s3, 256 }
  0x17   :  { %p15868_p8 = scmp.ne.s32.totalorder %s18923_s3, %s15867_s13  ;;  %p15871_p9 = scmp.lt.u32.totalorder %s15867_s13, %s18923_s3 }
  0x19   :  { %p15873_p10 = pnand %p15871_p9, %p15868_p8 }
  0x1b   :  { %15876 = shalt.err (!%p15873_p10)
}
  0x1c   :  { %s15877_s1 = scalar_lea.vmem %s56_s8, 256  ;;  %p15882_p12 = scmp.lt.s32.totalorder %s56_s8, %s56_s8 }
  0x1d   :  { %p15878_p11 = scmp.ne.s32.totalorder %s56_s8, %s15877_s1  ;;  %p15883_p13 = scmp.lt.s32.totalorder %s15877_s1, %s15877_s1 }
  0x1f   :  { %p15884_p0 = por %p15883_p13, %p15882_p12 }
  0x21   :  { %p15885_p1 = pnand %p15884_p0, %p15878_p11 }
  0x23   :  { %15888 = shalt.err (!%p15885_p1)
}
  0x24   :  { %61 = dma.hbm_to_vmem [thread:$0]  %s18923_s3, 256, %s56_s8, [#allocation10], %s15986_s28, %s15986_s28, %s15987_s29  }
  0x25   :  { %s15889_s22 = scalar_lea.hbm %s18920_s0, 8192 }
  0x26   :  { %p15890_p2 = scmp.ne.s32.totalorder %s18920_s0, %s15889_s22  ;;  %p15893_p3 = scmp.lt.u32.totalorder %s15889_s22, %s18920_s0 }
  0x28   :  { %p15895_p4 = pnand %p15893_p3, %p15890_p2 }
  0x2a   :  { %15898 = shalt.err (!%p15895_p4)
}
  0x2b   :  { %s15899_s27 = scalar_lea.vmem %s20_s10, 8192  ;;  %p15904_p6 = scmp.lt.s32.totalorder %s20_s10, %s20_s10 }
  0x2c   :  { %p15900_p5 = scmp.ne.s32.totalorder %s20_s10, %s15899_s27  ;;  %p15905_p7 = scmp.lt.s32.totalorder %s15899_s27, %s15899_s27 }
  0x2e   :  { %p15906_p8 = por %p15905_p7, %p15904_p6 }
  0x30   :  { %p15907_p9 = pnand %p15906_p8, %p15900_p5 }
  0x32   :  { %15910 = shalt.err (!%p15907_p9)
}
  0x33   :  { %s15990_s3 = smov 128   ;;  %s15991_s30 = smov 8  }
  0x34   :  { %25 = dma.hbm_to_vmem [thread:$0]  %s18920_s0, 8192, %s20_s10, [#allocation4], %s15990_s3, %s15990_s3, %s15991_s30  }
  0x35   :  { %s15992_s8 = smov [#allocation8]   ;;  %s15993_s11 = smov [#allocation11]  }
  0x36   :  { %s43_s9 = sshll.u32 %s15992_s8, 4  ;;  %s68_s12 = sshll.u32 %s15993_s11, 4  ;;  %s44_s9 = int_to_ptr.vmem [resolvable:$true] %s43_s9  ;;  %s69_s12 = int_to_ptr.vmem [resolvable:$true] %s68_s12 }
  0x37   :  { %s15911_s15 = scalar_lea.hbm %s18922_s2, 2304 }
  0x38   :  { %p15912_p10 = scmp.ne.s32.totalorder %s18922_s2, %s15911_s15  ;;  %p15915_p11 = scmp.lt.u32.totalorder %s15911_s15, %s18922_s2 }
  0x3a   :  { %p15917_p12 = pnand %p15915_p11, %p15912_p10 }
  0x3c   :  { %15920 = shalt.err (!%p15917_p12)
}
  0x3d   :  { %s15921_s0 = scalar_lea.vmem %s44_s9, 2304  ;;  %p15926_p0 = scmp.lt.s32.totalorder %s44_s9, %s44_s9 }
  0x3e   :  { %p15922_p13 = scmp.ne.s32.totalorder %s44_s9, %s15921_s0  ;;  %p15927_p1 = scmp.lt.s32.totalorder %s15921_s0, %s15921_s0 }
  0x40   :  { %p15928_p2 = por %p15927_p1, %p15926_p0 }
  0x42   :  { %p15929_p3 = pnand %p15928_p2, %p15922_p13 }
  0x44   :  { %15932 = shalt.err (!%p15929_p3)
}
  0x45   :  { %49 = dma.hbm_to_vmem [thread:$0]  %s18922_s2, 2304, %s44_s9, [#allocation7], %s15986_s28, %s15986_s28, %s15987_s29  }
  0x46   :  { %s15933_s22 = scalar_lea.hbm %s18924_s4, 128 }
  0x47   :  { %p15934_p4 = scmp.ne.s32.totalorder %s18924_s4, %s15933_s22  ;;  %p15937_p5 = scmp.lt.u32.totalorder %s15933_s22, %s18924_s4 }
  0x49   :  { %p15939_p6 = pnand %p15937_p5, %p15934_p4 }
  0x4b   :  { %15942 = shalt.err (!%p15939_p6)
}
  0x4c   :  { %s15943_s27 = scalar_lea.vmem %s69_s12, 128  ;;  %p15948_p8 = scmp.lt.s32.totalorder %s69_s12, %s69_s12 }
  0x4d   :  { %p15944_p7 = scmp.ne.s32.totalorder %s69_s12, %s15943_s27  ;;  %p15949_p9 = scmp.lt.s32.totalorder %s15943_s27, %s15943_s27 }
  0x4f   :  { %p15950_p10 = por %p15949_p9, %p15948_p8 }
  0x51   :  { %p15951_p11 = pnand %p15950_p10, %p15944_p7 }
  0x53   :  { %15954 = shalt.err (!%p15951_p11)
}
  0x54   :  { %71 = dma.hbm_to_vmem [thread:$0]  %s18924_s4, 128, %s69_s12, [#allocation10]  }
  0x55   :  { %15977 = dma.done.wait [#allocation4], 8192  }
  0x56   :  { %15978 = vsyncadd [#allocation4], 4294959104 }
  0x57   :  { %15979 = dma.done.wait [#allocation7], 3328  }
  0x58   :  { %15980 = vsyncadd [#allocation7], 4294963968 }
  0x59   :  { %15981 = dma.done.wait [#allocation10], 384  }
  0x5a   :  { %15982 = vsyncadd [#allocation10], 4294966912  ;;  %v15410_v0 = vld [vmem:[#allocation6] sm:$0xff]   ;;  %v15411_v1 = vld [vmem:[#allocation6 + $0x8] sm:$0xff]   ;;  %vm743_vm0 = vcmask 257024   ;;  %vm745_vm1 = vcmask 253952  }
  0x5b   :  { %14123 = vmatprep.subr.bf16.mxu0 %v15410_v0  ;;  %v15412_v2 = vld [vmem:[#allocation6 + $0x10] sm:$0xff]   ;;  %v15413_v3 = vld [vmem:[#allocation6 + $0x18] sm:$0xff]   ;;  %v88_v4 = vld [vmem:[#allocation3] sm:$0xff]  ;;  %vm2260_vm2 = vsmask.f32 3328  ;;  %vm3272_vm9 = vcmask 261120  }
  0x5c   :  { %14124 = vmatpush3.bf16.msra.mxu0 %v15410_v0  ;;  %v89_v5 = vld [vmem:[#allocation3 + $0x8] sm:$0xff]  ;;  %v15414_v7 = vld [vmem:[#allocation6 + $0x20] sm:$0xff]   ;;  %v15416_v9 = vld [vmem:[#allocation6 + $0x30] sm:$0xff]   ;;  %vm2261_vm3 = vsmask.f32 7440  ;;  %vm4407_vm10 = vcmask 1042432  }
  0x5d   :  { %14125 = vmatprep.subr.bf16.mxu0 %v15411_v1  ;;  %v158_v6 = vpack.c.bf16 %v89_v5, %v88_v4  ;;  %v15415_v8 = vld [vmem:[#allocation6 + $0x28] sm:$0xff]   ;;  %v15417_v10 = vld [vmem:[#allocation6 + $0x38] sm:$0xff]   ;;  %v90_v11 = vld [vmem:[#allocation3 + $0x10] sm:$0xff]  ;;  %vm1739_vm5 = vsmask.f32 7938  ;;  %vm4408_vm11 = vcmask 1046532  }
  0x5e   :  { %v91_v12 = vld [vmem:[#allocation3 + $0x18] sm:$0xff]  ;;  %v92_v13 = vld [vmem:[#allocation3 + $0x20] sm:$0xff]  ;;  %v93_v14 = vld [vmem:[#allocation3 + $0x28] sm:$0xff]  ;;  %vm1745_vm6 = vsmask.f32 256  ;;  %s15995_s4 = smov [#allocation12]  }
  0x5f   :  { %14139 = vmatprep.mubr.bf16.mxu0 %v158_v6  ;;  %v159_v15 = vpack.c.bf16 %v91_v12, %v90_v11  ;;  %v160_v16 = vpack.c.bf16 %v93_v14, %v92_v13  ;;  %v94_v17 = vld [vmem:[#allocation3 + $0x30] sm:$0xff]  ;;  %v95_v18 = vld [vmem:[#allocation3 + $0x38] sm:$0xff]  ;;  %v96_v19 = vld [vmem:[#allocation3 + $0x40] sm:$0xff]  ;;  %s12767_s29 = sshll.u32 %s15995_s4, 4  ;;  %s12768_s29 = int_to_ptr.vmem [resolvable:$true] %s12767_s29 }
  0x60   :  { %14126 = vmatpush3.bf16.msra.mxu0 %v15411_v1  ;;  %v97_v20 = vld [vmem:[#allocation3 + $0x48] sm:$0xff]  ;;  %v161_v21 = vpack.c.bf16 %v95_v18, %v94_v17  ;;  %v98_v23 = vld [vmem:[#allocation3 + $0x50] sm:$0xff]  ;;  %v99_v24 = vld [vmem:[#allocation3 + $0x58] sm:$0xff]  ;;  %s15955_s6 = scalar_lea.vmem %s12768_s29, 8192  ;;  %p15960_p13 = scmp.lt.s32.totalorder %s12768_s29, %s12768_s29 }
  0x61   :  { %14127 = vmatprep.subr.bf16.mxu0 %v15412_v2  ;;  %v162_v22 = vpack.c.bf16 %v97_v20, %v96_v19  ;;  %v100_v25 = vld [vmem:[#allocation3 + $0x60] sm:$0xff]  ;;  %v101_v26 = vld [vmem:[#allocation3 + $0x68] sm:$0xff]  ;;  %v163_v27 = vpack.c.bf16 %v99_v24, %v98_v23  ;;  %v102_v29 = vld [vmem:[#allocation3 + $0x70] sm:$0xff]  ;;  %p15956_p12 = scmp.ne.s32.totalorder %s12768_s29, %s15955_s6  ;;  %p15961_p0 = scmp.lt.s32.totalorder %s15955_s6, %s15955_s6 }
  0x62   :  { %v164_v28 = vpack.c.bf16 %v101_v26, %v100_v25  ;;  %v103_v30 = vld [vmem:[#allocation3 + $0x78] sm:$0xff]  ;;  %v104_v31 = vld [vmem:[#allocation3 + $0x80] sm:$0xff]  ;;  %v105_v32 = vld [vmem:[#allocation3 + $0x88] sm:$0xff] }
  0x63   :  { %v165_v33 = vpack.c.bf16 %v103_v30, %v102_v29  ;;  %v166_v34 = vpack.c.bf16 %v105_v32, %v104_v31  ;;  %v106_v35 = vld [vmem:[#allocation3 + $0x90] sm:$0xff]  ;;  %v107_v36 = vld [vmem:[#allocation3 + $0x98] sm:$0xff]  ;;  %v108_v37 = vld [vmem:[#allocation3 + $0xa0] sm:$0xff]  ;;  %p15962_p1 = por %p15961_p0, %p15960_p13 }
  0x64   :  { %14128 = vmatpush3.bf16.msra.mxu0 %v15412_v2  ;;  %v109_v38 = vld [vmem:[#allocation3 + $0xa8] sm:$0xff]  ;;  %v167_v39 = vpack.c.bf16 %v107_v36, %v106_v35  ;;  %v110_v41 = vld [vmem:[#allocation3 + $0xb0] sm:$0xff]  ;;  %v111_v42 = vld [vmem:[#allocation3 + $0xb8] sm:$0xff] }
  0x65   :  { %14129 = vmatprep.subr.bf16.mxu0 %v15413_v3  ;;  %v168_v40 = vpack.c.bf16 %v109_v38, %v108_v37  ;;  %v112_v43 = vld [vmem:[#allocation3 + $0xc0] sm:$0xff]  ;;  %v113_v44 = vld [vmem:[#allocation3 + $0xc8] sm:$0xff]  ;;  %v169_v45 = vpack.c.bf16 %v111_v42, %v110_v41  ;;  %v114_v47 = vld [vmem:[#allocation3 + $0xd0] sm:$0xff]  ;;  %p15963_p2 = pnand %p15962_p1, %p15956_p12 }
  0x66   :  { %v170_v46 = vpack.c.bf16 %v113_v44, %v112_v43  ;;  %v115_v48 = vld [vmem:[#allocation3 + $0xd8] sm:$0xff]  ;;  %v116_v49 = vld [vmem:[#allocation3 + $0xe0] sm:$0xff]  ;;  %v117_v50 = vld [vmem:[#allocation3 + $0xe8] sm:$0xff] }
  0x67   :  { %v171_v51 = vpack.c.bf16 %v115_v48, %v114_v47  ;;  %v172_v52 = vpack.c.bf16 %v117_v50, %v116_v49  ;;  %v118_v53 = vld [vmem:[#allocation3 + $0xf0] sm:$0xff]  ;;  %v119_v54 = vld [vmem:[#allocation3 + $0xf8] sm:$0xff]  ;;  %v120_v55 = vld [vmem:[#allocation3 + $0x100] sm:$0xff] }
  0x68   :  { %14130 = vmatpush3.bf16.msra.mxu0 %v15413_v3  ;;  %v121_v56 = vld [vmem:[#allocation3 + $0x108] sm:$0xff]  ;;  %v173_v57 = vpack.c.bf16 %v119_v54, %v118_v53  ;;  %v122_v59 = vld [vmem:[#allocation3 + $0x110] sm:$0xff]  ;;  %v123_v60 = vld [vmem:[#allocation3 + $0x118] sm:$0xff] }
  0x69   :  { %14131 = vmatprep.subr.bf16.mxu0 %v15414_v7  ;;  %v174_v58 = vpack.c.bf16 %v121_v56, %v120_v55  ;;  %v124_v61 = vld [vmem:[#allocation3 + $0x120] sm:$0xff]  ;;  %v125_v62 = vld [vmem:[#allocation3 + $0x128] sm:$0xff]  ;;  %v175_v63 = vpack.c.bf16 %v123_v60, %v122_v59  ;;  %v126_v1 = vld [vmem:[#allocation3 + $0x130] sm:$0xff] }
  0x6a   :  { %v176_v0 = vpack.c.bf16 %v125_v62, %v124_v61  ;;  %v127_v2 = vld [vmem:[#allocation3 + $0x138] sm:$0xff]  ;;  %v128_v3 = vld [vmem:[#allocation3 + $0x140] sm:$0xff]  ;;  %v129_v4 = vld [vmem:[#allocation3 + $0x148] sm:$0xff] }
  0x6b   :  { %v177_v5 = vpack.c.bf16 %v127_v2, %v126_v1  ;;  %v178_v6 = vpack.c.bf16 %v129_v4, %v128_v3  ;;  %v134_v13 = vld [vmem:[#allocation3 + $0x170] sm:$0xff]  ;;  %v135_v14 = vld [vmem:[#allocation3 + $0x178] sm:$0xff]  ;;  %v141_v23 = vld [vmem:[#allocation3 + $0x1a8] sm:$0xff] }
  0x6c   :  { %14132 = vmatpush3.bf16.msra.mxu0 %v15414_v7  ;;  %v130_v7 = vld [vmem:[#allocation3 + $0x150] sm:$0xff]  ;;  %v181_v17 = vpack.c.bf16 %v135_v14, %v134_v13  ;;  %v16100_v20 = vld [vmem:[#allocation3 + $0x198] sm:$0xff]  ;;  %v145_v29 = vld [vmem:[#allocation3 + $0x1c8] sm:$0xff] }
  0x6d   :  { %14133 = vmatprep.subr.bf16.mxu0 %v15415_v8  ;;  %v16098_v19 = vld [vmem:[#allocation3 + $0x190] sm:$0xff]  ;;  %v149_v35 = vld [vmem:[#allocation3 + $0x1e8] sm:$0xff]  ;;  %v15419_v42 = vld [vmem:[#allocation8 + $0x18] sm:$0xff]  }
  0x6e   :  { %v183_v24 = vpack.c.bf16 %v16100_v20, %v16098_v19  ;;  %v142_v26 = vld [vmem:[#allocation3 + $0x1b0] sm:$0xff]  ;;  %v16424_v56 = vld [vmem:[#allocation11] ss:$0 sm:$0xff]  ;;  %v16426_v60 = vld [vmem:[#allocation11 + $0x1] ss:$0 sm:$0xff] }
  0x6f   :  { %v146_v32 = vld [vmem:[#allocation3 + $0x1d0] sm:$0xff]  ;;  %vm16444_vm4 = vmor %vm2260_vm2, %vm2261_vm3 }
  0x70   :  { %14134 = vmatpush3.bf16.msra.mxu0 %v15415_v8  ;;  %v131_v8 = vld [vmem:[#allocation3 + $0x158] sm:$0xff]  ;;  %v150_v38 = vld [vmem:[#allocation3 + $0x1f0] sm:$0xff]  ;;  %vm16471_vm7 = vmand %vm743_vm0, %vm1739_vm5 }
  0x71   :  { %14135 = vmatprep.subr.bf16.mxu0 %v15416_v9  ;;  %v179_v11 = vpack.c.bf16 %v131_v8, %v130_v7  ;;  %v15418_v41 = vld [vmem:[#allocation8 + $0x10] sm:$0xff]   ;;  %vm16478_vm8 = vmand %vm745_vm1, %vm1745_vm6 }
  0x72   :  { %vm17479_vm12 = vmor %vm4407_vm10, %vm4408_vm11 }
  0x74   :  { %14136 = vmatpush3.bf16.msra.mxu0 %v15416_v9  ;;  %v132_v9 = vld [vmem:[#allocation3 + $0x160] sm:$0xff] }
  0x75   :  { %14137 = vmatprep.subr.bf16.mxu0 %v15417_v10 }
  0x78   :  { %14138 = vmatpush3.bf16.msra.mxu0 %v15417_v10  ;;  %v133_v10 = vld [vmem:[#allocation3 + $0x168] sm:$0xff] }
  0x79   :  { %v180_v12 = vpack.c.bf16 %v133_v10, %v132_v9  ;;  %14203 = vmatprep.subr.bf16.mxu0 %v15418_v41 }
  0x7b   :  { %14140 = vmatmul.mubr.bf16.vlgmr.msra.gmra.mrb[0].mxu0 %v159_v15  ;;  %v136_v15 = vld [vmem:[#allocation3 + $0x180] sm:$0xff] }
  0x7c   :  { %14143 = vmatprep.mubr.bf16.mxu0 %v160_v16  ;;  %v137_v16 = vld [vmem:[#allocation3 + $0x188] sm:$0xff]  ;;  %14204 = vmatpush3.bf16.msra.mxu0 %v15418_v41 }
  0x7d   :  { %v182_v18 = vpack.c.bf16 %v137_v16, %v136_v15  ;;  %14205 = vmatprep.subr.bf16.mxu0 %v15419_v42 }
  0x80   :  { %14206 = vmatpush3.bf16.msra.mxu0 %v15419_v42 }
  0x83   :  { %14144 = vmatmul.mubr.bf16.gmra.mrb[4].mxu0 %v161_v21  ;;  %v15994_v21 = vmov 0  }
  0x84   :  { %14147 = vmatprep.mubr.bf16.mxu0 %v162_v22  ;;  %751 = vst.msk [vmem:[#allocation2 + $0x18] sm:$0xf] %vm743_vm0, %v15994_v21  ;;  %744 = vst.msk [vmem:[#allocation2] sm:$0xf] %vm743_vm0, %v15994_v21  ;;  %v140_v22 = vld [vmem:[#allocation3 + $0x1a0] sm:$0xff] }
  0x85   :  { %752 = vst.msk [vmem:[#allocation2 + $0x1c] sm:$0x1] %vm745_vm1, %v15994_v21  ;;  %746 = vst.msk [vmem:[#allocation2 + $0x4] sm:$0x1] %vm745_vm1, %v15994_v21  ;;  %v184_v25 = vpack.c.bf16 %v141_v23, %v140_v22 }
  0x86   :  { %747 = vst.msk [vmem:[#allocation2 + $0x8] sm:$0xf] %vm743_vm0, %v15994_v21  ;;  %749 = vst.msk [vmem:[#allocation2 + $0x10] sm:$0xf] %vm743_vm0, %v15994_v21 }
  0x87   :  { %748 = vst.msk [vmem:[#allocation2 + $0xc] sm:$0x1] %vm745_vm1, %v15994_v21  ;;  %750 = vst.msk [vmem:[#allocation2 + $0x14] sm:$0x1] %vm745_vm1, %v15994_v21 }
  0x88   :  { %753 = vst.msk [vmem:[#allocation2 + $0x20] sm:$0xf] %vm743_vm0, %v15994_v21  ;;  %755 = vst.msk [vmem:[#allocation2 + $0x28] sm:$0xf] %vm743_vm0, %v15994_v21 }
  0x89   :  { %754 = vst.msk [vmem:[#allocation2 + $0x24] sm:$0x1] %vm745_vm1, %v15994_v21  ;;  %756 = vst.msk [vmem:[#allocation2 + $0x2c] sm:$0x1] %vm745_vm1, %v15994_v21 }
  0x8a   :  { %757 = vst.msk [vmem:[#allocation2 + $0x30] sm:$0xf] %vm743_vm0, %v15994_v21  ;;  %759 = vst.msk [vmem:[#allocation2 + $0x38] sm:$0xf] %vm743_vm0, %v15994_v21 }
  0x8b   :  { %14148 = vmatmul.mubr.bf16.gmra.mrb[8].mxu0 %v163_v27  ;;  %758 = vst.msk [vmem:[#allocation2 + $0x34] sm:$0x1] %vm745_vm1, %v15994_v21  ;;  %760 = vst.msk [vmem:[#allocation2 + $0x3c] sm:$0x1] %vm745_vm1, %v15994_v21  ;;  %v143_v27 = vld [vmem:[#allocation3 + $0x1b8] sm:$0xff] }
  0x8c   :  { %14151 = vmatprep.mubr.bf16.mxu0 %v164_v28  ;;  %761 = vst.msk [vmem:[#allocation2 + $0x40] sm:$0xf] %vm743_vm0, %v15994_v21  ;;  %763 = vst.msk [vmem:[#allocation2 + $0x48] sm:$0xf] %vm743_vm0, %v15994_v21  ;;  %v144_v28 = vld [vmem:[#allocation3 + $0x1c0] sm:$0xff]  ;;  %v185_v30 = vpack.c.bf16 %v143_v27, %v142_v26 }
  0x8d   :  { %762 = vst.msk [vmem:[#allocation2 + $0x44] sm:$0x1] %vm745_vm1, %v15994_v21  ;;  %764 = vst.msk [vmem:[#allocation2 + $0x4c] sm:$0x1] %vm745_vm1, %v15994_v21  ;;  %v186_v31 = vpack.c.bf16 %v145_v29, %v144_v28  ;;  %v2128_v43 = vld [vmem:[#allocation2] sm:$0xf] }
  0x8e   :  { %765 = vst.msk [vmem:[#allocation2 + $0x50] sm:$0xf] %vm743_vm0, %v15994_v21  ;;  %767 = vst.msk [vmem:[#allocation2 + $0x58] sm:$0xf] %vm743_vm0, %v15994_v21  ;;  %v2196_v53 = vld [vmem:[#allocation2 + $0x4] sm:$0x1] }
  0x8f   :  { %766 = vst.msk [vmem:[#allocation2 + $0x54] sm:$0x1] %vm745_vm1, %v15994_v21  ;;  %768 = vst.msk [vmem:[#allocation2 + $0x5c] sm:$0x1] %vm745_vm1, %v15994_v21 }
  0x90   :  { %769 = vst.msk [vmem:[#allocation2 + $0x60] sm:$0xf] %vm743_vm0, %v15994_v21  ;;  %771 = vst.msk [vmem:[#allocation2 + $0x68] sm:$0xf] %vm743_vm0, %v15994_v21 }
  0x91   :  { %770 = vst.msk [vmem:[#allocation2 + $0x64] sm:$0x1] %vm745_vm1, %v15994_v21  ;;  %772 = vst.msk [vmem:[#allocation2 + $0x6c] sm:$0x1] %vm745_vm1, %v15994_v21 }
  0x92   :  { %773 = vst.msk [vmem:[#allocation2 + $0x70] sm:$0xf] %vm743_vm0, %v15994_v21  ;;  %775 = vst.msk [vmem:[#allocation2 + $0x78] sm:$0xf] %vm743_vm0, %v15994_v21 }
  0x93   :  { %14152 = vmatmul.mubr.bf16.gmra.mrb[12].mxu0 %v165_v33  ;;  %774 = vst.msk [vmem:[#allocation2 + $0x74] sm:$0x1] %vm745_vm1, %v15994_v21  ;;  %776 = vst.msk [vmem:[#allocation2 + $0x7c] sm:$0x1] %vm745_vm1, %v15994_v21  ;;  %v147_v33 = vld [vmem:[#allocation3 + $0x1d8] sm:$0xff] }
  0x94   :  { %14155 = vmatprep.mubr.bf16.mxu0 %v166_v34  ;;  %777 = vst.msk [vmem:[#allocation2 + $0x80] sm:$0xf] %vm743_vm0, %v15994_v21  ;;  %779 = vst.msk [vmem:[#allocation2 + $0x88] sm:$0xf] %vm743_vm0, %v15994_v21  ;;  %v148_v34 = vld [vmem:[#allocation3 + $0x1e0] sm:$0xff]  ;;  %v187_v36 = vpack.c.bf16 %v147_v33, %v146_v32 }
  0x95   :  { %778 = vst.msk [vmem:[#allocation2 + $0x84] sm:$0x1] %vm745_vm1, %v15994_v21  ;;  %780 = vst.msk [vmem:[#allocation2 + $0x8c] sm:$0x1] %vm745_vm1, %v15994_v21  ;;  %v188_v37 = vpack.c.bf16 %v149_v35, %v148_v34  ;;  %v2136_v44 = vld [vmem:[#allocation2 + $0x50] sm:$0xf] }
  0x96   :  { %781 = vst.msk [vmem:[#allocation2 + $0x90] sm:$0xf] %vm743_vm0, %v15994_v21  ;;  %783 = vst.msk [vmem:[#allocation2 + $0x98] sm:$0xf] %vm743_vm0, %v15994_v21  ;;  %v2376_v47 = vshrl.u32 %v2136_v44, 16  ;;  %v2379_v48 = vshll.u32 %v2136_v44, 16 }
  0x97   :  { %782 = vst.msk [vmem:[#allocation2 + $0x94] sm:$0x1] %vm745_vm1, %v15994_v21  ;;  %784 = vst.msk [vmem:[#allocation2 + $0x9c] sm:$0x1] %vm745_vm1, %v15994_v21  ;;  %v2204_v55 = vld [vmem:[#allocation2 + $0x54] sm:$0x1] }
  0x98   :  { %785 = vst.msk [vmem:[#allocation2 + $0xa0] sm:$0xf] %vm743_vm0, %v15994_v21  ;;  %787 = vst.msk [vmem:[#allocation2 + $0xa8] sm:$0xf] %vm743_vm0, %v15994_v21  ;;  %v2385_v59 = vshll.u32 %v2204_v55, 16 }
  0x99   :  { %786 = vst.msk [vmem:[#allocation2 + $0xa4] sm:$0x1] %vm745_vm1, %v15994_v21  ;;  %788 = vst.msk [vmem:[#allocation2 + $0xac] sm:$0x1] %vm745_vm1, %v15994_v21 }
  0x9a   :  { %789 = vst.msk [vmem:[#allocation2 + $0xb0] sm:$0xf] %vm743_vm0, %v15994_v21  ;;  %791 = vst.msk [vmem:[#allocation2 + $0xb8] sm:$0xf] %vm743_vm0, %v15994_v21 }
  0x9b   :  { %14156 = vmatmul.mubr.bf16.gmra.mrb[16].mxu0 %v167_v39  ;;  %790 = vst.msk [vmem:[#allocation2 + $0xb4] sm:$0x1] %vm745_vm1, %v15994_v21  ;;  %792 = vst.msk [vmem:[#allocation2 + $0xbc] sm:$0x1] %vm745_vm1, %v15994_v21  ;;  %v151_v39 = vld [vmem:[#allocation3 + $0x1f8] sm:$0xff] }
  0x9c   :  { %14159 = vmatprep.mubr.bf16.mxu0 %v168_v40  ;;  %793 = vst.msk [vmem:[#allocation2 + $0xc0] sm:$0xf] %vm743_vm0, %v15994_v21  ;;  %795 = vst.msk [vmem:[#allocation2 + $0xc8] sm:$0xf] %vm743_vm0, %v15994_v21  ;;  %v189_v40 = vpack.c.bf16 %v151_v39, %v150_v38 }
  0x9d   :  { %794 = vst.msk [vmem:[#allocation2 + $0xc4] sm:$0x1] %vm745_vm1, %v15994_v21  ;;  %796 = vst.msk [vmem:[#allocation2 + $0xcc] sm:$0x1] %vm745_vm1, %v15994_v21 }
  0x9e   :  { %797 = vst.msk [vmem:[#allocation2 + $0xd0] sm:$0xf] %vm743_vm0, %v15994_v21  ;;  %799 = vst.msk [vmem:[#allocation2 + $0xd8] sm:$0xf] %vm743_vm0, %v15994_v21 }
  0x9f   :  { %798 = vst.msk [vmem:[#allocation2 + $0xd4] sm:$0x1] %vm745_vm1, %v15994_v21  ;;  %800 = vst.msk [vmem:[#allocation2 + $0xdc] sm:$0x1] %vm745_vm1, %v15994_v21 }
  0xa0   :  { %801 = vst.msk [vmem:[#allocation2 + $0xe0] sm:$0xf] %vm743_vm0, %v15994_v21  ;;  %803 = vst.msk [vmem:[#allocation2 + $0xe8] sm:$0xf] %vm743_vm0, %v15994_v21 }
  0xa1   :  { %802 = vst.msk [vmem:[#allocation2 + $0xe4] sm:$0x1] %vm745_vm1, %v15994_v21  ;;  %804 = vst.msk [vmem:[#allocation2 + $0xec] sm:$0x1] %vm745_vm1, %v15994_v21 }
  0xa2   :  { %805 = vst.msk [vmem:[#allocation2 + $0xf0] sm:$0xf] %vm743_vm0, %v15994_v21  ;;  %807 = vst.msk [vmem:[#allocation2 + $0xf8] sm:$0xf] %vm743_vm0, %v15994_v21 }
  0xa3   :  { %14160 = vmatmul.mubr.bf16.gmra.mrb[20].mxu0 %v169_v45  ;;  %806 = vst.msk [vmem:[#allocation2 + $0xf4] sm:$0x1] %vm745_vm1, %v15994_v21  ;;  %808 = vst.msk [vmem:[#allocation2 + $0xfc] sm:$0x1] %vm745_vm1, %v15994_v21  ;;  %v2264_v45 = vshrl.u32 %v2128_v43, 16 }
  0xa4   :  { %14163 = vmatprep.mubr.bf16.mxu0 %v170_v46  ;;  %809 = vst.msk [vmem:[#allocation2 + $0x100] sm:$0xf] %vm743_vm0, %v15994_v21  ;;  %811 = vst.msk [vmem:[#allocation2 + $0x108] sm:$0xf] %vm743_vm0, %v15994_v21  ;;  %v2267_v46 = vshll.u32 %v2128_v43, 16 }
  0xa5   :  { %810 = vst.msk [vmem:[#allocation2 + $0x104] sm:$0x1] %vm745_vm1, %v15994_v21  ;;  %812 = vst.msk [vmem:[#allocation2 + $0x10c] sm:$0x1] %vm745_vm1, %v15994_v21  ;;  %v2266_v49 = vrot.slane %v2264_v45, 4 }
  0xa6   :  { %813 = vst.msk [vmem:[#allocation2 + $0x110] sm:$0xf] %vm743_vm0, %v15994_v21  ;;  %815 = vst.msk [vmem:[#allocation2 + $0x118] sm:$0xf] %vm743_vm0, %v15994_v21  ;;  %v2269_v50 = vrot.slane %v2267_v46, 5 }
  0xa7   :  { %814 = vst.msk [vmem:[#allocation2 + $0x114] sm:$0x1] %vm745_vm1, %v15994_v21  ;;  %816 = vst.msk [vmem:[#allocation2 + $0x11c] sm:$0x1] %vm745_vm1, %v15994_v21  ;;  %v1741_v45 = vld [vmem:[#allocation2 + $0x8] sm:$0xf] }
  0xa8   :  { %817 = vst.msk [vmem:[#allocation2 + $0x120] sm:$0xf] %vm743_vm0, %v15994_v21  ;;  %819 = vst.msk [vmem:[#allocation2 + $0x128] sm:$0xf] %vm743_vm0, %v15994_v21  ;;  %v2270_v54 = vor.u32 %v2269_v50, %v2266_v49 }
  0xa9   :  { %818 = vst.msk [vmem:[#allocation2 + $0x124] sm:$0x1] %vm745_vm1, %v15994_v21  ;;  %820 = vst.msk [vmem:[#allocation2 + $0x12c] sm:$0x1] %vm745_vm1, %v15994_v21 }
  0xaa   :  { %821 = vst.msk [vmem:[#allocation2 + $0x130] sm:$0xf] %vm743_vm0, %v15994_v21  ;;  %823 = vst.msk [vmem:[#allocation2 + $0x138] sm:$0xf] %vm743_vm0, %v15994_v21 }
  0xab   :  { %14164 = vmatmul.mubr.bf16.gmra.mrb[24].mxu0 %v171_v51  ;;  %822 = vst.msk [vmem:[#allocation2 + $0x134] sm:$0x1] %vm745_vm1, %v15994_v21  ;;  %824 = vst.msk [vmem:[#allocation2 + $0x13c] sm:$0x1] %vm745_vm1, %v15994_v21  ;;  %v2378_v51 = vrot.slane %v2376_v47, 4 }
  0xac   :  { %14167 = vmatprep.mubr.bf16.mxu0 %v172_v52  ;;  %825 = vst.msk [vmem:[#allocation2 + $0x140] sm:$0xf] %vm743_vm0, %v15994_v21  ;;  %827 = vst.msk [vmem:[#allocation2 + $0x148] sm:$0xf] %vm743_vm0, %v15994_v21  ;;  %v2381_v52 = vrot.slane %v2379_v48, 5 }
  0xad   :  { %826 = vst.msk [vmem:[#allocation2 + $0x144] sm:$0x1] %vm745_vm1, %v15994_v21  ;;  %828 = vst.msk [vmem:[#allocation2 + $0x14c] sm:$0x1] %vm745_vm1, %v15994_v21 }
  0xae   :  { %829 = vst.msk [vmem:[#allocation2 + $0x150] sm:$0xf] %vm743_vm0, %v15994_v21  ;;  %831 = vst.msk [vmem:[#allocation2 + $0x158] sm:$0xf] %vm743_vm0, %v15994_v21 }
  0xaf   :  { %830 = vst.msk [vmem:[#allocation2 + $0x154] sm:$0x1] %vm745_vm1, %v15994_v21  ;;  %832 = vst.msk [vmem:[#allocation2 + $0x15c] sm:$0x1] %vm745_vm1, %v15994_v21 }
  0xb0   :  { %833 = vst.msk [vmem:[#allocation2 + $0x160] sm:$0xf] %vm743_vm0, %v15994_v21  ;;  %835 = vst.msk [vmem:[#allocation2 + $0x168] sm:$0xf] %vm743_vm0, %v15994_v21 }
  0xb1   :  { %834 = vst.msk [vmem:[#allocation2 + $0x164] sm:$0x1] %vm745_vm1, %v15994_v21  ;;  %836 = vst.msk [vmem:[#allocation2 + $0x16c] sm:$0x1] %vm745_vm1, %v15994_v21 }
  0xb2   :  { %837 = vst.msk [vmem:[#allocation2 + $0x170] sm:$0xf] %vm743_vm0, %v15994_v21  ;;  %839 = vst.msk [vmem:[#allocation2 + $0x178] sm:$0xf] %vm743_vm0, %v15994_v21 }
  0xb3   :  { %14168 = vmatmul.mubr.bf16.gmra.mrb[28].mxu0 %v173_v57  ;;  %838 = vst.msk [vmem:[#allocation2 + $0x174] sm:$0x1] %vm745_vm1, %v15994_v21  ;;  %840 = vst.msk [vmem:[#allocation2 + $0x17c] sm:$0x1] %vm745_vm1, %v15994_v21  ;;  %v2273_v57 = vshll.u32 %v2196_v53, 16 }
  0xb4   :  { %14171 = vmatprep.mubr.bf16.mxu0 %v174_v58  ;;  %841 = vst.msk [vmem:[#allocation2 + $0x180] sm:$0xf] %vm743_vm0, %v15994_v21  ;;  %843 = vst.msk [vmem:[#allocation2 + $0x188] sm:$0xf] %vm743_vm0, %v15994_v21  ;;  %v2382_v58 = vor.u32 %v2381_v52, %v2378_v51  ;;  %v1747_v52 = vld [vmem:[#allocation2 + $0xc] sm:$0x1] }
  0xb5   :  { %842 = vst.msk [vmem:[#allocation2 + $0x184] sm:$0x1] %vm745_vm1, %v15994_v21  ;;  %844 = vst.msk [vmem:[#allocation2 + $0x18c] sm:$0x1] %vm745_vm1, %v15994_v21  ;;  %v16432_v3 = vrot.slane %v2273_v57, 5 }
  0xb6   :  { %845 = vst.msk [vmem:[#allocation2 + $0x190] sm:$0xf] %vm743_vm0, %v15994_v21  ;;  %847 = vst.msk [vmem:[#allocation2 + $0x198] sm:$0xf] %vm743_vm0, %v15994_v21  ;;  %v16434_v4 = vrot.slane %v2382_v58, 4 }
  0xb7   :  { %846 = vst.msk [vmem:[#allocation2 + $0x194] sm:$0x1] %vm745_vm1, %v15994_v21  ;;  %848 = vst.msk [vmem:[#allocation2 + $0x19c] sm:$0x1] %vm745_vm1, %v15994_v21 }
  0xb8   :  { %849 = vst.msk [vmem:[#allocation2 + $0x1a0] sm:$0xf] %vm743_vm0, %v15994_v21  ;;  %851 = vst.msk [vmem:[#allocation2 + $0x1a8] sm:$0xf] %vm743_vm0, %v15994_v21 }
  0xb9   :  { %850 = vst.msk [vmem:[#allocation2 + $0x1a4] sm:$0x1] %vm745_vm1, %v15994_v21  ;;  %852 = vst.msk [vmem:[#allocation2 + $0x1ac] sm:$0x1] %vm745_vm1, %v15994_v21 }
  0xba   :  { %853 = vst.msk [vmem:[#allocation2 + $0x1b0] sm:$0xf] %vm743_vm0, %v15994_v21  ;;  %855 = vst.msk [vmem:[#allocation2 + $0x1b8] sm:$0xf] %vm743_vm0, %v15994_v21 }
  0xbb   :  { %14172 = vmatmul.mubr.bf16.gmra.mrb[32].mxu0 %v175_v63  ;;  %854 = vst.msk [vmem:[#allocation2 + $0x1b4] sm:$0x1] %vm745_vm1, %v15994_v21  ;;  %856 = vst.msk [vmem:[#allocation2 + $0x1bc] sm:$0x1] %vm745_vm1, %v15994_v21 }
  0xbc   :  { %14175 = vmatprep.mubr.bf16.mxu0 %v176_v0  ;;  %857 = vst.msk [vmem:[#allocation2 + $0x1c0] sm:$0xf] %vm743_vm0, %v15994_v21  ;;  %859 = vst.msk [vmem:[#allocation2 + $0x1c8] sm:$0xf] %vm743_vm0, %v15994_v21  ;;  %v16429_v0 = vrot.slane %v2270_v54, 4 }
  0xbd   :  { %858 = vst.msk [vmem:[#allocation2 + $0x1c4] sm:$0x1] %vm745_vm1, %v15994_v21  ;;  %860 = vst.msk [vmem:[#allocation2 + $0x1cc] sm:$0x1] %vm745_vm1, %v15994_v21 }
  0xbe   :  { %861 = vst.msk [vmem:[#allocation2 + $0x1d0] sm:$0xf] %vm743_vm0, %v15994_v21  ;;  %863 = vst.msk [vmem:[#allocation2 + $0x1d8] sm:$0xf] %vm743_vm0, %v15994_v21  ;;  %v2276_v23 = vsel %vm16444_vm4, %v16429_v0, %v16432_v3 }
  0xbf   :  { %862 = vst.msk [vmem:[#allocation2 + $0x1d4] sm:$0x1] %vm745_vm1, %v15994_v21  ;;  %864 = vst.msk [vmem:[#allocation2 + $0x1dc] sm:$0x1] %vm745_vm1, %v15994_v21 }
  0xc0   :  { %865 = vst.msk [vmem:[#allocation2 + $0x1e0] sm:$0xf] %vm743_vm0, %v15994_v21  ;;  %867 = vst.msk [vmem:[#allocation2 + $0x1e8] sm:$0xf] %vm743_vm0, %v15994_v21 }
  0xc1   :  { %866 = vst.msk [vmem:[#allocation2 + $0x1e4] sm:$0x1] %vm745_vm1, %v15994_v21  ;;  %868 = vst.msk [vmem:[#allocation2 + $0x1ec] sm:$0x1] %vm745_vm1, %v15994_v21 }
  0xc2   :  { %869 = vst.msk [vmem:[#allocation2 + $0x1f0] sm:$0xf] %vm743_vm0, %v15994_v21  ;;  %871 = vst.msk [vmem:[#allocation2 + $0x1f8] sm:$0xf] %vm743_vm0, %v15994_v21 }
  0xc3   :  { %14176 = vmatmul.mubr.bf16.gmra.mrb[36].mxu0 %v177_v5  ;;  %870 = vst.msk [vmem:[#allocation2 + $0x1f4] sm:$0x1] %vm745_vm1, %v15994_v21  ;;  %872 = vst.msk [vmem:[#allocation2 + $0x1fc] sm:$0x1] %vm745_vm1, %v15994_v21  ;;  %v16436_v5 = vrot.slane %v2385_v59, 5 }
  0xc4   :  { %14179 = vmatprep.mubr.bf16.mxu0 %v178_v6  ;;  %873 = vst.msk [vmem:[#allocation2 + $0x200] sm:$0xf] %vm743_vm0, %v15994_v21  ;;  %875 = vst.msk [vmem:[#allocation2 + $0x208] sm:$0xf] %vm743_vm0, %v15994_v21  ;;  %v2144_v6 = vld [vmem:[#allocation2 + $0xa0] sm:$0xf] }
  0xc5   :  { %874 = vst.msk [vmem:[#allocation2 + $0x204] sm:$0x1] %vm745_vm1, %v15994_v21  ;;  %876 = vst.msk [vmem:[#allocation2 + $0x20c] sm:$0x1] %vm745_vm1, %v15994_v21  ;;  %v2488_v10 = vshrl.u32 %v2144_v6, 16 }
  0xc6   :  { %877 = vst.msk [vmem:[#allocation2 + $0x210] sm:$0xf] %vm743_vm0, %v15994_v21  ;;  %879 = vst.msk [vmem:[#allocation2 + $0x218] sm:$0xf] %vm743_vm0, %v15994_v21 }
  0xc7   :  { %878 = vst.msk [vmem:[#allocation2 + $0x214] sm:$0x1] %vm745_vm1, %v15994_v21  ;;  %880 = vst.msk [vmem:[#allocation2 + $0x21c] sm:$0x1] %vm745_vm1, %v15994_v21 }
  0xc8   :  { %881 = vst.msk [vmem:[#allocation2 + $0x220] sm:$0xf] %vm743_vm0, %v15994_v21  ;;  %883 = vst.msk [vmem:[#allocation2 + $0x228] sm:$0xf] %vm743_vm0, %v15994_v21 }
  0xc9   :  { %882 = vst.msk [vmem:[#allocation2 + $0x224] sm:$0x1] %vm745_vm1, %v15994_v21  ;;  %884 = vst.msk [vmem:[#allocation2 + $0x22c] sm:$0x1] %vm745_vm1, %v15994_v21 }
  0xca   :  { %885 = vst.msk [vmem:[#allocation2 + $0x230] sm:$0xf] %vm743_vm0, %v15994_v21  ;;  %887 = vst.msk [vmem:[#allocation2 + $0x238] sm:$0xf] %vm743_vm0, %v15994_v21 }
  0xcb   :  { %14180 = vmatmul.mubr.bf16.gmra.mrb[40].mxu0 %v179_v11  ;;  %886 = vst.msk [vmem:[#allocation2 + $0x234] sm:$0x1] %vm745_vm1, %v15994_v21  ;;  %888 = vst.msk [vmem:[#allocation2 + $0x23c] sm:$0x1] %vm745_vm1, %v15994_v21  ;;  %v2491_v11 = vshll.u32 %v2144_v6, 16 }
  0xcc   :  { %14183 = vmatprep.mubr.bf16.mxu0 %v180_v12  ;;  %889 = vst.msk [vmem:[#allocation2 + $0x240] sm:$0xf] %vm743_vm0, %v15994_v21  ;;  %891 = vst.msk [vmem:[#allocation2 + $0x248] sm:$0xf] %vm743_vm0, %v15994_v21 }
  0xcd   :  { %890 = vst.msk [vmem:[#allocation2 + $0x244] sm:$0x1] %vm745_vm1, %v15994_v21  ;;  %892 = vst.msk [vmem:[#allocation2 + $0x24c] sm:$0x1] %vm745_vm1, %v15994_v21 }
  0xce   :  { %893 = vst.msk [vmem:[#allocation2 + $0x250] sm:$0xf] %vm743_vm0, %v15994_v21  ;;  %895 = vst.msk [vmem:[#allocation2 + $0x258] sm:$0xf] %vm743_vm0, %v15994_v21 }
  0xcf   :  { %894 = vst.msk [vmem:[#allocation2 + $0x254] sm:$0x1] %vm745_vm1, %v15994_v21  ;;  %896 = vst.msk [vmem:[#allocation2 + $0x25c] sm:$0x1] %vm745_vm1, %v15994_v21 }
  0xd0   :  { %897 = vst.msk [vmem:[#allocation2 + $0x260] sm:$0xf] %vm743_vm0, %v15994_v21  ;;  %899 = vst.msk [vmem:[#allocation2 + $0x268] sm:$0xf] %vm743_vm0, %v15994_v21 }
  0xd1   :  { %898 = vst.msk [vmem:[#allocation2 + $0x264] sm:$0x1] %vm745_vm1, %v15994_v21  ;;  %900 = vst.msk [vmem:[#allocation2 + $0x26c] sm:$0x1] %vm745_vm1, %v15994_v21 }
  0xd2   :  { %901 = vst.msk [vmem:[#allocation2 + $0x270] sm:$0xf] %vm743_vm0, %v15994_v21  ;;  %903 = vst.msk [vmem:[#allocation2 + $0x278] sm:$0xf] %vm743_vm0, %v15994_v21 }
  0xd3   :  { %14184 = vmatmul.mubr.bf16.gmra.mrb[44].mxu0 %v181_v17  ;;  %902 = vst.msk [vmem:[#allocation2 + $0x274] sm:$0x1] %vm745_vm1, %v15994_v21  ;;  %904 = vst.msk [vmem:[#allocation2 + $0x27c] sm:$0x1] %vm745_vm1, %v15994_v21  ;;  %v16449_v17 = vrot.slane %v2488_v10, 4 }
  0xd4   :  { %14187 = vmatprep.mubr.bf16.mxu0 %v182_v18  ;;  %v16451_v18 = vrot.slane %v2491_v11, 5 }
  0xdb   :  { %14188 = vmatmul.mubr.bf16.gmra.mrb[48].mxu0 %v183_v24 }
  0xdc   :  { %14191 = vmatprep.mubr.bf16.mxu0 %v184_v25  ;;  %v16462_v25 = vld [vmem:[#allocation2 + $0xa4] sm:$0x1] }
  0xe3   :  { %14192 = vmatmul.mubr.bf16.gmra.mrb[52].mxu0 %v185_v30 }
  0xe4   :  { %14195 = vmatprep.mubr.bf16.mxu0 %v186_v31 }
  0xeb   :  { %14196 = vmatmul.mubr.bf16.gmra.mrb[56].mxu0 %v187_v36  ;;  %v1756_v36 = vld [vmem:[#allocation2 + $0x18] sm:$0xf] }
  0xec   :  { %14199 = vmatprep.mubr.bf16.mxu0 %v188_v37  ;;  %v1759_v37 = vld [vmem:[#allocation2 + $0x1c] sm:$0x1] }
  0xf3   :  { %14200 = vmatmul.mubr.bf16.gmra.mrb[60].mxu0 %v189_v40 }
 0x14e   :  { %v14141_v61 = vpop.f32.mrb[0].mxu0 }
 0x14f   :  { %v549_v62 = vmul.f32 %v14141_v61, %v16424_v56  ;;  %v288_v63 = vpop.f32.mrb[1].mxu0  ;;  %v1762_v61 = vld [vmem:[#allocation2 + $0x20] sm:$0xf] }
 0x150   :  { %v547_v1 = vmul.f32 %v16424_v56, %v288_v63  ;;  %v14142_v2 = vpop.f32.mrb[2].mxu0 }
 0x151   :  { %v617_v7 = vadd.f32 %v16426_v60, %v549_v62  ;;  %v550_v8 = vmul.f32 %v14142_v2, %v16424_v56  ;;  %v291_v9 = vpop.f32.mrb[3].mxu0  ;;  %v1765_v2 = vld [vmem:[#allocation2 + $0x24] sm:$0x1] }
 0x152   :  { %v615_v12 = vadd.f32 %v16426_v60, %v547_v1  ;;  %v548_v13 = vmul.f32 %v16424_v56, %v291_v9 }
 0x153   :  { %v681_v15 = vmax.f32 %v617_v7, 0.0  ;;  %v618_v16 = vadd.f32 %v16426_v60, %v550_v8 }
 0x154   :  { %v679_v19 = vmax.f32 %v615_v12, 0.0  ;;  %v616_v20 = vadd.f32 %v16426_v60, %v548_v13  ;;  %v1750_v12 = vld [vmem:[#allocation2 + $0x10] sm:$0xf]  ;;  %v1753_v13 = vld [vmem:[#allocation2 + $0x14] sm:$0x1] }
 0x155   :  { %v13681_v21 = vpack.c.bf16 %v681_v15, %v681_v15  ;;  %v682_v22 = vmax.f32 %v618_v16, 0.0 }
 0x156   :  { %v13679_v26 = vpack.c.bf16 %v679_v19, %v679_v19  ;;  %v680_v27 = vmax.f32 %v616_v20, 0.0  ;;  %v14145_v28 = vpop.f32.mrb[4].mxu0 }
 0x157   :  { %v1114_v31 = vshrl.u32 %v13681_v21, 16  ;;  %v1117_v32 = vshll.u32 %v13681_v21, 16  ;;  %v13682_v33 = vpack.c.bf16 %v682_v22, %v682_v22  ;;  %v553_v34 = vmul.f32 %v14145_v28, %v16424_v56  ;;  %v304_v35 = vpop.f32.mrb[5].mxu0 }
 0x158   :  { %v1098_v38 = vshrl.u32 %v13679_v26, 16  ;;  %v1101_v39 = vshll.u32 %v13679_v26, 16  ;;  %v13680_v40 = vpack.c.bf16 %v680_v27, %v680_v27  ;;  %v551_v41 = vmul.f32 %v16424_v56, %v304_v35  ;;  %v14146_v42 = vpop.f32.mrb[6].mxu0 }
 0x159   :  { %v1116_v43 = vrot.slane %v1114_v31, 7  ;;  %v1122_v46 = vshrl.u32 %v13682_v33, 16  ;;  %v1125_v47 = vshll.u32 %v13682_v33, 16  ;;  %v621_v48 = vadd.f32 %v16426_v60, %v553_v34  ;;  %v307_v49 = vpop.f32.mrb[7].mxu0 }
 0x15a   :  { %v1100_v51 = vrot.slane %v1098_v38, 7  ;;  %v1106_v53 = vshrl.u32 %v13680_v40, 16  ;;  %v1109_v54 = vshll.u32 %v13680_v40, 16  ;;  %v619_v55 = vadd.f32 %v16426_v60, %v551_v41 }
 0x15b   :  { %v1119_v57 = vor.u32 %v1117_v32, %v1116_v43  ;;  %v1120_v58 = vrot.slane %v1116_v43, 4  ;;  %v1124_v59 = vrot.slane %v1122_v46, 7  ;;  %v685_v62 = vmax.f32 %v621_v48, 0.0  ;;  %v15420_v32 = vld [vmem:[#allocation8 + $0x30] sm:$0xff]  }
 0x15c   :  { %v1103_v63 = vor.u32 %v1101_v39, %v1100_v51  ;;  %v1104_v1 = vrot.slane %v1100_v51, 4  ;;  %v1108_v6 = vrot.slane %v1106_v53, 7  ;;  %v683_v7 = vmax.f32 %v619_v55, 0.0  ;;  %14883 = vmatprep.subr.bf16.mxu1 %v15420_v32  ;;  %v1783_v51 = vld [vmem:[#allocation2 + $0x3c] sm:$0x1] }
 0x15d   :  { %v1757_v8 = vsel %vm16471_vm7, %v1119_v57, %v1756_v36  ;;  %v1760_v9 = vsel %vm16478_vm8, %v1120_v58, %v1759_v37  ;;  %v1127_v10 = vor.u32 %v1125_v47, %v1124_v59  ;;  %v1128_v11 = vrot.slane %v1124_v59, 4  ;;  %14885 = vmatpush3.bf16.msra.mxu1 %v15420_v32  ;;  %v1768_v55 = vld [vmem:[#allocation2 + $0x28] sm:$0xf]  ;;  %v1771_v57 = vld [vmem:[#allocation2 + $0x2c] sm:$0x1] }
 0x15e   :  { %1758 = vst [vmem:[#allocation2 + $0x18] sm:$0xf] %v1757_v8  ;;  %1761 = vst [vmem:[#allocation2 + $0x1c] sm:$0x1] %v1760_v9  ;;  %v1742_v15 = vsel %vm16471_vm7, %v1103_v63, %v1741_v45  ;;  %v1748_v16 = vsel %vm16478_vm8, %v1104_v1, %v1747_v52  ;;  %v1111_v19 = vor.u32 %v1109_v54, %v1108_v6  ;;  %v1112_v20 = vrot.slane %v1108_v6, 4  ;;  %v14149_v21 = vpop.f32.mrb[8].mxu0 }
 0x15f   :  { %1743 = vst [vmem:[#allocation2 + $0x8] sm:$0xf] %v1742_v15  ;;  %1749 = vst [vmem:[#allocation2 + $0xc] sm:$0x1] %v1748_v16  ;;  %v1763_v22 = vsel %vm16471_vm7, %v1127_v10, %v1762_v61  ;;  %v1766_v26 = vsel %vm16478_vm8, %v1128_v11, %v1765_v2  ;;  %v13685_v27 = vpack.c.bf16 %v685_v62, %v685_v62  ;;  %v320_v31 = vpop.f32.mrb[9].mxu0 }
 0x160   :  { %v13683_v28 = vpack.c.bf16 %v683_v7, %v683_v7  ;;  %1764 = vst [vmem:[#allocation2 + $0x20] sm:$0xf] %v1763_v22  ;;  %1767 = vst [vmem:[#allocation2 + $0x24] sm:$0x1] %v1766_v26  ;;  %v1751_v33 = vsel %vm16471_vm7, %v1111_v19, %v1750_v12  ;;  %v1754_v34 = vsel %vm16478_vm8, %v1112_v20, %v1753_v13  ;;  %v14150_v37 = vpop.f32.mrb[10].mxu0 }
 0x161   :  { %v554_v35 = vmul.f32 %v14146_v42, %v16424_v56  ;;  %v552_v36 = vmul.f32 %v16424_v56, %v307_v49  ;;  %1752 = vst [vmem:[#allocation2 + $0x10] sm:$0xf] %v1751_v33  ;;  %1755 = vst [vmem:[#allocation2 + $0x14] sm:$0x1] %v1754_v34  ;;  %v1146_v38 = vshrl.u32 %v13685_v27, 16  ;;  %v1149_v39 = vshll.u32 %v13685_v27, 16 }
 0x162   :  { %v1130_v40 = vshrl.u32 %v13683_v28, 16  ;;  %v1133_v41 = vshll.u32 %v13683_v28, 16  ;;  %v323_v43 = vpop.f32.mrb[11].mxu0  ;;  %v557_v47 = vmul.f32 %v14149_v21, %v16424_v56  ;;  %v555_v48 = vmul.f32 %v16424_v56, %v320_v31  ;;  %v1780_v49 = vld [vmem:[#allocation2 + $0x38] sm:$0xf] }
 0x163   :  { %v622_v45 = vadd.f32 %v16426_v60, %v554_v35  ;;  %v620_v46 = vadd.f32 %v16426_v60, %v552_v36  ;;  %v1148_v42 = vrot.slane %v1146_v38, 7  ;;  %v558_v53 = vmul.f32 %v14150_v37, %v16424_v56  ;;  %v1786_v28 = vld [vmem:[#allocation2 + $0x40] sm:$0xf]  ;;  %v1789_v37 = vld [vmem:[#allocation2 + $0x44] sm:$0x1] }
 0x164   :  { %v1132_v52 = vrot.slane %v1130_v40, 7  ;;  %v556_v54 = vmul.f32 %v16424_v56, %v323_v43  ;;  %v625_v61 = vadd.f32 %v16426_v60, %v557_v47  ;;  %v623_v62 = vadd.f32 %v16426_v60, %v555_v48  ;;  %v1777_v43 = vld [vmem:[#allocation2 + $0x34] sm:$0x1] }
 0x165   :  { %v686_v58 = vmax.f32 %v622_v45, 0.0  ;;  %v684_v59 = vmax.f32 %v620_v46, 0.0  ;;  %v1151_v63 = vor.u32 %v1149_v39, %v1148_v42  ;;  %v1152_v1 = vrot.slane %v1148_v42, 4  ;;  %v1774_v39 = vld [vmem:[#allocation2 + $0x30] sm:$0xf] }
 0x166   :  { %v1135_v2 = vor.u32 %v1133_v41, %v1132_v52  ;;  %v1136_v6 = vrot.slane %v1132_v52, 4  ;;  %v689_v9 = vmax.f32 %v625_v61, 0.0  ;;  %v687_v10 = vmax.f32 %v623_v62, 0.0  ;;  %v14153_v11 = vpop.f32.mrb[12].mxu0  ;;  %v15421_v61 = vld [vmem:[#allocation8 + $0x38] sm:$0xff]  }
 0x167   :  { %v13686_v7 = vpack.c.bf16 %v686_v58, %v686_v58  ;;  %v13684_v8 = vpack.c.bf16 %v684_v59, %v684_v59  ;;  %v1781_v12 = vsel %vm16471_vm7, %v1151_v63, %v1780_v49  ;;  %v1784_v13 = vsel %vm16478_vm8, %v1152_v1, %v1783_v51  ;;  %v336_v19 = vpop.f32.mrb[13].mxu0  ;;  %14884 = vmatprep.subr.bf16.mxu1 %v15421_v61 }
 0x168   :  { %v1769_v15 = vsel %vm16471_vm7, %v1135_v2, %v1768_v55  ;;  %v1772_v16 = vsel %vm16478_vm8, %v1136_v6, %v1771_v57  ;;  %1782 = vst [vmem:[#allocation2 + $0x38] sm:$0xf] %v1781_v12  ;;  %1785 = vst [vmem:[#allocation2 + $0x3c] sm:$0x1] %v1784_v13  ;;  %v16517_v27 = vpop.f32.mrb[14].mxu0  ;;  %v13689_v31 = vpack.c.bf16 %v689_v9, %v689_v9  ;;  %14886 = vmatpush3.bf16.msra.mxu1 %v15421_v61 }
 0x169   :  { %1770 = vst [vmem:[#allocation2 + $0x28] sm:$0xf] %v1769_v15  ;;  %1773 = vst [vmem:[#allocation2 + $0x2c] sm:$0x1] %v1772_v16  ;;  %v1154_v20 = vshrl.u32 %v13686_v7, 16  ;;  %v1157_v21 = vshll.u32 %v13686_v7, 16  ;;  %v13687_v32 = vpack.c.bf16 %v687_v10, %v687_v10  ;;  %v626_v33 = vadd.f32 %v16426_v60, %v558_v53 }
 0x16a   :  { %v1138_v22 = vshrl.u32 %v13684_v8, 16  ;;  %v1141_v26 = vshll.u32 %v13684_v8, 16  ;;  %v624_v34 = vadd.f32 %v16426_v60, %v556_v54  ;;  %v16521_v35 = vpop.f32.mrb[15].mxu0  ;;  %v561_v40 = vmul.f32 %v14153_v11, %v16424_v56  ;;  %v1804_v53 = vld [vmem:[#allocation2 + $0x68] sm:$0xf] }
 0x16b   :  { %v1156_v36 = vrot.slane %v1154_v20, 7  ;;  %v559_v41 = vmul.f32 %v16424_v56, %v336_v19  ;;  %v1178_v45 = vshrl.u32 %v13689_v31, 16  ;;  %v1181_v46 = vshll.u32 %v13689_v31, 16  ;;  %v1807_v54 = vld [vmem:[#allocation2 + $0x6c] sm:$0x1] }
 0x16c   :  { %v1140_v38 = vrot.slane %v1138_v22, 7  ;;  %v1162_v47 = vshrl.u32 %v13687_v32, 16  ;;  %v1165_v48 = vshll.u32 %v13687_v32, 16  ;;  %v690_v58 = vmax.f32 %v626_v33, 0.0  ;;  %v1792_v6 = vld [vmem:[#allocation2 + $0x58] sm:$0xf] }
 0x16d   :  { %v1159_v42 = vor.u32 %v1157_v21, %v1156_v36  ;;  %v1160_v49 = vrot.slane %v1156_v36, 4  ;;  %v1180_v55 = vrot.slane %v1178_v45, 7  ;;  %v688_v59 = vmax.f32 %v624_v34, 0.0  ;;  %v1795_v7 = vld [vmem:[#allocation2 + $0x5c] sm:$0x1] }
 0x16e   :  { %v1143_v51 = vor.u32 %v1141_v26, %v1140_v38  ;;  %v1144_v52 = vrot.slane %v1140_v38, 4  ;;  %v1164_v57 = vrot.slane %v1162_v47, 7  ;;  %v14157_v8 = vpop.f32.mrb[16].mxu0  ;;  %v13690_v15 = vpack.c.bf16 %v690_v58, %v690_v58  ;;  %v1810_v38 = vld [vmem:[#allocation2 + $0x70] sm:$0xf] }
 0x16f   :  { %v1787_v62 = vsel %vm16471_vm7, %v1159_v42, %v1786_v28  ;;  %v1790_v63 = vsel %vm16478_vm8, %v1160_v49, %v1789_v37  ;;  %v1183_v9 = vor.u32 %v1181_v46, %v1180_v55  ;;  %v1184_v10 = vrot.slane %v1180_v55, 4  ;;  %v352_v13 = vpop.f32.mrb[17].mxu0  ;;  %v10796_v14 = vld [vmem:[#allocation2 + $0x38] sm:$0xe] }
 0x170   :  { %v1775_v1 = vsel %vm16471_vm7, %v1143_v51, %v1774_v39  ;;  %v1778_v2 = vsel %vm16478_vm8, %v1144_v52, %v1777_v43  ;;  %1788 = vst [vmem:[#allocation2 + $0x40] sm:$0xf] %v1787_v62  ;;  %1791 = vst [vmem:[#allocation2 + $0x44] sm:$0x1] %v1790_v63  ;;  %v1167_v11 = vor.u32 %v1165_v48, %v1164_v57  ;;  %v1168_v12 = vrot.slane %v1164_v57, 4  ;;  %v16535_v21 = vpop.f32.mrb[18].mxu0 }
 0x171   :  { %1776 = vst [vmem:[#allocation2 + $0x30] sm:$0xf] %v1775_v1  ;;  %1779 = vst [vmem:[#allocation2 + $0x34] sm:$0x1] %v1778_v2  ;;  %v13688_v16 = vpack.c.bf16 %v688_v59, %v688_v59  ;;  %v629_v19 = vadd.f32 %v16426_v60, %v561_v40  ;;  %v627_v20 = vadd.f32 %v16426_v60, %v559_v41  ;;  %v355_v32 = vpop.f32.mrb[19].mxu0  ;;  %v1186_v33 = vshrl.u32 %v13690_v15, 16 }
 0x172   :  { %v1805_v22 = vsel %vm16471_vm7, %v1183_v9, %v1804_v53  ;;  %v1808_v26 = vsel %vm16478_vm8, %v1184_v10, %v1807_v54  ;;  %v1793_v28 = vsel %vm16471_vm7, %v1167_v11, %v1792_v6  ;;  %v1796_v31 = vsel %vm16478_vm8, %v1168_v12, %v1795_v7  ;;  %v1813_v39 = vld [vmem:[#allocation2 + $0x74] sm:$0x1]  ;;  %v1798_v40 = vld [vmem:[#allocation2 + $0x60] sm:$0xf]  ;;  %v1801_v41 = vld [vmem:[#allocation2 + $0x64] sm:$0x1] }
 0x173   :  { %1806 = vst [vmem:[#allocation2 + $0x68] sm:$0xf] %v1805_v22  ;;  %1809 = vst [vmem:[#allocation2 + $0x6c] sm:$0x1] %v1808_v26  ;;  %v1189_v34 = vshll.u32 %v13690_v15, 16  ;;  %v1170_v36 = vshrl.u32 %v13688_v16, 16  ;;  %v562_v46 = vmul.f32 %v16517_v27, %v16424_v56  ;;  %v560_v47 = vmul.f32 %v16424_v56, %v16521_v35 }
 0x174   :  { %1794 = vst [vmem:[#allocation2 + $0x58] sm:$0xf] %v1793_v28  ;;  %1797 = vst [vmem:[#allocation2 + $0x5c] sm:$0x1] %v1796_v31  ;;  %v1173_v37 = vshll.u32 %v13688_v16, 16  ;;  %v693_v43 = vmax.f32 %v629_v19, 0.0  ;;  %v565_v49 = vmul.f32 %v14157_v8, %v16424_v56  ;;  %v563_v51 = vmul.f32 %v16424_v56, %v352_v13 }
 0x175   :  { %v691_v45 = vmax.f32 %v627_v20, 0.0  ;;  %v1188_v48 = vrot.slane %v1186_v33, 7  ;;  %v1172_v42 = vrot.slane %v1170_v36, 7  ;;  %v630_v54 = vadd.f32 %v16426_v60, %v562_v46  ;;  %v16557_v6 = vld [vmem:[#allocation8 + $0x40] sm:$0xff]   ;;  %v1828_v11 = vld [vmem:[#allocation2 + $0x88] sm:$0xf] }
 0x176   :  { %v13693_v52 = vpack.c.bf16 %v693_v43, %v693_v43  ;;  %v628_v55 = vadd.f32 %v16426_v60, %v560_v47  ;;  %v16553_v27 = vpop.f32.mrb[20].mxu0  ;;  %14475 = vmatprep.subr.bf16.mxu1 %v16557_v6  ;;  %v1831_v22 = vld [vmem:[#allocation2 + $0x8c] sm:$0x1]  ;;  %v1816_v26 = vld [vmem:[#allocation2 + $0x78] sm:$0xf]  ;;  %v633_v31 = vadd.f32 %v16426_v60, %v565_v49  ;;  %v631_v33 = vadd.f32 %v16426_v60, %v563_v51 }
 0x177   :  { %v13691_v53 = vpack.c.bf16 %v691_v45, %v691_v45  ;;  %v1191_v57 = vor.u32 %v1189_v34, %v1188_v48  ;;  %v1192_v58 = vrot.slane %v1188_v48, 4  ;;  %v1175_v59 = vor.u32 %v1173_v37, %v1172_v42  ;;  %v16555_v2 = vpop.f32.mrb[21].mxu0  ;;  %v1819_v28 = vld [vmem:[#allocation2 + $0x7c] sm:$0x1] }
 0x178   :  { %v1176_v61 = vrot.slane %v1172_v42, 4  ;;  %v1210_v62 = vshrl.u32 %v13693_v52, 16  ;;  %v1213_v35 = vshll.u32 %v13693_v52, 16  ;;  %v16567_v12 = vpop.f32.mrb[22].mxu0  ;;  %v694_v16 = vmax.f32 %v630_v54, 0.0 }
 0x179   :  { %v1194_v63 = vshrl.u32 %v13691_v53, 16  ;;  %v1197_v1 = vshll.u32 %v13691_v53, 16  ;;  %v1811_v7 = vsel %vm16471_vm7, %v1191_v57, %v1810_v38  ;;  %v1814_v8 = vsel %vm16478_vm8, %v1192_v58, %v1813_v39  ;;  %v16569_v20 = vpop.f32.mrb[23].mxu0  ;;  %v1837_v57 = vld [vmem:[#allocation2 + $0x94] sm:$0x1] }
 0x17a   :  { %v1799_v9 = vsel %vm16471_vm7, %v1175_v59, %v1798_v40  ;;  %v1802_v10 = vsel %vm16478_vm8, %v1176_v61, %v1801_v41  ;;  %1812 = vst [vmem:[#allocation2 + $0x70] sm:$0xf] %v1811_v7  ;;  %1815 = vst [vmem:[#allocation2 + $0x74] sm:$0x1] %v1814_v8  ;;  %v1212_v13 = vrot.slane %v1210_v62, 7  ;;  %v692_v19 = vmax.f32 %v628_v55, 0.0 }
 0x17b   :  { %1800 = vst [vmem:[#allocation2 + $0x60] sm:$0xf] %v1799_v9  ;;  %1803 = vst [vmem:[#allocation2 + $0x64] sm:$0x1] %v1802_v10  ;;  %v1196_v15 = vrot.slane %v1194_v63, 7  ;;  %v566_v34 = vmul.f32 %v16535_v21, %v16424_v56  ;;  %v564_v36 = vmul.f32 %v16424_v56, %v355_v32  ;;  %v13694_v41 = vpack.c.bf16 %v694_v16, %v694_v16 }
 0x17c   :  { %v1215_v37 = vor.u32 %v1213_v35, %v1212_v13  ;;  %v1216_v38 = vrot.slane %v1212_v13, 4  ;;  %v13692_v43 = vpack.c.bf16 %v692_v19, %v692_v19  ;;  %v697_v45 = vmax.f32 %v633_v31, 0.0  ;;  %v2129_v32 = vld [vmem:[#allocation2 + $0x8] sm:$0xf]  ;;  %v1834_v55 = vld [vmem:[#allocation2 + $0x90] sm:$0xf] }
 0x17d   :  { %v1199_v39 = vor.u32 %v1197_v1, %v1196_v15  ;;  %v1200_v40 = vrot.slane %v1196_v15, 4  ;;  %v695_v46 = vmax.f32 %v631_v33, 0.0  ;;  %v1218_v49 = vshrl.u32 %v13694_v41, 16  ;;  %v1822_v58 = vld [vmem:[#allocation2 + $0x80] sm:$0xf] }
 0x17e   :  { %v1829_v47 = vsel %vm16471_vm7, %v1215_v37, %v1828_v11  ;;  %v1832_v48 = vsel %vm16478_vm8, %v1216_v38, %v1831_v22  ;;  %v1221_v51 = vshll.u32 %v13694_v41, 16  ;;  %v1202_v52 = vshrl.u32 %v13692_v43, 16  ;;  %v16585_v54 = vpop.f32.mrb[24].mxu0  ;;  %v1825_v59 = vld [vmem:[#allocation2 + $0x84] sm:$0x1] }
 0x17f   :  { %v1817_v42 = vsel %vm16471_vm7, %v1199_v39, %v1816_v26  ;;  %v1820_v21 = vsel %vm16478_vm8, %v1200_v40, %v1819_v28  ;;  %1830 = vst [vmem:[#allocation2 + $0x88] sm:$0xf] %v1829_v47  ;;  %1833 = vst [vmem:[#allocation2 + $0x8c] sm:$0x1] %v1832_v48  ;;  %v1205_v53 = vshll.u32 %v13692_v43, 16  ;;  %v13697_v61 = vpack.c.bf16 %v697_v45, %v697_v45  ;;  %v16589_v1 = vpop.f32.mrb[25].mxu0 }
 0x180   :  { %1818 = vst [vmem:[#allocation2 + $0x78] sm:$0xf] %v1817_v42  ;;  %1821 = vst [vmem:[#allocation2 + $0x7c] sm:$0x1] %v1820_v21  ;;  %v13695_v62 = vpack.c.bf16 %v695_v46, %v695_v46  ;;  %v634_v35 = vadd.f32 %v16426_v60, %v566_v34  ;;  %v632_v63 = vadd.f32 %v16426_v60, %v564_v36  ;;  %v1220_v7 = vrot.slane %v1218_v49, 7  ;;  %v16591_v11 = vpop.f32.mrb[26].mxu0 }
 0x181   :  { %v1204_v8 = vrot.slane %v1202_v52, 7  ;;  %v2278_v9 = vshrl.u32 %v2129_v32, 16  ;;  %v2281_v10 = vshll.u32 %v2129_v32, 16  ;;  %v1242_v13 = vshrl.u32 %v13697_v61, 16  ;;  %v16593_v22 = vpop.f32.mrb[27].mxu0 }
 0x182   :  { %v1245_v15 = vshll.u32 %v13697_v61, 16  ;;  %v1226_v16 = vshrl.u32 %v13695_v62, 16  ;;  %v1229_v19 = vshll.u32 %v13695_v62, 16  ;;  %v1223_v26 = vor.u32 %v1221_v51, %v1220_v7  ;;  %v1852_v36 = vld [vmem:[#allocation2 + $0xb8] sm:$0xf] }
 0x183   :  { %v1224_v28 = vrot.slane %v1220_v7, 4  ;;  %v1207_v31 = vor.u32 %v1205_v53, %v1204_v8  ;;  %v1208_v33 = vrot.slane %v1204_v8, 4  ;;  %v1244_v34 = vrot.slane %v1242_v13, 7  ;;  %v1855_v46 = vld [vmem:[#allocation2 + $0xbc] sm:$0x1] }
 0x184   :  { %v1228_v37 = vrot.slane %v1226_v16, 7  ;;  %v698_v38 = vmax.f32 %v634_v35, 0.0  ;;  %v696_v39 = vmax.f32 %v632_v63, 0.0  ;;  %v1835_v40 = vsel %vm16471_vm7, %v1223_v26, %v1834_v55  ;;  %v1840_v47 = vld [vmem:[#allocation2 + $0xa8] sm:$0xf] }
 0x185   :  { %v1838_v41 = vsel %vm16478_vm8, %v1224_v28, %v1837_v57  ;;  %v1823_v43 = vsel %vm16471_vm7, %v1207_v31, %v1822_v58  ;;  %v1826_v45 = vsel %vm16478_vm8, %v1208_v33, %v1825_v59  ;;  %v1843_v48 = vld [vmem:[#allocation2 + $0xac] sm:$0x1]  ;;  %1836 = vst [vmem:[#allocation2 + $0x90] sm:$0xf] %v1835_v40  ;;  %v1247_v42 = vor.u32 %v1245_v15, %v1244_v34  ;;  %v2130_v58 = vld [vmem:[#allocation2 + $0x10] sm:$0xf] }
 0x186   :  { %1839 = vst [vmem:[#allocation2 + $0x94] sm:$0x1] %v1838_v41  ;;  %1824 = vst [vmem:[#allocation2 + $0x80] sm:$0xf] %v1823_v43  ;;  %v1248_v21 = vrot.slane %v1244_v34, 4  ;;  %v1231_v32 = vor.u32 %v1229_v19, %v1228_v37  ;;  %v1232_v49 = vrot.slane %v1228_v37, 4  ;;  %v13698_v52 = vpack.c.bf16 %v698_v38, %v698_v38 }
 0x187   :  { %1827 = vst [vmem:[#allocation2 + $0x84] sm:$0x1] %v1826_v45  ;;  %v2197_v51 = vld [vmem:[#allocation2 + $0xc] sm:$0x1]  ;;  %v13696_v53 = vpack.c.bf16 %v696_v39, %v696_v39  ;;  %v2280_v55 = vrot.slane %v2278_v9, 4  ;;  %v2283_v57 = vrot.slane %v2281_v10, 5  ;;  %v1853_v59 = vsel %vm16471_vm7, %v1247_v42, %v1852_v36 }
 0x188   :  { %v16603_v61 = vpop.f32.mrb[28].mxu0  ;;  %v1856_v62 = vsel %vm16478_vm8, %v1248_v21, %v1855_v46  ;;  %v1841_v35 = vsel %vm16471_vm7, %v1231_v32, %v1840_v47  ;;  %v1844_v63 = vsel %vm16478_vm8, %v1232_v49, %v1843_v48  ;;  %v2131_v7 = vld [vmem:[#allocation2 + $0x18] sm:$0xf]  ;;  %v2198_v8 = vld [vmem:[#allocation2 + $0x14] sm:$0x1]  ;;  %v1250_v10 = vshrl.u32 %v13698_v52, 16 }
 0x189   :  { %v16613_v9 = vpop.f32.mrb[29].mxu0  ;;  %1854 = vst [vmem:[#allocation2 + $0xb8] sm:$0xf] %v1853_v59  ;;  %1857 = vst [vmem:[#allocation2 + $0xbc] sm:$0x1] %v1856_v62  ;;  %v1253_v13 = vshll.u32 %v13698_v52, 16  ;;  %v2284_v31 = vor.u32 %v2283_v57, %v2280_v55 }
 0x18a   :  { %1842 = vst [vmem:[#allocation2 + $0xa8] sm:$0xf] %v1841_v35  ;;  %1845 = vst [vmem:[#allocation2 + $0xac] sm:$0x1] %v1844_v63  ;;  %v1234_v15 = vshrl.u32 %v13696_v53, 16  ;;  %v1237_v16 = vshll.u32 %v13696_v53, 16 }
 0x18b   :  { %v16615_v19 = vpop.f32.mrb[30].mxu0  ;;  %v1858_v26 = vld [vmem:[#allocation2 + $0xc0] sm:$0xf]  ;;  %v1861_v28 = vld [vmem:[#allocation2 + $0xc4] sm:$0x1]  ;;  %v2287_v33 = vshll.u32 %v2197_v51, 16 }
 0x18c   :  { %v2292_v34 = vshrl.u32 %v2130_v58, 16  ;;  %v2295_v36 = vshll.u32 %v2130_v58, 16  ;;  %v16617_v37 = vpop.f32.mrb[31].mxu0  ;;  %v1252_v38 = vrot.slane %v1250_v10, 7  ;;  %v1236_v39 = vrot.slane %v1234_v15, 7 }
 0x18d   :  { %v1846_v40 = vld [vmem:[#allocation2 + $0xb0] sm:$0xf]  ;;  %v2301_v41 = vshll.u32 %v2198_v8, 16  ;;  %v2306_v43 = vshrl.u32 %v2131_v7, 16  ;;  %v1849_v45 = vld [vmem:[#allocation2 + $0xb4] sm:$0x1] }
 0x18e   :  { %v2285_v46 = vrot.slane %v2284_v31, 4  ;;  %v2289_v47 = vrot.slane %v2287_v33, 5  ;;  %v2294_v48 = vrot.slane %v2292_v34, 4  ;;  %v2297_v42 = vrot.slane %v2295_v36, 5  ;;  %v2199_v53 = vld [vmem:[#allocation2 + $0x1c] sm:$0x1] }
 0x18f   :  { %v1255_v21 = vor.u32 %v1253_v13, %v1252_v38  ;;  %v1256_v32 = vrot.slane %v1252_v38, 4  ;;  %v1239_v49 = vor.u32 %v1237_v16, %v1236_v39  ;;  %v1240_v52 = vrot.slane %v1236_v39, 4  ;;  %v2132_v59 = vld [vmem:[#allocation2 + $0x20] sm:$0xf]  ;;  %v16629_v10 = vpop.f32.mrb[32].mxu0 }
 0x190   :  { %v2290_v51 = vsel %vm16444_vm4, %v2285_v46, %v2289_v47  ;;  %v2298_v55 = vor.u32 %v2297_v42, %v2294_v48  ;;  %v2303_v57 = vrot.slane %v2301_v41, 5  ;;  %v2308_v58 = vrot.slane %v2306_v43, 4  ;;  %v2200_v38 = vld [vmem:[#allocation2 + $0x24] sm:$0x1] }
 0x191   :  { %v1859_v62 = vsel %vm16471_vm7, %v1255_v21, %v1858_v26  ;;  %v1862_v35 = vsel %vm16478_vm8, %v1256_v32, %v1861_v28  ;;  %v1847_v63 = vsel %vm16471_vm7, %v1239_v49, %v1846_v40  ;;  %v1850_v8 = vsel %vm16478_vm8, %v1240_v52, %v1849_v45  ;;  %v16636_v28 = vpop.f32.mrb[33].mxu0 }
 0x192   :  { %1860 = vst [vmem:[#allocation2 + $0xc0] sm:$0xf] %v1859_v62  ;;  %1863 = vst [vmem:[#allocation2 + $0xc4] sm:$0x1] %v1862_v35  ;;  %v12855_v13 = vcombine.low %v2276_v23, %v2290_v51  ;;  %v2299_v15 = vrot.slane %v2298_v55, 4  ;;  %v2309_v16 = vshll.u32 %v2131_v7, 16  ;;  %v569_v31 = vmul.f32 %v16553_v27, %v16424_v56 }
 0x193   :  { %1848 = vst [vmem:[#allocation2 + $0xb0] sm:$0xf] %v1847_v63  ;;  %1851 = vst [vmem:[#allocation2 + $0xb4] sm:$0x1] %v1850_v8  ;;  %v2315_v26 = vshll.u32 %v2199_v53, 16  ;;  %v567_v33 = vmul.f32 %v16424_v56, %v16555_v2  ;;  %v570_v34 = vmul.f32 %v16567_v12, %v16424_v56  ;;  %v568_v36 = vmul.f32 %v16424_v56, %v16569_v20  ;;  %v16646_v0 = vpop.f32.mrb[34].mxu0 }
 0x194   :  { %14207 = vmatprep.mubr.msk.bf16.mxu0 %vm3272_vm9, %v12855_v13  ;;  %v2304_v3 = vsel %vm16444_vm4, %v2299_v15, %v2303_v57  ;;  %v2311_v23 = vrot.slane %v2309_v16, 5  ;;  %v2320_v27 = vshrl.u32 %v2132_v59, 16  ;;  %v16651_v39 = vpop.f32.mrb[35].mxu0  ;;  %v637_v2 = vadd.f32 %v16426_v60, %v569_v31  ;;  %v2133_v20 = vld [vmem:[#allocation2 + $0x28] sm:$0xf] }
 0x195   :  { %v2317_v7 = vrot.slane %v2315_v26, 5  ;;  %v635_v12 = vadd.f32 %v16426_v60, %v567_v33  ;;  %v638_v40 = vadd.f32 %v16426_v60, %v570_v34  ;;  %v636_v56 = vadd.f32 %v16426_v60, %v568_v36  ;;  %v2201_v31 = vld [vmem:[#allocation2 + $0x2c] sm:$0x1]  ;;  %v1876_v34 = vld [vmem:[#allocation2 + $0xd8] sm:$0xf] }
 0x196   :  { %v2312_v41 = vor.u32 %v2311_v23, %v2308_v58  ;;  %v2322_v43 = vrot.slane %v2320_v27, 4  ;;  %v2323_v45 = vshll.u32 %v2132_v59, 16  ;;  %v2329_v46 = vshll.u32 %v2200_v38, 16  ;;  %v16659_v35 = vpop.f32.mrb[36].mxu0  ;;  %v1879_v36 = vld [vmem:[#allocation2 + $0xdc] sm:$0x1] }
 0x197   :  { %v701_v47 = vmax.f32 %v637_v2, 0.0  ;;  %v699_v48 = vmax.f32 %v635_v12, 0.0  ;;  %v702_v42 = vmax.f32 %v638_v40, 0.0  ;;  %v700_v21 = vmax.f32 %v636_v56, 0.0  ;;  %v16665_v8 = vpop.f32.mrb[37].mxu0 }
 0x198   :  { %v2313_v32 = vrot.slane %v2312_v41, 4  ;;  %v2325_v49 = vrot.slane %v2323_v45, 5  ;;  %v16657_v52 = vrot.slane %v2329_v46, 5  ;;  %v2334_v53 = vshrl.u32 %v2133_v20, 16  ;;  %v16667_v33 = vpop.f32.mrb[38].mxu0 }
 0x199   :  { %v13701_v51 = vpack.c.bf16 %v701_v47, %v701_v47  ;;  %v13699_v55 = vpack.c.bf16 %v699_v48, %v699_v48  ;;  %v13702_v57 = vpack.c.bf16 %v702_v42, %v702_v42  ;;  %v13700_v62 = vpack.c.bf16 %v700_v21, %v700_v21  ;;  %v1864_v23 = vld [vmem:[#allocation2 + $0xc8] sm:$0xf]  ;;  %v1867_v27 = vld [vmem:[#allocation2 + $0xcc] sm:$0x1]  ;;  %v16669_v40 = vpop.f32.mrb[39].mxu0 }
 0x19a   :  { %v2318_v60 = vsel %vm16444_vm4, %v2313_v32, %v2317_v7  ;;  %v2326_v58 = vor.u32 %v2325_v49, %v2322_v43  ;;  %v16663_v59 = vrot.slane %v2334_v53, 4  ;;  %v2337_v63 = vshll.u32 %v2133_v20, 16  ;;  %v1882_v20 = vld [vmem:[#allocation2 + $0xe0] sm:$0xf]  ;;  %v1885_v46 = vld [vmem:[#allocation2 + $0xe4] sm:$0x1] }
 0x19b   :  { %v12856_v13 = vcombine.low %v2304_v3, %v2318_v60  ;;  %v1274_v15 = vshrl.u32 %v13701_v51, 16  ;;  %v1277_v16 = vshll.u32 %v13701_v51, 16  ;;  %v1258_v26 = vshrl.u32 %v13699_v55, 16  ;;  %v1870_v51 = vld [vmem:[#allocation2 + $0xd0] sm:$0xf] }
 0x19c   :  { %v1261_v38 = vshll.u32 %v13699_v55, 16  ;;  %v1282_v2 = vshrl.u32 %v13702_v57, 16  ;;  %v1285_v7 = vshll.u32 %v13702_v57, 16  ;;  %v1266_v12 = vshrl.u32 %v13700_v62, 16  ;;  %v1873_v55 = vld [vmem:[#allocation2 + $0xd4] sm:$0x1] }
 0x19d   :  { %14208 = vmatmul.mubr.msk.bf16.vlgmr.msra.gmra.mrb[64].mxu0 %vm3272_vm9, %v12856_v13  ;;  %v1276_v56 = vrot.slane %v1274_v15, 7  ;;  %v1260_v3 = vrot.slane %v1258_v26, 7  ;;  %v1269_v41 = vshll.u32 %v13700_v62, 16  ;;  %v16672_v43 = vrot.slane %v2326_v58, 4  ;;  %v2134_v26 = vld [vmem:[#allocation2 + $0x30] sm:$0xf] }
 0x19e   :  { %v1284_v45 = vrot.slane %v1282_v2, 7  ;;  %v1268_v47 = vrot.slane %v1266_v12, 7  ;;  %v2339_v48 = vrot.slane %v2337_v63, 5  ;;  %v2343_v42 = vshll.u32 %v2201_v31, 16  ;;  %v2135_v31 = vld [vmem:[#allocation2 + $0x38] sm:$0xf] }
 0x19f   :  { %v1279_v21 = vor.u32 %v1277_v16, %v1276_v56  ;;  %v1280_v32 = vrot.slane %v1276_v56, 4  ;;  %v1263_v49 = vor.u32 %v1261_v38, %v1260_v3  ;;  %v1264_v53 = vrot.slane %v1260_v3, 4  ;;  %v2202_v38 = vld [vmem:[#allocation2 + $0x34] sm:$0x1]  ;;  %v16682_v2 = vpop.f32.mrb[40].mxu0 }
 0x1a0   :  { %v1287_v57 = vor.u32 %v1285_v7, %v1284_v45  ;;  %v1288_v60 = vrot.slane %v1284_v45, 4  ;;  %v1271_v13 = vor.u32 %v1269_v41, %v1268_v47  ;;  %v1272_v15 = vrot.slane %v1268_v47, 4  ;;  %v2203_v7 = vld [vmem:[#allocation2 + $0x3c] sm:$0x1]  ;;  %v16692_v12 = vpop.f32.mrb[41].mxu0 }
 0x1a1   :  { %v1877_v62 = vsel %vm16471_vm7, %v1279_v21, %v1876_v34  ;;  %v1880_v58 = vsel %vm16478_vm8, %v1280_v32, %v1879_v36  ;;  %v1865_v63 = vsel %vm16471_vm7, %v1263_v49, %v1864_v23  ;;  %v1868_v16 = vsel %vm16478_vm8, %v1264_v53, %v1867_v27  ;;  %v16699_v45 = vpop.f32.mrb[42].mxu0 }
 0x1a2   :  { %1878 = vst [vmem:[#allocation2 + $0xd8] sm:$0xf] %v1877_v62  ;;  %1881 = vst [vmem:[#allocation2 + $0xdc] sm:$0x1] %v1880_v58  ;;  %v1883_v34 = vsel %vm16471_vm7, %v1287_v57, %v1882_v20  ;;  %v1886_v36 = vsel %vm16478_vm8, %v1288_v60, %v1885_v46  ;;  %v1871_v23 = vsel %vm16471_vm7, %v1271_v13, %v1870_v51  ;;  %v2345_v20 = vrot.slane %v2343_v42, 5  ;;  %v16701_v49 = vpop.f32.mrb[43].mxu0 }
 0x1a3   :  { %1866 = vst [vmem:[#allocation2 + $0xc8] sm:$0xf] %v1865_v63  ;;  %1869 = vst [vmem:[#allocation2 + $0xcc] sm:$0x1] %v1868_v16  ;;  %v1874_v27 = vsel %vm16478_vm8, %v1272_v15, %v1873_v55  ;;  %v2332_v56 = vsel %vm16444_vm4, %v16672_v43, %v16657_v52  ;;  %v2340_v3 = vor.u32 %v2339_v48, %v16663_v59  ;;  %v2348_v41 = vshrl.u32 %v2134_v26, 16 }
 0x1a4   :  { %1884 = vst [vmem:[#allocation2 + $0xe0] sm:$0xf] %v1883_v34  ;;  %1887 = vst [vmem:[#allocation2 + $0xe4] sm:$0x1] %v1886_v36  ;;  %v2351_v46 = vshll.u32 %v2134_v26, 16  ;;  %v2357_v47 = vshll.u32 %v2202_v38, 16 }
 0x1a5   :  { %1872 = vst [vmem:[#allocation2 + $0xd0] sm:$0xf] %v1871_v23  ;;  %1875 = vst [vmem:[#allocation2 + $0xd4] sm:$0x1] %v1874_v27  ;;  %v2362_v21 = vshrl.u32 %v2135_v31, 16  ;;  %v2365_v32 = vshll.u32 %v2135_v31, 16 }
 0x1a6   :  { %v2341_v53 = vrot.slane %v2340_v3, 4  ;;  %v2350_v51 = vrot.slane %v2348_v41, 4  ;;  %v2371_v55 = vshll.u32 %v2203_v7, 16  ;;  %v16703_v57 = vld [vmem:[#allocation11] ss:$0 sm:$0xff]  ;;  %v2353_v43 = vrot.slane %v2351_v46, 5 }
 0x1a7   :  { %v573_v52 = vmul.f32 %v16703_v57, %v16585_v54  ;;  %v2359_v59 = vrot.slane %v2357_v47, 5  ;;  %v2364_v48 = vrot.slane %v2362_v21, 4  ;;  %v2367_v42 = vrot.slane %v2365_v32, 5  ;;  %v2137_v60 = vld [vmem:[#allocation2 + $0x58] sm:$0xf] }
 0x1a8   :  { %v2346_v13 = vsel %vm16444_vm4, %v2341_v53, %v2345_v20  ;;  %v2373_v15 = vrot.slane %v2371_v55, 5  ;;  %v16709_v26 = vld [vmem:[#allocation11 + $0x1] ss:$0 sm:$0xff]  ;;  %v571_v58 = vmul.f32 %v16703_v57, %v16589_v1  ;;  %v2354_v16 = vor.u32 %v2353_v43, %v2350_v51  ;;  %v2205_v46 = vld [vmem:[#allocation2 + $0x5c] sm:$0x1] }
 0x1a9   :  { %v641_v62 = vadd.f32 %v16709_v26, %v573_v52  ;;  %v12857_v63 = vcombine.low %v2332_v56, %v2346_v13  ;;  %v2368_v31 = vor.u32 %v2367_v42, %v2364_v48  ;;  %v574_v54 = vmul.f32 %v16703_v57, %v16591_v11  ;;  %v16721_v56 = vpop.f32.mrb[44].mxu0  ;;  %v16728_v51 = vld [vmem:[#allocation2 + $0x60] sm:$0xf]  ;;  %v1900_v13 = vld [vmem:[#allocation2 + $0x108] sm:$0xf] }
 0x1aa   :  { %v639_v34 = vadd.f32 %v16709_v26, %v571_v58  ;;  %v572_v36 = vmul.f32 %v16703_v57, %v16593_v22  ;;  %v2390_v23 = vshrl.u32 %v2137_v60, 16  ;;  %v2355_v27 = vrot.slane %v2354_v16, 4  ;;  %v16730_v55 = vpop.f32.mrb[45].mxu0 }
 0x1ab   :  { %v705_v38 = vmax.f32 %v641_v62, 0.0  ;;  %14211 = vmatprep.mubr.msk.bf16.mxu0 %vm3272_vm9, %v12857_v63  ;;  %v2369_v7 = vrot.slane %v2368_v31, 4  ;;  %v642_v3 = vadd.f32 %v16709_v26, %v574_v54  ;;  %v2393_v1 = vshll.u32 %v2137_v60, 16  ;;  %v16732_v60 = vpop.f32.mrb[46].mxu0  ;;  %v1903_v31 = vld [vmem:[#allocation2 + $0x10c] sm:$0x1] }
 0x1ac   :  { %v703_v41 = vmax.f32 %v639_v34, 0.0  ;;  %v640_v11 = vadd.f32 %v16709_v26, %v572_v36  ;;  %v2392_v47 = vrot.slane %v2390_v23, 4  ;;  %v2360_v21 = vsel %vm16444_vm4, %v2355_v27, %v2359_v59  ;;  %v16734_v16 = vpop.f32.mrb[47].mxu0  ;;  %v1888_v36 = vld [vmem:[#allocation2 + $0xf8] sm:$0xf] }
 0x1ad   :  { %v13705_v20 = vpack.c.bf16 %v705_v38, %v705_v38  ;;  %v2374_v22 = vsel %vm16444_vm4, %v2369_v7, %v2373_v15  ;;  %v706_v32 = vmax.f32 %v642_v3, 0.0  ;;  %v2395_v53 = vrot.slane %v2393_v1, 5  ;;  %v1891_v23 = vld [vmem:[#allocation2 + $0xfc] sm:$0x1] }
 0x1ae   :  { %v12858_v52 = vcombine.low %v2360_v21, %v2374_v22  ;;  %v13703_v42 = vpack.c.bf16 %v703_v41, %v703_v41  ;;  %v704_v58 = vmax.f32 %v640_v11, 0.0  ;;  %v2399_v59 = vshll.u32 %v2205_v46, 16  ;;  %v1906_v46 = vld [vmem:[#allocation2 + $0x110] sm:$0xf]  ;;  %v16738_v22 = vpop.f32.mrb[48].mxu0 }
 0x1af   :  { %v1306_v43 = vshrl.u32 %v13705_v20, 16  ;;  %v1309_v48 = vshll.u32 %v13705_v20, 16  ;;  %v13706_v62 = vpack.c.bf16 %v706_v32, %v706_v32  ;;  %v2396_v63 = vor.u32 %v2395_v53, %v2392_v47  ;;  %v1909_v47 = vld [vmem:[#allocation2 + $0x114] sm:$0x1] }
 0x1b0   :  { %14212 = vmatmul.mubr.msk.bf16.gmra.mrb[68].mxu0 %vm3272_vm9, %v12858_v52  ;;  %v1290_v54 = vshrl.u32 %v13703_v42, 16  ;;  %v1293_v38 = vshll.u32 %v13703_v42, 16  ;;  %v2404_v34 = vshrl.u32 %v16728_v51, 16  ;;  %v13704_v3 = vpack.c.bf16 %v704_v58, %v704_v58  ;;  %v16740_v42 = vpop.f32.mrb[49].mxu0 }
 0x1b1   :  { %v1308_v15 = vrot.slane %v1306_v43, 7  ;;  %v1314_v27 = vshrl.u32 %v13706_v62, 16  ;;  %v1317_v7 = vshll.u32 %v13706_v62, 16  ;;  %v2397_v1 = vrot.slane %v2396_v63, 4  ;;  %v1894_v63 = vld [vmem:[#allocation2 + $0x100] sm:$0xf] }
 0x1b2   :  { %v1292_v11 = vrot.slane %v1290_v54, 7  ;;  %v2401_v21 = vrot.slane %v2399_v59, 5  ;;  %v1298_v53 = vshrl.u32 %v13704_v3, 16  ;;  %v1301_v52 = vshll.u32 %v13704_v3, 16  ;;  %v2139_v54 = vld [vmem:[#allocation2 + $0x68] sm:$0xf] }
 0x1b3   :  { %v1311_v20 = vor.u32 %v1309_v48, %v1308_v15  ;;  %v1312_v41 = vrot.slane %v1308_v15, 4  ;;  %v1316_v32 = vrot.slane %v1314_v27, 7  ;;  %v2406_v43 = vrot.slane %v2404_v34, 4  ;;  %v1897_v15 = vld [vmem:[#allocation2 + $0x104] sm:$0x1]  ;;  %v16746_v29 = vpop.f32.mrb[50].mxu0 }
 0x1b4   :  { %v1295_v48 = vor.u32 %v1293_v38, %v1292_v11  ;;  %v1296_v58 = vrot.slane %v1292_v11, 4  ;;  %v2207_v59 = vld [vmem:[#allocation2 + $0x6c] sm:$0x1]  ;;  %v1300_v3 = vrot.slane %v1298_v53, 7  ;;  %v2402_v24 = vsel %vm16444_vm4, %v2397_v1, %v2401_v21 }
 0x1b5   :  { %v1901_v30 = vsel %vm16471_vm7, %v1311_v20, %v1900_v13  ;;  %v1904_v62 = vsel %vm16478_vm8, %v1312_v41, %v1903_v31  ;;  %v1319_v27 = vor.u32 %v1317_v7, %v1316_v32  ;;  %v1320_v34 = vrot.slane %v1316_v32, 4  ;;  %v2206_v13 = vld [vmem:[#allocation2 + $0x64] sm:$0x1]  ;;  %v16750_v20 = vpop.f32.mrb[51].mxu0  ;;  %v2140_v32 = vld [vmem:[#allocation2 + $0x70] sm:$0xf] }
 0x1b6   :  { %1902 = vst [vmem:[#allocation2 + $0x108] sm:$0xf] %v1901_v30  ;;  %1905 = vst [vmem:[#allocation2 + $0x10c] sm:$0x1] %v1904_v62  ;;  %v1889_v31 = vsel %vm16471_vm7, %v1295_v48, %v1888_v36  ;;  %v1892_v38 = vsel %vm16478_vm8, %v1296_v58, %v1891_v23  ;;  %v18932_v30 = vsel %vm16444_vm4, %v16434_v4, %v16436_v5  ;;  %v2407_v41 = vshll.u32 %v16728_v51, 16 }
 0x1b7   :  { %v12859_v7 = vcombine.low %v18932_v30, %v2402_v24  ;;  %1890 = vst [vmem:[#allocation2 + $0xf8] sm:$0xf] %v1889_v31  ;;  %1893 = vst [vmem:[#allocation2 + $0xfc] sm:$0x1] %v1892_v38  ;;  %v1907_v1 = vsel %vm16471_vm7, %v1319_v27, %v1906_v46  ;;  %v1910_v11 = vsel %vm16478_vm8, %v1320_v34, %v1909_v47  ;;  %v1304_v21 = vrot.slane %v1300_v3, 4 }
 0x1b8   :  { %v1303_v36 = vor.u32 %v1301_v52, %v1300_v3  ;;  %1908 = vst [vmem:[#allocation2 + $0x110] sm:$0xf] %v1907_v1  ;;  %1911 = vst [vmem:[#allocation2 + $0x114] sm:$0x1] %v1910_v11  ;;  %v2409_v23 = vrot.slane %v2407_v41, 5  ;;  %v2413_v4 = vshll.u32 %v2206_v13, 16  ;;  %v577_v47 = vmul.f32 %v16703_v57, %v16603_v61 }
 0x1b9   :  { %14215 = vmatprep.mubr.msk.bf16.mxu0 %vm3272_vm9, %v12859_v7  ;;  %v2418_v5 = vshrl.u32 %v2139_v54, 16  ;;  %v2421_v24 = vshll.u32 %v2139_v54, 16  ;;  %v1898_v46 = vsel %vm16478_vm8, %v1304_v21, %v1897_v15  ;;  %v2427_v53 = vshll.u32 %v2207_v59, 16  ;;  %v2208_v3 = vld [vmem:[#allocation2 + $0x74] sm:$0x1]  ;;  %v16784_v41 = vpop.f32.mrb[52].mxu0 }
 0x1ba   :  { %v1895_v51 = vsel %vm16471_vm7, %v1303_v36, %v1894_v63  ;;  %1899 = vst [vmem:[#allocation2 + $0x104] sm:$0x1] %v1898_v46  ;;  %v2410_v52 = vor.u32 %v2409_v23, %v2406_v43  ;;  %v2415_v62 = vrot.slane %v2413_v4, 5  ;;  %v645_v34 = vadd.f32 %v16709_v26, %v577_v47  ;;  %v16782_v30 = vld [vmem:[#allocation2 + $0x78] sm:$0xf] }
 0x1bb   :  { %1896 = vst [vmem:[#allocation2 + $0x100] sm:$0xf] %v1895_v51  ;;  %v2420_v48 = vrot.slane %v2418_v5, 4  ;;  %v2423_v58 = vrot.slane %v2421_v24, 5  ;;  %v2429_v27 = vrot.slane %v2427_v53, 5  ;;  %v575_v54 = vmul.f32 %v16703_v57, %v16613_v9 }
 0x1bc   :  { %v578_v63 = vmul.f32 %v16703_v57, %v16615_v19  ;;  %v2411_v15 = vrot.slane %v2410_v52, 4  ;;  %v576_v61 = vmul.f32 %v16703_v57, %v16617_v37  ;;  %v2432_v13 = vshrl.u32 %v2140_v32, 16 }
 0x1bd   :  { %v2424_v59 = vor.u32 %v2423_v58, %v2420_v48  ;;  %v709_v43 = vmax.f32 %v645_v34, 0.0  ;;  %v643_v31 = vadd.f32 %v16709_v26, %v575_v54  ;;  %v2435_v7 = vshll.u32 %v2140_v32, 16  ;;  %v1927_v48 = vld [vmem:[#allocation2 + $0x12c] sm:$0x1] }
 0x1be   :  { %v646_v38 = vadd.f32 %v16709_v26, %v578_v63  ;;  %v2416_v9 = vsel %vm16444_vm4, %v2411_v15, %v2415_v62  ;;  %v644_v1 = vadd.f32 %v16709_v26, %v576_v61  ;;  %v2434_v11 = vrot.slane %v2432_v13, 4  ;;  %v1924_v62 = vld [vmem:[#allocation2 + $0x128] sm:$0xf]  ;;  %v2209_v13 = vld [vmem:[#allocation2 + $0x7c] sm:$0x1] }
 0x1bf   :  { %v2425_v19 = vrot.slane %v2424_v59, 4  ;;  %v13709_v37 = vpack.c.bf16 %v709_v43, %v709_v43  ;;  %v707_v36 = vmax.f32 %v643_v31, 0.0  ;;  %v2437_v23 = vrot.slane %v2435_v7, 5  ;;  %v15424_v15 = vld [vmem:[#allocation2 + $0x108] ss:$8 sps:$4 sm:$0xff]   ;;  %v16794_v59 = vpop.f32.mrb[53].mxu0 }
 0x1c0   :  { %v710_v21 = vmax.f32 %v646_v38, 0.0  ;;  %v708_v5 = vmax.f32 %v644_v1, 0.0  ;;  %v2441_v24 = vshll.u32 %v2208_v3, 16  ;;  %v2446_v32 = vshrl.u32 %v16782_v30, 16  ;;  %v1912_v31 = vld [vmem:[#allocation2 + $0x118] sm:$0xf] }
 0x1c1   :  { %v2430_v4 = vsel %vm16444_vm4, %v2425_v19, %v2429_v27  ;;  %v1338_v46 = vshrl.u32 %v13709_v37, 16  ;;  %v1341_v53 = vshll.u32 %v13709_v37, 16  ;;  %v13707_v47 = vpack.c.bf16 %v707_v36, %v707_v36  ;;  %v1915_v38 = vld [vmem:[#allocation2 + $0x11c] sm:$0x1] }
 0x1c2   :  { %v12860_v51 = vcombine.low %v2416_v9, %v2430_v4  ;;  %v15422_v52 = vld [vmem:[#allocation2 + $0xf8] ss:$8 sps:$4 sm:$0xff]   ;;  %v13710_v58 = vpack.c.bf16 %v710_v21, %v710_v21  ;;  %v13708_v34 = vpack.c.bf16 %v708_v5, %v708_v5  ;;  %v2438_v54 = vor.u32 %v2437_v23, %v2434_v11  ;;  %v1930_v21 = vld [vmem:[#allocation2 + $0x130] sm:$0xf]  ;;  %v16800_v4 = vpop.f32.mrb[54].mxu0 }
 0x1c3   :  { %v16792_v63 = vrot.slane %v2441_v24, 5  ;;  %v1340_v27 = vrot.slane %v1338_v46, 7  ;;  %v1322_v61 = vshrl.u32 %v13707_v47, 16  ;;  %v1325_v3 = vshll.u32 %v13707_v47, 16  ;;  %14435 = vmatprep.mubr.msk.bf16.mxu1 %vm3272_vm9, %v15422_v52  ;;  %v1933_v24 = vld [vmem:[#allocation2 + $0x134] sm:$0x1] }
 0x1c4   :  { %14216 = vmatmul.mubr.msk.bf16.gmra.mrb[72].mxu0 %vm3272_vm9, %v12860_v51  ;;  %v2448_v43 = vrot.slane %v2446_v32, 4  ;;  %v1346_v7 = vshrl.u32 %v13710_v58, 16  ;;  %v1349_v9 = vshll.u32 %v13710_v58, 16  ;;  %v1330_v19 = vshrl.u32 %v13708_v34, 16  ;;  %14436 = vmatmul.mubr.msk.bf16.vlgmr.msra.gmra.mrb[0].mxu1 %vm3272_vm9, %v15424_v15  ;;  %v16807_v15 = vpop.f32.mrb[55].mxu0 }
 0x1c5   :  { %v1333_v1 = vshll.u32 %v13708_v34, 16  ;;  %v1343_v11 = vor.u32 %v1341_v53, %v1340_v27  ;;  %v1344_v37 = vrot.slane %v1340_v27, 4  ;;  %v1324_v36 = vrot.slane %v1322_v61, 7  ;;  %14476 = vmatpush3.bf16.msra.mxu1 %v16557_v6  ;;  %v1918_v34 = vld [vmem:[#allocation2 + $0x120] sm:$0xf] }
 0x1c6   :  { %v2439_v23 = vrot.slane %v2438_v54, 4  ;;  %v1348_v5 = vrot.slane %v1346_v7, 7  ;;  %v1332_v32 = vrot.slane %v1330_v19, 7  ;;  %v2449_v51 = vshll.u32 %v16782_v30, 16  ;;  %v1921_v54 = vld [vmem:[#allocation2 + $0x124] sm:$0x1] }
 0x1c7   :  { %v2455_v46 = vshll.u32 %v2209_v13, 16  ;;  %v1925_v47 = vsel %vm16471_vm7, %v1343_v11, %v1924_v62  ;;  %v1928_v53 = vsel %vm16478_vm8, %v1344_v37, %v1927_v48  ;;  %v1327_v52 = vor.u32 %v1325_v3, %v1324_v36  ;;  %v2142_v30 = vld [vmem:[#allocation2 + $0x80] sm:$0xf]  ;;  %v2143_v13 = vld [vmem:[#allocation2 + $0x88] sm:$0xf] }
 0x1c8   :  { %v1328_v58 = vrot.slane %v1324_v36, 4  ;;  %1926 = vst [vmem:[#allocation2 + $0x128] sm:$0xf] %v1925_v47  ;;  %1929 = vst [vmem:[#allocation2 + $0x12c] sm:$0x1] %v1928_v53  ;;  %v1351_v6 = vor.u32 %v1349_v9, %v1348_v5  ;;  %v1352_v27 = vrot.slane %v1348_v5, 4  ;;  %v1335_v61 = vor.u32 %v1333_v1, %v1332_v32 }
 0x1c9   :  { %v1336_v7 = vrot.slane %v1332_v32, 4  ;;  %v1913_v62 = vsel %vm16471_vm7, %v1327_v52, %v1912_v31  ;;  %v2444_v3 = vsel %vm16444_vm4, %v2439_v23, %v16792_v63  ;;  %v2451_v19 = vrot.slane %v2449_v51, 5  ;;  %v2210_v11 = vld [vmem:[#allocation2 + $0x84] sm:$0x1]  ;;  %v2211_v37 = vld [vmem:[#allocation2 + $0x8c] sm:$0x1] }
 0x1ca   :  { %v1916_v48 = vsel %vm16478_vm8, %v1328_v58, %v1915_v38  ;;  %1914 = vst [vmem:[#allocation2 + $0x118] sm:$0xf] %v1913_v62  ;;  %v1931_v9 = vsel %vm16471_vm7, %v1351_v6, %v1930_v21  ;;  %v1934_v1 = vsel %vm16478_vm8, %v1352_v27, %v1933_v24  ;;  %v1919_v31 = vsel %vm16471_vm7, %v1335_v61, %v1918_v34 }
 0x1cb   :  { %1917 = vst [vmem:[#allocation2 + $0x11c] sm:$0x1] %v1916_v48  ;;  %v1922_v38 = vsel %vm16478_vm8, %v1336_v7, %v1921_v54  ;;  %1932 = vst [vmem:[#allocation2 + $0x130] sm:$0xf] %v1931_v9  ;;  %v2452_v63 = vor.u32 %v2451_v19, %v2448_v43  ;;  %v2457_v36 = vrot.slane %v2455_v46, 5  ;;  %v2460_v23 = vshrl.u32 %v2142_v30, 16 }
 0x1cc   :  { %1935 = vst [vmem:[#allocation2 + $0x134] sm:$0x1] %v1934_v1  ;;  %1920 = vst [vmem:[#allocation2 + $0x120] sm:$0xf] %v1919_v31  ;;  %v2463_v5 = vshll.u32 %v2142_v30, 16  ;;  %v2469_v32 = vshll.u32 %v2210_v11, 16  ;;  %v581_v58 = vmul.f32 %v16703_v57, %v16629_v10  ;;  %v579_v7 = vmul.f32 %v16703_v57, %v16636_v28 }
 0x1cd   :  { %1923 = vst [vmem:[#allocation2 + $0x124] sm:$0x1] %v1922_v38  ;;  %v2474_v51 = vshrl.u32 %v2143_v13, 16  ;;  %v2477_v21 = vshll.u32 %v2143_v13, 16  ;;  %v2483_v47 = vshll.u32 %v2211_v37, 16  ;;  %v2453_v53 = vrot.slane %v2452_v63, 4 }
 0x1ce   :  { %v2462_v24 = vrot.slane %v2460_v23, 4  ;;  %v2465_v52 = vrot.slane %v2463_v5, 5  ;;  %v2471_v34 = vrot.slane %v2469_v32, 5  ;;  %v649_v61 = vadd.f32 %v16709_v26, %v581_v58  ;;  %v2145_v48 = vld [vmem:[#allocation2 + $0xa8] sm:$0xf]  ;;  %v16841_v31 = vpop.f32.mrb[56].mxu0 }
 0x1cf   :  { %v2476_v54 = vrot.slane %v2474_v51, 4  ;;  %v2479_v6 = vrot.slane %v2477_v21, 5  ;;  %v2485_v27 = vrot.slane %v2483_v47, 5  ;;  %v2458_v43 = vsel %vm16444_vm4, %v2453_v53, %v2457_v36  ;;  %v2213_v47 = vld [vmem:[#allocation2 + $0xac] sm:$0x1] }
 0x1d0   :  { %v2466_v46 = vor.u32 %v2465_v52, %v2462_v24  ;;  %v12861_v30 = vcombine.low %v2444_v3, %v2458_v43  ;;  %v582_v62 = vmul.f32 %v16703_v57, %v16646_v0  ;;  %v580_v10 = vmul.f32 %v16703_v57, %v16651_v39 }
 0x1d1   :  { %v2480_v13 = vor.u32 %v2479_v6, %v2476_v54  ;;  %v713_v11 = vmax.f32 %v649_v61, 0.0  ;;  %v647_v37 = vadd.f32 %v16709_v26, %v579_v7  ;;  %v18933_v9 = vor.u32 %v16451_v18, %v16449_v17  ;;  %v1951_v54 = vld [vmem:[#allocation2 + $0x15c] sm:$0x1]  ;;  %v16860_v61 = vld [vmem:[#allocation2 + $0xb0] sm:$0xf] }
 0x1d2   :  { %v2467_v19 = vrot.slane %v2466_v46, 4  ;;  %14219 = vmatprep.mubr.msk.bf16.mxu0 %vm3272_vm9, %v12861_v30  ;;  %v650_v0 = vadd.f32 %v16709_v26, %v582_v62  ;;  %v648_v3 = vadd.f32 %v16709_v26, %v580_v10  ;;  %v18934_v39 = vshll.u32 %v16462_v25, 16  ;;  %v15426_v5 = vld [vmem:[#allocation2 + $0x128] ss:$8 sps:$4 sm:$0xff]   ;;  %v16863_v10 = vpop.f32.mrb[57].mxu0 }
 0x1d3   :  { %v16839_v1 = vrot.slane %v18933_v9, 4  ;;  %v2481_v28 = vrot.slane %v2480_v13, 4  ;;  %v15425_v63 = vld [vmem:[#allocation2 + $0x118] ss:$8 sps:$4 sm:$0xff]   ;;  %v13713_v17 = vpack.c.bf16 %v713_v11, %v713_v11  ;;  %v711_v18 = vmax.f32 %v647_v37, 0.0 }
 0x1d4   :  { %v16848_v38 = vrot.slane %v18934_v39, 5  ;;  %v2472_v36 = vsel %vm16444_vm4, %v2467_v19, %v2471_v34  ;;  %v2502_v23 = vshrl.u32 %v2145_v48, 16  ;;  %v714_v51 = vmax.f32 %v650_v0, 0.0  ;;  %14439 = vmatprep.mubr.msk.bf16.mxu1 %vm3272_vm9, %v15425_v63  ;;  %v1948_v34 = vld [vmem:[#allocation2 + $0x158] sm:$0xf] }
 0x1d5   :  { %v2486_v32 = vsel %vm16444_vm4, %v2481_v28, %v2485_v27  ;;  %v712_v21 = vmax.f32 %v648_v3, 0.0  ;;  %v1370_v24 = vshrl.u32 %v13713_v17, 16  ;;  %v1373_v52 = vshll.u32 %v13713_v17, 16  ;;  %14440 = vmatmul.mubr.msk.bf16.gmra.mrb[4].mxu1 %vm3272_vm9, %v15426_v5  ;;  %v1936_v19 = vld [vmem:[#allocation2 + $0x148] sm:$0xf] }
 0x1d6   :  { %v12862_v53 = vcombine.low %v2472_v36, %v2486_v32  ;;  %v13711_v58 = vpack.c.bf16 %v711_v18, %v711_v18  ;;  %v13714_v6 = vpack.c.bf16 %v714_v51, %v714_v51  ;;  %v2504_v43 = vrot.slane %v2502_v23, 4  ;;  %v1939_v11 = vld [vmem:[#allocation2 + $0x14c] sm:$0x1]  ;;  %v1957_v36 = vld [vmem:[#allocation2 + $0x164] sm:$0x1]  ;;  %v16865_v23 = vpop.f32.mrb[58].mxu0 }
 0x1d7   :  { %v13712_v27 = vpack.c.bf16 %v712_v21, %v712_v21  ;;  %v2505_v46 = vshll.u32 %v2145_v48, 16  ;;  %v1372_v7 = vrot.slane %v1370_v24, 7  ;;  %v2511_v62 = vshll.u32 %v2213_v47, 16  ;;  %v1954_v48 = vld [vmem:[#allocation2 + $0x160] sm:$0xf] }
 0x1d8   :  { %14220 = vmatmul.mubr.msk.bf16.gmra.mrb[76].mxu0 %vm3272_vm9, %v12862_v53  ;;  %v1354_v30 = vshrl.u32 %v13711_v58, 16  ;;  %v1357_v13 = vshll.u32 %v13711_v58, 16  ;;  %v1378_v37 = vshrl.u32 %v13714_v6, 16  ;;  %v1381_v9 = vshll.u32 %v13714_v6, 16  ;;  %v1942_v17 = vld [vmem:[#allocation2 + $0x150] sm:$0xf] }
 0x1d9   :  { %v1362_v28 = vshrl.u32 %v13712_v27, 16  ;;  %v1365_v0 = vshll.u32 %v13712_v27, 16  ;;  %v1375_v3 = vor.u32 %v1373_v52, %v1372_v7  ;;  %v1376_v39 = vrot.slane %v1372_v7, 4  ;;  %v1945_v51 = vld [vmem:[#allocation2 + $0x154] sm:$0x1]  ;;  %v16872_v7 = vpop.f32.mrb[59].mxu0 }
 0x1da   :  { %v1356_v63 = vrot.slane %v1354_v30, 7  ;;  %v2507_v18 = vrot.slane %v2505_v46, 5  ;;  %v1380_v5 = vrot.slane %v1378_v37, 7  ;;  %v2513_v21 = vrot.slane %v2511_v62, 5  ;;  %v2147_v6 = vld [vmem:[#allocation2 + $0xb8] sm:$0xf] }
 0x1db   :  { %v1364_v32 = vrot.slane %v1362_v28, 7  ;;  %v2516_v47 = vshrl.u32 %v16860_v61, 16  ;;  %v1949_v53 = vsel %vm16471_vm7, %v1375_v3, %v1948_v34  ;;  %v1952_v24 = vsel %vm16478_vm8, %v1376_v39, %v1951_v54  ;;  %v2215_v27 = vld [vmem:[#allocation2 + $0xbc] sm:$0x1]  ;;  %v2214_v28 = vld [vmem:[#allocation2 + $0xb4] sm:$0x1] }
 0x1dc   :  { %v1359_v52 = vor.u32 %v1357_v13, %v1356_v63  ;;  %v1360_v58 = vrot.slane %v1356_v63, 4  ;;  %1950 = vst [vmem:[#allocation2 + $0x158] sm:$0xf] %v1949_v53  ;;  %1953 = vst [vmem:[#allocation2 + $0x15c] sm:$0x1] %v1952_v24  ;;  %v1383_v46 = vor.u32 %v1381_v9, %v1380_v5  ;;  %v1384_v30 = vrot.slane %v1380_v5, 4 }
 0x1dd   :  { %v1367_v37 = vor.u32 %v1365_v0, %v1364_v32  ;;  %v1368_v62 = vrot.slane %v1364_v32, 4  ;;  %v2508_v54 = vor.u32 %v2507_v18, %v2504_v43  ;;  %v2518_v13 = vrot.slane %v2516_v47, 4  ;;  %v2148_v63 = vld [vmem:[#allocation2 + $0xc0] sm:$0xf]  ;;  %v15434_v5 = vld [vmem:[#allocation8 + $0x48] sm:$0xff]  }
 0x1de   :  { %v1937_v25 = vsel %vm16471_vm7, %v1359_v52, %v1936_v19  ;;  %v1940_v34 = vsel %vm16478_vm8, %v1360_v58, %v1939_v11  ;;  %v1955_v3 = vsel %vm16471_vm7, %v1383_v46, %v1954_v48  ;;  %v1958_v9 = vsel %vm16478_vm8, %v1384_v30, %v1957_v36  ;;  %14477 = vmatprep.subr.bf16.mxu1 %v15434_v5 }
 0x1df   :  { %1938 = vst [vmem:[#allocation2 + $0x148] sm:$0xf] %v1937_v25  ;;  %1941 = vst [vmem:[#allocation2 + $0x14c] sm:$0x1] %v1940_v34  ;;  %v1943_v0 = vsel %vm16471_vm7, %v1367_v37, %v1942_v17  ;;  %v1946_v39 = vsel %vm16478_vm8, %v1368_v62, %v1945_v51  ;;  %v2509_v43 = vrot.slane %v2508_v54, 4  ;;  %v2519_v25 = vshll.u32 %v16860_v61, 16  ;;  %14478 = vmatpush3.bf16.msra.mxu1 %v15434_v5 }
 0x1e0   :  { %1956 = vst [vmem:[#allocation2 + $0x160] sm:$0xf] %v1955_v3  ;;  %1959 = vst [vmem:[#allocation2 + $0x164] sm:$0x1] %v1958_v9  ;;  %v2525_v19 = vshll.u32 %v2214_v28, 16  ;;  %v2530_v11 = vshrl.u32 %v2147_v6, 16  ;;  %v585_v36 = vmul.f32 %v16703_v57, %v16659_v35  ;;  %v583_v17 = vmul.f32 %v16703_v57, %v16665_v8 }
 0x1e1   :  { %1944 = vst [vmem:[#allocation2 + $0x150] sm:$0xf] %v1943_v0  ;;  %1947 = vst [vmem:[#allocation2 + $0x154] sm:$0x1] %v1946_v39  ;;  %v2533_v48 = vshll.u32 %v2147_v6, 16  ;;  %v2539_v18 = vshll.u32 %v2215_v27, 16  ;;  %v2514_v32 = vsel %vm16444_vm4, %v2509_v43, %v2513_v21  ;;  %v18935_v61 = vsel %vm16444_vm4, %v16839_v1, %v16848_v38 }
 0x1e2   :  { %v2521_v51 = vrot.slane %v2519_v25, 5  ;;  %v2527_v47 = vrot.slane %v2525_v19, 5  ;;  %v2532_v53 = vrot.slane %v2530_v11, 4  ;;  %v12863_v24 = vcombine.low %v18935_v61, %v2514_v32  ;;  %v2216_v54 = vld [vmem:[#allocation2 + $0xc4] sm:$0x1]  ;;  %v16907_v0 = vpop.f32.mrb[60].mxu0 }
 0x1e3   :  { %v2535_v52 = vrot.slane %v2533_v48, 5  ;;  %v2541_v58 = vrot.slane %v2539_v18, 5  ;;  %v653_v35 = vadd.f32 %v16709_v26, %v585_v36  ;;  %v651_v8 = vadd.f32 %v16709_v26, %v583_v17  ;;  %v16913_v18 = vld [vmem:[#allocation2 + $0xc8] sm:$0xf]  ;;  %v1972_v32 = vld [vmem:[#allocation2 + $0x178] sm:$0xf] }
 0x1e4   :  { %v2522_v6 = vor.u32 %v2521_v51, %v2518_v13  ;;  %v586_v21 = vmul.f32 %v16703_v57, %v16667_v33  ;;  %v584_v27 = vmul.f32 %v16703_v57, %v16669_v40  ;;  %14223 = vmatprep.mubr.msk.bf16.mxu0 %vm3272_vm9, %v12863_v24  ;;  %v2544_v38 = vshrl.u32 %v2148_v63, 16  ;;  %v1975_v51 = vld [vmem:[#allocation2 + $0x17c] sm:$0x1] }
 0x1e5   :  { %v2536_v46 = vor.u32 %v2535_v52, %v2532_v53  ;;  %v717_v1 = vmax.f32 %v653_v35, 0.0  ;;  %v2547_v30 = vshll.u32 %v2148_v63, 16  ;;  %v715_v62 = vmax.f32 %v651_v8, 0.0  ;;  %v1960_v52 = vld [vmem:[#allocation2 + $0x168] sm:$0xf]  ;;  %v16919_v8 = vpop.f32.mrb[61].mxu0 }
 0x1e6   :  { %v2523_v37 = vrot.slane %v2522_v6, 4  ;;  %v654_v28 = vadd.f32 %v16709_v26, %v586_v21  ;;  %v652_v34 = vadd.f32 %v16709_v26, %v584_v27  ;;  %v2546_v33 = vrot.slane %v2544_v38, 4  ;;  %v1963_v27 = vld [vmem:[#allocation2 + $0x16c] sm:$0x1] }
 0x1e7   :  { %v2537_v13 = vrot.slane %v2536_v46, 4  ;;  %v13717_v3 = vpack.c.bf16 %v717_v1, %v717_v1  ;;  %v2549_v9 = vrot.slane %v2547_v30, 5  ;;  %v13715_v39 = vpack.c.bf16 %v715_v62, %v715_v62  ;;  %v15428_v17 = vld [vmem:[#allocation2 + $0x158] ss:$8 sps:$4 sm:$0xff]  }
 0x1e8   :  { %v2528_v40 = vsel %vm16444_vm4, %v2523_v37, %v2527_v47  ;;  %v718_v43 = vmax.f32 %v654_v28, 0.0  ;;  %v716_v25 = vmax.f32 %v652_v34, 0.0  ;;  %v15427_v19 = vld [vmem:[#allocation2 + $0x148] ss:$8 sps:$4 sm:$0xff]   ;;  %v2558_v38 = vshrl.u32 %v16913_v18, 16 }
 0x1e9   :  { %v2542_v11 = vsel %vm16444_vm4, %v2537_v13, %v2541_v58  ;;  %v1402_v63 = vshrl.u32 %v13717_v3, 16  ;;  %v1405_v48 = vshll.u32 %v13717_v3, 16  ;;  %v2550_v36 = vor.u32 %v2549_v9, %v2546_v33  ;;  %14443 = vmatprep.mubr.msk.bf16.mxu1 %vm3272_vm9, %v15427_v19  ;;  %v1978_v62 = vld [vmem:[#allocation2 + $0x180] sm:$0xf]  ;;  %v1981_v28 = vld [vmem:[#allocation2 + $0x184] sm:$0x1] }
 0x1ea   :  { %v12864_v5 = vcombine.low %v2528_v40, %v2542_v11  ;;  %v1386_v53 = vshrl.u32 %v13715_v39, 16  ;;  %v1389_v61 = vshll.u32 %v13715_v39, 16  ;;  %v13718_v24 = vpack.c.bf16 %v718_v43, %v718_v43  ;;  %14444 = vmatmul.mubr.msk.bf16.gmra.mrb[8].mxu1 %vm3272_vm9, %v15428_v17  ;;  %v16923_v3 = vpop.f32.mrb[62].mxu0  ;;  %v1966_v40 = vld [vmem:[#allocation2 + $0x170] sm:$0xf] }
 0x1eb   :  { %v1404_v47 = vrot.slane %v1402_v63, 7  ;;  %v13716_v35 = vpack.c.bf16 %v716_v25, %v716_v25  ;;  %v16916_v6 = vrot.slane %v2550_v36, 4  ;;  %v2553_v58 = vshll.u32 %v2216_v54, 16  ;;  %v16925_v43 = vpop.f32.mrb[63].mxu0  ;;  %v2217_v63 = vld [vmem:[#allocation2 + $0xcc] sm:$0x1] }
 0x1ec   :  { %14224 = vmatmul.mubr.msk.bf16.gmra.mrb[80].mxu0 %vm3272_vm9, %v12864_v5  ;;  %v1388_v21 = vrot.slane %v1386_v53, 7  ;;  %v1410_v46 = vshrl.u32 %v13718_v24, 16  ;;  %v1413_v1 = vshll.u32 %v13718_v24, 16  ;;  %v2150_v36 = vld [vmem:[#allocation2 + $0xd0] sm:$0xf] }
 0x1ed   :  { %v1407_v30 = vor.u32 %v1405_v48, %v1404_v47  ;;  %v1408_v37 = vrot.slane %v1404_v47, 4  ;;  %v1394_v34 = vshrl.u32 %v13716_v35, 16  ;;  %v1397_v13 = vshll.u32 %v13716_v35, 16  ;;  %v1969_v24 = vld [vmem:[#allocation2 + $0x174] sm:$0x1] }
 0x1ee   :  { %v1391_v54 = vor.u32 %v1389_v61, %v1388_v21  ;;  %v1392_v33 = vrot.slane %v1388_v21, 4  ;;  %v1412_v9 = vrot.slane %v1410_v46, 7  ;;  %v2555_v39 = vrot.slane %v2553_v58, 5  ;;  %v2151_v47 = vld [vmem:[#allocation2 + $0xd8] sm:$0xf] }
 0x1ef   :  { %v1973_v25 = vsel %vm16471_vm7, %v1407_v30, %v1972_v32  ;;  %v1976_v19 = vsel %vm16478_vm8, %v1408_v37, %v1975_v51  ;;  %v1396_v11 = vrot.slane %v1394_v34, 7  ;;  %v2560_v48 = vrot.slane %v2558_v38, 4  ;;  %v2218_v21 = vld [vmem:[#allocation2 + $0xd4] sm:$0x1]  ;;  %v2219_v46 = vld [vmem:[#allocation2 + $0xdc] sm:$0x1] }
 0x1f0   :  { %1974 = vst [vmem:[#allocation2 + $0x178] sm:$0xf] %v1973_v25  ;;  %1977 = vst [vmem:[#allocation2 + $0x17c] sm:$0x1] %v1976_v19  ;;  %v1961_v17 = vsel %vm16471_vm7, %v1391_v54, %v1960_v52  ;;  %v1964_v5 = vsel %vm16478_vm8, %v1392_v33, %v1963_v27  ;;  %v1415_v53 = vor.u32 %v1413_v1, %v1412_v9  ;;  %v1416_v61 = vrot.slane %v1412_v9, 4 }
 0x1f1   :  { %1962 = vst [vmem:[#allocation2 + $0x168] sm:$0xf] %v1961_v17  ;;  %1965 = vst [vmem:[#allocation2 + $0x16c] sm:$0x1] %v1964_v5  ;;  %v1399_v32 = vor.u32 %v1397_v13, %v1396_v11  ;;  %v1400_v51 = vrot.slane %v1396_v11, 4  ;;  %v2556_v35 = vsel %vm16444_vm4, %v16916_v6, %v2555_v39  ;;  %v2561_v58 = vshll.u32 %v16913_v18, 16 }
 0x1f2   :  { %v1979_v52 = vsel %vm16471_vm7, %v1415_v53, %v1978_v62  ;;  %v1982_v27 = vsel %vm16478_vm8, %v1416_v61, %v1981_v28  ;;  %v2567_v1 = vshll.u32 %v2217_v63, 16  ;;  %v2572_v38 = vshrl.u32 %v2150_v36, 16  ;;  %v2152_v63 = vld [vmem:[#allocation2 + $0xf0] sm:$0xf] }
 0x1f3   :  { %1980 = vst [vmem:[#allocation2 + $0x180] sm:$0xf] %v1979_v52  ;;  %1983 = vst [vmem:[#allocation2 + $0x184] sm:$0x1] %v1982_v27  ;;  %v1967_v30 = vsel %vm16471_vm7, %v1399_v32, %v1966_v40  ;;  %v1970_v6 = vsel %vm16478_vm8, %v1400_v51, %v1969_v24  ;;  %v2563_v37 = vrot.slane %v2561_v58, 5  ;;  %v2575_v18 = vshll.u32 %v2150_v36, 16 }
 0x1f4   :  { %1968 = vst [vmem:[#allocation2 + $0x170] sm:$0xf] %v1967_v30  ;;  %1971 = vst [vmem:[#allocation2 + $0x174] sm:$0x1] %v1970_v6  ;;  %v2569_v34 = vrot.slane %v2567_v1, 5  ;;  %v2574_v13 = vrot.slane %v2572_v38, 4  ;;  %v589_v40 = vmul.f32 %v16703_v57, %v16682_v2  ;;  %v587_v11 = vmul.f32 %v16703_v57, %v16692_v12 }
 0x1f5   :  { %v2581_v62 = vshll.u32 %v2218_v21, 16  ;;  %v2586_v54 = vshrl.u32 %v2151_v47, 16  ;;  %v2564_v33 = vor.u32 %v2563_v37, %v2560_v48  ;;  %v2577_v28 = vrot.slane %v2575_v18, 5  ;;  %v16960_v27 = vld [vmem:[#allocation2 + $0xf8] sm:$0xf] }
 0x1f6   :  { %v2589_v9 = vshll.u32 %v2151_v47, 16  ;;  %v2595_v39 = vshll.u32 %v2219_v46, 16  ;;  %v657_v61 = vadd.f32 %v16709_v26, %v589_v40  ;;  %v655_v48 = vadd.f32 %v16709_v26, %v587_v11  ;;  %v16964_v38 = vld [vmem:[#allocation11 + $0x1] ss:$0 sm:$0xff]  ;;  %v2220_v18 = vld [vmem:[#allocation2 + $0xf4] sm:$0x1] }
 0x1f7   :  { %v2583_v25 = vrot.slane %v2581_v62, 5  ;;  %v2588_v19 = vrot.slane %v2586_v54, 4  ;;  %v2565_v36 = vrot.slane %v2564_v33, 4  ;;  %v2578_v17 = vor.u32 %v2577_v28, %v2574_v13  ;;  %v1999_v40 = vld [vmem:[#allocation2 + $0x1ac] sm:$0x1] }
 0x1f8   :  { %v2591_v5 = vrot.slane %v2589_v9, 5  ;;  %v2597_v53 = vrot.slane %v2595_v39, 5  ;;  %v590_v24 = vmul.f32 %v16703_v57, %v16699_v45  ;;  %v588_v47 = vmul.f32 %v16703_v57, %v16701_v49 }
 0x1f9   :  { %v2570_v2 = vsel %vm16444_vm4, %v2565_v36, %v2569_v34  ;;  %v2579_v32 = vrot.slane %v2578_v17, 4  ;;  %v2600_v51 = vshrl.u32 %v2152_v63, 16  ;;  %v721_v21 = vmax.f32 %v657_v61, 0.0  ;;  %v1987_v36 = vld [vmem:[#allocation2 + $0x19c] sm:$0x1] }
 0x1fa   :  { %v2592_v12 = vor.u32 %v2591_v5, %v2588_v19  ;;  %v12865_v58 = vcombine.low %v2556_v35, %v2570_v2  ;;  %v719_v46 = vmax.f32 %v655_v48, 0.0  ;;  %v658_v52 = vadd.f32 %v16709_v26, %v590_v24  ;;  %v15430_v34 = vld [vmem:[#allocation2 + $0x178] ss:$8 sps:$4 sm:$0xff]   ;;  %v1996_v19 = vld [vmem:[#allocation2 + $0x1a8] sm:$0xf] }
 0x1fb   :  { %v2584_v1 = vsel %vm16444_vm4, %v2579_v32, %v2583_v25  ;;  %v656_v49 = vadd.f32 %v16964_v38, %v588_v47  ;;  %v16967_v57 = vrot.slane %v2600_v51, 4  ;;  %v15429_v30 = vld [vmem:[#allocation2 + $0x168] ss:$8 sps:$4 sm:$0xff]   ;;  %v13721_v35 = vpack.c.bf16 %v721_v21, %v721_v21 }
 0x1fc   :  { %v2593_v45 = vrot.slane %v2592_v12, 4  ;;  %14227 = vmatprep.mubr.msk.bf16.mxu0 %vm3272_vm9, %v12865_v58  ;;  %v13719_v6 = vpack.c.bf16 %v719_v46, %v719_v46  ;;  %v722_v37 = vmax.f32 %v658_v52, 0.0  ;;  %v2603_v26 = vshll.u32 %v2152_v63, 16  ;;  %14447 = vmatprep.mubr.msk.bf16.mxu1 %vm3272_vm9, %v15429_v30  ;;  %v1984_v63 = vld [vmem:[#allocation2 + $0x198] sm:$0xf] }
 0x1fd   :  { %v720_v62 = vmax.f32 %v656_v49, 0.0  ;;  %v2609_v54 = vshll.u32 %v2220_v18, 16  ;;  %v2614_v33 = vshrl.u32 %v16960_v27, 16  ;;  %v1434_v9 = vshrl.u32 %v13721_v35, 16  ;;  %14448 = vmatmul.mubr.msk.bf16.gmra.mrb[12].mxu1 %vm3272_vm9, %v15430_v34 }
 0x1fe   :  { %v2598_v13 = vsel %vm16444_vm4, %v2593_v45, %v2597_v53  ;;  %v1437_v39 = vshll.u32 %v13721_v35, 16  ;;  %v1418_v25 = vshrl.u32 %v13719_v6, 16  ;;  %v1421_v11 = vshll.u32 %v13719_v6, 16  ;;  %v2221_v45 = vld [vmem:[#allocation2 + $0xfc] sm:$0x1] }
 0x1ff   :  { %v12866_v28 = vcombine.low %v2584_v1, %v2598_v13  ;;  %v13722_v17 = vpack.c.bf16 %v722_v37, %v722_v37  ;;  %v13720_v5 = vpack.c.bf16 %v720_v62, %v720_v62  ;;  %v2605_v53 = vrot.slane %v2603_v26, 5  ;;  %v2002_v1 = vld [vmem:[#allocation2 + $0x1b0] sm:$0xf]  ;;  %v2154_v37 = vld [vmem:[#allocation2 + $0x100] sm:$0xf] }
 0x200   :  { %v1436_v61 = vrot.slane %v1434_v9, 7  ;;  %v1420_v48 = vrot.slane %v1418_v25, 7  ;;  %v16976_v24 = vrot.slane %v2609_v54, 5  ;;  %v2616_v47 = vrot.slane %v2614_v33, 4  ;;  %v2005_v62 = vld [vmem:[#allocation2 + $0x1b4] sm:$0x1] }
 0x201   :  { %14228 = vmatmul.mubr.msk.bf16.gmra.mrb[84].mxu0 %vm3272_vm9, %v12866_v28  ;;  %v1442_v2 = vshrl.u32 %v13722_v17, 16  ;;  %v1445_v32 = vshll.u32 %v13722_v17, 16  ;;  %v1426_v12 = vshrl.u32 %v13720_v5, 16  ;;  %v1429_v51 = vshll.u32 %v13720_v5, 16  ;;  %v1990_v54 = vld [vmem:[#allocation2 + $0x1a0] sm:$0xf] }
 0x202   :  { %v1439_v58 = vor.u32 %v1437_v39, %v1436_v61  ;;  %v1440_v21 = vrot.slane %v1436_v61, 4  ;;  %v1423_v46 = vor.u32 %v1421_v11, %v1420_v48  ;;  %v1424_v52 = vrot.slane %v1420_v48, 4  ;;  %v1993_v33 = vld [vmem:[#allocation2 + $0x1a4] sm:$0x1]  ;;  %v2155_v39 = vld [vmem:[#allocation2 + $0x108] sm:$0xf] }
 0x203   :  { %v1444_v49 = vrot.slane %v1442_v2, 7  ;;  %v1428_v30 = vrot.slane %v1426_v12, 7  ;;  %v2606_v35 = vor.u32 %v2605_v53, %v16967_v57  ;;  %v2617_v6 = vshll.u32 %v16960_v27, 16  ;;  %v2222_v11 = vld [vmem:[#allocation2 + $0x104] sm:$0x1] }
 0x204   :  { %v1997_v18 = vsel %vm16471_vm7, %v1439_v58, %v1996_v19  ;;  %v2000_v26 = vsel %vm16478_vm8, %v1440_v21, %v1999_v40  ;;  %v1985_v34 = vsel %vm16471_vm7, %v1423_v46, %v1984_v63  ;;  %v1988_v13 = vsel %vm16478_vm8, %v1424_v52, %v1987_v36  ;;  %v2223_v61 = vld [vmem:[#allocation2 + $0x10c] sm:$0x1] }
 0x205   :  { %1998 = vst [vmem:[#allocation2 + $0x1a8] sm:$0xf] %v1997_v18  ;;  %2001 = vst [vmem:[#allocation2 + $0x1ac] sm:$0x1] %v2000_v26  ;;  %v1447_v27 = vor.u32 %v1445_v32, %v1444_v49  ;;  %v1448_v57 = vrot.slane %v1444_v49, 4  ;;  %v1431_v28 = vor.u32 %v1429_v51, %v1428_v30  ;;  %v1432_v9 = vrot.slane %v1428_v30, 4 }
 0x206   :  { %1986 = vst [vmem:[#allocation2 + $0x198] sm:$0xf] %v1985_v34  ;;  %1989 = vst [vmem:[#allocation2 + $0x19c] sm:$0x1] %v1988_v13  ;;  %v2607_v25 = vrot.slane %v2606_v35, 4  ;;  %v2619_v19 = vrot.slane %v2617_v6, 5 }
 0x207   :  { %v2623_v40 = vshll.u32 %v2221_v45, 16  ;;  %v2628_v63 = vshrl.u32 %v2154_v37, 16  ;;  %v2003_v36 = vsel %vm16471_vm7, %v1447_v27, %v2002_v1  ;;  %v2006_v17 = vsel %vm16478_vm8, %v1448_v57, %v2005_v62  ;;  %v16999_v45 = vld [vmem:[#allocation11] ss:$0 sm:$0xff]  ;;  %v2156_v18 = vld [vmem:[#allocation2 + $0x110] sm:$0xf] }
 0x208   :  { %v1991_v5 = vsel %vm16471_vm7, %v1431_v28, %v1990_v54  ;;  %v1994_v53 = vsel %vm16478_vm8, %v1432_v9, %v1993_v33  ;;  %2004 = vst [vmem:[#allocation2 + $0x1b0] sm:$0xf] %v2003_v36  ;;  %2007 = vst [vmem:[#allocation2 + $0x1b4] sm:$0x1] %v2006_v17  ;;  %v2612_v48 = vsel %vm16444_vm4, %v2607_v25, %v16976_v24  ;;  %v2631_v51 = vshll.u32 %v2154_v37, 16 }
 0x209   :  { %1992 = vst [vmem:[#allocation2 + $0x1a0] sm:$0xf] %v1991_v5  ;;  %1995 = vst [vmem:[#allocation2 + $0x1a4] sm:$0x1] %v1994_v53  ;;  %v2620_v2 = vor.u32 %v2619_v19, %v2616_v47  ;;  %v2625_v32 = vrot.slane %v2623_v40, 5  ;;  %v2630_v12 = vrot.slane %v2628_v63, 4  ;;  %v593_v49 = vmul.f32 %v16999_v45, %v16721_v56 }
 0x20a   :  { %v2637_v58 = vshll.u32 %v2222_v11, 16  ;;  %v2642_v21 = vshrl.u32 %v2155_v39, 16  ;;  %v2645_v46 = vshll.u32 %v2155_v39, 16  ;;  %v2651_v1 = vshll.u32 %v2223_v61, 16  ;;  %v2224_v19 = vld [vmem:[#allocation2 + $0x114] sm:$0x1] }
 0x20b   :  { %v2621_v52 = vrot.slane %v2620_v2, 4  ;;  %v591_v30 = vmul.f32 %v16999_v45, %v16730_v55  ;;  %v2633_v35 = vrot.slane %v2631_v51, 5  ;;  %v661_v34 = vadd.f32 %v16964_v38, %v593_v49  ;;  %v17020_v61 = vld [vmem:[#allocation2 + $0x118] sm:$0xf] }
 0x20c   :  { %v2639_v6 = vrot.slane %v2637_v58, 5  ;;  %v2644_v24 = vrot.slane %v2642_v21, 4  ;;  %v2647_v47 = vrot.slane %v2645_v46, 5  ;;  %v2653_v26 = vrot.slane %v2651_v1, 5  ;;  %v2020_v21 = vld [vmem:[#allocation2 + $0x1c8] sm:$0xf] }
 0x20d   :  { %v2626_v37 = vsel %vm16444_vm4, %v2621_v52, %v2625_v32  ;;  %v659_v13 = vadd.f32 %v16964_v38, %v591_v30  ;;  %v2634_v54 = vor.u32 %v2633_v35, %v2630_v12  ;;  %v594_v56 = vmul.f32 %v16999_v45, %v16732_v60  ;;  %v2023_v46 = vld [vmem:[#allocation2 + $0x1cc] sm:$0x1] }
 0x20e   :  { %v12867_v62 = vcombine.low %v2612_v48, %v2626_v37  ;;  %v2648_v33 = vor.u32 %v2647_v47, %v2644_v24  ;;  %v725_v55 = vmax.f32 %v661_v34, 0.0  ;;  %v592_v57 = vmul.f32 %v16999_v45, %v16734_v16  ;;  %v2008_v24 = vld [vmem:[#allocation2 + $0x1b8] sm:$0xf]  ;;  %v2011_v37 = vld [vmem:[#allocation2 + $0x1bc] sm:$0x1] }
 0x20f   :  { %v723_v27 = vmax.f32 %v659_v13, 0.0  ;;  %v2656_v28 = vshrl.u32 %v2156_v18, 16  ;;  %v2635_v9 = vrot.slane %v2634_v54, 4  ;;  %v662_v25 = vadd.f32 %v16964_v38, %v594_v56  ;;  %v15432_v2 = vld [vmem:[#allocation2 + $0x1a8] ss:$8 sps:$4 sm:$0xff]  }
 0x210   :  { %14231 = vmatprep.mubr.msk.bf16.mxu0 %vm3272_vm9, %v12867_v62  ;;  %v2649_v39 = vrot.slane %v2648_v33, 4  ;;  %v2659_v40 = vshll.u32 %v2156_v18, 16  ;;  %v13725_v11 = vpack.c.bf16 %v725_v55, %v725_v55  ;;  %v660_v36 = vadd.f32 %v16964_v38, %v592_v57  ;;  %v15431_v60 = vld [vmem:[#allocation2 + $0x198] ss:$8 sps:$4 sm:$0xff]   ;;  %v2029_v57 = vld [vmem:[#allocation2 + $0x1d4] sm:$0x1] }
 0x211   :  { %v13723_v63 = vpack.c.bf16 %v723_v27, %v723_v27  ;;  %v2658_v17 = vrot.slane %v2656_v28, 4  ;;  %v2640_v5 = vsel %vm16444_vm4, %v2635_v9, %v2639_v6  ;;  %v726_v53 = vmax.f32 %v662_v25, 0.0  ;;  %14451 = vmatprep.mubr.msk.bf16.mxu1 %vm3272_vm9, %v15431_v60  ;;  %v2026_v27 = vld [vmem:[#allocation2 + $0x1d0] sm:$0xf]  ;;  %v2225_v28 = vld [vmem:[#allocation2 + $0x11c] sm:$0x1] }
 0x212   :  { %v2654_v16 = vsel %vm16444_vm4, %v2649_v39, %v2653_v26  ;;  %v2661_v48 = vrot.slane %v2659_v40, 5  ;;  %v1466_v12 = vshrl.u32 %v13725_v11, 16  ;;  %v1469_v51 = vshll.u32 %v13725_v11, 16  ;;  %14452 = vmatmul.mubr.msk.bf16.gmra.mrb[16].mxu1 %vm3272_vm9, %v15432_v2  ;;  %v2014_v60 = vld [vmem:[#allocation2 + $0x1c0] sm:$0xf] }
 0x213   :  { %v12868_v32 = vcombine.low %v2640_v5, %v2654_v16  ;;  %v1450_v58 = vshrl.u32 %v13723_v63, 16  ;;  %v1453_v52 = vshll.u32 %v13723_v63, 16  ;;  %v13726_v1 = vpack.c.bf16 %v726_v53, %v726_v53  ;;  %v2017_v5 = vld [vmem:[#allocation2 + $0x1c4] sm:$0x1] }
 0x214   :  { %v724_v49 = vmax.f32 %v660_v36, 0.0  ;;  %v2662_v30 = vor.u32 %v2661_v48, %v2658_v17  ;;  %v1468_v35 = vrot.slane %v1466_v12, 7  ;;  %v2665_v47 = vshll.u32 %v2224_v19, 16  ;;  %v2158_v19 = vld [vmem:[#allocation2 + $0x120] sm:$0xf] }
 0x215   :  { %14232 = vmatmul.mubr.msk.bf16.gmra.mrb[88].mxu0 %vm3272_vm9, %v12868_v32  ;;  %v1452_v6 = vrot.slane %v1450_v58, 7  ;;  %v2670_v18 = vshrl.u32 %v17020_v61, 16  ;;  %v1474_v26 = vshrl.u32 %v13726_v1, 16  ;;  %v1477_v34 = vshll.u32 %v13726_v1, 16  ;;  %v2159_v32 = vld [vmem:[#allocation2 + $0x128] sm:$0xf] }
 0x216   :  { %v13724_v13 = vpack.c.bf16 %v724_v49, %v724_v49  ;;  %v17026_v62 = vrot.slane %v2662_v30, 4  ;;  %v1471_v54 = vor.u32 %v1469_v51, %v1468_v35  ;;  %v1472_v33 = vrot.slane %v1468_v35, 4  ;;  %v2227_v35 = vld [vmem:[#allocation2 + $0x12c] sm:$0x1] }
 0x217   :  { %v1455_v56 = vor.u32 %v1453_v52, %v1452_v6  ;;  %v1456_v55 = vrot.slane %v1452_v6, 4  ;;  %v1476_v9 = vrot.slane %v1474_v26, 7  ;;  %v2667_v40 = vrot.slane %v2665_v47, 5 }
 0x218   :  { %v1458_v39 = vshrl.u32 %v13724_v13, 16  ;;  %v1461_v25 = vshll.u32 %v13724_v13, 16  ;;  %v2021_v11 = vsel %vm16471_vm7, %v1471_v54, %v2020_v21  ;;  %v2024_v63 = vsel %vm16478_vm8, %v1472_v33, %v2023_v46  ;;  %v2226_v21 = vld [vmem:[#allocation2 + $0x124] sm:$0x1] }
 0x219   :  { %v2009_v36 = vsel %vm16471_vm7, %v1455_v56, %v2008_v24  ;;  %v2012_v17 = vsel %vm16478_vm8, %v1456_v55, %v2011_v37  ;;  %2022 = vst [vmem:[#allocation2 + $0x1c8] sm:$0xf] %v2021_v11  ;;  %2025 = vst [vmem:[#allocation2 + $0x1cc] sm:$0x1] %v2024_v63  ;;  %v1479_v16 = vor.u32 %v1477_v34, %v1476_v9  ;;  %v1480_v53 = vrot.slane %v1476_v9, 4 }
 0x21a   :  { %2010 = vst [vmem:[#allocation2 + $0x1b8] sm:$0xf] %v2009_v36  ;;  %2013 = vst [vmem:[#allocation2 + $0x1bc] sm:$0x1] %v2012_v17  ;;  %v1460_v48 = vrot.slane %v1458_v39, 7  ;;  %v2668_v2 = vsel %vm16444_vm4, %v17026_v62, %v2667_v40  ;;  %v2672_v12 = vrot.slane %v2670_v18, 4  ;;  %v598_v63 = vmul.f32 %v16999_v45, %v16746_v29 }
 0x21b   :  { %v2673_v51 = vshll.u32 %v17020_v61, 16  ;;  %v2679_v58 = vshll.u32 %v2225_v28, 16  ;;  %v2684_v46 = vshrl.u32 %v2158_v19, 16  ;;  %v2027_v52 = vsel %vm16471_vm7, %v1479_v16, %v2026_v27  ;;  %v2160_v28 = vld [vmem:[#allocation2 + $0x140] sm:$0xf] }
 0x21c   :  { %v2030_v1 = vsel %vm16478_vm8, %v1480_v53, %v2029_v57  ;;  %v1463_v49 = vor.u32 %v1461_v25, %v1460_v48  ;;  %v1464_v30 = vrot.slane %v1460_v48, 4  ;;  %2028 = vst [vmem:[#allocation2 + $0x1d0] sm:$0xf] %v2027_v52  ;;  %v2687_v18 = vshll.u32 %v2158_v19, 16 }
 0x21d   :  { %2031 = vst [vmem:[#allocation2 + $0x1d4] sm:$0x1] %v2030_v1  ;;  %v2675_v6 = vrot.slane %v2673_v51, 5  ;;  %v2681_v24 = vrot.slane %v2679_v58, 5  ;;  %v2686_v47 = vrot.slane %v2684_v46, 4  ;;  %v2693_v26 = vshll.u32 %v2226_v21, 16 }
 0x21e   :  { %v2015_v61 = vsel %vm16471_vm7, %v1463_v49, %v2014_v60  ;;  %v2018_v37 = vsel %vm16478_vm8, %v1464_v30, %v2017_v5  ;;  %v2698_v34 = vshrl.u32 %v2159_v32, 16  ;;  %v2689_v62 = vrot.slane %v2687_v18, 5  ;;  %v15444_v21 = vld [vmem:[#allocation8 + $0x50] sm:$0xff]   ;;  %v15445_v18 = vld [vmem:[#allocation8] sm:$0xff]  }
 0x21f   :  { %2016 = vst [vmem:[#allocation2 + $0x1c0] sm:$0xf] %v2015_v61  ;;  %2019 = vst [vmem:[#allocation2 + $0x1c4] sm:$0x1] %v2018_v37  ;;  %v2676_v13 = vor.u32 %v2675_v6, %v2672_v12  ;;  %v2701_v54 = vshll.u32 %v2159_v32, 16  ;;  %v2707_v33 = vshll.u32 %v2227_v35, 16  ;;  %v597_v27 = vmul.f32 %v16999_v45, %v16738_v22  ;;  %14543 = vmatprep.subr.bf16.mxu1 %v15444_v21 }
 0x220   :  { %v2695_v56 = vrot.slane %v2693_v26, 5  ;;  %v2700_v55 = vrot.slane %v2698_v34, 4  ;;  %v595_v57 = vmul.f32 %v16999_v45, %v16740_v42  ;;  %v2690_v39 = vor.u32 %v2689_v62, %v2686_v47  ;;  %v17061_v32 = vld [vmem:[#allocation2 + $0x148] sm:$0xf]  ;;  %v2228_v12 = vld [vmem:[#allocation2 + $0x144] sm:$0x1]  ;;  %14271 = vmatprep.subr.bf16.mxu0 %v15445_v18 }
 0x221   :  { %v2677_v9 = vrot.slane %v2676_v13, 4  ;;  %v2703_v25 = vrot.slane %v2701_v54, 5  ;;  %v2709_v40 = vrot.slane %v2707_v33, 5  ;;  %v665_v19 = vadd.f32 %v16964_v38, %v597_v27  ;;  %v2044_v13 = vld [vmem:[#allocation2 + $0x1f8] sm:$0xf]  ;;  %14272 = vmatpush3.bf16.msra.mxu0 %v15445_v18 }
 0x222   :  { %v663_v11 = vadd.f32 %v16964_v38, %v595_v57  ;;  %v596_v36 = vmul.f32 %v16999_v45, %v16750_v20  ;;  %v2691_v17 = vrot.slane %v2690_v39, 4  ;;  %v2712_v60 = vshrl.u32 %v2160_v28, 16  ;;  %v2047_v62 = vld [vmem:[#allocation2 + $0x1fc] sm:$0x1]  ;;  %v2032_v33 = vld [vmem:[#allocation2 + $0x1e8] sm:$0xf] }
 0x223   :  { %v2682_v22 = vsel %vm16444_vm4, %v2677_v9, %v2681_v24  ;;  %v2704_v42 = vor.u32 %v2703_v25, %v2700_v55  ;;  %v729_v16 = vmax.f32 %v665_v19, 0.0  ;;  %v666_v48 = vadd.f32 %v16964_v38, %v598_v63  ;;  %v15435_v47 = vld [vmem:[#allocation2 + $0x1c8] ss:$8 sps:$4 sm:$0xff]   ;;  %v2035_v25 = vld [vmem:[#allocation2 + $0x1ec] sm:$0x1] }
 0x224   :  { %v12869_v5 = vcombine.low %v2668_v2, %v2682_v22  ;;  %v727_v53 = vmax.f32 %v663_v11, 0.0  ;;  %v2696_v29 = vsel %vm16444_vm4, %v2691_v17, %v2695_v56  ;;  %v664_v20 = vadd.f32 %v16964_v38, %v596_v36  ;;  %v2230_v18 = vld [vmem:[#allocation2 + $0x154] sm:$0x1] }
 0x225   :  { %v2705_v51 = vrot.slane %v2704_v42, 4  ;;  %v17066_v58 = vrot.slane %v2712_v60, 4  ;;  %v13729_v46 = vpack.c.bf16 %v729_v16, %v729_v16  ;;  %v730_v52 = vmax.f32 %v666_v48, 0.0  ;;  %v2050_v60 = vld [vmem:[#allocation2 + $0x200] sm:$0xf] }
 0x226   :  { %14235 = vmatprep.mubr.msk.bf16.mxu0 %vm3272_vm9, %v12869_v5  ;;  %v13727_v2 = vpack.c.bf16 %v727_v53, %v727_v53  ;;  %v2715_v1 = vshll.u32 %v2160_v28, 16  ;;  %v15433_v49 = vld [vmem:[#allocation2 + $0x1b8] ss:$8 sps:$4 sm:$0xff]   ;;  %v728_v35 = vmax.f32 %v664_v20, 0.0  ;;  %v2721_v6 = vshll.u32 %v2228_v12, 16 }
 0x227   :  { %v2710_v30 = vsel %vm16444_vm4, %v2705_v51, %v2709_v40  ;;  %v2726_v24 = vshrl.u32 %v17061_v32, 16  ;;  %v1498_v37 = vshrl.u32 %v13729_v46, 16  ;;  %v1501_v26 = vshll.u32 %v13729_v46, 16  ;;  %14455 = vmatprep.mubr.msk.bf16.mxu1 %vm3272_vm9, %v15433_v49  ;;  %v2053_v5 = vld [vmem:[#allocation2 + $0x204] sm:$0x1] }
 0x228   :  { %v12870_v61 = vcombine.low %v2696_v29, %v2710_v30  ;;  %v1482_v34 = vshrl.u32 %v13727_v2, 16  ;;  %v1485_v54 = vshll.u32 %v13727_v2, 16  ;;  %v13730_v56 = vpack.c.bf16 %v730_v52, %v730_v52  ;;  %14456 = vmatmul.mubr.msk.bf16.gmra.mrb[20].mxu1 %vm3272_vm9, %v15435_v47  ;;  %v2229_v16 = vld [vmem:[#allocation2 + $0x14c] sm:$0x1]  ;;  %v2162_v51 = vld [vmem:[#allocation2 + $0x150] sm:$0xf] }
 0x229   :  { %v13728_v55 = vpack.c.bf16 %v728_v35, %v728_v35  ;;  %v2717_v27 = vrot.slane %v2715_v1, 5  ;;  %v1500_v57 = vrot.slane %v1498_v37, 7  ;;  %v17075_v9 = vrot.slane %v2721_v6, 5  ;;  %v2038_v52 = vld [vmem:[#allocation2 + $0x1f0] sm:$0xf] }
 0x22a   :  { %14236 = vmatmul.mubr.msk.bf16.gmra.mrb[92].mxu0 %vm3272_vm9, %v12870_v61  ;;  %v1484_v28 = vrot.slane %v1482_v34, 7  ;;  %v2728_v39 = vrot.slane %v2726_v24, 4  ;;  %v1506_v40 = vshrl.u32 %v13730_v56, 16  ;;  %v1509_v19 = vshll.u32 %v13730_v56, 16  ;;  %v2041_v1 = vld [vmem:[#allocation2 + $0x1f4] sm:$0x1] }
 0x22b   :  { %v1490_v11 = vshrl.u32 %v13728_v55, 16  ;;  %v1493_v63 = vshll.u32 %v13728_v55, 16  ;;  %v1503_v36 = vor.u32 %v1501_v26, %v1500_v57  ;;  %v1504_v22 = vrot.slane %v1500_v57, 4  ;;  %v2163_v35 = vld [vmem:[#allocation2 + $0x158] sm:$0xf] }
 0x22c   :  { %v1487_v17 = vor.u32 %v1485_v54, %v1484_v28  ;;  %v1488_v42 = vrot.slane %v1484_v28, 4  ;;  %v1508_v53 = vrot.slane %v1506_v40, 7  ;;  %v2718_v12 = vor.u32 %v2717_v27, %v17066_v58  ;;  %v15447_v54 = vld [vmem:[#allocation8 + $0x8] sm:$0xff]  }
 0x22d   :  { %v1492_v48 = vrot.slane %v1490_v11, 7  ;;  %v2729_v29 = vshll.u32 %v17061_v32, 16  ;;  %v2045_v20 = vsel %vm16471_vm7, %v1503_v36, %v2044_v13  ;;  %v2048_v21 = vsel %vm16478_vm8, %v1504_v22, %v2047_v62  ;;  %v2231_v62 = vld [vmem:[#allocation2 + $0x15c] sm:$0x1]  ;;  %14273 = vmatprep.subr.bf16.mxu0 %v15447_v54 }
 0x22e   :  { %v2033_v46 = vsel %vm16471_vm7, %v1487_v17, %v2032_v33  ;;  %v2036_v2 = vsel %vm16478_vm8, %v1488_v42, %v2035_v25  ;;  %2046 = vst [vmem:[#allocation2 + $0x1f8] sm:$0xf] %v2045_v20  ;;  %2049 = vst [vmem:[#allocation2 + $0x1fc] sm:$0x1] %v2048_v21  ;;  %v1511_v32 = vor.u32 %v1509_v19, %v1508_v53  ;;  %v1512_v58 = vrot.slane %v1508_v53, 4 }
 0x22f   :  { %2034 = vst [vmem:[#allocation2 + $0x1e8] sm:$0xf] %v2033_v46  ;;  %2037 = vst [vmem:[#allocation2 + $0x1ec] sm:$0x1] %v2036_v2  ;;  %v1495_v49 = vor.u32 %v1493_v63, %v1492_v48  ;;  %v1496_v30 = vrot.slane %v1492_v48, 4  ;;  %v2719_v6 = vrot.slane %v2718_v12, 4  ;;  %v601_v63 = vmul.f32 %v16999_v45, %v16784_v41  ;;  %14274 = vmatpush3.bf16.msra.mxu0 %v15447_v54 }
 0x230   :  { %v2731_v24 = vrot.slane %v2729_v29, 5  ;;  %v2735_v47 = vshll.u32 %v2229_v16, 16  ;;  %v2740_v61 = vshrl.u32 %v2162_v51, 16  ;;  %v2051_v37 = vsel %vm16471_vm7, %v1511_v32, %v2050_v60  ;;  %v2164_v42 = vld [vmem:[#allocation2 + $0x160] sm:$0xf] }
 0x231   :  { %v2054_v26 = vsel %vm16478_vm8, %v1512_v58, %v2053_v5  ;;  %v2039_v34 = vsel %vm16471_vm7, %v1495_v49, %v2038_v52  ;;  %v2042_v13 = vsel %vm16478_vm8, %v1496_v30, %v2041_v1  ;;  %2052 = vst [vmem:[#allocation2 + $0x200] sm:$0xf] %v2051_v37  ;;  %v2724_v33 = vsel %vm16444_vm4, %v2719_v6, %v17075_v9  ;;  %v2232_v1 = vld [vmem:[#allocation2 + $0x164] sm:$0x1]  ;;  %v2071_v54 = vld [vmem:[#allocation2 + $0x21c] sm:$0x1] }
 0x232   :  { %2055 = vst [vmem:[#allocation2 + $0x204] sm:$0x1] %v2054_v26  ;;  %2040 = vst [vmem:[#allocation2 + $0x1f0] sm:$0xf] %v2039_v34  ;;  %v2732_v56 = vor.u32 %v2731_v24, %v2728_v39  ;;  %v2737_v55 = vrot.slane %v2735_v47, 5  ;;  %v2742_v27 = vrot.slane %v2740_v61, 4  ;;  %v599_v36 = vmul.f32 %v16999_v45, %v16794_v59 }
 0x233   :  { %2043 = vst [vmem:[#allocation2 + $0x1f4] sm:$0x1] %v2042_v13  ;;  %v2743_v57 = vshll.u32 %v2162_v51, 16  ;;  %v2749_v28 = vshll.u32 %v2230_v18, 16  ;;  %v2754_v25 = vshrl.u32 %v2163_v35, 16  ;;  %v2757_v40 = vshll.u32 %v2163_v35, 16 }
 0x234   :  { %v2733_v19 = vrot.slane %v2732_v56, 4  ;;  %v2763_v11 = vshll.u32 %v2231_v62, 16  ;;  %v669_v16 = vadd.f32 %v16964_v38, %v601_v63  ;;  %v667_v53 = vadd.f32 %v16964_v38, %v599_v36  ;;  %v17117_v47 = vld [vmem:[#allocation2 + $0x168] sm:$0xf]  ;;  %v2068_v62 = vld [vmem:[#allocation2 + $0x218] sm:$0xf] }
 0x235   :  { %v2745_v22 = vrot.slane %v2743_v57, 5  ;;  %v2751_v17 = vrot.slane %v2749_v28, 5  ;;  %v2756_v9 = vrot.slane %v2754_v25, 4  ;;  %v2759_v39 = vrot.slane %v2757_v40, 5  ;;  %v2056_v25 = vld [vmem:[#allocation2 + $0x208] sm:$0xf] }
 0x236   :  { %v2738_v60 = vsel %vm16444_vm4, %v2733_v19, %v2737_v55  ;;  %v2765_v5 = vrot.slane %v2763_v11, 5  ;;  %v602_v59 = vmul.f32 %v16999_v45, %v16800_v4  ;;  %v733_v29 = vmax.f32 %v669_v16, 0.0  ;;  %v2059_v11 = vld [vmem:[#allocation2 + $0x20c] sm:$0x1] }
 0x237   :  { %v12871_v48 = vcombine.low %v2724_v33, %v2738_v60  ;;  %v2746_v12 = vor.u32 %v2745_v22, %v2742_v27  ;;  %v2760_v41 = vor.u32 %v2759_v39, %v2756_v9  ;;  %v731_v51 = vmax.f32 %v667_v53, 0.0 }
 0x238   :  { %v600_v20 = vmul.f32 %v16999_v45, %v16807_v15  ;;  %v2768_v21 = vshrl.u32 %v2164_v42, 16  ;;  %v670_v52 = vadd.f32 %v16964_v38, %v602_v59  ;;  %v2771_v32 = vshll.u32 %v2164_v42, 16  ;;  %v15437_v61 = vld [vmem:[#allocation2 + $0x1f8] ss:$8 sps:$4 sm:$0xff]  }
 0x239   :  { %14239 = vmatprep.mubr.msk.bf16.mxu0 %vm3272_vm9, %v12871_v48  ;;  %v2747_v46 = vrot.slane %v2746_v12, 4  ;;  %v2761_v2 = vrot.slane %v2760_v41, 4  ;;  %v13733_v58 = vpack.c.bf16 %v733_v29, %v733_v29  ;;  %v13731_v49 = vpack.c.bf16 %v731_v51, %v731_v51  ;;  %v15436_v4 = vld [vmem:[#allocation2 + $0x1e8] ss:$8 sps:$4 sm:$0xff]  }
 0x23a   :  { %v668_v30 = vadd.f32 %v16964_v38, %v600_v20  ;;  %v2770_v35 = vrot.slane %v2768_v21, 4  ;;  %v734_v24 = vmax.f32 %v670_v52, 0.0  ;;  %v2773_v18 = vrot.slane %v2771_v32, 5  ;;  %14459 = vmatprep.mubr.msk.bf16.mxu1 %vm3272_vm9, %v15436_v4  ;;  %v2166_v41 = vld [vmem:[#allocation2 + $0x170] sm:$0xf] }
 0x23b   :  { %v2752_v6 = vsel %vm16444_vm4, %v2747_v46, %v2751_v17  ;;  %v2766_v15 = vsel %vm16444_vm4, %v2761_v2, %v2765_v5  ;;  %v1530_v26 = vshrl.u32 %v13733_v58, 16  ;;  %v1533_v34 = vshll.u32 %v13733_v58, 16  ;;  %14460 = vmatmul.mubr.msk.bf16.gmra.mrb[24].mxu1 %vm3272_vm9, %v15437_v61  ;;  %v2233_v5 = vld [vmem:[#allocation2 + $0x16c] sm:$0x1]  ;;  %v2074_v21 = vld [vmem:[#allocation2 + $0x220] sm:$0xf] }
 0x23c   :  { %v12872_v37 = vcombine.low %v2752_v6, %v2766_v15  ;;  %v1514_v13 = vshrl.u32 %v13731_v49, 16  ;;  %v1517_v33 = vshll.u32 %v13731_v49, 16  ;;  %v13734_v56 = vpack.c.bf16 %v734_v24, %v734_v24  ;;  %v2077_v46 = vld [vmem:[#allocation2 + $0x224] sm:$0x1]  ;;  %v2062_v2 = vld [vmem:[#allocation2 + $0x210] sm:$0xf] }
 0x23d   :  { %v732_v55 = vmax.f32 %v668_v30, 0.0  ;;  %v2774_v27 = vor.u32 %v2773_v18, %v2770_v35  ;;  %v1532_v57 = vrot.slane %v1530_v26, 7  ;;  %v2777_v40 = vshll.u32 %v2232_v1, 16  ;;  %v2065_v58 = vld [vmem:[#allocation2 + $0x214] sm:$0x1] }
 0x23e   :  { %14240 = vmatmul.mubr.msk.bf16.gmra.mrb[96].mxu0 %vm3272_vm9, %v12872_v37  ;;  %v1516_v28 = vrot.slane %v1514_v13, 7  ;;  %v2782_v19 = vshrl.u32 %v17117_v47, 16  ;;  %v1538_v63 = vshrl.u32 %v13734_v56, 16  ;;  %v1541_v36 = vshll.u32 %v13734_v56, 16  ;;  %v2167_v30 = vld [vmem:[#allocation2 + $0x178] sm:$0xf] }
 0x23f   :  { %v13732_v22 = vpack.c.bf16 %v732_v55, %v732_v55  ;;  %v17123_v17 = vrot.slane %v2774_v27, 4  ;;  %v1535_v9 = vor.u32 %v1533_v34, %v1532_v57  ;;  %v1536_v39 = vrot.slane %v1532_v57, 4  ;;  %v2234_v15 = vld [vmem:[#allocation2 + $0x174] sm:$0x1]  ;;  %v2235_v34 = vld [vmem:[#allocation2 + $0x17c] sm:$0x1] }
 0x240   :  { %v1519_v42 = vor.u32 %v1517_v33, %v1516_v28  ;;  %v1520_v60 = vrot.slane %v1516_v28, 4  ;;  %v1540_v16 = vrot.slane %v1538_v63, 7  ;;  %v17125_v12 = vrot.slane %v2777_v40, 5 }
 0x241   :  { %v1522_v53 = vshrl.u32 %v13732_v22, 16  ;;  %v1525_v48 = vshll.u32 %v13732_v22, 16  ;;  %v2069_v59 = vsel %vm16471_vm7, %v1535_v9, %v2068_v62  ;;  %v2072_v29 = vsel %vm16478_vm8, %v1536_v39, %v2071_v54  ;;  %v2168_v22 = vld [vmem:[#allocation2 + $0x190] sm:$0xf] }
 0x242   :  { %v2057_v51 = vsel %vm16471_vm7, %v1519_v42, %v2056_v25  ;;  %v2060_v20 = vsel %vm16478_vm8, %v1520_v60, %v2059_v11  ;;  %2070 = vst [vmem:[#allocation2 + $0x218] sm:$0xf] %v2069_v59  ;;  %2073 = vst [vmem:[#allocation2 + $0x21c] sm:$0x1] %v2072_v29  ;;  %v1543_v52 = vor.u32 %v1541_v36, %v1540_v16  ;;  %v1544_v1 = vrot.slane %v1540_v16, 4 }
 0x243   :  { %2058 = vst [vmem:[#allocation2 + $0x208] sm:$0xf] %v2057_v51  ;;  %2061 = vst [vmem:[#allocation2 + $0x20c] sm:$0x1] %v2060_v20  ;;  %v1524_v32 = vrot.slane %v1522_v53, 7  ;;  %v2780_v49 = vsel %vm16444_vm4, %v17123_v17, %v17125_v12  ;;  %v2784_v35 = vrot.slane %v2782_v19, 4  ;;  %v605_v63 = vmul.f32 %v16999_v45, %v16841_v31 }
 0x244   :  { %v2785_v4 = vshll.u32 %v17117_v47, 16  ;;  %v2791_v6 = vshll.u32 %v2233_v5, 16  ;;  %v2796_v24 = vshrl.u32 %v2166_v41, 16  ;;  %v2075_v18 = vsel %vm16471_vm7, %v1543_v52, %v2074_v21  ;;  %v17161_v20 = vld [vmem:[#allocation2 + $0x198] sm:$0xf] }
 0x245   :  { %v2078_v61 = vsel %vm16478_vm8, %v1544_v1, %v2077_v46  ;;  %v1527_v37 = vor.u32 %v1525_v48, %v1524_v32  ;;  %v1528_v26 = vrot.slane %v1524_v32, 4  ;;  %2076 = vst [vmem:[#allocation2 + $0x220] sm:$0xf] %v2075_v18  ;;  %v2799_v33 = vshll.u32 %v2166_v41, 16 }
 0x246   :  { %2079 = vst [vmem:[#allocation2 + $0x224] sm:$0x1] %v2078_v61  ;;  %v2787_v13 = vrot.slane %v2785_v4, 5  ;;  %v2793_v62 = vrot.slane %v2791_v6, 5  ;;  %v2798_v54 = vrot.slane %v2796_v24, 4  ;;  %v2805_v55 = vshll.u32 %v2234_v15, 16 }
 0x247   :  { %v2063_v47 = vsel %vm16471_vm7, %v1527_v37, %v2062_v2  ;;  %v2066_v56 = vsel %vm16478_vm8, %v1528_v26, %v2065_v58  ;;  %v2810_v27 = vshrl.u32 %v2167_v30, 16  ;;  %v2801_v28 = vrot.slane %v2799_v33, 5  ;;  %v2092_v37 = vld [vmem:[#allocation2 + $0x248] sm:$0xf]  ;;  %v2095_v26 = vld [vmem:[#allocation2 + $0x24c] sm:$0x1] }
 0x248   :  { %2064 = vst [vmem:[#allocation2 + $0x210] sm:$0xf] %v2063_v47  ;;  %2067 = vst [vmem:[#allocation2 + $0x214] sm:$0x1] %v2066_v56  ;;  %v2788_v57 = vor.u32 %v2787_v13, %v2784_v35  ;;  %v2813_v25 = vshll.u32 %v2167_v30, 16  ;;  %v2819_v40 = vshll.u32 %v2235_v34, 16  ;;  %v603_v36 = vmul.f32 %v16999_v45, %v16863_v10 }
 0x249   :  { %v2807_v19 = vrot.slane %v2805_v55, 5  ;;  %v2812_v11 = vrot.slane %v2810_v27, 4  ;;  %v2802_v9 = vor.u32 %v2801_v28, %v2798_v54  ;;  %v673_v60 = vadd.f32 %v16964_v38, %v605_v63  ;;  %v2080_v56 = vld [vmem:[#allocation2 + $0x238] sm:$0xf] }
 0x24a   :  { %v2789_v17 = vrot.slane %v2788_v57, 4  ;;  %v2815_v39 = vrot.slane %v2813_v25, 5  ;;  %v2821_v42 = vrot.slane %v2819_v40, 5  ;;  %v671_v5 = vadd.f32 %v16964_v38, %v603_v36  ;;  %v2083_v57 = vld [vmem:[#allocation2 + $0x23c] sm:$0x1] }
 0x24b   :  { %v606_v16 = vmul.f32 %v16999_v45, %v16865_v23  ;;  %v604_v53 = vmul.f32 %v16999_v45, %v16872_v7  ;;  %v2803_v48 = vrot.slane %v2802_v9, 4  ;;  %v2824_v12 = vshrl.u32 %v2168_v22, 16  ;;  %v2236_v7 = vld [vmem:[#allocation2 + $0x194] sm:$0x1] }
 0x24c   :  { %v2794_v31 = vsel %vm16444_vm4, %v2789_v17, %v2793_v62  ;;  %v2816_v10 = vor.u32 %v2815_v39, %v2812_v11  ;;  %v737_v59 = vmax.f32 %v673_v60, 0.0  ;;  %v735_v29 = vmax.f32 %v671_v5, 0.0  ;;  %v15439_v15 = vld [vmem:[#allocation2 + $0x218] ss:$8 sps:$4 sm:$0xff]   ;;  %v2098_v17 = vld [vmem:[#allocation2 + $0x250] sm:$0xf] }
 0x24d   :  { %v12873_v41 = vcombine.low %v2780_v49, %v2794_v31  ;;  %v674_v51 = vadd.f32 %v16964_v38, %v606_v16  ;;  %v2808_v21 = vsel %vm16444_vm4, %v2803_v48, %v2807_v19  ;;  %v672_v46 = vadd.f32 %v16964_v38, %v604_v53  ;;  %v2101_v9 = vld [vmem:[#allocation2 + $0x254] sm:$0x1]  ;;  %v2237_v39 = vld [vmem:[#allocation2 + $0x19c] sm:$0x1]  ;;  %v2170_v53 = vld [vmem:[#allocation2 + $0x1a0] sm:$0xf] }
 0x24e   :  { %v2817_v23 = vrot.slane %v2816_v10, 4  ;;  %v17166_v2 = vrot.slane %v2824_v12, 4  ;;  %v13737_v52 = vpack.c.bf16 %v737_v59, %v737_v59  ;;  %v13735_v1 = vpack.c.bf16 %v735_v29, %v735_v29  ;;  %v2089_v59 = vld [vmem:[#allocation2 + $0x244] sm:$0x1]  ;;  %v2171_v29 = vld [vmem:[#allocation2 + $0x1a8] sm:$0xf] }
 0x24f   :  { %14243 = vmatprep.mubr.msk.bf16.mxu0 %vm3272_vm9, %v12873_v41  ;;  %v738_v32 = vmax.f32 %v674_v51, 0.0  ;;  %v2827_v58 = vshll.u32 %v2168_v22, 16  ;;  %v15438_v49 = vld [vmem:[#allocation2 + $0x208] ss:$8 sps:$4 sm:$0xff]   ;;  %v736_v35 = vmax.f32 %v672_v46, 0.0  ;;  %v2833_v4 = vshll.u32 %v2236_v7, 16 }
 0x250   :  { %v2822_v30 = vsel %vm16444_vm4, %v2817_v23, %v2821_v42  ;;  %v2838_v6 = vshrl.u32 %v17161_v20, 16  ;;  %v1562_v38 = vshrl.u32 %v13737_v52, 16  ;;  %v1565_v18 = vshll.u32 %v13737_v52, 16  ;;  %14463 = vmatprep.mubr.msk.bf16.mxu1 %vm3272_vm9, %v15438_v49  ;;  %v2086_v41 = vld [vmem:[#allocation2 + $0x240] sm:$0xf] }
 0x251   :  { %v12874_v24 = vcombine.low %v2808_v21, %v2822_v30  ;;  %v1546_v61 = vshrl.u32 %v13735_v1, 16  ;;  %v1549_v34 = vshll.u32 %v13735_v1, 16  ;;  %v13738_v13 = vpack.c.bf16 %v738_v32, %v738_v32  ;;  %14464 = vmatmul.mubr.msk.bf16.gmra.mrb[28].mxu1 %vm3272_vm9, %v15439_v15  ;;  %v2238_v46 = vld [vmem:[#allocation2 + $0x1a4] sm:$0x1] }
 0x252   :  { %v13736_v62 = vpack.c.bf16 %v736_v35, %v736_v35  ;;  %v2829_v54 = vrot.slane %v2827_v58, 5  ;;  %v1564_v33 = vrot.slane %v1562_v38, 7  ;;  %v17175_v55 = vrot.slane %v2833_v4, 5  ;;  %v2239_v35 = vld [vmem:[#allocation2 + $0x1ac] sm:$0x1] }
 0x253   :  { %14244 = vmatmul.mubr.msk.bf16.gmra.mrb[100].mxu0 %vm3272_vm9, %v12874_v24  ;;  %v1548_v47 = vrot.slane %v1546_v61, 7  ;;  %v2840_v27 = vrot.slane %v2838_v6, 4  ;;  %v1570_v28 = vshrl.u32 %v13738_v13, 16  ;;  %v1573_v25 = vshll.u32 %v13738_v13, 16 }
 0x254   :  { %v1554_v40 = vshrl.u32 %v13736_v62, 16  ;;  %v1557_v19 = vshll.u32 %v13736_v62, 16  ;;  %v1567_v11 = vor.u32 %v1565_v18, %v1564_v33  ;;  %v1568_v63 = vrot.slane %v1564_v33, 4 }
 0x255   :  { %v1551_v36 = vor.u32 %v1549_v34, %v1548_v47  ;;  %v1552_v22 = vrot.slane %v1548_v47, 4  ;;  %v1572_v42 = vrot.slane %v1570_v28, 7  ;;  %v2830_v5 = vor.u32 %v2829_v54, %v17166_v2  ;;  %v15538_v28 = vld [vmem:[#allocation11 + $0x1] ss:$0 sm:$0xff] }
 0x256   :  { %v1556_v60 = vrot.slane %v1554_v40, 7  ;;  %v2841_v16 = vshll.u32 %v17161_v20, 16  ;;  %v2093_v31 = vsel %vm16471_vm7, %v1567_v11, %v2092_v37  ;;  %v2096_v48 = vsel %vm16478_vm8, %v1568_v63, %v2095_v26 }
 0x257   :  { %v2081_v10 = vsel %vm16471_vm7, %v1551_v36, %v2080_v56  ;;  %v2084_v12 = vsel %vm16478_vm8, %v1552_v22, %v2083_v57  ;;  %2094 = vst [vmem:[#allocation2 + $0x248] sm:$0xf] %v2093_v31  ;;  %2097 = vst [vmem:[#allocation2 + $0x24c] sm:$0x1] %v2096_v48  ;;  %v1575_v51 = vor.u32 %v1573_v25, %v1572_v42  ;;  %v1576_v20 = vrot.slane %v1572_v42, 4 }
 0x258   :  { %2082 = vst [vmem:[#allocation2 + $0x238] sm:$0xf] %v2081_v10  ;;  %2085 = vst [vmem:[#allocation2 + $0x23c] sm:$0x1] %v2084_v12  ;;  %v1559_v21 = vor.u32 %v1557_v19, %v1556_v60  ;;  %v1560_v23 = vrot.slane %v1556_v60, 4  ;;  %v2831_v7 = vrot.slane %v2830_v5, 4  ;;  %v609_v13 = vmul.f32 %v16999_v45, %v16907_v0 }
 0x259   :  { %v2843_v2 = vrot.slane %v2841_v16, 5  ;;  %v2847_v52 = vshll.u32 %v2237_v39, 16  ;;  %v2852_v1 = vshrl.u32 %v2170_v53, 16  ;;  %v2099_v32 = vsel %vm16471_vm7, %v1575_v51, %v2098_v17  ;;  %v2240_v60 = vld [vmem:[#allocation2 + $0x1b4] sm:$0x1] }
 0x25a   :  { %v2102_v58 = vsel %vm16478_vm8, %v1576_v20, %v2101_v9  ;;  %v2087_v49 = vsel %vm16471_vm7, %v1559_v21, %v2086_v41  ;;  %v2090_v30 = vsel %vm16478_vm8, %v1560_v23, %v2089_v59  ;;  %2100 = vst [vmem:[#allocation2 + $0x250] sm:$0xf] %v2099_v32  ;;  %v2836_v4 = vsel %vm16444_vm4, %v2831_v7, %v17175_v55  ;;  %v2172_v55 = vld [vmem:[#allocation2 + $0x1b0] sm:$0xf]  ;;  %v2116_v23 = vld [vmem:[#allocation2 + $0x268] sm:$0xf] }
 0x25b   :  { %2103 = vst [vmem:[#allocation2 + $0x254] sm:$0x1] %v2102_v58  ;;  %2088 = vst [vmem:[#allocation2 + $0x240] sm:$0xf] %v2087_v49  ;;  %v2844_v6 = vor.u32 %v2843_v2, %v2840_v27  ;;  %v2849_v15 = vrot.slane %v2847_v52, 5  ;;  %v2854_v24 = vrot.slane %v2852_v1, 4  ;;  %v607_v62 = vmul.f32 %v16999_v45, %v16919_v8 }
 0x25c   :  { %2091 = vst [vmem:[#allocation2 + $0x244] sm:$0x1] %v2090_v30  ;;  %v2855_v38 = vshll.u32 %v2170_v53, 16  ;;  %v2861_v18 = vshll.u32 %v2238_v46, 16  ;;  %v2866_v61 = vshrl.u32 %v2171_v29, 16  ;;  %v2869_v37 = vshll.u32 %v2171_v29, 16 }
 0x25d   :  { %v2845_v26 = vrot.slane %v2844_v6, 4  ;;  %v2875_v34 = vshll.u32 %v2239_v35, 16  ;;  %v677_v25 = vadd.f32 %v15538_v28, %v609_v13  ;;  %v675_v40 = vadd.f32 %v15538_v28, %v607_v62  ;;  %v2119_v46 = vld [vmem:[#allocation2 + $0x26c] sm:$0x1]  ;;  %v2104_v49 = vld [vmem:[#allocation2 + $0x258] sm:$0xf] }
 0x25e   :  { %v2857_v54 = vrot.slane %v2855_v38, 5  ;;  %v2863_v33 = vrot.slane %v2861_v18, 5  ;;  %v2868_v47 = vrot.slane %v2866_v61, 4  ;;  %v2871_v56 = vrot.slane %v2869_v37, 5 }
 0x25f   :  { %v2850_v27 = vsel %vm16444_vm4, %v2845_v26, %v2849_v15  ;;  %v2877_v57 = vrot.slane %v2875_v34, 5  ;;  %v610_v0 = vmul.f32 %v16999_v45, %v16923_v3  ;;  %v741_v36 = vmax.f32 %v677_v25, 0.0  ;;  %v2241_v34 = vld [vmem:[#allocation2 + $0x1bc] sm:$0x1]  ;;  %v2125_v25 = vld [vmem:[#allocation2 + $0x274] sm:$0x1] }
 0x260   :  { %v12875_v19 = vcombine.low %v2836_v4, %v2850_v27  ;;  %v2858_v11 = vor.u32 %v2857_v54, %v2854_v24  ;;  %v2872_v63 = vor.u32 %v2871_v56, %v2868_v47  ;;  %v739_v8 = vmax.f32 %v675_v40, 0.0  ;;  %v2107_v4 = vld [vmem:[#allocation2 + $0x25c] sm:$0x1]  ;;  %v2174_v47 = vld [vmem:[#allocation2 + $0x1c0] sm:$0xf] }
 0x261   :  { %v608_v22 = vmul.f32 %v16999_v45, %v16925_v43  ;;  %v2880_v17 = vshrl.u32 %v2172_v55, 16  ;;  %v678_v42 = vadd.f32 %v15538_v28, %v610_v0  ;;  %v2883_v5 = vshll.u32 %v2172_v55, 16  ;;  %v17213_v45 = vld [vmem:[#allocation2 + $0x1b8] sm:$0xf]  ;;  %v15441_v59 = vld [vmem:[#allocation2 + $0x248] ss:$8 sps:$4 sm:$0xff]  }
 0x262   :  { %14247 = vmatprep.mubr.msk.bf16.mxu0 %vm3272_vm9, %v12875_v19  ;;  %v2859_v9 = vrot.slane %v2858_v11, 4  ;;  %v2873_v39 = vrot.slane %v2872_v63, 4  ;;  %v13741_v16 = vpack.c.bf16 %v741_v36, %v741_v36  ;;  %v13739_v53 = vpack.c.bf16 %v739_v8, %v739_v8  ;;  %v15440_v10 = vld [vmem:[#allocation2 + $0x238] ss:$8 sps:$4 sm:$0xff]   ;;  %v2113_v0 = vld [vmem:[#allocation2 + $0x264] sm:$0x1] }
 0x263   :  { %v676_v31 = vadd.f32 %v15538_v28, %v608_v22  ;;  %v2882_v48 = vrot.slane %v2880_v17, 4  ;;  %v742_v43 = vmax.f32 %v678_v42, 0.0  ;;  %v2885_v41 = vrot.slane %v2883_v5, 5  ;;  %14467 = vmatprep.mubr.msk.bf16.mxu1 %vm3272_vm9, %v15440_v10  ;;  %v2122_v28 = vld [vmem:[#allocation2 + $0x270] sm:$0xf] }
 0x264   :  { %v2864_v3 = vsel %vm16444_vm4, %v2859_v9, %v2863_v33  ;;  %v2878_v12 = vsel %vm16444_vm4, %v2873_v39, %v2877_v57  ;;  %v1594_v51 = vshrl.u32 %v13741_v16, 16  ;;  %v1597_v20 = vshll.u32 %v13741_v16, 16  ;;  %14468 = vmatmul.mubr.msk.bf16.gmra.mrb[32].mxu1 %vm3272_vm9, %v15441_v59  ;;  %v2110_v40 = vld [vmem:[#allocation2 + $0x260] sm:$0xf]  ;;  %v2175_v8 = vld [vmem:[#allocation2 + $0x1c8] sm:$0xf] }
 0x265   :  { %v12876_v29 = vcombine.low %v2864_v3, %v2878_v12  ;;  %v1578_v21 = vshrl.u32 %v13739_v53, 16  ;;  %v1581_v7 = vshll.u32 %v13739_v53, 16  ;;  %v13742_v2 = vpack.c.bf16 %v742_v43, %v742_v43  ;;  %v2242_v39 = vld [vmem:[#allocation2 + $0x1c4] sm:$0x1] }
 0x266   :  { %v740_v52 = vmax.f32 %v676_v31, 0.0  ;;  %v2886_v1 = vor.u32 %v2885_v41, %v2882_v48  ;;  %v1596_v32 = vrot.slane %v1594_v51, 7  ;;  %v2889_v30 = vshll.u32 %v2240_v60, 16  ;;  %v2176_v60 = vld [vmem:[#allocation2 + $0x1e0] sm:$0xf] }
 0x267   :  { %14248 = vmatmul.mubr.msk.bf16.gmra.mrb[104].mxu0 %vm3272_vm9, %v12876_v29  ;;  %v1580_v58 = vrot.slane %v1578_v21, 7  ;;  %v2894_v35 = vshrl.u32 %v17213_v45, 16  ;;  %v1602_v6 = vshrl.u32 %v13742_v2, 16  ;;  %v1605_v15 = vshll.u32 %v13742_v2, 16  ;;  %v2243_v48 = vld [vmem:[#allocation2 + $0x1cc] sm:$0x1] }
 0x268   :  { %v13740_v24 = vpack.c.bf16 %v740_v52, %v740_v52  ;;  %v17219_v38 = vrot.slane %v2886_v1, 4  ;;  %v1599_v18 = vor.u32 %v1597_v20, %v1596_v32  ;;  %v1600_v61 = vrot.slane %v1596_v32, 4  ;;  %v2245_v1 = vld [vmem:[#allocation2 + $0x1ec] sm:$0x1] }
 0x269   :  { %v1583_v37 = vor.u32 %v1581_v7, %v1580_v58  ;;  %v1584_v26 = vrot.slane %v1580_v58, 4  ;;  %v1604_v13 = vrot.slane %v1602_v6, 7  ;;  %v17221_v33 = vrot.slane %v2889_v30, 5  ;;  %v2244_v7 = vld [vmem:[#allocation2 + $0x1e4] sm:$0x1] }
 0x26a   :  { %v1586_v62 = vshrl.u32 %v13740_v24, 16  ;;  %v1589_v54 = vshll.u32 %v13740_v24, 16  ;;  %v2117_v56 = vsel %vm16471_vm7, %v1599_v18, %v2116_v23  ;;  %v2120_v55 = vsel %vm16478_vm8, %v1600_v61, %v2119_v46  ;;  %v2177_v46 = vld [vmem:[#allocation2 + $0x1e8] sm:$0xf] }
 0x26b   :  { %v2105_v27 = vsel %vm16471_vm7, %v1583_v37, %v2104_v49  ;;  %v2108_v57 = vsel %vm16478_vm8, %v1584_v26, %v2107_v4  ;;  %2118 = vst [vmem:[#allocation2 + $0x268] sm:$0xf] %v2117_v56  ;;  %2121 = vst [vmem:[#allocation2 + $0x26c] sm:$0x1] %v2120_v55  ;;  %v1607_v19 = vor.u32 %v1605_v15, %v1604_v13  ;;  %v1608_v11 = vrot.slane %v1604_v13, 4 }
 0x26c   :  { %2106 = vst [vmem:[#allocation2 + $0x258] sm:$0xf] %v2105_v27  ;;  %2109 = vst [vmem:[#allocation2 + $0x25c] sm:$0x1] %v2108_v57  ;;  %v1588_v63 = vrot.slane %v1586_v62, 7  ;;  %v2892_v36 = vsel %vm16444_vm4, %v17219_v38, %v17221_v33  ;;  %v2896_v22 = vrot.slane %v2894_v35, 4 }
 0x26d   :  { %v2897_v17 = vshll.u32 %v17213_v45, 16  ;;  %v2903_v9 = vshll.u32 %v2241_v34, 16  ;;  %v2908_v42 = vshrl.u32 %v2174_v47, 16  ;;  %v2123_v5 = vsel %vm16471_vm7, %v1607_v19, %v2122_v28  ;;  %v2178_v37 = vld [vmem:[#allocation2 + $0x1f0] sm:$0xf] }
 0x26e   :  { %v2126_v16 = vsel %vm16478_vm8, %v1608_v11, %v2125_v25  ;;  %v1591_v53 = vor.u32 %v1589_v54, %v1588_v63  ;;  %v1592_v31 = vrot.slane %v1588_v63, 4  ;;  %2124 = vst [vmem:[#allocation2 + $0x270] sm:$0xf] %v2123_v5  ;;  %v2911_v43 = vshll.u32 %v2174_v47, 16  ;;  %v2246_v26 = vld [vmem:[#allocation2 + $0x1f4] sm:$0x1] }
 0x26f   :  { %2127 = vst [vmem:[#allocation2 + $0x274] sm:$0x1] %v2126_v16  ;;  %v2899_v10 = vrot.slane %v2897_v17, 5  ;;  %v2905_v3 = vrot.slane %v2903_v9, 5  ;;  %v2910_v12 = vrot.slane %v2908_v42, 4  ;;  %v2917_v59 = vshll.u32 %v2242_v39, 16 }
 0x270   :  { %v2111_v45 = vsel %vm16471_vm7, %v1591_v53, %v2110_v40  ;;  %v2114_v41 = vsel %vm16478_vm8, %v1592_v31, %v2113_v0  ;;  %v2922_v29 = vshrl.u32 %v2175_v8, 16  ;;  %v2913_v20 = vrot.slane %v2911_v43, 5  ;;  %v2179_v33 = vld [vmem:[#allocation2 + $0x1f8] sm:$0xf]  ;;  %v2247_v57 = vld [vmem:[#allocation2 + $0x1fc] sm:$0x1] }
 0x271   :  { %2112 = vst [vmem:[#allocation2 + $0x260] sm:$0xf] %v2111_v45  ;;  %2115 = vst [vmem:[#allocation2 + $0x264] sm:$0x1] %v2114_v41  ;;  %v2900_v51 = vor.u32 %v2899_v10, %v2896_v22  ;;  %v2925_v21 = vshll.u32 %v2175_v8, 16  ;;  %v2931_v23 = vshll.u32 %v2243_v48, 16 }
 0x272   :  { %v2919_v2 = vrot.slane %v2917_v59, 5  ;;  %v2924_v52 = vrot.slane %v2922_v29, 4  ;;  %v2936_v32 = vshrl.u32 %v2176_v60, 16  ;;  %v2939_v58 = vshll.u32 %v2176_v60, 16  ;;  %v2180_v28 = vld [vmem:[#allocation2 + $0x200] sm:$0xf] }
 0x273   :  { %v2901_v44 = vrot.slane %v2900_v51, 4  ;;  %v2914_v49 = vor.u32 %v2913_v20, %v2910_v12  ;;  %v2927_v30 = vrot.slane %v2925_v21, 5  ;;  %v2933_v50 = vrot.slane %v2931_v23, 5  ;;  %v2248_v22 = vld [vmem:[#allocation2 + $0x204] sm:$0x1] }
 0x274   :  { %v2938_v35 = vrot.slane %v2936_v32, 4  ;;  %v2941_v4 = vrot.slane %v2939_v58, 5  ;;  %v2945_v6 = vshll.u32 %v2244_v7, 16  ;;  %v2950_v15 = vshrl.u32 %v2177_v46, 16  ;;  %v2181_v5 = vld [vmem:[#allocation2 + $0x208] sm:$0xf] }
 0x275   :  { %v2906_v24 = vsel %vm16444_vm4, %v2901_v44, %v2905_v3  ;;  %v2915_v38 = vrot.slane %v2914_v49, 4  ;;  %v2928_v18 = vor.u32 %v2927_v30, %v2924_v52  ;;  %v2953_v61 = vshll.u32 %v2177_v46, 16  ;;  %v15443_v16 = vld [vmem:[#allocation2 + $0x268] ss:$8 sps:$4 sm:$0xff]   ;;  %v2249_v43 = vld [vmem:[#allocation2 + $0x20c] sm:$0x1] }
 0x276   :  { %v12877_v34 = vcombine.low %v2892_v36, %v2906_v24  ;;  %v2942_v13 = vor.u32 %v2941_v4, %v2938_v35  ;;  %v2947_v62 = vrot.slane %v2945_v6, 5  ;;  %v2952_v54 = vrot.slane %v2950_v15, 4  ;;  %v2182_v21 = vld [vmem:[#allocation2 + $0x210] sm:$0xf]  ;;  %v2250_v52 = vld [vmem:[#allocation2 + $0x214] sm:$0x1] }
 0x277   :  { %v2920_v47 = vsel %vm16444_vm4, %v2915_v38, %v2919_v2  ;;  %v2929_v56 = vrot.slane %v2928_v18, 4  ;;  %v2955_v55 = vrot.slane %v2953_v61, 5  ;;  %v2959_v27 = vshll.u32 %v2245_v1, 16  ;;  %v2183_v49 = vld [vmem:[#allocation2 + $0x218] sm:$0xf] }
 0x278   :  { %14251 = vmatprep.mubr.msk.bf16.mxu0 %vm3272_vm9, %v12877_v34  ;;  %v2943_v25 = vrot.slane %v2942_v13, 4  ;;  %v2964_v40 = vshrl.u32 %v2178_v37, 16  ;;  %v2967_v19 = vshll.u32 %v2178_v37, 16  ;;  %v2973_v11 = vshll.u32 %v2246_v26, 16  ;;  %v15442_v17 = vld [vmem:[#allocation2 + $0x258] ss:$8 sps:$4 sm:$0xff]  }
 0x279   :  { %v2934_v63 = vsel %vm16444_vm4, %v2929_v56, %v2933_v50  ;;  %v2956_v0 = vor.u32 %v2955_v55, %v2952_v54  ;;  %v2961_v36 = vrot.slane %v2959_v27, 5  ;;  %v2978_v8 = vshrl.u32 %v2179_v33, 16  ;;  %14471 = vmatprep.mubr.msk.bf16.mxu1 %vm3272_vm9, %v15442_v17  ;;  %v2184_v18 = vld [vmem:[#allocation2 + $0x230] sm:$0xf]  ;;  %v2251_v26 = vld [vmem:[#allocation2 + $0x21c] sm:$0x1] }
 0x27a   :  { %v12878_v9 = vcombine.low %v2920_v47, %v2934_v63  ;;  %v2948_v39 = vsel %vm16444_vm4, %v2943_v25, %v2947_v62  ;;  %v2966_v42 = vrot.slane %v2964_v40, 4  ;;  %v2969_v60 = vrot.slane %v2967_v19, 5  ;;  %14472 = vmatmul.mubr.msk.bf16.gmra.mrb[36].mxu1 %vm3272_vm9, %v15443_v16 }
 0x27b   :  { %v2957_v53 = vrot.slane %v2956_v0, 4  ;;  %v2975_v31 = vrot.slane %v2973_v11, 5  ;;  %v2980_v48 = vrot.slane %v2978_v8, 4  ;;  %v2981_v10 = vshll.u32 %v2179_v33, 16  ;;  %v2252_v11 = vld [vmem:[#allocation2 + $0x234] sm:$0x1] }
 0x27c   :  { %14252 = vmatmul.mubr.msk.bf16.gmra.mrb[108].mxu0 %vm3272_vm9, %v12878_v9  ;;  %v2970_v3 = vor.u32 %v2969_v60, %v2966_v42  ;;  %v2987_v12 = vshll.u32 %v2247_v57, 16  ;;  %v2992_v45 = vshrl.u32 %v2180_v28, 16  ;;  %v2995_v41 = vshll.u32 %v2180_v28, 16  ;;  %v2185_v28 = vld [vmem:[#allocation2 + $0x238] sm:$0xf] }
 0x27d   :  { %v2962_v59 = vsel %vm16444_vm4, %v2957_v53, %v2961_v36  ;;  %v2983_v29 = vrot.slane %v2981_v10, 5  ;;  %v3001_v51 = vshll.u32 %v2248_v22, 16  ;;  %v3006_v20 = vshrl.u32 %v2181_v5, 16  ;;  %v2253_v8 = vld [vmem:[#allocation2 + $0x23c] sm:$0x1] }
 0x27e   :  { %v12879_v23 = vcombine.low %v2948_v39, %v2962_v59  ;;  %v2971_v46 = vrot.slane %v2970_v3, 4  ;;  %v2989_v7 = vrot.slane %v2987_v12, 5  ;;  %v2994_v2 = vrot.slane %v2992_v45, 4  ;;  %v2187_v10 = vld [vmem:[#allocation2 + $0x248] sm:$0xf] }
 0x27f   :  { %v2984_v1 = vor.u32 %v2983_v29, %v2980_v48  ;;  %v2997_v32 = vrot.slane %v2995_v41, 5  ;;  %v3003_v58 = vrot.slane %v3001_v51, 5  ;;  %v3008_v44 = vrot.slane %v3006_v20, 4  ;;  %v2254_v41 = vld [vmem:[#allocation2 + $0x244] sm:$0x1] }
 0x280   :  { %14255 = vmatprep.mubr.msk.bf16.mxu0 %vm3272_vm9, %v12879_v23  ;;  %v2976_v30 = vsel %vm16444_vm4, %v2971_v46, %v2975_v31  ;;  %v3009_v50 = vshll.u32 %v2181_v5, 16  ;;  %v3015_v35 = vshll.u32 %v2249_v43, 16  ;;  %v3020_v4 = vshrl.u32 %v2182_v21, 16  ;;  %v2186_v5 = vld [vmem:[#allocation2 + $0x240] sm:$0xf] }
 0x281   :  { %v2985_v6 = vrot.slane %v2984_v1, 4  ;;  %v2998_v15 = vor.u32 %v2997_v32, %v2994_v2  ;;  %v3023_v24 = vshll.u32 %v2182_v21, 16  ;;  %v3029_v38 = vshll.u32 %v2250_v52, 16  ;;  %v2255_v20 = vld [vmem:[#allocation2 + $0x24c] sm:$0x1] }
 0x282   :  { %v3011_v61 = vrot.slane %v3009_v50, 5  ;;  %v3017_v37 = vrot.slane %v3015_v35, 5  ;;  %v3022_v34 = vrot.slane %v3020_v4, 4  ;;  %v3034_v13 = vshrl.u32 %v2183_v49, 16  ;;  %v5918_v23 = vld [vmem:[#allocation2 + $0x8] sm:$0xf] }
 0x283   :  { %v2990_v62 = vsel %vm16444_vm4, %v2985_v6, %v2989_v7  ;;  %v2999_v54 = vrot.slane %v2998_v15, 4  ;;  %v3025_v33 = vrot.slane %v3023_v24, 5  ;;  %v3031_v47 = vrot.slane %v3029_v38, 5  ;;  %v5919_v52 = vld [vmem:[#allocation2 + $0xc] sm:$0x1] }
 0x284   :  { %v12880_v56 = vcombine.low %v2976_v30, %v2990_v62  ;;  %v3012_v55 = vor.u32 %v3011_v61, %v3008_v44  ;;  %v3036_v27 = vrot.slane %v3034_v13, 4  ;;  %v3037_v57 = vshll.u32 %v2183_v49, 16  ;;  %v5920_v1 = vld [vmem:[#allocation2 + $0x10] sm:$0xf] }
 0x285   :  { %v3004_v25 = vsel %vm16444_vm4, %v2999_v54, %v3003_v58  ;;  %v3026_v40 = vor.u32 %v3025_v33, %v3022_v34  ;;  %v3043_v19 = vshll.u32 %v2251_v26, 16  ;;  %v3048_v63 = vshrl.u32 %v2184_v18, 16 }
 0x286   :  { %14256 = vmatmul.mubr.msk.bf16.gmra.mrb[112].mxu0 %vm3272_vm9, %v12880_v56  ;;  %v3013_v0 = vrot.slane %v3012_v55, 4  ;;  %v3039_v36 = vrot.slane %v3037_v57, 5  ;;  %v3051_v22 = vshll.u32 %v2184_v18, 16  ;;  %v3057_v17 = vshll.u32 %v2252_v11, 16 }
 0x287   :  { %v3027_v9 = vrot.slane %v3026_v40, 4  ;;  %v3045_v39 = vrot.slane %v3043_v19, 5  ;;  %v3050_v42 = vrot.slane %v3048_v63, 4  ;;  %v3062_v60 = vshrl.u32 %v2185_v28, 16  ;;  %v2189_v63 = vld [vmem:[#allocation2 + $0x258] sm:$0xf] }
 0x288   :  { %v3018_v16 = vsel %vm16444_vm4, %v3013_v0, %v3017_v37  ;;  %v3040_v53 = vor.u32 %v3039_v36, %v3036_v27  ;;  %v3053_v31 = vrot.slane %v3051_v22, 5  ;;  %v3059_v48 = vrot.slane %v3057_v17, 5  ;;  %v5921_v37 = vld [vmem:[#allocation2 + $0x14] sm:$0x1]  ;;  %v2257_v17 = vld [vmem:[#allocation2 + $0x25c] sm:$0x1] }
 0x289   :  { %v12881_v3 = vcombine.low %v3004_v25, %v3018_v16  ;;  %v3032_v12 = vsel %vm16444_vm4, %v3027_v9, %v3031_v47  ;;  %v3064_v43 = vrot.slane %v3062_v60, 4  ;;  %v3065_v45 = vshll.u32 %v2185_v28, 16  ;;  %v2188_v47 = vld [vmem:[#allocation2 + $0x250] sm:$0xf]  ;;  %v2256_v28 = vld [vmem:[#allocation2 + $0x254] sm:$0x1] }
 0x28a   :  { %v3041_v59 = vrot.slane %v3040_v53, 4  ;;  %v3054_v29 = vor.u32 %v3053_v31, %v3050_v42  ;;  %v3071_v51 = vshll.u32 %v2253_v8, 16  ;;  %v3076_v21 = vshrl.u32 %v2186_v5, 16 }
 0x28b   :  { %14259 = vmatprep.mubr.msk.bf16.mxu0 %vm3272_vm9, %v12881_v3  ;;  %v3067_v46 = vrot.slane %v3065_v45, 5  ;;  %v3079_v7 = vshll.u32 %v2186_v5, 16  ;;  %v3090_v2 = vshrl.u32 %v2187_v10, 16  ;;  %v3085_v49 = vshll.u32 %v2254_v41, 16  ;;  %v2191_v5 = vld [vmem:[#allocation2 + $0x268] sm:$0xf] }
 0x28c   :  { %v3046_v32 = vsel %vm16444_vm4, %v3041_v59, %v3045_v39  ;;  %v3055_v58 = vrot.slane %v3054_v29, 4  ;;  %v3078_v44 = vrot.slane %v3076_v21, 4  ;;  %v3073_v35 = vrot.slane %v3071_v51, 5  ;;  %v2258_v41 = vld [vmem:[#allocation2 + $0x264] sm:$0x1] }
 0x28d   :  { %v12882_v30 = vcombine.low %v3032_v12, %v3046_v32  ;;  %v3068_v50 = vor.u32 %v3067_v46, %v3064_v43  ;;  %v3081_v4 = vrot.slane %v3079_v7, 5  ;;  %v3092_v15 = vrot.slane %v3090_v2, 4  ;;  %v5922_v2 = vld [vmem:[#allocation2 + $0x18] sm:$0xf] }
 0x28e   :  { %v3060_v6 = vsel %vm16444_vm4, %v3055_v58, %v3059_v48  ;;  %v3093_v24 = vshll.u32 %v2187_v10, 16  ;;  %v3099_v38 = vshll.u32 %v2255_v20, 16  ;;  %v6047_v26 = vshrl.u32 %v5918_v23, 16  ;;  %v2190_v10 = vld [vmem:[#allocation2 + $0x260] sm:$0xf] }
 0x28f   :  { %14260 = vmatmul.mubr.msk.bf16.gmra.mrb[116].mxu0 %vm3272_vm9, %v12882_v30  ;;  %v3069_v18 = vrot.slane %v3068_v50, 4  ;;  %v3082_v61 = vor.u32 %v3081_v4, %v3078_v44  ;;  %v6050_v34 = vshll.u32 %v5918_v23, 16  ;;  %v3087_v13 = vrot.slane %v3085_v49, 5  ;;  %v5923_v44 = vld [vmem:[#allocation2 + $0x1c] sm:$0x1] }
 0x290   :  { %v3095_v62 = vrot.slane %v3093_v24, 5  ;;  %v6056_v54 = vshll.u32 %v5919_v52, 16  ;;  %v6061_v33 = vshrl.u32 %v5920_v1, 16  ;;  %v6049_v27 = vrot.slane %v6047_v26, 4 }
 0x291   :  { %v3074_v56 = vsel %vm16444_vm4, %v3069_v18, %v3073_v35  ;;  %v3083_v55 = vrot.slane %v3082_v61, 4  ;;  %v6052_v57 = vrot.slane %v6050_v34, 5  ;;  %v3101_v19 = vrot.slane %v3099_v38, 5  ;;  %v2259_v35 = vld [vmem:[#allocation2 + $0x26c] sm:$0x1] }
 0x292   :  { %v12883_v25 = vcombine.low %v3060_v6, %v3074_v56  ;;  %v3096_v40 = vor.u32 %v3095_v62, %v3092_v15  ;;  %v6063_v11 = vrot.slane %v6061_v33, 4  ;;  %v6064_v8 = vshll.u32 %v5920_v1, 16  ;;  %v5924_v18 = vld [vmem:[#allocation2 + $0x20] sm:$0xf] }
 0x293   :  { %v3088_v0 = vsel %vm16444_vm4, %v3083_v55, %v3087_v13  ;;  %v6053_v36 = vor.u32 %v6052_v57, %v6049_v27  ;;  %v6070_v22 = vshll.u32 %v5921_v37, 16  ;;  %v3104_v39 = vshrl.u32 %v2188_v47, 16  ;;  %v5925_v55 = vld [vmem:[#allocation2 + $0x24] sm:$0x1] }
 0x294   :  { %14263 = vmatprep.mubr.msk.bf16.mxu0 %vm3272_vm9, %v12883_v25  ;;  %v3097_v9 = vrot.slane %v3096_v40, 4  ;;  %v3107_v42 = vshll.u32 %v2188_v47, 16  ;;  %v3113_v60 = vshll.u32 %v2256_v28, 16  ;;  %v6058_v53 = vrot.slane %v6056_v54, 5 }
 0x295   :  { %v6054_v16 = vrot.slane %v6053_v36, 4  ;;  %v6066_v31 = vrot.slane %v6064_v8, 5  ;;  %v3118_v48 = vshrl.u32 %v2189_v63, 16  ;;  %v6072_v12 = vrot.slane %v6070_v22, 5  ;;  %v5927_v22 = vld [vmem:[#allocation2 + $0x2c] sm:$0x1] }
 0x296   :  { %v3102_v3 = vsel %vm16444_vm4, %v3097_v9, %v3101_v19  ;;  %v3106_v43 = vrot.slane %v3104_v39, 4  ;;  %v3109_v45 = vrot.slane %v3107_v42, 5  ;;  %v3115_v51 = vrot.slane %v3113_v60, 5  ;;  %v5928_v60 = vld [vmem:[#allocation2 + $0x30] sm:$0xf] }
 0x297   :  { %v12884_v59 = vcombine.low %v3088_v0, %v3102_v3  ;;  %v6067_v29 = vor.u32 %v6066_v31, %v6063_v11  ;;  %v3120_v20 = vrot.slane %v3118_v48, 4  ;;  %v3121_v23 = vshll.u32 %v2189_v63, 16  ;;  %v5926_v11 = vld [vmem:[#allocation2 + $0x28] sm:$0xf]  ;;  %v5929_v3 = vld [vmem:[#allocation2 + $0x34] sm:$0x1] }
 0x298   :  { %v3110_v21 = vor.u32 %v3109_v45, %v3106_v43  ;;  %v3127_v46 = vshll.u32 %v2257_v17, 16  ;;  %v3132_v7 = vshrl.u32 %v2190_v10, 16  ;;  %v3135_v1 = vshll.u32 %v2190_v10, 16 }
 0x299   :  { %14264 = vmatmul.mubr.msk.bf16.gmra.mrb[120].mxu0 %vm3272_vm9, %v12884_v59  ;;  %v6068_v52 = vrot.slane %v6067_v29, 4  ;;  %v3141_v32 = vshll.u32 %v2258_v41, 16  ;;  %v3146_v58 = vshrl.u32 %v2191_v5, 16  ;;  %v6059_v49 = vsel %vm16444_vm4, %v6054_v16, %v6058_v53  ;;  %v15539_v41 = vld [vmem:[#allocation2] sm:$0xf] }
 0x29a   :  { %v3111_v30 = vrot.slane %v3110_v21, 4  ;;  %v3123_v50 = vrot.slane %v3121_v23, 5  ;;  %v3134_v4 = vrot.slane %v3132_v7, 4  ;;  %v3129_v15 = vrot.slane %v3127_v46, 5  ;;  %v15540_v59 = vld [vmem:[#allocation2 + $0x8] sm:$0xf] }
 0x29b   :  { %v6073_v6 = vsel %vm16444_vm4, %v6068_v52, %v6072_v12  ;;  %v3137_v24 = vrot.slane %v3135_v1, 5  ;;  %v3143_v38 = vrot.slane %v3141_v32, 5  ;;  %v3148_v26 = vrot.slane %v3146_v58, 4  ;;  %v5930_v21 = vld [vmem:[#allocation2 + $0x38] sm:$0xf] }
 0x29c   :  { %v13183_v61 = vcombine.low %v6059_v49, %v6073_v6  ;;  %v3124_v37 = vor.u32 %v3123_v50, %v3120_v20  ;;  %v3149_v34 = vshll.u32 %v2191_v5, 16  ;;  %v3155_v62 = vshll.u32 %v2259_v35, 16  ;;  %v5931_v52 = vld [vmem:[#allocation2 + $0x3c] sm:$0x1]  ;;  %v5932_v49 = vld [vmem:[#allocation2 + $0x40] sm:$0xf] }
 0x29d   :  { %v3138_v13 = vor.u32 %v3137_v24, %v3134_v4  ;;  %v6075_v54 = vshrl.u32 %v5922_v2, 16  ;;  %v6078_v33 = vshll.u32 %v5922_v2, 16  ;;  %v6084_v27 = vshll.u32 %v5923_v44, 16  ;;  %v15542_v24 = vld [vmem:[#allocation2 + $0x18] sm:$0xf] }
 0x29e   :  { %14479 = vmatprep.mubr.msk.bf16.mxu1 %vm3272_vm9, %v13183_v61  ;;  %v3125_v47 = vrot.slane %v3124_v37, 4  ;;  %v3151_v56 = vrot.slane %v3149_v34, 5  ;;  %v6089_v57 = vshrl.u32 %v5924_v18, 16  ;;  %v3116_v28 = vsel %vm16444_vm4, %v3111_v30, %v3115_v51 }
 0x29f   :  { %v3139_v25 = vrot.slane %v3138_v13, 4  ;;  %v6077_v40 = vrot.slane %v6075_v54, 4  ;;  %v6080_v19 = vrot.slane %v6078_v33, 5  ;;  %v3157_v36 = vrot.slane %v3155_v62, 5  ;;  %v5934_v54 = vld [vmem:[#allocation2 + $0x58] sm:$0xf] }
 0x2a0   :  { %v3130_v63 = vsel %vm16444_vm4, %v3125_v47, %v3129_v15  ;;  %v3152_v0 = vor.u32 %v3151_v56, %v3148_v26  ;;  %v6086_v8 = vrot.slane %v6084_v27, 5  ;;  %v6091_v39 = vrot.slane %v6089_v57, 4  ;;  %v15541_v15 = vld [vmem:[#allocation2 + $0x10] sm:$0xf]  ;;  %v5935_v27 = vld [vmem:[#allocation2 + $0x5c] sm:$0x1] }
 0x2a1   :  { %v12885_v17 = vcombine.low %v3116_v28, %v3130_v63  ;;  %v6081_v9 = vor.u32 %v6080_v19, %v6077_v40  ;;  %v6092_v42 = vshll.u32 %v5924_v18, 16  ;;  %v3144_v5 = vsel %vm16444_vm4, %v3139_v25, %v3143_v38  ;;  %v5933_v18 = vld [vmem:[#allocation2 + $0x44] sm:$0x1]  ;;  %v15462_v57 = vld [vmem:[#allocation8 + $0x58] sm:$0xff]  }
 0x2a2   :  { %v3153_v16 = vrot.slane %v3152_v0, 4  ;;  %v6098_v53 = vshll.u32 %v5925_v55, 16  ;;  %v6103_v31 = vshrl.u32 %v5926_v11, 16  ;;  %v6106_v12 = vshll.u32 %v5926_v11, 16  ;;  %v5936_v11 = vld [vmem:[#allocation2 + $0x60] sm:$0xf] }
 0x2a3   :  { %14267 = vmatprep.mubr.msk.bf16.mxu0 %vm3272_vm9, %v12885_v17  ;;  %v6082_v48 = vrot.slane %v6081_v9, 4  ;;  %v6094_v10 = vrot.slane %v6092_v42, 5  ;;  %v6112_v43 = vshll.u32 %v5927_v22, 16  ;;  %v12921_v29 = vcombine.low %v15539_v41, %v15540_v59  ;;  %v15543_v22 = vld [vmem:[#allocation8 + $0x50] sm:$0xff]   ;;  %v15544_v9 = vld [vmem:[#allocation2 + $0x20] sm:$0xf] }
 0x2a4   :  { %v3158_v45 = vsel %vm16444_vm4, %v3153_v16, %v3157_v36  ;;  %v6105_v51 = vrot.slane %v6103_v31, 4  ;;  %v6117_v20 = vshrl.u32 %v5928_v60, 16  ;;  %v6100_v7 = vrot.slane %v6098_v53, 5  ;;  %v5939_v59 = vld [vmem:[#allocation2 + $0x6c] sm:$0x1] }
 0x2a5   :  { %v12886_v23 = vcombine.low %v3144_v5, %v3158_v45  ;;  %v6095_v46 = vor.u32 %v6094_v10, %v6091_v39  ;;  %v6108_v2 = vrot.slane %v6106_v12, 5  ;;  %v6087_v1 = vsel %vm16444_vm4, %v6082_v48, %v6086_v8  ;;  %v15545_v39 = vld [vmem:[#allocation2 + $0x28] sm:$0xf] }
 0x2a6   :  { %v6119_v32 = vrot.slane %v6117_v20, 4  ;;  %v6120_v58 = vshll.u32 %v5928_v60, 16  ;;  %v6126_v44 = vshll.u32 %v5929_v3, 16  ;;  %v6114_v35 = vrot.slane %v6112_v43, 5  ;;  %v5937_v60 = vld [vmem:[#allocation2 + $0x64] sm:$0x1] }
 0x2a7   :  { %14268 = vmatmul.mubr.msk.bf16.gmra.mrb[124].mxu0 %vm3272_vm9, %v12886_v23  ;;  %v6096_v30 = vrot.slane %v6095_v46, 4  ;;  %v6109_v50 = vor.u32 %v6108_v2, %v6105_v51  ;;  %v6131_v4 = vshrl.u32 %v5930_v21, 16  ;;  %v12922_v38 = vcombine.low %v15541_v15, %v15542_v24  ;;  %v5938_v3 = vld [vmem:[#allocation2 + $0x68] sm:$0xf]  ;;  %v5940_v23 = vld [vmem:[#allocation2 + $0x70] sm:$0xf] }
 0x2a8   :  { %14275 = vmatprep.mubr.msk.bf16.mxu0 %vm3272_vm9, %v12921_v29  ;;  %v6122_v6 = vrot.slane %v6120_v58, 5  ;;  %v6134_v61 = vshll.u32 %v5930_v21, 16  ;;  %v6140_v37 = vshll.u32 %v5931_v52, 16  ;;  %v6145_v62 = vshrl.u32 %v5932_v49, 16  ;;  %v15547_v58 = vld [vmem:[#allocation2 + $0x38] sm:$0xf] }
 0x2a9   :  { %v6101_v26 = vsel %vm16444_vm4, %v6096_v30, %v6100_v7  ;;  %v6110_v34 = vrot.slane %v6109_v50, 4  ;;  %v6133_v13 = vrot.slane %v6131_v4, 4  ;;  %v6128_v56 = vrot.slane %v6126_v44, 5  ;;  %v5942_v24 = vld [vmem:[#allocation2 + $0x78] sm:$0xf] }
 0x2aa   :  { %v13184_v33 = vcombine.low %v6087_v1, %v6101_v26  ;;  %v6123_v47 = vor.u32 %v6122_v6, %v6119_v32  ;;  %v6136_v55 = vrot.slane %v6134_v61, 5  ;;  %v6142_v28 = vrot.slane %v6140_v37, 5  ;;  %v15546_v32 = vld [vmem:[#allocation2 + $0x30] sm:$0xf]  ;;  %v5943_v26 = vld [vmem:[#allocation2 + $0x7c] sm:$0x1] }
 0x2ab   :  { %v6147_v25 = vrot.slane %v6145_v62, 4  ;;  %v6148_v40 = vshll.u32 %v5932_v49, 16  ;;  %v6154_v19 = vshll.u32 %v5933_v18, 16  ;;  %v6115_v63 = vsel %vm16444_vm4, %v6110_v34, %v6114_v35  ;;  %v5941_v49 = vld [vmem:[#allocation2 + $0x74] sm:$0x1] }
 0x2ac   :  { %14480 = vmatmul.mubr.msk.bf16.vlgmr.msra.gmra.mrb[40].mxu1 %vm3272_vm9, %v13184_v33  ;;  %v6124_v0 = vrot.slane %v6123_v47, 4  ;;  %v6137_v36 = vor.u32 %v6136_v55, %v6133_v13  ;;  %v6159_v8 = vshrl.u32 %v5934_v54, 16  ;;  %v12923_v42 = vcombine.low %v15544_v9, %v15545_v39  ;;  %v5944_v33 = vld [vmem:[#allocation2 + $0x80] sm:$0xf]  ;;  %v15548_v55 = vld [vmem:[#allocation2 + $0x50] sm:$0xf] }
 0x2ad   :  { %14544 = vmatpush3.bf16.msra.mxu1 %v15543_v22  ;;  %v6150_v17 = vrot.slane %v6148_v40, 5  ;;  %v6162_v5 = vshll.u32 %v5934_v54, 16  ;;  %v6168_v16 = vshll.u32 %v5935_v27, 16  ;;  %v6173_v10 = vshrl.u32 %v5936_v11, 16  ;;  %v15549_v27 = vld [vmem:[#allocation2 + $0x58] sm:$0xf] }
 0x2ae   :  { %v6129_v53 = vsel %vm16444_vm4, %v6124_v0, %v6128_v56  ;;  %v6138_v31 = vrot.slane %v6137_v36, 4  ;;  %v6161_v48 = vrot.slane %v6159_v8, 4  ;;  %14545 = vmatprep.subr.bf16.mxu1 %v15462_v57  ;;  %v6156_v45 = vrot.slane %v6154_v19, 5  ;;  %v5945_v19 = vld [vmem:[#allocation2 + $0x84] sm:$0x1] }
 0x2af   :  { %v13185_v12 = vcombine.low %v6115_v63, %v6129_v53  ;;  %14276 = vmatmul.mubr.msk.bf16.vlgmr.msra.gmra.mrb[64].mxu0 %vm3272_vm9, %v12922_v38  ;;  %v6151_v43 = vor.u32 %v6150_v17, %v6147_v25  ;;  %v6164_v41 = vrot.slane %v6162_v5, 5  ;;  %v6170_v29 = vrot.slane %v6168_v16, 5  ;;  %v5946_v17 = vld [vmem:[#allocation2 + $0x88] sm:$0xf]  ;;  %v5947_v5 = vld [vmem:[#allocation2 + $0x8c] sm:$0x1] }
 0x2b0   :  { %14279 = vmatprep.mubr.msk.bf16.mxu0 %vm3272_vm9, %v12923_v42  ;;  %v6175_v51 = vrot.slane %v6173_v10, 4  ;;  %v6176_v20 = vshll.u32 %v5936_v11, 16  ;;  %v6182_v21 = vshll.u32 %v5937_v60, 16  ;;  %v6143_v46 = vsel %vm16444_vm4, %v6138_v31, %v6142_v28  ;;  %v5948_v10 = vld [vmem:[#allocation2 + $0x90] sm:$0xf] }
 0x2b1   :  { %14483 = vmatprep.mubr.msk.bf16.mxu1 %vm3272_vm9, %v13185_v12  ;;  %v6152_v7 = vrot.slane %v6151_v43, 4  ;;  %v6165_v2 = vor.u32 %v6164_v41, %v6161_v48  ;;  %v6187_v52 = vshrl.u32 %v5938_v3, 16  ;;  %14546 = vmatpush3.bf16.msra.mxu1 %v15462_v57  ;;  %v12924_v44 = vcombine.low %v15546_v32, %v15547_v58 }
 0x2b2   :  { %v6178_v1 = vrot.slane %v6176_v20, 5  ;;  %v6190_v30 = vshll.u32 %v5938_v3, 16  ;;  %v6196_v50 = vshll.u32 %v5939_v59, 16  ;;  %v6201_v15 = vshrl.u32 %v5940_v23, 16  ;;  %v15550_v59 = vld [vmem:[#allocation2 + $0x60] sm:$0xf] }
 0x2b3   :  { %v6157_v35 = vsel %vm16444_vm4, %v6152_v7, %v6156_v45  ;;  %v6166_v4 = vrot.slane %v6165_v2, 4  ;;  %v6189_v6 = vrot.slane %v6187_v52, 4  ;;  %v6184_v61 = vrot.slane %v6182_v21, 5  ;;  %v5949_v20 = vld [vmem:[#allocation2 + $0x94] sm:$0x1] }
 0x2b4   :  { %v13186_v38 = vcombine.low %v6143_v46, %v6157_v35  ;;  %v6179_v18 = vor.u32 %v6178_v1, %v6175_v51  ;;  %v6192_v37 = vrot.slane %v6190_v30, 5  ;;  %v6198_v34 = vrot.slane %v6196_v50, 5  ;;  %v5950_v1 = vld [vmem:[#allocation2 + $0xa8] sm:$0xf]  ;;  %v5951_v30 = vld [vmem:[#allocation2 + $0xac] sm:$0x1] }
 0x2b5   :  { %v6203_v13 = vrot.slane %v6201_v15, 4  ;;  %v6204_v62 = vshll.u32 %v5940_v23, 16  ;;  %v6210_v54 = vshll.u32 %v5941_v49, 16  ;;  %v12925_v57 = vcombine.low %v15548_v55, %v15549_v27  ;;  %v5952_v15 = vld [vmem:[#allocation2 + $0xb0] sm:$0xf] }
 0x2b6   :  { %14484 = vmatmul.mubr.msk.bf16.gmra.mrb[44].mxu1 %vm3272_vm9, %v13186_v38  ;;  %v6180_v47 = vrot.slane %v6179_v18, 4  ;;  %v6193_v56 = vor.u32 %v6192_v37, %v6189_v6  ;;  %v6215_v28 = vshrl.u32 %v5942_v24, 16  ;;  %v6171_v25 = vsel %vm16444_vm4, %v6166_v4, %v6170_v29  ;;  %v15551_v29 = vld [vmem:[#allocation2 + $0x68] sm:$0xf]  ;;  %v15552_v18 = vld [vmem:[#allocation2 + $0x70] sm:$0xf] }
 0x2b7   :  { %14280 = vmatmul.mubr.msk.bf16.gmra.mrb[68].mxu0 %vm3272_vm9, %v12924_v44  ;;  %v6206_v40 = vrot.slane %v6204_v62, 5  ;;  %v6218_v11 = vshll.u32 %v5942_v24, 16  ;;  %v6224_v63 = vshll.u32 %v5943_v26, 16  ;;  %v6229_v22 = vshrl.u32 %v5944_v33, 16  ;;  %v5953_v62 = vld [vmem:[#allocation2 + $0xb4] sm:$0x1] }
 0x2b8   :  { %v6185_v0 = vsel %vm16444_vm4, %v6180_v47, %v6184_v61  ;;  %v6194_v36 = vrot.slane %v6193_v56, 4  ;;  %14283 = vmatprep.mubr.msk.bf16.mxu0 %vm3272_vm9, %v12925_v57  ;;  %v6217_v8 = vrot.slane %v6215_v28, 4  ;;  %v6212_v42 = vrot.slane %v6210_v54, 5  ;;  %v15553_v61 = vld [vmem:[#allocation2 + $0x78] sm:$0xf] }
 0x2b9   :  { %v13187_v9 = vcombine.low %v6171_v25, %v6185_v0  ;;  %v6207_v39 = vor.u32 %v6206_v40, %v6203_v13  ;;  %v6220_v60 = vrot.slane %v6218_v11, 5  ;;  %v6226_v16 = vrot.slane %v6224_v63, 5  ;;  %v5954_v57 = vld [vmem:[#allocation2 + $0xb8] sm:$0xf]  ;;  %v5955_v11 = vld [vmem:[#allocation2 + $0xbc] sm:$0x1] }
 0x2ba   :  { %v6231_v53 = vrot.slane %v6229_v22, 4  ;;  %v6232_v31 = vshll.u32 %v5944_v33, 16  ;;  %v6238_v48 = vshll.u32 %v5945_v19, 16  ;;  %v6199_v3 = vsel %vm16444_vm4, %v6194_v36, %v6198_v34  ;;  %v15479_v63 = vld [vmem:[#allocation8 + $0x60] sm:$0xff]  }
 0x2bb   :  { %14487 = vmatprep.mubr.msk.bf16.mxu1 %vm3272_vm9, %v13187_v9  ;;  %v6208_v12 = vrot.slane %v6207_v39, 4  ;;  %v6221_v43 = vor.u32 %v6220_v60, %v6217_v8  ;;  %v6243_v45 = vshrl.u32 %v5946_v17, 16  ;;  %v12926_v51 = vcombine.low %v15550_v59, %v15551_v29  ;;  %v15481_v0 = vld [vmem:[#allocation8 + $0x20] sm:$0xff]   ;;  %14611 = vmatprep.subr.bf16.mxu1 %v15479_v63  ;;  %v5958_v29 = vld [vmem:[#allocation2 + $0xc8] sm:$0xf] }
 0x2bc   :  { %v6234_v41 = vrot.slane %v6232_v31, 5  ;;  %v6246_v21 = vshll.u32 %v5946_v17, 16  ;;  %v6252_v23 = vshll.u32 %v5947_v5, 16  ;;  %v6257_v52 = vshrl.u32 %v5948_v10, 16  ;;  %v5956_v9 = vld [vmem:[#allocation2 + $0xc0] sm:$0xf]  ;;  %14339 = vmatprep.subr.bf16.mxu0 %v15481_v0 }
 0x2bd   :  { %v6213_v46 = vsel %vm16444_vm4, %v6208_v12, %v6212_v42  ;;  %v6222_v7 = vrot.slane %v6221_v43, 4  ;;  %v6245_v2 = vrot.slane %v6243_v45, 4  ;;  %v6240_v44 = vrot.slane %v6238_v48, 5  ;;  %v15554_v60 = vld [vmem:[#allocation2 + $0x80] sm:$0xf]  ;;  %14340 = vmatpush3.bf16.msra.mxu0 %v15481_v0 }
 0x2be   :  { %v13188_v32 = vcombine.low %v6199_v3, %v6213_v46  ;;  %v6235_v58 = vor.u32 %v6234_v41, %v6231_v53  ;;  %v6248_v49 = vrot.slane %v6246_v21, 5  ;;  %v6254_v50 = vrot.slane %v6252_v23, 5  ;;  %v15555_v5 = vld [vmem:[#allocation2 + $0x88] sm:$0xf]  ;;  %v5959_v46 = vld [vmem:[#allocation2 + $0xcc] sm:$0x1] }
 0x2bf   :  { %14284 = vmatmul.mubr.msk.bf16.gmra.mrb[72].mxu0 %vm3272_vm9, %v12926_v51  ;;  %v6259_v35 = vrot.slane %v6257_v52, 4  ;;  %v6260_v4 = vshll.u32 %v5948_v10, 16  ;;  %v6266_v6 = vshll.u32 %v5949_v20, 16  ;;  %v12927_v37 = vcombine.low %v15552_v18, %v15553_v61  ;;  %v5957_v10 = vld [vmem:[#allocation2 + $0xc4] sm:$0x1]  ;;  %v15482_v18 = vld [vmem:[#allocation8 + $0x28] sm:$0xff]  }
 0x2c0   :  { %14488 = vmatmul.mubr.msk.bf16.gmra.mrb[48].mxu1 %vm3272_vm9, %v13188_v32  ;;  %v6236_v24 = vrot.slane %v6235_v58, 4  ;;  %v6249_v38 = vor.u32 %v6248_v49, %v6245_v2  ;;  %v6271_v26 = vshrl.u32 %v5950_v1, 16  ;;  %v6227_v34 = vsel %vm16444_vm4, %v6222_v7, %v6226_v16  ;;  %v5960_v32 = vld [vmem:[#allocation2 + $0xd0] sm:$0xf]  ;;  %v15556_v49 = vld [vmem:[#allocation2 + $0xa0] sm:$0xf]  ;;  %14341 = vmatprep.subr.bf16.mxu0 %v15482_v18 }
 0x2c1   :  { %v6262_v13 = vrot.slane %v6260_v4, 5  ;;  %v6274_v54 = vshll.u32 %v5950_v1, 16  ;;  %v6280_v33 = vshll.u32 %v5951_v30, 16  ;;  %14287 = vmatprep.mubr.msk.bf16.mxu0 %vm3272_vm9, %v12927_v37  ;;  %v6285_v27 = vshrl.u32 %v5952_v15, 16  ;;  %v15557_v30 = vld [vmem:[#allocation2 + $0xa8] sm:$0xf]  ;;  %14342 = vmatpush3.bf16.msra.mxu0 %v15482_v18 }
 0x2c2   :  { %v6241_v47 = vsel %vm16444_vm4, %v6236_v24, %v6240_v44  ;;  %v6250_v56 = vrot.slane %v6249_v38, 4  ;;  %v6273_v55 = vrot.slane %v6271_v26, 4  ;;  %v6268_v40 = vrot.slane %v6266_v6, 5  ;;  %v15559_v63 = vld [vmem:[#allocation2 + $0xb8] sm:$0xf] }
 0x2c3   :  { %v13189_v28 = vcombine.low %v6227_v34, %v6241_v47  ;;  %v6263_v25 = vor.u32 %v6262_v13, %v6259_v35  ;;  %v6276_v19 = vrot.slane %v6274_v54, 5  ;;  %v6282_v36 = vrot.slane %v6280_v33, 5  ;;  %v5962_v13 = vld [vmem:[#allocation2 + $0xd8] sm:$0xf]  ;;  %v5971_v18 = vld [vmem:[#allocation2 + $0x10c] sm:$0x1] }
 0x2c4   :  { %v6287_v8 = vrot.slane %v6285_v27, 4  ;;  %v6288_v22 = vshll.u32 %v5952_v15, 16  ;;  %v6294_v17 = vshll.u32 %v5953_v62, 16  ;;  %v12928_v16 = vcombine.low %v15554_v60, %v15555_v5  ;;  %v5961_v15 = vld [vmem:[#allocation2 + $0xd4] sm:$0x1] }
 0x2c5   :  { %14491 = vmatprep.mubr.msk.bf16.mxu1 %vm3272_vm9, %v13189_v28  ;;  %v6264_v39 = vrot.slane %v6263_v25, 4  ;;  %v6277_v42 = vor.u32 %v6276_v19, %v6273_v55  ;;  %v6299_v53 = vshrl.u32 %v5954_v57, 16  ;;  %v6255_v31 = vsel %vm16444_vm4, %v6250_v56, %v6254_v50  ;;  %v5963_v56 = vld [vmem:[#allocation2 + $0xdc] sm:$0x1]  ;;  %v5964_v25 = vld [vmem:[#allocation2 + $0xe0] sm:$0xf] }
 0x2c6   :  { %v6290_v48 = vrot.slane %v6288_v22, 5  ;;  %v6302_v3 = vshll.u32 %v5954_v57, 16  ;;  %v6308_v12 = vshll.u32 %v5955_v11, 16  ;;  %v6313_v59 = vshrl.u32 %v5956_v9, 16  ;;  %v15558_v11 = vld [vmem:[#allocation2 + $0xb0] sm:$0xf] }
 0x2c7   :  { %v6269_v43 = vsel %vm16444_vm4, %v6264_v39, %v6268_v40  ;;  %v6278_v45 = vrot.slane %v6277_v42, 4  ;;  %14288 = vmatmul.mubr.msk.bf16.gmra.mrb[76].mxu0 %vm3272_vm9, %v12928_v16  ;;  %v6301_v41 = vrot.slane %v6299_v53, 4  ;;  %v6296_v21 = vrot.slane %v6294_v17, 5 }
 0x2c8   :  { %v13190_v51 = vcombine.low %v6255_v31, %v6269_v43  ;;  %v6291_v20 = vor.u32 %v6290_v48, %v6287_v8  ;;  %v6304_v23 = vrot.slane %v6302_v3, 5  ;;  %v6310_v7 = vrot.slane %v6308_v12, 5  ;;  %v15560_v8 = vld [vmem:[#allocation8 + $0x30] sm:$0xff]   ;;  %v5966_v31 = vld [vmem:[#allocation2 + $0xf8] sm:$0xf] }
 0x2c9   :  { %v6315_v2 = vrot.slane %v6313_v59, 4  ;;  %v6316_v52 = vshll.u32 %v5956_v9, 16  ;;  %v6322_v1 = vshll.u32 %v5957_v10, 16  ;;  %v12929_v50 = vcombine.low %v15556_v49, %v15557_v30  ;;  %14407 = vmatprep.subr.bf16.mxu0 %v15560_v8  ;;  %v5965_v9 = vld [vmem:[#allocation2 + $0xe4] sm:$0x1] }
 0x2ca   :  { %14492 = vmatmul.mubr.msk.bf16.gmra.mrb[52].mxu1 %vm3272_vm9, %v13190_v51  ;;  %v6292_v58 = vrot.slane %v6291_v20, 4  ;;  %v6305_v44 = vor.u32 %v6304_v23, %v6301_v41  ;;  %v6327_v35 = vshrl.u32 %v5958_v29, 16  ;;  %v6283_v4 = vsel %vm16444_vm4, %v6278_v45, %v6282_v36  ;;  %v5967_v43 = vld [vmem:[#allocation2 + $0xfc] sm:$0x1]  ;;  %v5968_v51 = vld [vmem:[#allocation2 + $0x100] sm:$0xf] }
 0x2cb   :  { %v6318_v6 = vrot.slane %v6316_v52, 5  ;;  %v6330_v24 = vshll.u32 %v5958_v29, 16  ;;  %v6336_v38 = vshll.u32 %v5959_v46, 16  ;;  %14291 = vmatprep.mubr.msk.bf16.mxu0 %vm3272_vm9, %v12929_v50  ;;  %v6341_v34 = vshrl.u32 %v5960_v32, 16  ;;  %v15561_v23 = vld [vmem:[#allocation2 + $0xc0] sm:$0xf] }
 0x2cc   :  { %v6297_v61 = vsel %vm16444_vm4, %v6292_v58, %v6296_v21  ;;  %v6306_v37 = vrot.slane %v6305_v44, 4  ;;  %v6329_v26 = vrot.slane %v6327_v35, 4  ;;  %v6324_v33 = vrot.slane %v6322_v1, 5  ;;  %v15562_v46 = vld [vmem:[#allocation2 + $0xc8] sm:$0xf] }
 0x2cd   :  { %v13191_v62 = vcombine.low %v6283_v4, %v6297_v61  ;;  %v6319_v54 = vor.u32 %v6318_v6, %v6315_v2  ;;  %v6332_v47 = vrot.slane %v6330_v24, 5  ;;  %v6338_v55 = vrot.slane %v6336_v38, 5  ;;  %v5970_v4 = vld [vmem:[#allocation2 + $0x108] sm:$0xf] }
 0x2ce   :  { %v6343_v27 = vrot.slane %v6341_v34, 4  ;;  %v6344_v57 = vshll.u32 %v5960_v32, 16  ;;  %v6350_v28 = vshll.u32 %v5961_v15, 16  ;;  %v12930_v0 = vcombine.low %v15558_v11, %v15559_v63  ;;  %v5969_v32 = vld [vmem:[#allocation2 + $0x104] sm:$0x1] }
 0x2cf   :  { %14495 = vmatprep.mubr.msk.bf16.mxu1 %vm3272_vm9, %v13191_v62  ;;  %v6320_v40 = vrot.slane %v6319_v54, 4  ;;  %v6333_v19 = vor.u32 %v6332_v47, %v6329_v26  ;;  %v6355_v36 = vshrl.u32 %v5962_v13, 16  ;;  %v6311_v22 = vsel %vm16444_vm4, %v6306_v37, %v6310_v7  ;;  %v15564_v47 = vld [vmem:[#allocation2 + $0xd8] sm:$0xf] }
 0x2d0   :  { %v6346_v17 = vrot.slane %v6344_v57, 5  ;;  %v6358_v39 = vshll.u32 %v5962_v13, 16  ;;  %v6364_v42 = vshll.u32 %v5963_v56, 16  ;;  %14292 = vmatmul.mubr.msk.bf16.gmra.mrb[80].mxu0 %vm3272_vm9, %v12930_v0  ;;  %v6369_v53 = vshrl.u32 %v5964_v25, 16  ;;  %v5972_v13 = vld [vmem:[#allocation2 + $0x110] sm:$0xf] }
 0x2d1   :  { %v6325_v60 = vsel %vm16444_vm4, %v6320_v40, %v6324_v33  ;;  %v6334_v5 = vrot.slane %v6333_v19, 4  ;;  %v6357_v16 = vrot.slane %v6355_v36, 4  ;;  %v6352_v3 = vrot.slane %v6350_v28, 5  ;;  %v15563_v33 = vld [vmem:[#allocation2 + $0xd0] sm:$0xf] }
 0x2d2   :  { %v13192_v48 = vcombine.low %v6311_v22, %v6325_v60  ;;  %v6347_v10 = vor.u32 %v6346_v17, %v6343_v27  ;;  %v6360_v12 = vrot.slane %v6358_v39, 5  ;;  %v6366_v45 = vrot.slane %v6364_v42, 5  ;;  %v5973_v28 = vld [vmem:[#allocation2 + $0x114] sm:$0x1]  ;;  %v5974_v36 = vld [vmem:[#allocation2 + $0x118] sm:$0xf] }
 0x2d3   :  { %v6371_v41 = vrot.slane %v6369_v53, 4  ;;  %v6372_v59 = vshll.u32 %v5964_v25, 16  ;;  %v6378_v29 = vshll.u32 %v5965_v9, 16  ;;  %v12931_v7 = vcombine.low %v15561_v23, %v15562_v46  ;;  %v5975_v39 = vld [vmem:[#allocation2 + $0x11c] sm:$0x1] }
 0x2d4   :  { %14496 = vmatmul.mubr.msk.bf16.gmra.mrb[56].mxu1 %vm3272_vm9, %v13192_v48  ;;  %v6348_v20 = vrot.slane %v6347_v10, 4  ;;  %v6361_v21 = vor.u32 %v6360_v12, %v6357_v16  ;;  %v6383_v2 = vshrl.u32 %v5966_v31, 16  ;;  %v6339_v52 = vsel %vm16444_vm4, %v6334_v5, %v6338_v55  ;;  %v5976_v53 = vld [vmem:[#allocation2 + $0x120] sm:$0xf]  ;;  %v15565_v10 = vld [vmem:[#allocation2 + $0xf0] sm:$0xf] }
 0x2d5   :  { %v6374_v1 = vrot.slane %v6372_v59, 5  ;;  %v6386_v58 = vshll.u32 %v5966_v31, 16  ;;  %v6392_v44 = vshll.u32 %v5967_v43, 16  ;;  %14295 = vmatprep.mubr.msk.bf16.mxu0 %vm3272_vm9, %v12931_v7  ;;  %v6397_v35 = vshrl.u32 %v5968_v51, 16  ;;  %v5977_v59 = vld [vmem:[#allocation2 + $0x124] sm:$0x1] }
 0x2d6   :  { %v6353_v49 = vsel %vm16444_vm4, %v6348_v20, %v6352_v3  ;;  %v6362_v30 = vrot.slane %v6361_v21, 4  ;;  %v6385_v50 = vrot.slane %v6383_v2, 4  ;;  %v6380_v24 = vrot.slane %v6378_v29, 5  ;;  %v15566_v3 = vld [vmem:[#allocation2 + $0xf8] sm:$0xf] }
 0x2d7   :  { %v13193_v6 = vcombine.low %v6339_v52, %v6353_v49  ;;  %v6375_v15 = vor.u32 %v6374_v1, %v6371_v41  ;;  %v6388_v38 = vrot.slane %v6386_v58, 5  ;;  %v6394_v61 = vrot.slane %v6392_v44, 5  ;;  %v5978_v7 = vld [vmem:[#allocation2 + $0x128] sm:$0xf]  ;;  %v5979_v58 = vld [vmem:[#allocation2 + $0x12c] sm:$0x1] }
 0x2d8   :  { %v6399_v37 = vrot.slane %v6397_v35, 4  ;;  %v6400_v26 = vshll.u32 %v5968_v51, 16  ;;  %v6406_v34 = vshll.u32 %v5969_v32, 16  ;;  %v12932_v56 = vcombine.low %v15563_v33, %v15564_v47  ;;  %v5980_v35 = vld [vmem:[#allocation2 + $0x130] sm:$0xf] }
 0x2d9   :  { %14499 = vmatprep.mubr.msk.bf16.mxu1 %vm3272_vm9, %v13193_v6  ;;  %v6376_v62 = vrot.slane %v6375_v15, 4  ;;  %v6389_v54 = vor.u32 %v6388_v38, %v6385_v50  ;;  %v6411_v55 = vshrl.u32 %v5970_v4, 16  ;;  %v6367_v27 = vsel %vm16444_vm4, %v6362_v30, %v6366_v45  ;;  %v15567_v15 = vld [vmem:[#allocation2 + $0x100] sm:$0xf] }
 0x2da   :  { %v6402_v57 = vrot.slane %v6400_v26, 5  ;;  %v6414_v25 = vshll.u32 %v5970_v4, 16  ;;  %v6420_v40 = vshll.u32 %v5971_v18, 16  ;;  %14296 = vmatmul.mubr.msk.bf16.gmra.mrb[84].mxu0 %vm3272_vm9, %v12932_v56  ;;  %v6425_v0 = vshrl.u32 %v5972_v13, 16  ;;  %v5981_v26 = vld [vmem:[#allocation2 + $0x134] sm:$0x1] }
 0x2db   :  { %v6381_v19 = vsel %vm16444_vm4, %v6376_v62, %v6380_v24  ;;  %v6390_v11 = vrot.slane %v6389_v54, 4  ;;  %v6413_v63 = vrot.slane %v6411_v55, 4  ;;  %v6408_v17 = vrot.slane %v6406_v34, 5  ;;  %v15568_v24 = vld [vmem:[#allocation2 + $0x108] sm:$0xf] }
 0x2dc   :  { %v13194_v8 = vcombine.low %v6367_v27, %v6381_v19  ;;  %v6403_v22 = vor.u32 %v6402_v57, %v6399_v37  ;;  %v6416_v9 = vrot.slane %v6414_v25, 5  ;;  %v6422_v42 = vrot.slane %v6420_v40, 5  ;;  %v5982_v56 = vld [vmem:[#allocation2 + $0x148] sm:$0xf]  ;;  %v5983_v25 = vld [vmem:[#allocation2 + $0x14c] sm:$0x1] }
 0x2dd   :  { %v6427_v60 = vrot.slane %v6425_v0, 4  ;;  %v6428_v5 = vshll.u32 %v5972_v13, 16  ;;  %v6434_v16 = vshll.u32 %v5973_v28, 16  ;;  %v12933_v12 = vcombine.low %v15565_v10, %v15566_v3  ;;  %v5984_v0 = vld [vmem:[#allocation2 + $0x150] sm:$0xf] }
 0x2de   :  { %14500 = vmatmul.mubr.msk.bf16.gmra.mrb[60].mxu1 %vm3272_vm9, %v13194_v8  ;;  %v6404_v31 = vrot.slane %v6403_v22, 4  ;;  %v6417_v48 = vor.u32 %v6416_v9, %v6413_v63  ;;  %v6439_v43 = vshrl.u32 %v5974_v36, 16  ;;  %v6395_v45 = vsel %vm16444_vm4, %v6390_v11, %v6394_v61  ;;  %v15569_v22 = vld [vmem:[#allocation2 + $0x110] sm:$0xf] }
 0x2df   :  { %v6430_v41 = vrot.slane %v6428_v5, 5  ;;  %v6442_v29 = vshll.u32 %v5974_v36, 16  ;;  %v6448_v51 = vshll.u32 %v5975_v39, 16  ;;  %14299 = vmatprep.mubr.msk.bf16.mxu0 %vm3272_vm9, %v12933_v12  ;;  %v6453_v46 = vshrl.u32 %v5976_v53, 16  ;;  %v5985_v5 = vld [vmem:[#allocation2 + $0x154] sm:$0x1] }
 0x2e0   :  { %v6409_v20 = vsel %vm16444_vm4, %v6404_v31, %v6408_v17  ;;  %v6418_v21 = vrot.slane %v6417_v48, 4  ;;  %v6441_v23 = vrot.slane %v6439_v43, 4  ;;  %v6436_v1 = vrot.slane %v6434_v16, 5  ;;  %v15570_v17 = vld [vmem:[#allocation2 + $0x118] sm:$0xf] }
 0x2e1   :  { %v13195_v2 = vcombine.low %v6395_v45, %v6409_v20  ;;  %v6431_v52 = vor.u32 %v6430_v41, %v6427_v60  ;;  %v6444_v32 = vrot.slane %v6442_v29, 5  ;;  %v6450_v44 = vrot.slane %v6448_v51, 5  ;;  %v5986_v12 = vld [vmem:[#allocation2 + $0x158] sm:$0xf]  ;;  %v5987_v29 = vld [vmem:[#allocation2 + $0x15c] sm:$0x1] }
 0x2e2   :  { %v6455_v49 = vrot.slane %v6453_v46, 4  ;;  %v6456_v30 = vshll.u32 %v5976_v53, 16  ;;  %v6462_v50 = vshll.u32 %v5977_v59, 16  ;;  %v12934_v38 = vcombine.low %v15567_v15, %v15568_v24  ;;  %v5988_v46 = vld [vmem:[#allocation2 + $0x160] sm:$0xf] }
 0x2e3   :  { %14503 = vmatprep.mubr.msk.bf16.mxu1 %vm3272_vm9, %v13195_v2  ;;  %v6432_v4 = vrot.slane %v6431_v52, 4  ;;  %v6445_v6 = vor.u32 %v6444_v32, %v6441_v23  ;;  %v6467_v18 = vshrl.u32 %v5978_v7, 16  ;;  %v6423_v61 = vsel %vm16444_vm4, %v6418_v21, %v6422_v42  ;;  %v15571_v52 = vld [vmem:[#allocation2 + $0x120] sm:$0xf] }
 0x2e4   :  { %v6458_v37 = vrot.slane %v6456_v30, 5  ;;  %v6470_v34 = vshll.u32 %v5978_v7, 16  ;;  %v6476_v13 = vshll.u32 %v5979_v58, 16  ;;  %14300 = vmatmul.mubr.msk.bf16.gmra.mrb[88].mxu0 %vm3272_vm9, %v12934_v38  ;;  %v6481_v47 = vshrl.u32 %v5980_v35, 16  ;;  %v5989_v30 = vld [vmem:[#allocation2 + $0x164] sm:$0x1] }
 0x2e5   :  { %v6437_v62 = vsel %vm16444_vm4, %v6432_v4, %v6436_v1  ;;  %v6446_v54 = vrot.slane %v6445_v6, 4  ;;  %v6469_v33 = vrot.slane %v6467_v18, 4  ;;  %v6464_v57 = vrot.slane %v6462_v50, 5  ;;  %v15572_v1 = vld [vmem:[#allocation2 + $0x128] sm:$0xf] }
 0x2e6   :  { %v13196_v55 = vcombine.low %v6423_v61, %v6437_v62  ;;  %v6459_v27 = vor.u32 %v6458_v37, %v6455_v49  ;;  %v6472_v28 = vrot.slane %v6470_v34, 5  ;;  %v6478_v40 = vrot.slane %v6476_v13, 5  ;;  %v5990_v38 = vld [vmem:[#allocation2 + $0x168] sm:$0xf]  ;;  %v5991_v34 = vld [vmem:[#allocation2 + $0x16c] sm:$0x1] }
 0x2e7   :  { %v6483_v19 = vrot.slane %v6481_v47, 4  ;;  %v6484_v11 = vshll.u32 %v5980_v35, 16  ;;  %v6490_v63 = vshll.u32 %v5981_v26, 16  ;;  %v12935_v9 = vcombine.low %v15569_v22, %v15570_v17  ;;  %v5992_v47 = vld [vmem:[#allocation2 + $0x170] sm:$0xf] }
 0x2e8   :  { %14504 = vmatmul.mubr.msk.bf16.gmra.mrb[0].mxu1 %vm3272_vm9, %v13196_v55  ;;  %v6460_v36 = vrot.slane %v6459_v27, 4  ;;  %v6473_v8 = vor.u32 %v6472_v28, %v6469_v33  ;;  %v6495_v39 = vshrl.u32 %v5982_v56, 16  ;;  %v6451_v42 = vsel %vm16444_vm4, %v6446_v54, %v6450_v44  ;;  %v15573_v27 = vld [vmem:[#allocation2 + $0x140] sm:$0xf] }
 0x2e9   :  { %v6486_v60 = vrot.slane %v6484_v11, 5  ;;  %v6498_v16 = vshll.u32 %v5982_v56, 16  ;;  %v6504_v53 = vshll.u32 %v5983_v25, 16  ;;  %14303 = vmatprep.mubr.msk.bf16.mxu0 %vm3272_vm9, %v12935_v9  ;;  %v6509_v3 = vshrl.u32 %v5984_v0, 16  ;;  %v5993_v11 = vld [vmem:[#allocation2 + $0x174] sm:$0x1] }
 0x2ea   :  { %v6465_v31 = vsel %vm16444_vm4, %v6460_v36, %v6464_v57  ;;  %v6474_v48 = vrot.slane %v6473_v8, 4  ;;  %v6497_v10 = vrot.slane %v6495_v39, 4  ;;  %v6492_v41 = vrot.slane %v6490_v63, 5  ;;  %v15574_v57 = vld [vmem:[#allocation2 + $0x148] sm:$0xf] }
 0x2eb   :  { %v13197_v43 = vcombine.low %v6451_v42, %v6465_v31  ;;  %v6487_v45 = vor.u32 %v6486_v60, %v6483_v19  ;;  %v6500_v59 = vrot.slane %v6498_v16, 5  ;;  %v6506_v51 = vrot.slane %v6504_v53, 5  ;;  %v5994_v9 = vld [vmem:[#allocation2 + $0x178] sm:$0xf]  ;;  %v5995_v16 = vld [vmem:[#allocation2 + $0x17c] sm:$0x1] }
 0x2ec   :  { %v6511_v20 = vrot.slane %v6509_v3, 4  ;;  %v6512_v21 = vshll.u32 %v5984_v0, 16  ;;  %v6518_v23 = vshll.u32 %v5985_v5, 16  ;;  %v12936_v32 = vcombine.low %v15571_v52, %v15572_v1  ;;  %v5996_v3 = vld [vmem:[#allocation2 + $0x180] sm:$0xf] }
 0x2ed   :  { %14507 = vmatprep.mubr.msk.bf16.mxu1 %vm3272_vm9, %v13197_v43  ;;  %v6488_v7 = vrot.slane %v6487_v45, 4  ;;  %v6501_v2 = vor.u32 %v6500_v59, %v6497_v10  ;;  %v6523_v58 = vshrl.u32 %v5986_v12, 16  ;;  %v6479_v44 = vsel %vm16444_vm4, %v6474_v48, %v6478_v40  ;;  %v15575_v45 = vld [vmem:[#allocation2 + $0x150] sm:$0xf] }
 0x2ee   :  { %v6514_v49 = vrot.slane %v6512_v21, 5  ;;  %v6526_v50 = vshll.u32 %v5986_v12, 16  ;;  %v6532_v35 = vshll.u32 %v5987_v29, 16  ;;  %14304 = vmatmul.mubr.msk.bf16.gmra.mrb[92].mxu0 %vm3272_vm9, %v12936_v32  ;;  %v6537_v24 = vshrl.u32 %v5988_v46, 16  ;;  %v5997_v21 = vld [vmem:[#allocation2 + $0x184] sm:$0x1] }
 0x2ef   :  { %v6493_v4 = vsel %vm16444_vm4, %v6488_v7, %v6492_v41  ;;  %v6502_v6 = vrot.slane %v6501_v2, 4  ;;  %v6525_v15 = vrot.slane %v6523_v58, 4  ;;  %v6520_v37 = vrot.slane %v6518_v23, 5  ;;  %v15576_v41 = vld [vmem:[#allocation2 + $0x158] sm:$0xf] }
 0x2f0   :  { %v13198_v18 = vcombine.low %v6479_v44, %v6493_v4  ;;  %v6515_v61 = vor.u32 %v6514_v49, %v6511_v20  ;;  %v6528_v26 = vrot.slane %v6526_v50, 5  ;;  %v6534_v13 = vrot.slane %v6532_v35, 5  ;;  %v5998_v32 = vld [vmem:[#allocation2 + $0x198] sm:$0xf]  ;;  %v5999_v50 = vld [vmem:[#allocation2 + $0x19c] sm:$0x1] }
 0x2f1   :  { %v6539_v62 = vrot.slane %v6537_v24, 4  ;;  %v6540_v54 = vshll.u32 %v5988_v46, 16  ;;  %v6546_v33 = vshll.u32 %v5989_v30, 16  ;;  %v12937_v28 = vcombine.low %v15573_v27, %v15574_v57  ;;  %v6000_v24 = vld [vmem:[#allocation2 + $0x1a0] sm:$0xf] }
 0x2f2   :  { %14508 = vmatmul.mubr.msk.bf16.gmra.mrb[4].mxu1 %vm3272_vm9, %v13198_v18  ;;  %v6516_v56 = vrot.slane %v6515_v61, 4  ;;  %v6529_v55 = vor.u32 %v6528_v26, %v6525_v15  ;;  %v6551_v25 = vshrl.u32 %v5990_v38, 16  ;;  %v6507_v40 = vsel %vm16444_vm4, %v6502_v6, %v6506_v51  ;;  %v15577_v61 = vld [vmem:[#allocation2 + $0x160] sm:$0xf] }
 0x2f3   :  { %v6542_v19 = vrot.slane %v6540_v54, 5  ;;  %v6554_v63 = vshll.u32 %v5990_v38, 16  ;;  %v6560_v0 = vshll.u32 %v5991_v34, 16  ;;  %14307 = vmatprep.mubr.msk.bf16.mxu0 %vm3272_vm9, %v12937_v28  ;;  %v6565_v17 = vshrl.u32 %v5992_v47, 16  ;;  %v6001_v54 = vld [vmem:[#allocation2 + $0x1a4] sm:$0x1] }
 0x2f4   :  { %v6521_v36 = vsel %vm16444_vm4, %v6516_v56, %v6520_v37  ;;  %v6530_v8 = vrot.slane %v6529_v55, 4  ;;  %v6553_v22 = vrot.slane %v6551_v25, 4  ;;  %v6548_v60 = vrot.slane %v6546_v33, 5  ;;  %v15578_v37 = vld [vmem:[#allocation2 + $0x168] sm:$0xf] }
 0x2f5   :  { %v13199_v39 = vcombine.low %v6507_v40, %v6521_v36  ;;  %v6543_v42 = vor.u32 %v6542_v19, %v6539_v62  ;;  %v6556_v5 = vrot.slane %v6554_v63, 5  ;;  %v6562_v53 = vrot.slane %v6560_v0, 5  ;;  %v6002_v28 = vld [vmem:[#allocation2 + $0x1a8] sm:$0xf]  ;;  %v6003_v63 = vld [vmem:[#allocation2 + $0x1ac] sm:$0x1] }
 0x2f6   :  { %v6567_v31 = vrot.slane %v6565_v17, 4  ;;  %v6568_v48 = vshll.u32 %v5992_v47, 16  ;;  %v6574_v10 = vshll.u32 %v5993_v11, 16  ;;  %v12938_v59 = vcombine.low %v15575_v45, %v15576_v41  ;;  %v6004_v17 = vld [vmem:[#allocation2 + $0x1b0] sm:$0xf] }
 0x2f7   :  { %14511 = vmatprep.mubr.msk.bf16.mxu1 %vm3272_vm9, %v13199_v39  ;;  %v6544_v12 = vrot.slane %v6543_v42, 4  ;;  %v6557_v43 = vor.u32 %v6556_v5, %v6553_v22  ;;  %v6579_v29 = vshrl.u32 %v5994_v9, 16  ;;  %v6535_v51 = vsel %vm16444_vm4, %v6530_v8, %v6534_v13  ;;  %v15579_v42 = vld [vmem:[#allocation2 + $0x170] sm:$0xf] }
 0x2f8   :  { %v6570_v20 = vrot.slane %v6568_v48, 5  ;;  %v6582_v23 = vshll.u32 %v5994_v9, 16  ;;  %v6588_v46 = vshll.u32 %v5995_v16, 16  ;;  %14308 = vmatmul.mubr.msk.bf16.gmra.mrb[96].mxu0 %vm3272_vm9, %v12938_v59  ;;  %v6593_v1 = vshrl.u32 %v5996_v3, 16  ;;  %v6005_v48 = vld [vmem:[#allocation2 + $0x1b4] sm:$0x1] }
 0x2f9   :  { %v6549_v7 = vsel %vm16444_vm4, %v6544_v12, %v6548_v60  ;;  %v6558_v2 = vrot.slane %v6557_v43, 4  ;;  %v6581_v52 = vrot.slane %v6579_v29, 4  ;;  %v6576_v49 = vrot.slane %v6574_v10, 5  ;;  %v15580_v60 = vld [vmem:[#allocation2 + $0x178] sm:$0xf] }
 0x2fa   :  { %v13200_v58 = vcombine.low %v6535_v51, %v6549_v7  ;;  %v6571_v44 = vor.u32 %v6570_v20, %v6567_v31  ;;  %v6584_v30 = vrot.slane %v6582_v23, 5  ;;  %v6590_v35 = vrot.slane %v6588_v46, 5  ;;  %v6006_v59 = vld [vmem:[#allocation2 + $0x1b8] sm:$0xf]  ;;  %v6007_v23 = vld [vmem:[#allocation2 + $0x1bc] sm:$0x1] }
 0x2fb   :  { %v6595_v4 = vrot.slane %v6593_v1, 4  ;;  %v6596_v6 = vshll.u32 %v5996_v3, 16  ;;  %v6602_v15 = vshll.u32 %v5997_v21, 16  ;;  %v12939_v26 = vcombine.low %v15577_v61, %v15578_v37  ;;  %v6008_v1 = vld [vmem:[#allocation2 + $0x1c0] sm:$0xf] }
 0x2fc   :  { %14512 = vmatmul.mubr.msk.bf16.gmra.mrb[8].mxu1 %vm3272_vm9, %v13200_v58  ;;  %v6572_v38 = vrot.slane %v6571_v44, 4  ;;  %v6585_v18 = vor.u32 %v6584_v30, %v6581_v52  ;;  %v6607_v34 = vshrl.u32 %v5998_v32, 16  ;;  %v6563_v13 = vsel %vm16444_vm4, %v6558_v2, %v6562_v53  ;;  %v15581_v44 = vld [vmem:[#allocation2 + $0x190] sm:$0xf] }
 0x2fd   :  { %v6598_v62 = vrot.slane %v6596_v6, 5  ;;  %v6610_v33 = vshll.u32 %v5998_v32, 16  ;;  %v6616_v47 = vshll.u32 %v5999_v50, 16  ;;  %14311 = vmatprep.mubr.msk.bf16.mxu0 %vm3272_vm9, %v12939_v26  ;;  %v6621_v57 = vshrl.u32 %v6000_v24, 16  ;;  %v6009_v6 = vld [vmem:[#allocation2 + $0x1c4] sm:$0x1] }
 0x2fe   :  { %v6577_v56 = vsel %vm16444_vm4, %v6572_v38, %v6576_v49  ;;  %v6586_v55 = vrot.slane %v6585_v18, 4  ;;  %v6609_v27 = vrot.slane %v6607_v34, 4  ;;  %v6604_v19 = vrot.slane %v6602_v15, 5  ;;  %v15582_v49 = vld [vmem:[#allocation2 + $0x198] sm:$0xf] }
 0x2ff   :  { %v13201_v25 = vcombine.low %v6563_v13, %v6577_v56  ;;  %v6599_v40 = vor.u32 %v6598_v62, %v6595_v4  ;;  %v6612_v11 = vrot.slane %v6610_v33, 5  ;;  %v6618_v0 = vrot.slane %v6616_v47, 5  ;;  %v6010_v26 = vld [vmem:[#allocation2 + $0x1c8] sm:$0xf]  ;;  %v6011_v33 = vld [vmem:[#allocation2 + $0x1cc] sm:$0x1] }
 0x300   :  { %v6623_v36 = vrot.slane %v6621_v57, 4  ;;  %v6624_v8 = vshll.u32 %v6000_v24, 16  ;;  %v6630_v22 = vshll.u32 %v6001_v54, 16  ;;  %v12940_v5 = vcombine.low %v15579_v42, %v15580_v60  ;;  %v6012_v57 = vld [vmem:[#allocation2 + $0x1d0] sm:$0xf] }
 0x301   :  { %14515 = vmatprep.mubr.msk.bf16.mxu1 %vm3272_vm9, %v13201_v25  ;;  %v6600_v9 = vrot.slane %v6599_v40, 4  ;;  %v6613_v39 = vor.u32 %v6612_v11, %v6609_v27  ;;  %v6635_v16 = vshrl.u32 %v6002_v28, 16  ;;  %v6591_v53 = vsel %vm16444_vm4, %v6586_v55, %v6590_v35  ;;  %v15583_v40 = vld [vmem:[#allocation2 + $0x1a0] sm:$0xf] }
 0x302   :  { %v6626_v31 = vrot.slane %v6624_v8, 5  ;;  %v6638_v10 = vshll.u32 %v6002_v28, 16  ;;  %v6644_v3 = vshll.u32 %v6003_v63, 16  ;;  %14312 = vmatmul.mubr.msk.bf16.gmra.mrb[100].mxu0 %vm3272_vm9, %v12940_v5  ;;  %v6649_v41 = vshrl.u32 %v6004_v17, 16  ;;  %v6013_v8 = vld [vmem:[#allocation2 + $0x1d4] sm:$0x1] }
 0x303   :  { %v6605_v12 = vsel %vm16444_vm4, %v6600_v9, %v6604_v19  ;;  %v6614_v43 = vrot.slane %v6613_v39, 4  ;;  %v6637_v45 = vrot.slane %v6635_v16, 4  ;;  %v6632_v20 = vrot.slane %v6630_v22, 5  ;;  %v15584_v19 = vld [vmem:[#allocation2 + $0x1a8] sm:$0xf] }
 0x304   :  { %v13202_v29 = vcombine.low %v6591_v53, %v6605_v12  ;;  %v6627_v51 = vor.u32 %v6626_v31, %v6623_v36  ;;  %v6640_v21 = vrot.slane %v6638_v10, 5  ;;  %v6646_v46 = vrot.slane %v6644_v3, 5  ;;  %v6014_v5 = vld [vmem:[#allocation2 + $0x1e8] sm:$0xf]  ;;  %v6015_v10 = vld [vmem:[#allocation2 + $0x1ec] sm:$0x1] }
 0x305   :  { %v6651_v7 = vrot.slane %v6649_v41, 4  ;;  %v6652_v2 = vshll.u32 %v6004_v17, 16  ;;  %v6658_v52 = vshll.u32 %v6005_v48, 16  ;;  %v12941_v30 = vcombine.low %v15581_v44, %v15582_v49  ;;  %v6016_v41 = vld [vmem:[#allocation2 + $0x1f0] sm:$0xf] }
 0x306   :  { %14516 = vmatmul.mubr.msk.bf16.gmra.mrb[12].mxu1 %vm3272_vm9, %v13202_v29  ;;  %v6628_v32 = vrot.slane %v6627_v51, 4  ;;  %v6641_v58 = vor.u32 %v6640_v21, %v6637_v45  ;;  %v6663_v50 = vshrl.u32 %v6006_v59, 16  ;;  %v6619_v35 = vsel %vm16444_vm4, %v6614_v43, %v6618_v0  ;;  %v15585_v51 = vld [vmem:[#allocation2 + $0x1b0] sm:$0xf] }
 0x307   :  { %v6654_v4 = vrot.slane %v6652_v2, 5  ;;  %v6666_v15 = vshll.u32 %v6006_v59, 16  ;;  %v6672_v24 = vshll.u32 %v6007_v23, 16  ;;  %14315 = vmatprep.mubr.msk.bf16.mxu0 %vm3272_vm9, %v12941_v30  ;;  %v6677_v37 = vshrl.u32 %v6008_v1, 16  ;;  %v6017_v2 = vld [vmem:[#allocation2 + $0x1f4] sm:$0x1] }
 0x308   :  { %v6633_v38 = vsel %vm16444_vm4, %v6628_v32, %v6632_v20  ;;  %v6642_v18 = vrot.slane %v6641_v58, 4  ;;  %v6665_v61 = vrot.slane %v6663_v50, 4  ;;  %v6660_v62 = vrot.slane %v6658_v52, 5  ;;  %v15586_v20 = vld [vmem:[#allocation2 + $0x1b8] sm:$0xf] }
 0x309   :  { %v13203_v34 = vcombine.low %v6619_v35, %v6633_v38  ;;  %v6655_v13 = vor.u32 %v6654_v4, %v6651_v7  ;;  %v6668_v54 = vrot.slane %v6666_v15, 5  ;;  %v6674_v47 = vrot.slane %v6672_v24, 5  ;;  %v6018_v30 = vld [vmem:[#allocation2 + $0x1f8] sm:$0xf]  ;;  %v6019_v15 = vld [vmem:[#allocation2 + $0x1fc] sm:$0x1] }
 0x30a   :  { %v6679_v56 = vrot.slane %v6677_v37, 4  ;;  %v6680_v55 = vshll.u32 %v6008_v1, 16  ;;  %v6686_v27 = vshll.u32 %v6009_v6, 16  ;;  %v12942_v11 = vcombine.low %v15583_v40, %v15584_v19  ;;  %v6020_v37 = vld [vmem:[#allocation2 + $0x200] sm:$0xf] }
 0x30b   :  { %14519 = vmatprep.mubr.msk.bf16.mxu1 %vm3272_vm9, %v13203_v34  ;;  %v6656_v28 = vrot.slane %v6655_v13, 4  ;;  %v6669_v25 = vor.u32 %v6668_v54, %v6665_v61  ;;  %v6691_v63 = vshrl.u32 %v6010_v26, 16  ;;  %v6647_v0 = vsel %vm16444_vm4, %v6642_v18, %v6646_v46  ;;  %v15587_v13 = vld [vmem:[#allocation2 + $0x1c0] sm:$0xf] }
 0x30c   :  { %v6682_v36 = vrot.slane %v6680_v55, 5  ;;  %v6694_v22 = vshll.u32 %v6010_v26, 16  ;;  %v6700_v17 = vshll.u32 %v6011_v33, 16  ;;  %14316 = vmatmul.mubr.msk.bf16.gmra.mrb[104].mxu0 %vm3272_vm9, %v12942_v11  ;;  %v6705_v60 = vshrl.u32 %v6012_v57, 16  ;;  %v6021_v55 = vld [vmem:[#allocation2 + $0x204] sm:$0x1] }
 0x30d   :  { %v6661_v9 = vsel %vm16444_vm4, %v6656_v28, %v6660_v62  ;;  %v6670_v39 = vrot.slane %v6669_v25, 4  ;;  %v6693_v42 = vrot.slane %v6691_v63, 4  ;;  %v6688_v31 = vrot.slane %v6686_v27, 5  ;;  %v15588_v62 = vld [vmem:[#allocation2 + $0x1c8] sm:$0xf] }
 0x30e   :  { %v13204_v16 = vcombine.low %v6647_v0, %v6661_v9  ;;  %v6683_v53 = vor.u32 %v6682_v36, %v6679_v56  ;;  %v6696_v48 = vrot.slane %v6694_v22, 5  ;;  %v6702_v3 = vrot.slane %v6700_v17, 5  ;;  %v6022_v11 = vld [vmem:[#allocation2 + $0x208] sm:$0xf]  ;;  %v6023_v22 = vld [vmem:[#allocation2 + $0x20c] sm:$0x1] }
 0x30f   :  { %v6707_v12 = vrot.slane %v6705_v60, 4  ;;  %v6708_v43 = vshll.u32 %v6012_v57, 16  ;;  %v6714_v45 = vshll.u32 %v6013_v8, 16  ;;  %v12943_v21 = vcombine.low %v15585_v51, %v15586_v20  ;;  %v6024_v60 = vld [vmem:[#allocation2 + $0x210] sm:$0xf] }
 0x310   :  { %14520 = vmatmul.mubr.msk.bf16.gmra.mrb[16].mxu1 %vm3272_vm9, %v13204_v16  ;;  %v6684_v59 = vrot.slane %v6683_v53, 4  ;;  %v6697_v29 = vor.u32 %v6696_v48, %v6693_v42  ;;  %v6719_v23 = vshrl.u32 %v6014_v5, 16  ;;  %v6675_v46 = vsel %vm16444_vm4, %v6670_v39, %v6674_v47  ;;  %v15589_v53 = vld [vmem:[#allocation2 + $0x1e0] sm:$0xf] }
 0x311   :  { %v6710_v7 = vrot.slane %v6708_v43, 5  ;;  %v6722_v52 = vshll.u32 %v6014_v5, 16  ;;  %v6728_v1 = vshll.u32 %v6015_v10, 16  ;;  %14319 = vmatprep.mubr.msk.bf16.mxu0 %vm3272_vm9, %v12943_v21  ;;  %v6733_v49 = vshrl.u32 %v6016_v41, 16  ;;  %v6025_v43 = vld [vmem:[#allocation2 + $0x214] sm:$0x1] }
 0x312   :  { %v6689_v32 = vsel %vm16444_vm4, %v6684_v59, %v6688_v31  ;;  %v6698_v58 = vrot.slane %v6697_v29, 4  ;;  %v6721_v44 = vrot.slane %v6719_v23, 4  ;;  %v6716_v4 = vrot.slane %v6714_v45, 5  ;;  %v15590_v31 = vld [vmem:[#allocation2 + $0x1e8] sm:$0xf] }
 0x313   :  { %v13205_v50 = vcombine.low %v6675_v46, %v6689_v32  ;;  %v6711_v35 = vor.u32 %v6710_v7, %v6707_v12  ;;  %v6724_v6 = vrot.slane %v6722_v52, 5  ;;  %v6730_v24 = vrot.slane %v6728_v1, 5  ;;  %v6026_v21 = vld [vmem:[#allocation2 + $0x218] sm:$0xf]  ;;  %v6027_v52 = vld [vmem:[#allocation2 + $0x21c] sm:$0x1] }
 0x314   :  { %v6735_v38 = vrot.slane %v6733_v49, 4  ;;  %v6736_v18 = vshll.u32 %v6016_v41, 16  ;;  %v6742_v61 = vshll.u32 %v6017_v2, 16  ;;  %v12944_v54 = vcombine.low %v15587_v13, %v15588_v62  ;;  %v6028_v49 = vld [vmem:[#allocation2 + $0x220] sm:$0xf] }
 0x315   :  { %14523 = vmatprep.mubr.msk.bf16.mxu1 %vm3272_vm9, %v13205_v50  ;;  %v6712_v26 = vrot.slane %v6711_v35, 4  ;;  %v6725_v34 = vor.u32 %v6724_v6, %v6721_v44  ;;  %v6747_v33 = vshrl.u32 %v6018_v30, 16  ;;  %v6703_v47 = vsel %vm16444_vm4, %v6698_v58, %v6702_v3  ;;  %v15591_v35 = vld [vmem:[#allocation2 + $0x1f0] sm:$0xf] }
 0x316   :  { %v6738_v56 = vrot.slane %v6736_v18, 5  ;;  %v6750_v27 = vshll.u32 %v6018_v30, 16  ;;  %v6756_v57 = vshll.u32 %v6019_v15, 16  ;;  %14320 = vmatmul.mubr.msk.bf16.gmra.mrb[108].mxu0 %vm3272_vm9, %v12944_v54  ;;  %v6761_v19 = vshrl.u32 %v6020_v37, 16  ;;  %v6029_v18 = vld [vmem:[#allocation2 + $0x224] sm:$0x1] }
 0x317   :  { %v6717_v28 = vsel %vm16444_vm4, %v6712_v26, %v6716_v4  ;;  %v6726_v25 = vrot.slane %v6725_v34, 4  ;;  %v6749_v40 = vrot.slane %v6747_v33, 4  ;;  %v6744_v36 = vrot.slane %v6742_v61, 5  ;;  %v15592_v4 = vld [vmem:[#allocation2 + $0x1f8] sm:$0xf] }
 0x318   :  { %v13206_v63 = vcombine.low %v6703_v47, %v6717_v28  ;;  %v6739_v0 = vor.u32 %v6738_v56, %v6735_v38  ;;  %v6752_v8 = vrot.slane %v6750_v27, 5  ;;  %v6758_v17 = vrot.slane %v6756_v57, 5  ;;  %v6030_v54 = vld [vmem:[#allocation2 + $0x238] sm:$0xf]  ;;  %v6031_v27 = vld [vmem:[#allocation2 + $0x23c] sm:$0x1] }
 0x319   :  { %v6763_v9 = vrot.slane %v6761_v19, 4  ;;  %v6764_v39 = vshll.u32 %v6020_v37, 16  ;;  %v6770_v42 = vshll.u32 %v6021_v55, 16  ;;  %v12945_v48 = vcombine.low %v15589_v53, %v15590_v31  ;;  %v6032_v19 = vld [vmem:[#allocation2 + $0x240] sm:$0xf] }
 0x31a   :  { %14524 = vmatmul.mubr.msk.bf16.gmra.mrb[20].mxu1 %vm3272_vm9, %v13206_v63  ;;  %v6740_v5 = vrot.slane %v6739_v0, 4  ;;  %v6753_v16 = vor.u32 %v6752_v8, %v6749_v40  ;;  %v6775_v10 = vshrl.u32 %v6022_v11, 16  ;;  %v6731_v3 = vsel %vm16444_vm4, %v6726_v25, %v6730_v24  ;;  %v15593_v0 = vld [vmem:[#allocation2 + $0x200] sm:$0xf] }
 0x31b   :  { %v6766_v12 = vrot.slane %v6764_v39, 5  ;;  %v6778_v45 = vshll.u32 %v6022_v11, 16  ;;  %v6784_v41 = vshll.u32 %v6023_v22, 16  ;;  %14323 = vmatprep.mubr.msk.bf16.mxu0 %vm3272_vm9, %v12945_v48  ;;  %v6789_v20 = vshrl.u32 %v6024_v60, 16  ;;  %v6033_v39 = vld [vmem:[#allocation2 + $0x244] sm:$0x1] }
 0x31c   :  { %v6745_v59 = vsel %vm16444_vm4, %v6740_v5, %v6744_v36  ;;  %v6754_v29 = vrot.slane %v6753_v16, 4  ;;  %v6777_v51 = vrot.slane %v6775_v10, 4  ;;  %v6772_v7 = vrot.slane %v6770_v42, 5  ;;  %v15594_v36 = vld [vmem:[#allocation2 + $0x208] sm:$0xf] }
 0x31d   :  { %v13207_v23 = vcombine.low %v6731_v3, %v6745_v59  ;;  %v6767_v46 = vor.u32 %v6766_v12, %v6763_v9  ;;  %v6780_v2 = vrot.slane %v6778_v45, 5  ;;  %v6786_v1 = vrot.slane %v6784_v41, 5  ;;  %v6034_v48 = vld [vmem:[#allocation2 + $0x248] sm:$0xf]  ;;  %v6035_v45 = vld [vmem:[#allocation2 + $0x24c] sm:$0x1] }
 0x31e   :  { %v6791_v32 = vrot.slane %v6789_v20, 4  ;;  %v6792_v58 = vshll.u32 %v6024_v60, 16  ;;  %v6798_v44 = vshll.u32 %v6025_v43, 16  ;;  %v12946_v6 = vcombine.low %v15591_v35, %v15592_v4  ;;  %v6036_v20 = vld [vmem:[#allocation2 + $0x250] sm:$0xf] }
 0x31f   :  { %14527 = vmatprep.mubr.msk.bf16.mxu1 %vm3272_vm9, %v13207_v23  ;;  %v6768_v30 = vrot.slane %v6767_v46, 4  ;;  %v6781_v50 = vor.u32 %v6780_v2, %v6777_v51  ;;  %v6803_v15 = vshrl.u32 %v6026_v21, 16  ;;  %v6759_v24 = vsel %vm16444_vm4, %v6754_v29, %v6758_v17  ;;  %v15595_v46 = vld [vmem:[#allocation2 + $0x210] sm:$0xf] }
 0x320   :  { %v6794_v38 = vrot.slane %v6792_v58, 5  ;;  %v6806_v61 = vshll.u32 %v6026_v21, 16  ;;  %v6812_v37 = vshll.u32 %v6027_v52, 16  ;;  %14324 = vmatmul.mubr.msk.bf16.gmra.mrb[112].mxu0 %vm3272_vm9, %v12946_v6  ;;  %v6817_v62 = vshrl.u32 %v6028_v49, 16  ;;  %v6037_v58 = vld [vmem:[#allocation2 + $0x254] sm:$0x1] }
 0x321   :  { %v6773_v26 = vsel %vm16444_vm4, %v6768_v30, %v6772_v7  ;;  %v6782_v34 = vrot.slane %v6781_v50, 4  ;;  %v6805_v13 = vrot.slane %v6803_v15, 4  ;;  %v6800_v56 = vrot.slane %v6798_v44, 5  ;;  %v15596_v7 = vld [vmem:[#allocation2 + $0x218] sm:$0xf] }
 0x322   :  { %v13208_v33 = vcombine.low %v6759_v24, %v6773_v26  ;;  %v6795_v47 = vor.u32 %v6794_v38, %v6791_v32  ;;  %v6808_v55 = vrot.slane %v6806_v61, 5  ;;  %v6814_v57 = vrot.slane %v6812_v37, 5  ;;  %v6038_v6 = vld [vmem:[#allocation2 + $0x258] sm:$0xf]  ;;  %v6039_v61 = vld [vmem:[#allocation2 + $0x25c] sm:$0x1] }
 0x323   :  { %v6819_v28 = vrot.slane %v6817_v62, 4  ;;  %v6820_v25 = vshll.u32 %v6028_v49, 16  ;;  %v6826_v40 = vshll.u32 %v6029_v18, 16  ;;  %v12947_v8 = vcombine.low %v15593_v0, %v15594_v36  ;;  %v6040_v62 = vld [vmem:[#allocation2 + $0x260] sm:$0xf] }
 0x324   :  { %14528 = vmatmul.mubr.msk.bf16.gmra.mrb[24].mxu1 %vm3272_vm9, %v13208_v33  ;;  %v6796_v11 = vrot.slane %v6795_v47, 4  ;;  %v6809_v63 = vor.u32 %v6808_v55, %v6805_v13  ;;  %v6831_v22 = vshrl.u32 %v6030_v54, 16  ;;  %v6787_v17 = vsel %vm16444_vm4, %v6782_v34, %v6786_v1  ;;  %v15597_v47 = vld [vmem:[#allocation2 + $0x230] sm:$0xf] }
 0x325   :  { %v6822_v9 = vrot.slane %v6820_v25, 5  ;;  %v6834_v42 = vshll.u32 %v6030_v54, 16  ;;  %v6840_v60 = vshll.u32 %v6031_v27, 16  ;;  %14327 = vmatprep.mubr.msk.bf16.mxu0 %vm3272_vm9, %v12947_v8  ;;  %v6845_v31 = vshrl.u32 %v6032_v19, 16  ;;  %v6041_v25 = vld [vmem:[#allocation2 + $0x264] sm:$0x1] }
 0x326   :  { %v6801_v5 = vsel %vm16444_vm4, %v6796_v11, %v6800_v56  ;;  %v6810_v16 = vrot.slane %v6809_v63, 4  ;;  %v6833_v53 = vrot.slane %v6831_v22, 4  ;;  %v6828_v12 = vrot.slane %v6826_v40, 5  ;;  %v15598_v56 = vld [vmem:[#allocation2 + $0x238] sm:$0xf] }
 0x327   :  { %v13209_v10 = vcombine.low %v6787_v17, %v6801_v5  ;;  %v6823_v3 = vor.u32 %v6822_v9, %v6819_v28  ;;  %v6836_v43 = vrot.slane %v6834_v42, 5  ;;  %v6842_v41 = vrot.slane %v6840_v60, 5  ;;  %v6042_v8 = vld [vmem:[#allocation2 + $0x268] sm:$0xf]  ;;  %v6043_v42 = vld [vmem:[#allocation2 + $0x26c] sm:$0x1] }
 0x328   :  { %v6847_v59 = vrot.slane %v6845_v31, 4  ;;  %v6848_v29 = vshll.u32 %v6032_v19, 16  ;;  %v6854_v51 = vshll.u32 %v6033_v39, 16  ;;  %v12948_v2 = vcombine.low %v15595_v46, %v15596_v7  ;;  %v6044_v31 = vld [vmem:[#allocation2 + $0x270] sm:$0xf] }
 0x329   :  { %14531 = vmatprep.mubr.msk.bf16.mxu1 %vm3272_vm9, %v13209_v10  ;;  %v6824_v21 = vrot.slane %v6823_v3, 4  ;;  %v6837_v23 = vor.u32 %v6836_v43, %v6833_v53  ;;  %v6859_v52 = vshrl.u32 %v6034_v48, 16  ;;  %v6815_v1 = vsel %vm16444_vm4, %v6810_v16, %v6814_v57  ;;  %v15599_v3 = vld [vmem:[#allocation2 + $0x240] sm:$0xf] }
 0x32a   :  { %v6850_v32 = vrot.slane %v6848_v29, 5  ;;  %v6862_v44 = vshll.u32 %v6034_v48, 16  ;;  %v6868_v49 = vshll.u32 %v6035_v45, 16  ;;  %14328 = vmatmul.mubr.msk.bf16.gmra.mrb[116].mxu0 %vm3272_vm9, %v12948_v2  ;;  %v6873_v4 = vshrl.u32 %v6036_v20, 16  ;;  %v6045_v29 = vld [vmem:[#allocation2 + $0x274] sm:$0x1] }
 0x32b   :  { %v6829_v30 = vsel %vm16444_vm4, %v6824_v21, %v6828_v12  ;;  %v6838_v50 = vrot.slane %v6837_v23, 4  ;;  %v6861_v35 = vrot.slane %v6859_v52, 4  ;;  %v6856_v38 = vrot.slane %v6854_v51, 5  ;;  %v15600_v12 = vld [vmem:[#allocation2 + $0x248] sm:$0xf] }
 0x32c   :  { %v13210_v15 = vcombine.low %v6815_v1, %v6829_v30  ;;  %v6851_v24 = vor.u32 %v6850_v32, %v6847_v59  ;;  %v6864_v18 = vrot.slane %v6862_v44, 5  ;;  %v6870_v37 = vrot.slane %v6868_v49, 5 }
 0x32d   :  { %v6875_v26 = vrot.slane %v6873_v4, 4  ;;  %v6876_v34 = vshll.u32 %v6036_v20, 16  ;;  %v6882_v13 = vshll.u32 %v6037_v58, 16  ;;  %v12949_v55 = vcombine.low %v15597_v47, %v15598_v56  ;;  %v7504_v58 = vld [vmem:[#allocation2 + $0x8] sm:$0xe] }
 0x32e   :  { %14532 = vmatmul.mubr.msk.bf16.gmra.mrb[28].mxu1 %vm3272_vm9, %v13210_v15  ;;  %v6852_v54 = vrot.slane %v6851_v24, 4  ;;  %v6865_v33 = vor.u32 %v6864_v18, %v6861_v35  ;;  %v6887_v27 = vshrl.u32 %v6038_v6, 16  ;;  %v6843_v57 = vsel %vm16444_vm4, %v6838_v50, %v6842_v41  ;;  %v7505_v35 = vld [vmem:[#allocation2 + $0x10] sm:$0xe]  ;;  %v15602_v24 = vld [vmem:[#allocation2 + $0x258] sm:$0xf] }
 0x32f   :  { %v6878_v28 = vrot.slane %v6876_v34, 5  ;;  %v6890_v40 = vshll.u32 %v6038_v6, 16  ;;  %v6896_v19 = vshll.u32 %v6039_v61, 16  ;;  %14331 = vmatprep.mubr.msk.bf16.mxu0 %vm3272_vm9, %v12949_v55  ;;  %v6901_v36 = vshrl.u32 %v6040_v62, 16  ;;  %v15601_v15 = vld [vmem:[#allocation2 + $0x250] sm:$0xf] }
 0x330   :  { %v6857_v11 = vsel %vm16444_vm4, %v6852_v54, %v6856_v38  ;;  %v6866_v63 = vrot.slane %v6865_v33, 4  ;;  %v6889_v0 = vrot.slane %v6887_v27, 4  ;;  %v6884_v9 = vrot.slane %v6882_v13, 5  ;;  %v15603_v13 = vld [vmem:[#allocation2 + $0xc] sm:$0x1] }
 0x331   :  { %v13211_v22 = vcombine.low %v6843_v57, %v6857_v11  ;;  %v6879_v17 = vor.u32 %v6878_v28, %v6875_v26  ;;  %v6892_v39 = vrot.slane %v6890_v40, 5  ;;  %v6898_v60 = vrot.slane %v6896_v19, 5  ;;  %v7506_v33 = vld [vmem:[#allocation2 + $0x18] sm:$0xe]  ;;  %v15604_v27 = vld [vmem:[#allocation2 + $0x14] sm:$0x1] }
 0x332   :  { %v6903_v5 = vrot.slane %v6901_v36, 4  ;;  %v6904_v16 = vshll.u32 %v6040_v62, 16  ;;  %v6910_v53 = vshll.u32 %v6041_v25, 16  ;;  %v12950_v43 = vcombine.low %v15599_v3, %v15600_v12  ;;  %v15605_v28 = vld [vmem:[#allocation2 + $0x268] sm:$0xf] }
 0x333   :  { %14535 = vmatprep.mubr.msk.bf16.mxu1 %vm3272_vm9, %v13211_v22  ;;  %v6880_v48 = vrot.slane %v6879_v17, 4  ;;  %v6893_v10 = vor.u32 %v6892_v39, %v6889_v0  ;;  %v6915_v45 = vshrl.u32 %v6042_v8, 16  ;;  %v6871_v41 = vsel %vm16444_vm4, %v6866_v63, %v6870_v37  ;;  %v15606_v25 = vld [vmem:[#allocation2 + $0x260] sm:$0xf]  ;;  %v4216_v36 = vld [vmem:[#allocation2 + $0x8] sm:$0xe] }
 0x334   :  { %v6906_v59 = vrot.slane %v6904_v16, 5  ;;  %v6918_v51 = vshll.u32 %v6042_v8, 16  ;;  %v6924_v20 = vshll.u32 %v6043_v42, 16  ;;  %14332 = vmatmul.mubr.msk.bf16.gmra.mrb[120].mxu0 %vm3272_vm9, %v12950_v43  ;;  %v6929_v7 = vshrl.u32 %v6044_v31, 16  ;;  %v7507_v19 = vld [vmem:[#allocation2 + $0x20] sm:$0xe] }
 0x335   :  { %v6885_v21 = vsel %vm16444_vm4, %v6880_v48, %v6884_v9  ;;  %v6894_v23 = vrot.slane %v6893_v10, 4  ;;  %v6917_v46 = vrot.slane %v6915_v45, 4  ;;  %v6912_v1 = vrot.slane %v6910_v53, 5  ;;  %v4215_v11 = vld [vmem:[#allocation2] sm:$0xe] }
 0x336   :  { %v13212_v2 = vcombine.low %v6871_v41, %v6885_v21  ;;  %v6907_v52 = vor.u32 %v6906_v59, %v6903_v5  ;;  %v6920_v32 = vrot.slane %v6918_v51, 5  ;;  %v6926_v44 = vrot.slane %v6924_v20, 5  ;;  %v15607_v9 = vld [vmem:[#allocation2 + $0x1c] sm:$0x1]  ;;  %v4217_v42 = vld [vmem:[#allocation2 + $0x10] sm:$0xe] }
 0x337   :  { %v6931_v49 = vrot.slane %v6929_v7, 4  ;;  %v6932_v30 = vshll.u32 %v6044_v31, 16  ;;  %v6938_v50 = vshll.u32 %v6045_v29, 16  ;;  %v12951_v38 = vcombine.low %v15601_v15, %v15602_v24  ;;  %v15608_v53 = vld [vmem:[#allocation2 + $0x4] sm:$0x1] }
 0x338   :  { %14536 = vmatmul.mubr.msk.bf16.gmra.mrb[32].mxu1 %vm3272_vm9, %v13212_v2  ;;  %v6908_v4 = vrot.slane %v6907_v52, 4  ;;  %v6921_v6 = vor.u32 %v6920_v32, %v6917_v46  ;;  %v6899_v18 = vsel %vm16444_vm4, %v6894_v23, %v6898_v60  ;;  %v13249_v37 = vrot.slane %v7504_v58, 9  ;;  %v7509_v48 = vld [vmem:[#allocation2 + $0x30] sm:$0xe]  ;;  %v15609_v3 = vld [vmem:[#allocation2 + $0x24] sm:$0x1] }
 0x339   :  { %v6934_v61 = vrot.slane %v6932_v30, 5  ;;  %14335 = vmatprep.mubr.msk.bf16.mxu0 %vm3272_vm9, %v12951_v38  ;;  %v7698_v62 = vrot.slane %v15603_v13, 5  ;;  %v13250_v54 = vrot.slane %v7505_v35, 9  ;;  %v7702_v57 = vrot.slane %v15604_v27, 5  ;;  %v15610_v45 = vld [vmem:[#allocation2 + $0xc] sm:$0x1] }
 0x33a   :  { %v6913_v26 = vsel %vm16444_vm4, %v6908_v4, %v6912_v1  ;;  %v6922_v34 = vrot.slane %v6921_v6, 4  ;;  %v12952_v40 = vcombine.low %v15606_v25, %v15605_v28  ;;  %v6940_v0 = vrot.slane %v6938_v50, 5  ;;  %v4218_v59 = vld [vmem:[#allocation2 + $0x18] sm:$0xe]  ;;  %v7508_v21 = vld [vmem:[#allocation2 + $0x28] sm:$0xe] }
 0x33b   :  { %v13213_v47 = vcombine.low %v6899_v18, %v6913_v26  ;;  %v6935_v56 = vor.u32 %v6934_v61, %v6931_v49  ;;  %v7703_v22 = vsel %vm17479_vm12, %v13250_v54, %v7702_v57  ;;  %v13251_v17 = vrot.slane %v7506_v33, 9  ;;  %v15611_v2 = vld [vmem:[#allocation2 + $0x34] sm:$0x1]  ;;  %v7510_v1 = vld [vmem:[#allocation2 + $0x38] sm:$0xe] }
 0x33c   :  { %v6927_v63 = vsel %vm16444_vm4, %v6922_v34, %v6926_v44  ;;  %14336 = vmatmul.mubr.msk.bf16.gmra.mrb[124].mxu0 %vm3272_vm9, %v12952_v40  ;;  %v7706_v39 = vrot.slane %v15607_v9, 5  ;;  %v7699_v60 = vsel %vm17479_vm12, %v13249_v37, %v7698_v62  ;;  %v13252_v5 = vrot.slane %v7507_v19, 9  ;;  %v7511_v32 = vld [vmem:[#allocation2 + $0x40] sm:$0xe]  ;;  %v15612_v49 = vld [vmem:[#allocation2 + $0x14] sm:$0x1] }
 0x33d   :  { %14539 = vmatprep.mubr.msk.bf16.mxu1 %vm3272_vm9, %v13213_v47  ;;  %v6936_v8 = vrot.slane %v6935_v56, 4  ;;  %v12987_v16 = vrot.slane %v4215_v11, 9  ;;  %v4412_v31 = vrot.slane %v15608_v53, 5  ;;  %v7710_v12 = vrot.slane %v15609_v3, 5  ;;  %v4219_v35 = vld [vmem:[#allocation2 + $0x20] sm:$0xe] }
 0x33e   :  { %v12988_v43 = vrot.slane %v4216_v36, 9  ;;  %v4416_v41 = vrot.slane %v15610_v45, 5  ;;  %v13313_v51 = vcombine.low %v7699_v60, %v7703_v22  ;;  %v17497_v23 = vsel %vm17479_vm12, %v13251_v17, %v7706_v39  ;;  %v15613_v15 = vld [vmem:[#allocation2 + $0x2c] sm:$0x1]  ;;  %v15614_v38 = vld [vmem:[#allocation2 + $0x1c] sm:$0x1] }
 0x33f   :  { %v6941_v10 = vsel %vm16444_vm4, %v6936_v8, %v6940_v0  ;;  %v4413_v20 = vsel %vm17479_vm12, %v12987_v16, %v4412_v31  ;;  %v13254_v7 = vrot.slane %v7509_v48, 9  ;;  %v7718_v52 = vrot.slane %v15611_v2, 5  ;;  %v4220_v61 = vld [vmem:[#allocation2 + $0x28] sm:$0xe]  ;;  %v7512_v62 = vld [vmem:[#allocation2 + $0x58] sm:$0xe] }
 0x340   :  { %v13214_v29 = vcombine.low %v6927_v63, %v6941_v10  ;;  %v4417_v46 = vsel %vm17479_vm12, %v12988_v43, %v4416_v41  ;;  %v12989_v44 = vrot.slane %v4217_v42, 9  ;;  %v4420_v30 = vrot.slane %v15612_v49, 5  ;;  %v15615_v33 = vld [vmem:[#allocation2 + $0x44] sm:$0x1]  ;;  %v7513_v28 = vld [vmem:[#allocation2 + $0x60] sm:$0xe] }
 0x341   :  { %v13051_v58 = vcombine.low %v4413_v20, %v4417_v46  ;;  %v12990_v50 = vrot.slane %v4218_v59, 9  ;;  %v7711_v4 = vsel %vm17479_vm12, %v13252_v5, %v7710_v12  ;;  %v13253_v6 = vrot.slane %v7508_v21, 9  ;;  %v15616_v27 = vld [vmem:[#allocation2 + $0x24] sm:$0x1]  ;;  %v15617_v40 = vld [vmem:[#allocation2 + $0x3c] sm:$0x1] }
 0x342   :  { %14540 = vmatmul.mubr.msk.bf16.gmra.mrb[36].mxu1 %vm3272_vm9, %v13214_v29  ;;  %v7714_v24 = vrot.slane %v15613_v15, 5  ;;  %v4424_v18 = vrot.slane %v15614_v38, 5  ;;  %v7719_v37 = vsel %vm17479_vm12, %v13254_v7, %v7718_v52  ;;  %v4421_v26 = vsel %vm17479_vm12, %v12989_v44, %v4420_v30  ;;  %v15618_v63 = vld [vmem:[#allocation2 + $0x2c] sm:$0x1]  ;;  %v4221_v36 = vld [vmem:[#allocation2 + $0x30] sm:$0xe] }
 0x343   :  { %14547 = vmatprep.mubr.msk.bf16.mxu1 %vm3272_vm9, %v13313_v51  ;;  %14343 = vmatprep.mubr.msk.bf16.mxu0 %vm3272_vm9, %v13051_v58  ;;  %v13255_v34 = vrot.slane %v7510_v1, 9  ;;  %v13256_v13 = vrot.slane %v7511_v32, 9  ;;  %v7726_v47 = vrot.slane %v15615_v33, 5  ;;  %v12991_v56 = vrot.slane %v4219_v35, 9  ;;  %v4222_v39 = vld [vmem:[#allocation2 + $0x38] sm:$0xe] }
 0x344   :  { %v4425_v54 = vsel %vm17479_vm12, %v12990_v50, %v4424_v18  ;;  %v4428_v57 = vrot.slane %v15616_v27, 5  ;;  %v7722_v19 = vrot.slane %v15617_v40, 5  ;;  %v12992_v11 = vrot.slane %v4220_v61, 9  ;;  %v15619_v60 = vld [vmem:[#allocation2 + $0x5c] sm:$0x1]  ;;  %v15483_v48 = vld [vmem:[#allocation8 + $0x68] sm:$0xff]  }
 0x345   :  { %v13052_v25 = vcombine.low %v4421_v26, %v4425_v54  ;;  %v4432_v0 = vrot.slane %v15618_v63, 5  ;;  %v13314_v8 = vcombine.low %v17497_v23, %v7711_v4  ;;  %v7715_v22 = vsel %vm17479_vm12, %v13253_v6, %v7714_v24  ;;  %v15620_v53 = vld [vmem:[#allocation2 + $0x64] sm:$0x1]  ;;  %v15621_v43 = vld [vmem:[#allocation2 + $0x34] sm:$0x1]  ;;  %v15624_v2 = vld [vmem:[#allocation8 + $0x38] sm:$0xff]  }
 0x346   :  { %v17517_v17 = vsel %vm17479_vm12, %v13256_v13, %v7726_v47  ;;  %v13257_v9 = vrot.slane %v7512_v62, 9  ;;  %v7730_v5 = vrot.slane %v15619_v60, 5  ;;  %v13258_v16 = vrot.slane %v7513_v28, 9  ;;  %v4223_v41 = vld [vmem:[#allocation2 + $0x50] sm:$0xe]  ;;  %v15625_v52 = vld [vmem:[#allocation8 + $0x60] sm:$0xff]  }
 0x347   :  { %14344 = vmatmul.mubr.msk.bf16.vlgmr.msra.gmra.mrb[64].mxu0 %vm3272_vm9, %v13052_v25  ;;  %v4433_v42 = vsel %vm17479_vm12, %v12992_v11, %v4432_v0  ;;  %v7734_v31 = vrot.slane %v15620_v53, 5  ;;  %v13315_v10 = vcombine.low %v7715_v22, %v7719_v37  ;;  %v4429_v3 = vsel %vm17479_vm12, %v12991_v56, %v4428_v57  ;;  %v15622_v59 = vld [vmem:[#allocation8 + $0x30] sm:$0xff]   ;;  %v15623_v21 = vld [vmem:[#allocation2 + $0x3c] sm:$0x1]  ;;  %v17527_v46 = vld [vmem:[#allocation2 + $0x68] sm:$0xe] }
 0x348   :  { %v12993_v12 = vrot.slane %v4221_v36, 9  ;;  %v4436_v45 = vrot.slane %v15621_v43, 5  ;;  %14408 = vmatpush3.bf16.msra.mxu0 %v15622_v59  ;;  %v7723_v29 = vsel %vm17479_vm12, %v13255_v34, %v7722_v19  ;;  %v13053_v51 = vcombine.low %v4429_v3, %v4433_v42  ;;  %v4224_v7 = vld [vmem:[#allocation2 + $0x58] sm:$0xe]  ;;  %v7515_v58 = vld [vmem:[#allocation2 + $0x70] sm:$0xe] }
 0x349   :  { %v12994_v20 = vrot.slane %v4222_v39, 9  ;;  %v4440_v23 = vrot.slane %v15623_v21, 5  ;;  %14409 = vmatprep.subr.bf16.mxu0 %v15624_v2  ;;  %v13316_v1 = vcombine.low %v7723_v29, %v17517_v17  ;;  %v7731_v44 = vsel %vm17479_vm12, %v13257_v9, %v7730_v5  ;;  %v15626_v50 = vld [vmem:[#allocation2 + $0x54] sm:$0x1]  ;;  %v7516_v4 = vld [vmem:[#allocation2 + $0x78] sm:$0xe] }
 0x34a   :  { %14548 = vmatmul.mubr.msk.bf16.vlgmr.msra.gmra.mrb[40].mxu1 %vm3272_vm9, %v13314_v8  ;;  %v4437_v32 = vsel %vm17479_vm12, %v12993_v12, %v4436_v45  ;;  %14347 = vmatprep.mubr.msk.bf16.mxu0 %vm3272_vm9, %v13053_v51  ;;  %v7735_v49 = vsel %vm17479_vm12, %v13258_v16, %v7734_v31  ;;  %v12995_v30 = vrot.slane %v4223_v41, 9  ;;  %v4444_v35 = vrot.slane %v15626_v50, 5  ;;  %v15485_v6 = vld [vmem:[#allocation8 + $0x70] sm:$0xff]   ;;  %v15627_v18 = vld [vmem:[#allocation2 + $0x5c] sm:$0x1] }
 0x34b   :  { %14612 = vmatpush3.bf16.msra.mxu1 %v15625_v52  ;;  %14551 = vmatprep.mubr.msk.bf16.mxu1 %vm3272_vm9, %v13315_v10  ;;  %v4441_v15 = vsel %vm17479_vm12, %v12994_v20, %v4440_v23  ;;  %v13259_v24 = vrot.slane %v17527_v46, 9  ;;  %v12996_v38 = vrot.slane %v4224_v7, 9  ;;  %v4448_v61 = vrot.slane %v15627_v18, 5  ;;  %v4225_v37 = vld [vmem:[#allocation2 + $0x60] sm:$0xe] }
 0x34c   :  { %14613 = vmatprep.subr.bf16.mxu1 %v15483_v48  ;;  %14410 = vmatpush3.bf16.msra.mxu0 %v15624_v2  ;;  %v13054_v26 = vcombine.low %v4437_v32, %v4441_v15  ;;  %v13260_v34 = vrot.slane %v7515_v58, 9  ;;  %v15628_v13 = vld [vmem:[#allocation2 + $0x74] sm:$0x1]  ;;  %v4445_v54 = vsel %vm17479_vm12, %v12995_v30, %v4444_v35  ;;  %v7517_v33 = vld [vmem:[#allocation2 + $0x80] sm:$0xe]  ;;  %v13317_v56 = vcombine.low %v7731_v44, %v7735_v49 }
 0x34d   :  { %v7742_v62 = vrot.slane %v15628_v13, 5  ;;  %v4226_v47 = vld [vmem:[#allocation2 + $0x68] sm:$0xe]  ;;  %v15629_v27 = vld [vmem:[#allocation2 + $0x6c] sm:$0x1]  ;;  %v4449_v28 = vsel %vm17479_vm12, %v12996_v38, %v4448_v61  ;;  %v13261_v25 = vrot.slane %v7516_v4, 9 }
 0x34e   :  { %v7738_v57 = vrot.slane %v15629_v27, 5  ;;  %v13055_v40 = vcombine.low %v4445_v54, %v4449_v28  ;;  %v15630_v19 = vld [vmem:[#allocation2 + $0x7c] sm:$0x1]  ;;  %v12997_v63 = vrot.slane %v4225_v37, 9  ;;  %v15631_v0 = vld [vmem:[#allocation2 + $0x64] sm:$0x1] }
 0x34f   :  { %14614 = vmatpush3.bf16.msra.mxu1 %v15483_v48  ;;  %14348 = vmatmul.mubr.msk.bf16.gmra.mrb[68].mxu0 %vm3272_vm9, %v13054_v26  ;;  %v7746_v11 = vrot.slane %v15630_v19, 5  ;;  %v4452_v36 = vrot.slane %v15631_v0, 5  ;;  %v4227_v8 = vld [vmem:[#allocation2 + $0x70] sm:$0xe]  ;;  %v13262_v22 = vrot.slane %v7517_v33, 9  ;;  %v12998_v39 = vrot.slane %v4226_v47, 9 }
 0x350   :  { %14679 = vmatprep.subr.bf16.mxu1 %v15485_v6  ;;  %v15632_v17 = vld [vmem:[#allocation2 + $0x84] sm:$0x1]  ;;  %v15633_v42 = vld [vmem:[#allocation2 + $0x6c] sm:$0x1]  ;;  %v4228_v5 = vld [vmem:[#allocation2 + $0x78] sm:$0xe]  ;;  %v7743_v16 = vsel %vm17479_vm12, %v13260_v34, %v7742_v62  ;;  %14351 = vmatprep.mubr.msk.bf16.mxu0 %vm3272_vm9, %v13055_v40  ;;  %v7739_v12 = vsel %vm17479_vm12, %v13259_v24, %v7738_v57 }
 0x351   :  { %v7750_v9 = vrot.slane %v15632_v17, 5  ;;  %v4456_v60 = vrot.slane %v15633_v42, 5  ;;  %v4453_v53 = vsel %vm17479_vm12, %v12997_v63, %v4452_v36  ;;  %v7519_v31 = vld [vmem:[#allocation2 + $0x90] sm:$0xe]  ;;  %v12999_v48 = vrot.slane %v4227_v8, 9 }
 0x352   :  { %14552 = vmatmul.mubr.msk.bf16.gmra.mrb[44].mxu1 %vm3272_vm9, %v13316_v1  ;;  %v15634_v10 = vld [vmem:[#allocation2 + $0x74] sm:$0x1]  ;;  %v13000_v43 = vrot.slane %v4228_v5, 9  ;;  %v15635_v45 = vld [vmem:[#allocation2 + $0x7c] sm:$0x1]  ;;  %v13318_v29 = vcombine.low %v7739_v12, %v7743_v16  ;;  %v7747_v51 = vsel %vm17479_vm12, %v13261_v25, %v7746_v11  ;;  %v13264_v52 = vrot.slane %v7519_v31, 9 }
 0x353   :  { %14555 = vmatprep.mubr.msk.bf16.mxu1 %vm3272_vm9, %v13317_v56  ;;  %v4460_v3 = vrot.slane %v15634_v10, 5  ;;  %v4464_v41 = vrot.slane %v15635_v45, 5  ;;  %v4229_v59 = vld [vmem:[#allocation2 + $0x80] sm:$0xe]  ;;  %v7751_v20 = vsel %vm17479_vm12, %v13262_v22, %v7750_v9  ;;  %v4457_v21 = vsel %vm17479_vm12, %v12998_v39, %v4456_v60  ;;  %v7521_v23 = vld [vmem:[#allocation2 + $0xb0] sm:$0xe] }
 0x354   :  { %v4230_v46 = vld [vmem:[#allocation2 + $0x88] sm:$0xe]  ;;  %v13056_v7 = vcombine.low %v4453_v53, %v4457_v21  ;;  %v15636_v44 = vld [vmem:[#allocation2 + $0x94] sm:$0x1]  ;;  %v13001_v50 = vrot.slane %v4229_v59, 9  ;;  %v13266_v15 = vrot.slane %v7521_v23, 9  ;;  %v13319_v34 = vcombine.low %v7747_v51, %v7751_v20 }
 0x355   :  { %v7518_v2 = vld [vmem:[#allocation2 + $0x88] sm:$0xe]  ;;  %v4461_v1 = vsel %vm17479_vm12, %v12999_v48, %v4460_v3  ;;  %v4465_v32 = vsel %vm17479_vm12, %v13000_v43, %v4464_v41  ;;  %v7758_v49 = vrot.slane %v15636_v44, 5  ;;  %v15637_v35 = vld [vmem:[#allocation2 + $0x84] sm:$0x1]  ;;  %v13002_v18 = vrot.slane %v4230_v46, 9 }
 0x356   :  { %v7520_v58 = vld [vmem:[#allocation2 + $0xa8] sm:$0xe]  ;;  %v13057_v30 = vcombine.low %v4461_v1, %v4465_v32  ;;  %v4468_v4 = vrot.slane %v15637_v35, 5  ;;  %v4231_v6 = vld [vmem:[#allocation2 + $0xa0] sm:$0xe]  ;;  %v13263_v13 = vrot.slane %v7518_v2, 9 }
 0x357   :  { %14352 = vmatmul.mubr.msk.bf16.gmra.mrb[72].mxu0 %vm3272_vm9, %v13056_v7  ;;  %v15638_v24 = vld [vmem:[#allocation2 + $0xb4] sm:$0x1]  ;;  %v15639_v61 = vld [vmem:[#allocation2 + $0x8c] sm:$0x1]  ;;  %v4232_v26 = vld [vmem:[#allocation2 + $0xa8] sm:$0xe]  ;;  %v7759_v19 = vsel %vm17479_vm12, %v13264_v52, %v7758_v49 }
 0x358   :  { %v7766_v38 = vrot.slane %v15638_v24, 5  ;;  %v4472_v37 = vrot.slane %v15639_v61, 5  ;;  %v15640_v62 = vld [vmem:[#allocation2 + $0x8c] sm:$0x1]  ;;  %14355 = vmatprep.mubr.msk.bf16.mxu0 %vm3272_vm9, %v13057_v30  ;;  %v7523_v33 = vld [vmem:[#allocation2 + $0xc0] sm:$0xe]  ;;  %v4469_v11 = vsel %vm17479_vm12, %v13001_v50, %v4468_v4 }
 0x359   :  { %v7754_v54 = vrot.slane %v15640_v62, 5  ;;  %v13265_v47 = vrot.slane %v7520_v58, 9  ;;  %v15641_v56 = vld [vmem:[#allocation2 + $0xac] sm:$0x1]  ;;  %v13003_v57 = vrot.slane %v4231_v6, 9  ;;  %v13004_v0 = vrot.slane %v4232_v26, 9 }
 0x35a   :  { %14556 = vmatmul.mubr.msk.bf16.gmra.mrb[48].mxu1 %vm3272_vm9, %v13318_v29  ;;  %v7762_v27 = vrot.slane %v15641_v56, 5  ;;  %v15642_v28 = vld [vmem:[#allocation2 + $0xa4] sm:$0x1]  ;;  %v7525_v40 = vld [vmem:[#allocation2 + $0xd0] sm:$0xe]  ;;  %v7767_v22 = vsel %vm17479_vm12, %v13266_v15, %v7766_v38  ;;  %v4473_v17 = vsel %vm17479_vm12, %v13002_v18, %v4472_v37  ;;  %v13268_v9 = vrot.slane %v7523_v33, 9 }
 0x35b   :  { %v4476_v25 = vrot.slane %v15642_v28, 5  ;;  %14559 = vmatprep.mubr.msk.bf16.mxu1 %vm3272_vm9, %v13319_v34  ;;  %v7522_v63 = vld [vmem:[#allocation2 + $0xb8] sm:$0xe]  ;;  %v15643_v36 = vld [vmem:[#allocation2 + $0xac] sm:$0x1]  ;;  %v13270_v31 = vrot.slane %v7525_v40, 9  ;;  %v7755_v3 = vsel %vm17479_vm12, %v13263_v13, %v7754_v54  ;;  %v13058_v43 = vcombine.low %v4469_v11, %v4473_v17 }
 0x35c   :  { %v4480_v8 = vrot.slane %v15643_v36, 5  ;;  %v4233_v42 = vld [vmem:[#allocation2 + $0xb0] sm:$0xe]  ;;  %v15644_v60 = vld [vmem:[#allocation2 + $0xc4] sm:$0x1]  ;;  %v7763_v12 = vsel %vm17479_vm12, %v13265_v47, %v7762_v27  ;;  %v13267_v45 = vrot.slane %v7522_v63, 9  ;;  %v13320_v2 = vcombine.low %v7755_v3, %v7759_v19 }
 0x35d   :  { %v4477_v39 = vsel %vm17479_vm12, %v13003_v57, %v4476_v25  ;;  %v7774_v5 = vrot.slane %v15644_v60, 5  ;;  %v7524_v53 = vld [vmem:[#allocation2 + $0xc8] sm:$0xe]  ;;  %v15645_v48 = vld [vmem:[#allocation2 + $0xd4] sm:$0x1]  ;;  %v13005_v21 = vrot.slane %v4233_v42, 9  ;;  %v13321_v52 = vcombine.low %v7763_v12, %v7767_v22 }
 0x35e   :  { %v4481_v16 = vsel %vm17479_vm12, %v13004_v0, %v4480_v8  ;;  %v7782_v10 = vrot.slane %v15645_v48, 5  ;;  %v4234_v41 = vld [vmem:[#allocation2 + $0xb8] sm:$0xe]  ;;  %v4235_v59 = vld [vmem:[#allocation2 + $0xc0] sm:$0xe]  ;;  %v13269_v1 = vrot.slane %v7524_v53, 9 }
 0x35f   :  { %v15646_v29 = vld [vmem:[#allocation2 + $0xbc] sm:$0x1]  ;;  %v13059_v20 = vcombine.low %v4477_v39, %v4481_v16  ;;  %v15647_v23 = vld [vmem:[#allocation2 + $0xb4] sm:$0x1]  ;;  %v4236_v7 = vld [vmem:[#allocation2 + $0xc8] sm:$0xe]  ;;  %14356 = vmatmul.mubr.msk.bf16.gmra.mrb[76].mxu0 %vm3272_vm9, %v13058_v43  ;;  %v7775_v49 = vsel %vm17479_vm12, %v13268_v9, %v7774_v5 }
 0x360   :  { %v7770_v51 = vrot.slane %v15646_v29, 5  ;;  %v4484_v46 = vrot.slane %v15647_v23, 5  ;;  %v15648_v32 = vld [vmem:[#allocation2 + $0xcc] sm:$0x1]  ;;  %v7527_v44 = vld [vmem:[#allocation2 + $0xe0] sm:$0xe]  ;;  %v17591_v30 = vsel %vm17479_vm12, %v13270_v31, %v7782_v10 }
 0x361   :  { %v7778_v58 = vrot.slane %v15648_v32, 5  ;;  %14359 = vmatprep.mubr.msk.bf16.mxu0 %vm3272_vm9, %v13059_v20  ;;  %v13006_v50 = vrot.slane %v4234_v41, 9  ;;  %v15649_v35 = vld [vmem:[#allocation2 + $0xbc] sm:$0x1]  ;;  %v7526_v6 = vld [vmem:[#allocation2 + $0xd8] sm:$0xe] }
 0x362   :  { %v4488_v4 = vrot.slane %v15649_v35, 5  ;;  %14560 = vmatmul.mubr.msk.bf16.gmra.mrb[52].mxu1 %vm3272_vm9, %v13320_v2  ;;  %v13007_v15 = vrot.slane %v4235_v59, 9  ;;  %v15650_v24 = vld [vmem:[#allocation2 + $0xc4] sm:$0x1]  ;;  %v13008_v18 = vrot.slane %v4236_v7, 9  ;;  %v7771_v26 = vsel %vm17479_vm12, %v13267_v45, %v7770_v51 }
 0x363   :  { %v4492_v38 = vrot.slane %v15650_v24, 5  ;;  %v15651_v61 = vld [vmem:[#allocation2 + $0xcc] sm:$0x1]  ;;  %14563 = vmatprep.mubr.msk.bf16.mxu1 %vm3272_vm9, %v13321_v52  ;;  %v4485_v34 = vsel %vm17479_vm12, %v13005_v21, %v4484_v46  ;;  %v13272_v13 = vrot.slane %v7527_v44, 9  ;;  %v15652_v62 = vld [vmem:[#allocation2 + $0xe4] sm:$0x1]  ;;  %v13322_v47 = vcombine.low %v7771_v26, %v7775_v49 }
 0x364   :  { %v4496_v37 = vrot.slane %v15651_v61, 5  ;;  %v7790_v54 = vrot.slane %v15652_v62, 5  ;;  %v4237_v33 = vld [vmem:[#allocation2 + $0xd0] sm:$0xe]  ;;  %v7779_v56 = vsel %vm17479_vm12, %v13269_v1, %v7778_v58  ;;  %v7528_v57 = vld [vmem:[#allocation2 + $0xf8] sm:$0xe]  ;;  %v4489_v25 = vsel %vm17479_vm12, %v13006_v50, %v4488_v4 }
 0x365   :  { %v13323_v28 = vcombine.low %v7779_v56, %v17591_v30  ;;  %v13271_v40 = vrot.slane %v7526_v6, 9  ;;  %v15653_v19 = vld [vmem:[#allocation2 + $0xdc] sm:$0x1]  ;;  %v4238_v63 = vld [vmem:[#allocation2 + $0xd8] sm:$0xe]  ;;  %v13060_v36 = vcombine.low %v4485_v34, %v4489_v25  ;;  %v4493_v8 = vsel %vm17479_vm12, %v13007_v15, %v4492_v38 }
 0x366   :  { %v4497_v27 = vsel %vm17479_vm12, %v13008_v18, %v4496_v37  ;;  %v7786_v11 = vrot.slane %v15653_v19, 5  ;;  %v4239_v0 = vld [vmem:[#allocation2 + $0xf0] sm:$0xe]  ;;  %v7529_v22 = vld [vmem:[#allocation2 + $0x100] sm:$0xe]  ;;  %v13009_v17 = vrot.slane %v4237_v33, 9  ;;  %v17610_v60 = vsel %vm17479_vm12, %v13272_v13, %v7790_v54 }
 0x367   :  { %v15654_v9 = vld [vmem:[#allocation2 + $0xd4] sm:$0x1]  ;;  %v4240_v42 = vld [vmem:[#allocation2 + $0xf8] sm:$0xe]  ;;  %v13061_v5 = vcombine.low %v4493_v8, %v4497_v27  ;;  %v13273_v16 = vrot.slane %v7528_v57, 9  ;;  %14360 = vmatmul.mubr.msk.bf16.gmra.mrb[80].mxu0 %vm3272_vm9, %v13060_v36  ;;  %v13010_v10 = vrot.slane %v4238_v63, 9 }
 0x368   :  { %v4500_v39 = vrot.slane %v15654_v9, 5  ;;  %v15655_v53 = vld [vmem:[#allocation2 + $0xfc] sm:$0x1]  ;;  %v7531_v48 = vld [vmem:[#allocation2 + $0x110] sm:$0xe]  ;;  %v13011_v43 = vrot.slane %v4239_v0, 9  ;;  %v7787_v46 = vsel %vm17479_vm12, %v13271_v40, %v7786_v11 }
 0x369   :  { %v7794_v31 = vrot.slane %v15655_v53, 5  ;;  %v15656_v3 = vld [vmem:[#allocation2 + $0xdc] sm:$0x1]  ;;  %v15657_v45 = vld [vmem:[#allocation2 + $0xf4] sm:$0x1]  ;;  %14363 = vmatprep.mubr.msk.bf16.mxu0 %vm3272_vm9, %v13061_v5  ;;  %v13274_v59 = vrot.slane %v7529_v22, 9  ;;  %v13324_v58 = vcombine.low %v7787_v46, %v17610_v60 }
 0x36a   :  { %v4504_v12 = vrot.slane %v15656_v3, 5  ;;  %v4508_v41 = vrot.slane %v15657_v45, 5  ;;  %v15658_v29 = vld [vmem:[#allocation2 + $0x104] sm:$0x1]  ;;  %v13012_v20 = vrot.slane %v4240_v42, 9  ;;  %14564 = vmatmul.mubr.msk.bf16.gmra.mrb[56].mxu1 %vm3272_vm9, %v13322_v47  ;;  %v4501_v7 = vsel %vm17479_vm12, %v13009_v17, %v4500_v39 }
 0x36b   :  { %v7798_v51 = vrot.slane %v15658_v29, 5  ;;  %v15659_v21 = vld [vmem:[#allocation2 + $0xfc] sm:$0x1]  ;;  %v7530_v2 = vld [vmem:[#allocation2 + $0x108] sm:$0xe]  ;;  %v13276_v52 = vrot.slane %v7531_v48, 9  ;;  %14567 = vmatprep.mubr.msk.bf16.mxu1 %vm3272_vm9, %v13323_v28  ;;  %v7795_v30 = vsel %vm17479_vm12, %v13273_v16, %v7794_v31 }
 0x36c   :  { %v4512_v23 = vrot.slane %v15659_v21, 5  ;;  %v15660_v1 = vld [vmem:[#allocation2 + $0x114] sm:$0x1]  ;;  %v7532_v44 = vld [vmem:[#allocation2 + $0x118] sm:$0xe]  ;;  %v4505_v50 = vsel %vm17479_vm12, %v13010_v10, %v4504_v12  ;;  %v4509_v35 = vsel %vm17479_vm12, %v13011_v43, %v4508_v41  ;;  %v13275_v38 = vrot.slane %v7530_v2, 9 }
 0x36d   :  { %v7806_v32 = vrot.slane %v15660_v1, 5  ;;  %v4241_v49 = vld [vmem:[#allocation2 + $0x100] sm:$0xe]  ;;  %v7799_v15 = vsel %vm17479_vm12, %v13274_v59, %v7798_v51  ;;  %v13062_v24 = vcombine.low %v4501_v7, %v4505_v50  ;;  %v15661_v18 = vld [vmem:[#allocation2 + $0x10c] sm:$0x1]  ;;  %v13277_v13 = vrot.slane %v7532_v44, 9 }
 0x36e   :  { %v4513_v4 = vsel %vm17479_vm12, %v13012_v20, %v4512_v23  ;;  %v7533_v6 = vld [vmem:[#allocation2 + $0x120] sm:$0xe]  ;;  %v7802_v61 = vrot.slane %v15661_v18, 5  ;;  %v4242_v37 = vld [vmem:[#allocation2 + $0x108] sm:$0xe]  ;;  %v13013_v62 = vrot.slane %v4241_v49, 9  ;;  %v13325_v22 = vcombine.low %v7795_v30, %v7799_v15 }
 0x36f   :  { %v4244_v26 = vld [vmem:[#allocation2 + $0x118] sm:$0xe]  ;;  %v17633_v34 = vsel %vm17479_vm12, %v13276_v52, %v7806_v32  ;;  %v15662_v54 = vld [vmem:[#allocation2 + $0x104] sm:$0x1]  ;;  %v13063_v47 = vcombine.low %v4509_v35, %v4513_v4  ;;  %v15663_v56 = vld [vmem:[#allocation2 + $0x11c] sm:$0x1]  ;;  %14364 = vmatmul.mubr.msk.bf16.gmra.mrb[84].mxu0 %vm3272_vm9, %v13062_v24 }
 0x370   :  { %v4516_v33 = vrot.slane %v15662_v54, 5  ;;  %v7810_v27 = vrot.slane %v15663_v56, 5  ;;  %v13278_v57 = vrot.slane %v7533_v6, 9  ;;  %v15664_v28 = vld [vmem:[#allocation2 + $0x124] sm:$0x1]  ;;  %v13014_v19 = vrot.slane %v4242_v37, 9 }
 0x371   :  { %v7814_v25 = vrot.slane %v15664_v28, 5  ;;  %v4243_v40 = vld [vmem:[#allocation2 + $0x110] sm:$0xe]  ;;  %v15665_v11 = vld [vmem:[#allocation2 + $0x10c] sm:$0x1]  ;;  %v13016_v0 = vrot.slane %v4244_v26, 9  ;;  %14367 = vmatprep.mubr.msk.bf16.mxu0 %vm3272_vm9, %v13063_v47  ;;  %v7803_v9 = vsel %vm17479_vm12, %v13275_v38, %v7802_v61 }
 0x372   :  { %v4520_v63 = vrot.slane %v15665_v11, 5  ;;  %v15666_v36 = vld [vmem:[#allocation2 + $0x11c] sm:$0x1]  ;;  %v7534_v17 = vld [vmem:[#allocation2 + $0x128] sm:$0xe]  ;;  %14568 = vmatmul.mubr.msk.bf16.gmra.mrb[60].mxu1 %vm3272_vm9, %v13324_v58  ;;  %v4517_v39 = vsel %vm17479_vm12, %v13013_v62, %v4516_v33  ;;  %v13015_v60 = vrot.slane %v4243_v40, 9  ;;  %v13326_v53 = vcombine.low %v7803_v9, %v17633_v34 }
 0x373   :  { %v4528_v8 = vrot.slane %v15666_v36, 5  ;;  %v7535_v42 = vld [vmem:[#allocation2 + $0x130] sm:$0xe]  ;;  %v15667_v5 = vld [vmem:[#allocation2 + $0x114] sm:$0x1]  ;;  %14571 = vmatprep.mubr.msk.bf16.mxu1 %vm3272_vm9, %v13325_v22  ;;  %v7811_v31 = vsel %vm17479_vm12, %v13277_v13, %v7810_v27  ;;  %v7815_v3 = vsel %vm17479_vm12, %v13278_v57, %v7814_v25  ;;  %v13279_v43 = vrot.slane %v7534_v17, 9 }
 0x374   :  { %v4524_v16 = vrot.slane %v15667_v5, 5  ;;  %v7536_v48 = vld [vmem:[#allocation2 + $0x148] sm:$0xe]  ;;  %v7537_v10 = vld [vmem:[#allocation2 + $0x150] sm:$0xe]  ;;  %v4521_v12 = vsel %vm17479_vm12, %v13014_v19, %v4520_v63  ;;  %v13280_v21 = vrot.slane %v7535_v42, 9  ;;  %v13327_v26 = vcombine.low %v7811_v31, %v7815_v3 }
 0x375   :  { %v4529_v45 = vsel %vm17479_vm12, %v13016_v0, %v4528_v8  ;;  %v4245_v41 = vld [vmem:[#allocation2 + $0x120] sm:$0xe]  ;;  %v13064_v29 = vcombine.low %v4517_v39, %v4521_v12  ;;  %v15668_v51 = vld [vmem:[#allocation2 + $0x12c] sm:$0x1]  ;;  %v15669_v23 = vld [vmem:[#allocation2 + $0x134] sm:$0x1] }
 0x376   :  { %v4247_v59 = vld [vmem:[#allocation2 + $0x140] sm:$0xe]  ;;  %v7818_v20 = vrot.slane %v15668_v51, 5  ;;  %v7822_v46 = vrot.slane %v15669_v23, 5  ;;  %v4248_v7 = vld [vmem:[#allocation2 + $0x148] sm:$0xe]  ;;  %v4525_v2 = vsel %vm17479_vm12, %v13015_v60, %v4524_v16 }
 0x377   :  { %v13281_v52 = vrot.slane %v7536_v48, 9  ;;  %v15670_v1 = vld [vmem:[#allocation2 + $0x14c] sm:$0x1]  ;;  %v13282_v58 = vrot.slane %v7537_v10, 9  ;;  %v4246_v44 = vld [vmem:[#allocation2 + $0x128] sm:$0xe]  ;;  %v13065_v49 = vcombine.low %v4525_v2, %v4529_v45  ;;  %14368 = vmatmul.mubr.msk.bf16.gmra.mrb[88].mxu0 %vm3272_vm9, %v13064_v29 }
 0x378   :  { %v7826_v32 = vrot.slane %v15670_v1, 5  ;;  %v15671_v30 = vld [vmem:[#allocation2 + $0x154] sm:$0x1]  ;;  %v13017_v35 = vrot.slane %v4245_v41, 9  ;;  %v15672_v4 = vld [vmem:[#allocation2 + $0x124] sm:$0x1]  ;;  %v7819_v47 = vsel %vm17479_vm12, %v13279_v43, %v7818_v20  ;;  %v7823_v56 = vsel %vm17479_vm12, %v13280_v21, %v7822_v46 }
 0x379   :  { %v7830_v50 = vrot.slane %v15671_v30, 5  ;;  %v4532_v6 = vrot.slane %v15672_v4, 5  ;;  %v13019_v15 = vrot.slane %v4247_v59, 9  ;;  %v15673_v24 = vld [vmem:[#allocation2 + $0x144] sm:$0x1]  ;;  %v13020_v18 = vrot.slane %v4248_v7, 9  ;;  %14371 = vmatprep.mubr.msk.bf16.mxu0 %vm3272_vm9, %v13065_v49 }
 0x37a   :  { %v4540_v38 = vrot.slane %v15673_v24, 5  ;;  %v15674_v61 = vld [vmem:[#allocation2 + $0x14c] sm:$0x1]  ;;  %v13018_v34 = vrot.slane %v4246_v44, 9  ;;  %v7539_v54 = vld [vmem:[#allocation2 + $0x160] sm:$0xe]  ;;  %14572 = vmatmul.mubr.msk.bf16.gmra.mrb[0].mxu1 %vm3272_vm9, %v13326_v53  ;;  %v7827_v25 = vsel %vm17479_vm12, %v13281_v52, %v7826_v32  ;;  %v13328_v60 = vcombine.low %v7819_v47, %v7823_v56 }
 0x37b   :  { %v4544_v37 = vrot.slane %v15674_v61, 5  ;;  %v15675_v13 = vld [vmem:[#allocation2 + $0x12c] sm:$0x1]  ;;  %v7541_v33 = vld [vmem:[#allocation2 + $0x170] sm:$0xe]  ;;  %14575 = vmatprep.mubr.msk.bf16.mxu1 %vm3272_vm9, %v13327_v26  ;;  %v7831_v27 = vsel %vm17479_vm12, %v13282_v58, %v7830_v50  ;;  %v4533_v57 = vsel %vm17479_vm12, %v13017_v35, %v4532_v6  ;;  %v13284_v40 = vrot.slane %v7539_v54, 9 }
 0x37c   :  { %v4536_v62 = vrot.slane %v15675_v13, 5  ;;  %v7538_v28 = vld [vmem:[#allocation2 + $0x158] sm:$0xe]  ;;  %v4541_v19 = vsel %vm17479_vm12, %v13019_v15, %v4540_v38  ;;  %v7540_v63 = vld [vmem:[#allocation2 + $0x168] sm:$0xe]  ;;  %v13286_v17 = vrot.slane %v7541_v33, 9  ;;  %v13329_v5 = vcombine.low %v7827_v25, %v7831_v27 }
 0x37d   :  { %v4545_v11 = vsel %vm17479_vm12, %v13020_v18, %v4544_v37  ;;  %v4249_v0 = vld [vmem:[#allocation2 + $0x150] sm:$0xe]  ;;  %v15676_v8 = vld [vmem:[#allocation2 + $0x164] sm:$0x1]  ;;  %v15677_v9 = vld [vmem:[#allocation2 + $0x174] sm:$0x1] }
 0x37e   :  { %v4537_v36 = vsel %vm17479_vm12, %v13018_v34, %v4536_v62  ;;  %v7838_v22 = vrot.slane %v15676_v8, 5  ;;  %v7846_v39 = vrot.slane %v15677_v9, 5  ;;  %v4252_v42 = vld [vmem:[#allocation2 + $0x168] sm:$0xe]  ;;  %v13283_v53 = vrot.slane %v7538_v28, 9 }
 0x37f   :  { %v13066_v16 = vcombine.low %v4533_v57, %v4537_v36  ;;  %v4250_v31 = vld [vmem:[#allocation2 + $0x158] sm:$0xe]  ;;  %v4251_v48 = vld [vmem:[#allocation2 + $0x160] sm:$0xe]  ;;  %v15678_v10 = vld [vmem:[#allocation2 + $0x15c] sm:$0x1]  ;;  %v13067_v12 = vcombine.low %v4541_v19, %v4545_v11 }
 0x380   :  { %v7834_v3 = vrot.slane %v15678_v10, 5  ;;  %v13021_v43 = vrot.slane %v4249_v0, 9  ;;  %v15679_v45 = vld [vmem:[#allocation2 + $0x154] sm:$0x1]  ;;  %v7543_v59 = vld [vmem:[#allocation2 + $0x180] sm:$0xe]  ;;  %v7839_v7 = vsel %vm17479_vm12, %v13284_v40, %v7838_v22  ;;  %v7847_v2 = vsel %vm17479_vm12, %v13286_v17, %v7846_v39 }
 0x381   :  { %v4548_v41 = vrot.slane %v15679_v45, 5  ;;  %14372 = vmatmul.mubr.msk.bf16.gmra.mrb[92].mxu0 %vm3272_vm9, %v13066_v16  ;;  %v13285_v29 = vrot.slane %v7540_v63, 9  ;;  %v15680_v51 = vld [vmem:[#allocation2 + $0x16c] sm:$0x1]  ;;  %v13024_v21 = vrot.slane %v4252_v42, 9  ;;  %v13022_v52 = vrot.slane %v4250_v31, 9 }
 0x382   :  { %v7842_v20 = vrot.slane %v15680_v51, 5  ;;  %v15681_v23 = vld [vmem:[#allocation2 + $0x16c] sm:$0x1]  ;;  %14375 = vmatprep.mubr.msk.bf16.mxu0 %vm3272_vm9, %v13067_v12  ;;  %v15682_v1 = vld [vmem:[#allocation2 + $0x15c] sm:$0x1]  ;;  %14576 = vmatmul.mubr.msk.bf16.gmra.mrb[4].mxu1 %vm3272_vm9, %v13328_v60  ;;  %v13288_v44 = vrot.slane %v7543_v59, 9  ;;  %v7835_v6 = vsel %vm17479_vm12, %v13283_v53, %v7834_v3 }
 0x383   :  { %v4560_v46 = vrot.slane %v15681_v23, 5  ;;  %v4552_v32 = vrot.slane %v15682_v1, 5  ;;  %v7542_v58 = vld [vmem:[#allocation2 + $0x178] sm:$0xe]  ;;  %v15683_v49 = vld [vmem:[#allocation2 + $0x184] sm:$0x1]  ;;  %14579 = vmatprep.mubr.msk.bf16.mxu1 %vm3272_vm9, %v13329_v5  ;;  %v4549_v15 = vsel %vm17479_vm12, %v13021_v43, %v4548_v41  ;;  %v13330_v38 = vcombine.low %v7835_v6, %v7839_v7 }
 0x384   :  { %v7854_v30 = vrot.slane %v15683_v49, 5  ;;  %v13023_v50 = vrot.slane %v4251_v48, 9  ;;  %v15684_v35 = vld [vmem:[#allocation2 + $0x164] sm:$0x1]  ;;  %v7544_v24 = vld [vmem:[#allocation2 + $0x198] sm:$0xe]  ;;  %v7843_v18 = vsel %vm17479_vm12, %v13285_v29, %v7842_v20 }
 0x385   :  { %v4556_v4 = vrot.slane %v15684_v35, 5  ;;  %v4561_v61 = vsel %vm17479_vm12, %v13024_v21, %v4560_v46  ;;  %v4253_v37 = vld [vmem:[#allocation2 + $0x170] sm:$0xe]  ;;  %v13331_v26 = vcombine.low %v7843_v18, %v7847_v2  ;;  %v4553_v34 = vsel %vm17479_vm12, %v13022_v52, %v4552_v32  ;;  %v15685_v62 = vld [vmem:[#allocation2 + $0x17c] sm:$0x1] }
 0x386   :  { %v13287_v13 = vrot.slane %v7542_v58, 9  ;;  %v7850_v54 = vrot.slane %v15685_v62, 5  ;;  %v4255_v33 = vld [vmem:[#allocation2 + $0x190] sm:$0xe]  ;;  %v4256_v47 = vld [vmem:[#allocation2 + $0x198] sm:$0xe]  ;;  %v13068_v56 = vcombine.low %v4549_v15, %v4553_v34  ;;  %v17694_v27 = vsel %vm17479_vm12, %v13288_v44, %v7854_v30 }
 0x387   :  { %v4557_v57 = vsel %vm17479_vm12, %v13023_v50, %v4556_v4  ;;  %v7545_v28 = vld [vmem:[#allocation2 + $0x1a0] sm:$0xe]  ;;  %v13289_v25 = vrot.slane %v7544_v24, 9  ;;  %v4254_v40 = vld [vmem:[#allocation2 + $0x178] sm:$0xe]  ;;  %v13025_v0 = vrot.slane %v4253_v37, 9 }
 0x388   :  { %v13069_v19 = vcombine.low %v4557_v57, %v4561_v61  ;;  %v15686_v11 = vld [vmem:[#allocation2 + $0x19c] sm:$0x1]  ;;  %v15687_v36 = vld [vmem:[#allocation2 + $0x174] sm:$0x1]  ;;  %v13027_v22 = vrot.slane %v4255_v33, 9  ;;  %v13028_v39 = vrot.slane %v4256_v47, 9  ;;  %v7851_v12 = vsel %vm17479_vm12, %v13287_v13, %v7850_v54 }
 0x389   :  { %v7858_v63 = vrot.slane %v15686_v11, 5  ;;  %v4564_v8 = vrot.slane %v15687_v36, 5  ;;  %14376 = vmatmul.mubr.msk.bf16.gmra.mrb[96].mxu0 %vm3272_vm9, %v13068_v56  ;;  %v15688_v17 = vld [vmem:[#allocation2 + $0x194] sm:$0x1]  ;;  %v15689_v42 = vld [vmem:[#allocation2 + $0x19c] sm:$0x1]  ;;  %v13332_v59 = vcombine.low %v7851_v12, %v17694_v27 }
 0x38a   :  { %v4572_v9 = vrot.slane %v15688_v17, 5  ;;  %v4576_v60 = vrot.slane %v15689_v42, 5  ;;  %14379 = vmatprep.mubr.msk.bf16.mxu0 %vm3272_vm9, %v13069_v19  ;;  %v13290_v5 = vrot.slane %v7545_v28, 9  ;;  %v15690_v16 = vld [vmem:[#allocation2 + $0x1a4] sm:$0x1]  ;;  %v13026_v31 = vrot.slane %v4254_v40, 9  ;;  %14580 = vmatmul.mubr.msk.bf16.gmra.mrb[8].mxu1 %vm3272_vm9, %v13330_v38 }
 0x38b   :  { %v7862_v53 = vrot.slane %v15690_v16, 5  ;;  %v15691_v48 = vld [vmem:[#allocation2 + $0x17c] sm:$0x1]  ;;  %v7547_v3 = vld [vmem:[#allocation2 + $0x1b0] sm:$0xe]  ;;  %14583 = vmatprep.mubr.msk.bf16.mxu1 %vm3272_vm9, %v13331_v26  ;;  %v4565_v43 = vsel %vm17479_vm12, %v13025_v0, %v4564_v8  ;;  %v7859_v29 = vsel %vm17479_vm12, %v13289_v25, %v7858_v63 }
 0x38c   :  { %v4568_v10 = vrot.slane %v15691_v48, 5  ;;  %v7546_v45 = vld [vmem:[#allocation2 + $0x1a8] sm:$0xe]  ;;  %v7549_v41 = vld [vmem:[#allocation2 + $0x1c0] sm:$0xe]  ;;  %v4573_v51 = vsel %vm17479_vm12, %v13027_v22, %v4572_v9  ;;  %v4577_v20 = vsel %vm17479_vm12, %v13028_v39, %v4576_v60  ;;  %v13292_v7 = vrot.slane %v7547_v3, 9 }
 0x38d   :  { %v4257_v21 = vld [vmem:[#allocation2 + $0x1a0] sm:$0xe]  ;;  %v7863_v23 = vsel %vm17479_vm12, %v13290_v5, %v7862_v53  ;;  %v15692_v2 = vld [vmem:[#allocation2 + $0x1b4] sm:$0x1]  ;;  %v7548_v1 = vld [vmem:[#allocation2 + $0x1b8] sm:$0xe]  ;;  %v13071_v15 = vcombine.low %v4573_v51, %v4577_v20 }
 0x38e   :  { %v4569_v46 = vsel %vm17479_vm12, %v13026_v31, %v4568_v10  ;;  %v7870_v52 = vrot.slane %v15692_v2, 5  ;;  %v4260_v32 = vld [vmem:[#allocation2 + $0x1b8] sm:$0xe]  ;;  %v13291_v44 = vrot.slane %v7546_v45, 9  ;;  %v13294_v49 = vrot.slane %v7549_v41, 9 }
 0x38f   :  { %v13070_v58 = vcombine.low %v4565_v43, %v4569_v46  ;;  %v15693_v30 = vld [vmem:[#allocation2 + $0x1c4] sm:$0x1]  ;;  %v4258_v35 = vld [vmem:[#allocation2 + $0x1a8] sm:$0xe]  ;;  %v15694_v4 = vld [vmem:[#allocation2 + $0x1ac] sm:$0x1]  ;;  %v13333_v33 = vcombine.low %v7859_v29, %v7863_v23 }
 0x390   :  { %v7878_v50 = vrot.slane %v15693_v30, 5  ;;  %v7866_v6 = vrot.slane %v15694_v4, 5  ;;  %v13029_v24 = vrot.slane %v4257_v21, 9  ;;  %v15695_v38 = vld [vmem:[#allocation2 + $0x1a4] sm:$0x1]  ;;  %v13293_v37 = vrot.slane %v7548_v1, 9 }
 0x391   :  { %v4580_v18 = vrot.slane %v15695_v38, 5  ;;  %v4259_v61 = vld [vmem:[#allocation2 + $0x1b0] sm:$0xe]  ;;  %14380 = vmatmul.mubr.msk.bf16.gmra.mrb[100].mxu0 %vm3272_vm9, %v13070_v58  ;;  %v15696_v26 = vld [vmem:[#allocation2 + $0x1bc] sm:$0x1]  ;;  %v13032_v13 = vrot.slane %v4260_v32, 9  ;;  %v7871_v47 = vsel %vm17479_vm12, %v13292_v7, %v7870_v52 }
 0x392   :  { %v7874_v34 = vrot.slane %v15696_v26, 5  ;;  %v15697_v62 = vld [vmem:[#allocation2 + $0x1bc] sm:$0x1]  ;;  %14383 = vmatprep.mubr.msk.bf16.mxu0 %vm3272_vm9, %v13071_v15  ;;  %v13030_v56 = vrot.slane %v4258_v35, 9  ;;  %v15698_v27 = vld [vmem:[#allocation2 + $0x1ac] sm:$0x1]  ;;  %14584 = vmatmul.mubr.msk.bf16.gmra.mrb[12].mxu1 %vm3272_vm9, %v13332_v59  ;;  %v7879_v25 = vsel %vm17479_vm12, %v13294_v49, %v7878_v50  ;;  %v7867_v0 = vsel %vm17479_vm12, %v13291_v44, %v7866_v6 }
 0x393   :  { %v4592_v54 = vrot.slane %v15697_v62, 5  ;;  %v4584_v57 = vrot.slane %v15698_v27, 5  ;;  %v7550_v28 = vld [vmem:[#allocation2 + $0x1c8] sm:$0xe]  ;;  %v7551_v40 = vld [vmem:[#allocation2 + $0x1d0] sm:$0xe]  ;;  %14587 = vmatprep.mubr.msk.bf16.mxu1 %vm3272_vm9, %v13333_v33  ;;  %v4581_v36 = vsel %vm17479_vm12, %v13029_v24, %v4580_v18  ;;  %v13334_v22 = vcombine.low %v7867_v0, %v7871_v47 }
 0x394   :  { %v13031_v19 = vrot.slane %v4259_v61, 9  ;;  %v15699_v11 = vld [vmem:[#allocation2 + $0x1b4] sm:$0x1]  ;;  %v7553_v8 = vld [vmem:[#allocation2 + $0x1f0] sm:$0xe]  ;;  %v7875_v17 = vsel %vm17479_vm12, %v13293_v37, %v7874_v34  ;;  %v13295_v9 = vrot.slane %v7550_v28, 9 }
 0x395   :  { %v4588_v63 = vrot.slane %v15699_v11, 5  ;;  %v4593_v39 = vsel %vm17479_vm12, %v13032_v13, %v4592_v54  ;;  %v4261_v42 = vld [vmem:[#allocation2 + $0x1c0] sm:$0xe]  ;;  %v13335_v60 = vcombine.low %v7875_v17, %v7879_v25  ;;  %v4585_v5 = vsel %vm17479_vm12, %v13030_v56, %v4584_v57  ;;  %v15700_v16 = vld [vmem:[#allocation2 + $0x1cc] sm:$0x1] }
 0x396   :  { %v7882_v53 = vrot.slane %v15700_v16, 5  ;;  %v13296_v31 = vrot.slane %v7551_v40, 9  ;;  %v4263_v48 = vld [vmem:[#allocation2 + $0x1e0] sm:$0xe]  ;;  %v4264_v10 = vld [vmem:[#allocation2 + $0x1e8] sm:$0xe]  ;;  %v13072_v3 = vcombine.low %v4581_v36, %v4585_v5 }
 0x397   :  { %v15701_v12 = vld [vmem:[#allocation2 + $0x1d4] sm:$0x1]  ;;  %v4589_v45 = vsel %vm17479_vm12, %v13031_v19, %v4588_v63  ;;  %v7552_v41 = vld [vmem:[#allocation2 + $0x1e8] sm:$0xe]  ;;  %v13298_v59 = vrot.slane %v7553_v8, 9  ;;  %v13033_v23 = vrot.slane %v4261_v42, 9 }
 0x398   :  { %v7886_v43 = vrot.slane %v15701_v12, 5  ;;  %v4262_v29 = vld [vmem:[#allocation2 + $0x1c8] sm:$0xe]  ;;  %v13073_v51 = vcombine.low %v4589_v45, %v4593_v39  ;;  %v15702_v20 = vld [vmem:[#allocation2 + $0x1f4] sm:$0x1]  ;;  %v13035_v52 = vrot.slane %v4263_v48, 9  ;;  %v7883_v13 = vsel %vm17479_vm12, %v13295_v9, %v7882_v53 }
 0x399   :  { %v7894_v21 = vrot.slane %v15702_v20, 5  ;;  %v15703_v46 = vld [vmem:[#allocation2 + $0x1c4] sm:$0x1]  ;;  %14384 = vmatmul.mubr.msk.bf16.gmra.mrb[104].mxu0 %vm3272_vm9, %v13072_v3  ;;  %v7555_v2 = vld [vmem:[#allocation2 + $0x200] sm:$0xe]  ;;  %v13036_v58 = vrot.slane %v4264_v10, 9 }
 0x39a   :  { %v4596_v7 = vrot.slane %v15703_v46, 5  ;;  %v15704_v1 = vld [vmem:[#allocation2 + $0x1e4] sm:$0x1]  ;;  %v15705_v44 = vld [vmem:[#allocation2 + $0x1ec] sm:$0x1]  ;;  %14387 = vmatprep.mubr.msk.bf16.mxu0 %vm3272_vm9, %v13073_v51  ;;  %v13297_v30 = vrot.slane %v7552_v41, 9  ;;  %14588 = vmatmul.mubr.msk.bf16.gmra.mrb[16].mxu1 %vm3272_vm9, %v13334_v22  ;;  %v7887_v24 = vsel %vm17479_vm12, %v13296_v31, %v7886_v43 }
 0x39b   :  { %v4604_v32 = vrot.slane %v15704_v1, 5  ;;  %v4608_v49 = vrot.slane %v15705_v44, 5  ;;  %v15706_v50 = vld [vmem:[#allocation2 + $0x1ec] sm:$0x1]  ;;  %v13034_v4 = vrot.slane %v4262_v29, 9  ;;  %14591 = vmatprep.mubr.msk.bf16.mxu1 %vm3272_vm9, %v13335_v60  ;;  %v7895_v38 = vsel %vm17479_vm12, %v13298_v59, %v7894_v21 }
 0x39c   :  { %v7890_v35 = vrot.slane %v15706_v50, 5  ;;  %v15707_v6 = vld [vmem:[#allocation2 + $0x1cc] sm:$0x1]  ;;  %v4597_v18 = vsel %vm17479_vm12, %v13033_v23, %v4596_v7  ;;  %v7554_v61 = vld [vmem:[#allocation2 + $0x1f8] sm:$0xe]  ;;  %v13300_v37 = vrot.slane %v7555_v2, 9  ;;  %v13336_v47 = vcombine.low %v7883_v13, %v7887_v24 }
 0x39d   :  { %v4600_v15 = vrot.slane %v15707_v6, 5  ;;  %v15708_v26 = vld [vmem:[#allocation2 + $0x204] sm:$0x1]  ;;  %v4605_v62 = vsel %vm17479_vm12, %v13035_v52, %v4604_v32  ;;  %v4609_v54 = vsel %vm17479_vm12, %v13036_v58, %v4608_v49  ;;  %v4265_v33 = vld [vmem:[#allocation2 + $0x1f0] sm:$0xe]  ;;  %v13299_v19 = vrot.slane %v7554_v61, 9 }
 0x39e   :  { %v7902_v34 = vrot.slane %v15708_v26, 5  ;;  %v7891_v56 = vsel %vm17479_vm12, %v13297_v30, %v7890_v35  ;;  %v7556_v57 = vld [vmem:[#allocation2 + $0x208] sm:$0xe]  ;;  %v15709_v11 = vld [vmem:[#allocation2 + $0x1fc] sm:$0x1]  ;;  %v13075_v22 = vcombine.low %v4605_v62, %v4609_v54  ;;  %v13037_v17 = vrot.slane %v4265_v33, 9 }
 0x39f   :  { %v4601_v27 = vsel %vm17479_vm12, %v13034_v4, %v4600_v15  ;;  %v4268_v28 = vld [vmem:[#allocation2 + $0x208] sm:$0xe]  ;;  %v13337_v25 = vcombine.low %v7891_v56, %v7895_v38  ;;  %v7898_v63 = vrot.slane %v15709_v11, 5  ;;  %v7557_v0 = vld [vmem:[#allocation2 + $0x210] sm:$0xe]  ;;  %v13301_v60 = vrot.slane %v7556_v57, 9 }
 0x3a0   :  { %v13074_v40 = vcombine.low %v4597_v18, %v4601_v27  ;;  %v4266_v36 = vld [vmem:[#allocation2 + $0x1f8] sm:$0xe]  ;;  %v17759_v8 = vsel %vm17479_vm12, %v13300_v37, %v7902_v34  ;;  %v15710_v9 = vld [vmem:[#allocation2 + $0x1f4] sm:$0x1]  ;;  %v4267_v42 = vld [vmem:[#allocation2 + $0x200] sm:$0xe] }
 0x3a1   :  { %v4612_v39 = vrot.slane %v15710_v9, 5  ;;  %v15711_v5 = vld [vmem:[#allocation2 + $0x20c] sm:$0x1]  ;;  %v13040_v53 = vrot.slane %v4268_v28, 9  ;;  %v13302_v10 = vrot.slane %v7557_v0, 9  ;;  %v13038_v43 = vrot.slane %v4266_v36, 9 }
 0x3a2   :  { %14388 = vmatmul.mubr.msk.bf16.gmra.mrb[108].mxu0 %vm3272_vm9, %v13074_v40  ;;  %v7906_v16 = vrot.slane %v15711_v5, 5  ;;  %v15712_v31 = vld [vmem:[#allocation2 + $0x20c] sm:$0x1]  ;;  %v15713_v3 = vld [vmem:[#allocation2 + $0x214] sm:$0x1]  ;;  %14592 = vmatmul.mubr.msk.bf16.gmra.mrb[20].mxu1 %vm3272_vm9, %v13336_v47  ;;  %v13039_v51 = vrot.slane %v4267_v42, 9  ;;  %v7899_v23 = vsel %vm17479_vm12, %v13299_v19, %v7898_v63 }
 0x3a3   :  { %v4624_v48 = vrot.slane %v15712_v31, 5  ;;  %14391 = vmatprep.mubr.msk.bf16.mxu0 %vm3272_vm9, %v13075_v22  ;;  %v7910_v12 = vrot.slane %v15713_v3, 5  ;;  %v15714_v45 = vld [vmem:[#allocation2 + $0x1fc] sm:$0x1]  ;;  %v7558_v59 = vld [vmem:[#allocation2 + $0x218] sm:$0xe]  ;;  %14595 = vmatprep.mubr.msk.bf16.mxu1 %vm3272_vm9, %v13337_v25  ;;  %v4613_v46 = vsel %vm17479_vm12, %v13037_v17, %v4612_v39  ;;  %v13338_v2 = vcombine.low %v7899_v23, %v17759_v8 }
 0x3a4   :  { %v4616_v41 = vrot.slane %v15714_v45, 5  ;;  %v7559_v29 = vld [vmem:[#allocation2 + $0x220] sm:$0xe]  ;;  %v15715_v20 = vld [vmem:[#allocation2 + $0x204] sm:$0x1]  ;;  %v7907_v52 = vsel %vm17479_vm12, %v13301_v60, %v7906_v16  ;;  %v13303_v49 = vrot.slane %v7558_v59, 9 }
 0x3a5   :  { %v4620_v21 = vrot.slane %v15715_v20, 5  ;;  %v7561_v7 = vld [vmem:[#allocation2 + $0x240] sm:$0xe]  ;;  %v4625_v1 = vsel %vm17479_vm12, %v13040_v53, %v4624_v48  ;;  %v4269_v32 = vld [vmem:[#allocation2 + $0x210] sm:$0xe]  ;;  %v7911_v58 = vsel %vm17479_vm12, %v13302_v10, %v7910_v12  ;;  %v13304_v30 = vrot.slane %v7559_v29, 9 }
 0x3a6   :  { %v4617_v44 = vsel %vm17479_vm12, %v13038_v43, %v4616_v41  ;;  %v4271_v50 = vld [vmem:[#allocation2 + $0x230] sm:$0xe]  ;;  %v4272_v35 = vld [vmem:[#allocation2 + $0x238] sm:$0xe]  ;;  %v15716_v6 = vld [vmem:[#allocation2 + $0x224] sm:$0x1]  ;;  %v13339_v25 = vcombine.low %v7907_v52, %v7911_v58 }
 0x3a7   :  { %v13076_v4 = vcombine.low %v4613_v46, %v4617_v44  ;;  %v7918_v15 = vrot.slane %v15716_v6, 5  ;;  %v4621_v24 = vsel %vm17479_vm12, %v13039_v51, %v4620_v21  ;;  %v13306_v38 = vrot.slane %v7561_v7, 9  ;;  %v4270_v18 = vld [vmem:[#allocation2 + $0x218] sm:$0xe]  ;;  %v15717_v26 = vld [vmem:[#allocation2 + $0x244] sm:$0x1] }
 0x3a8   :  { %v13077_v61 = vcombine.low %v4621_v24, %v4625_v1  ;;  %v7560_v37 = vld [vmem:[#allocation2 + $0x238] sm:$0xe]  ;;  %v7926_v34 = vrot.slane %v15717_v26, 5  ;;  %v13041_v13 = vrot.slane %v4269_v32, 9  ;;  %v15718_v62 = vld [vmem:[#allocation2 + $0x214] sm:$0x1] }
 0x3a9   :  { %v4628_v54 = vrot.slane %v15718_v62, 5  ;;  %v13043_v33 = vrot.slane %v4271_v50, 9  ;;  %v15719_v47 = vld [vmem:[#allocation2 + $0x234] sm:$0x1]  ;;  %v13044_v27 = vrot.slane %v4272_v35, 9  ;;  %v13042_v11 = vrot.slane %v4270_v18, 9 }
 0x3aa   :  { %14392 = vmatmul.mubr.msk.bf16.gmra.mrb[112].mxu0 %vm3272_vm9, %v13076_v4  ;;  %v4636_v56 = vrot.slane %v15719_v47, 5  ;;  %v15720_v57 = vld [vmem:[#allocation2 + $0x23c] sm:$0x1]  ;;  %14596 = vmatmul.mubr.msk.bf16.gmra.mrb[24].mxu1 %vm3272_vm9, %v13338_v2  ;;  %v13305_v36 = vrot.slane %v7560_v37, 9  ;;  %v7919_v17 = vsel %vm17479_vm12, %v13304_v30, %v7918_v15  ;;  %v7927_v39 = vsel %vm17479_vm12, %v13306_v38, %v7926_v34  ;;  %v4273_v5 = vld [vmem:[#allocation2 + $0x240] sm:$0xe] }
 0x3ab   :  { %v4640_v28 = vrot.slane %v15720_v57, 5  ;;  %v15721_v40 = vld [vmem:[#allocation2 + $0x21c] sm:$0x1]  ;;  %14395 = vmatprep.mubr.msk.bf16.mxu0 %vm3272_vm9, %v13077_v61  ;;  %14599 = vmatprep.mubr.msk.bf16.mxu1 %vm3272_vm9, %v13339_v25  ;;  %v4629_v9 = vsel %vm17479_vm12, %v13041_v13, %v4628_v54  ;;  %v7563_v31 = vld [vmem:[#allocation2 + $0x250] sm:$0xe]  ;;  %v13045_v51 = vrot.slane %v4273_v5, 9 }
 0x3ac   :  { %v7914_v19 = vrot.slane %v15721_v40, 5  ;;  %v15722_v63 = vld [vmem:[#allocation2 + $0x21c] sm:$0x1]  ;;  %v4637_v42 = vsel %vm17479_vm12, %v13043_v33, %v4636_v56  ;;  %v4276_v48 = vld [vmem:[#allocation2 + $0x258] sm:$0xe]  ;;  %v13308_v46 = vrot.slane %v7563_v31, 9 }
 0x3ad   :  { %v4632_v0 = vrot.slane %v15722_v63, 5  ;;  %v15723_v8 = vld [vmem:[#allocation2 + $0x23c] sm:$0x1]  ;;  %v4641_v60 = vsel %vm17479_vm12, %v13044_v27, %v4640_v28  ;;  %v7565_v43 = vld [vmem:[#allocation2 + $0x260] sm:$0xe]  ;;  %v13048_v1 = vrot.slane %v4276_v48, 9 }
 0x3ae   :  { %v7922_v22 = vrot.slane %v15723_v8, 5  ;;  %v7915_v16 = vsel %vm17479_vm12, %v13303_v49, %v7914_v19  ;;  %v4274_v45 = vld [vmem:[#allocation2 + $0x248] sm:$0xe]  ;;  %v13079_v29 = vcombine.low %v4637_v42, %v4641_v60  ;;  %v15724_v20 = vld [vmem:[#allocation2 + $0x244] sm:$0x1]  ;;  %v13310_v44 = vrot.slane %v7565_v43, 9 }
 0x3af   :  { %v4633_v53 = vsel %vm17479_vm12, %v13042_v11, %v4632_v0  ;;  %v13340_v10 = vcombine.low %v7915_v16, %v7919_v17  ;;  %v7562_v59 = vld [vmem:[#allocation2 + $0x248] sm:$0xe]  ;;  %v4644_v21 = vrot.slane %v15724_v20, 5  ;;  %v4275_v23 = vld [vmem:[#allocation2 + $0x250] sm:$0xe]  ;;  %v13046_v50 = vrot.slane %v4274_v45, 9 }
 0x3b0   :  { %v7923_v3 = vsel %vm17479_vm12, %v13305_v36, %v7922_v22  ;;  %v13078_v12 = vcombine.low %v4629_v9, %v4633_v53  ;;  %v15725_v7 = vld [vmem:[#allocation2 + $0x254] sm:$0x1]  ;;  %v7564_v52 = vld [vmem:[#allocation2 + $0x258] sm:$0xe]  ;;  %v15726_v32 = vld [vmem:[#allocation2 + $0x25c] sm:$0x1] }
 0x3b1   :  { %v13341_v41 = vcombine.low %v7923_v3, %v7927_v39  ;;  %v7934_v2 = vrot.slane %v15725_v7, 5  ;;  %v4656_v58 = vrot.slane %v15726_v32, 5  ;;  %v15727_v49 = vld [vmem:[#allocation2 + $0x264] sm:$0x1]  ;;  %v15728_v35 = vld [vmem:[#allocation2 + $0x24c] sm:$0x1]  ;;  %v4645_v13 = vsel %vm17479_vm12, %v13045_v51, %v4644_v21 }
 0x3b2   :  { %14396 = vmatmul.mubr.msk.bf16.gmra.mrb[116].mxu0 %vm3272_vm9, %v13078_v12  ;;  %v7942_v30 = vrot.slane %v15727_v49, 5  ;;  %v4648_v4 = vrot.slane %v15728_v35, 5  ;;  %14600 = vmatmul.mubr.msk.bf16.gmra.mrb[28].mxu1 %vm3272_vm9, %v13340_v10  ;;  %v13307_v6 = vrot.slane %v7562_v59, 9  ;;  %v15729_v15 = vld [vmem:[#allocation2 + $0x24c] sm:$0x1]  ;;  %v13047_v38 = vrot.slane %v4275_v23, 9 }
 0x3b3   :  { %14399 = vmatprep.mubr.msk.bf16.mxu0 %vm3272_vm9, %v13079_v29  ;;  %v7930_v24 = vrot.slane %v15729_v15, 5  ;;  %v15730_v18 = vld [vmem:[#allocation2 + $0x254] sm:$0x1]  ;;  %14603 = vmatprep.mubr.msk.bf16.mxu1 %vm3272_vm9, %v13341_v41  ;;  %v13309_v37 = vrot.slane %v7564_v52, 9  ;;  %v15731_v26 = vld [vmem:[#allocation2 + $0x25c] sm:$0x1]  ;;  %v4657_v62 = vsel %vm17479_vm12, %v13048_v1, %v4656_v58  ;;  %v7935_v33 = vsel %vm17479_vm12, %v13308_v46, %v7934_v2 }
 0x3b4   :  { %v4652_v61 = vrot.slane %v15730_v18, 5  ;;  %v7938_v34 = vrot.slane %v15731_v26, 5  ;;  %v4277_v54 = vld [vmem:[#allocation2 + $0x260] sm:$0xe]  ;;  %v7943_v47 = vsel %vm17479_vm12, %v13310_v44, %v7942_v30  ;;  %v4649_v56 = vsel %vm17479_vm12, %v13046_v50, %v4648_v4  ;;  %v7567_v28 = vld [vmem:[#allocation2 + $0x270] sm:$0xe] }
 0x3b5   :  { %v7931_v27 = vsel %vm17479_vm12, %v13307_v6, %v7930_v24  ;;  %v13080_v57 = vcombine.low %v4645_v13, %v4649_v56  ;;  %v4278_v40 = vld [vmem:[#allocation2 + $0x268] sm:$0xe]  ;;  %v13049_v63 = vrot.slane %v4277_v54, 9  ;;  %v15732_v0 = vld [vmem:[#allocation2 + $0x264] sm:$0x1]  ;;  %v13312_v9 = vrot.slane %v7567_v28, 9 }
 0x3b6   :  { %v4653_v25 = vsel %vm17479_vm12, %v13047_v38, %v4652_v61  ;;  %v7939_v19 = vsel %vm17479_vm12, %v13309_v37, %v7938_v34  ;;  %v4660_v36 = vrot.slane %v15732_v0, 5  ;;  %v13342_v8 = vcombine.low %v7931_v27, %v7935_v33  ;;  %v7566_v17 = vld [vmem:[#allocation2 + $0x268] sm:$0xe]  ;;  %v15733_v39 = vld [vmem:[#allocation2 + $0x274] sm:$0x1]  ;;  %v15514_v23 = vld [vmem:[#allocation8 + $0x78] sm:$0xff]  }
 0x3b7   :  { %v13081_v11 = vcombine.low %v4653_v25, %v4657_v62  ;;  %v13343_v22 = vcombine.low %v7939_v19, %v7943_v47  ;;  %v7950_v42 = vrot.slane %v15733_v39, 5  ;;  %v13050_v60 = vrot.slane %v4278_v40, 9  ;;  %v15734_v5 = vld [vmem:[#allocation2 + $0x26c] sm:$0x1]  ;;  %v15487_v41 = vld [vmem:[#allocation2 + $0x8] ss:$8 sps:$4 sm:$0xff]  }
 0x3b8   :  { %v4664_v16 = vrot.slane %v15734_v5, 5  ;;  %v13311_v53 = vrot.slane %v7566_v17, 9  ;;  %v15735_v31 = vld [vmem:[#allocation2 + $0x26c] sm:$0x1]  ;;  %v4661_v10 = vsel %vm17479_vm12, %v13049_v63, %v4660_v36  ;;  %v15484_v29 = vld [vmem:[#allocation2 + $0x10] ss:$8 sps:$4 sm:$0xff]  }
 0x3b9   :  { %v7946_v48 = vrot.slane %v15735_v31, 5  ;;  %v7951_v3 = vsel %vm17479_vm12, %v13312_v9, %v7950_v42  ;;  %v15489_v51 = vld [vmem:[#allocation2 + $0x18] ss:$8 sps:$4 sm:$0xff]   ;;  %v15491_v20 = vld [vmem:[#allocation2 + $0x28] ss:$8 sps:$4 sm:$0xff]  }
 0x3ba   :  { %14400 = vmatmul.mubr.msk.bf16.gmra.mrb[120].mxu0 %vm3272_vm9, %v13080_v57  ;;  %14604 = vmatmul.mubr.msk.bf16.gmra.mrb[32].mxu1 %vm3272_vm9, %v13342_v8  ;;  %v4665_v12 = vsel %vm17479_vm12, %v13050_v60, %v4664_v16  ;;  %v15486_v21 = vld [vmem:[#allocation2 + $0x20] ss:$8 sps:$4 sm:$0xff]   ;;  %v15488_v46 = vld [vmem:[#allocation2 + $0x30] ss:$8 sps:$4 sm:$0xff]  }
 0x3bb   :  { %14403 = vmatprep.mubr.msk.bf16.mxu0 %vm3272_vm9, %v13081_v11  ;;  %14607 = vmatprep.mubr.msk.bf16.mxu1 %vm3272_vm9, %v13343_v22  ;;  %v13082_v43 = vcombine.low %v4661_v10, %v4665_v12  ;;  %v7947_v45 = vsel %vm17479_vm12, %v13311_v53, %v7946_v48  ;;  %v15736_v7 = vld [vmem:[#allocation8 + $0x70] sm:$0xff]   ;;  %v17840_v2 = vld [vmem:[#allocation8 + $0x80] sm:$0xff]   ;;  %v9207_v25 = vld [vmem:[#allocation2 + $0x18] sm:$0xf] }
 0x3bc   :  { %v13344_v59 = vcombine.low %v7947_v45, %v7951_v3  ;;  %v15493_v52 = vld [vmem:[#allocation2 + $0x38] ss:$8 sps:$4 sm:$0xff]   ;;  %v15497_v44 = vld [vmem:[#allocation2 + $0x68] ss:$8 sps:$4 sm:$0xff]   ;;  %v9348_v36 = vshrl.u32 %v9207_v25, 16  ;;  %v9351_v8 = vshll.u32 %v9207_v25, 16 }
 0x3bd   :  { %v15495_v1 = vld [vmem:[#allocation2 + $0x58] ss:$8 sps:$4 sm:$0xff]   ;;  %v15501_v35 = vld [vmem:[#allocation2 + $0x88] ss:$8 sps:$4 sm:$0xff]   ;;  %v9206_v53 = vld [vmem:[#allocation2 + $0x14] sm:$0x1] }
 0x3be   :  { %v15490_v32 = vld [vmem:[#allocation2 + $0x40] ss:$8 sps:$4 sm:$0xff]   ;;  %v15494_v30 = vld [vmem:[#allocation2 + $0x70] ss:$8 sps:$4 sm:$0xff]   ;;  %v9350_v31 = vrot.slane %v9348_v36, 4  ;;  %v9353_v48 = vrot.slane %v9351_v8, 5 }
 0x3bf   :  { %v15492_v58 = vld [vmem:[#allocation2 + $0x60] ss:$8 sps:$4 sm:$0xff]   ;;  %v15498_v6 = vld [vmem:[#allocation2 + $0x90] ss:$8 sps:$4 sm:$0xff]   ;;  %v9208_v45 = vld [vmem:[#allocation2 + $0x1c] sm:$0x1] }
 0x3c0   :  { %v15499_v49 = vld [vmem:[#allocation2 + $0x78] ss:$8 sps:$4 sm:$0xff]   ;;  %v15503_v4 = vld [vmem:[#allocation2 + $0xa8] ss:$8 sps:$4 sm:$0xff]  }
 0x3c1   :  { %v15496_v50 = vld [vmem:[#allocation2 + $0x80] ss:$8 sps:$4 sm:$0xff]   ;;  %v15500_v15 = vld [vmem:[#allocation2 + $0xb0] ss:$8 sps:$4 sm:$0xff]  }
 0x3c2   :  { %14404 = vmatmul.mubr.msk.bf16.gmra.mrb[124].mxu0 %vm3272_vm9, %v13082_v43  ;;  %14608 = vmatmul.mubr.msk.bf16.gmra.mrb[36].mxu1 %vm3272_vm9, %v13344_v59  ;;  %v15505_v24 = vld [vmem:[#allocation2 + $0xb8] ss:$8 sps:$4 sm:$0xff]   ;;  %v15507_v38 = vld [vmem:[#allocation2 + $0xc8] ss:$8 sps:$4 sm:$0xff]  }
 0x3c3   :  { %14411 = vmatprep.mubr.msk.bf16.mxu0 %vm3272_vm9, %v15487_v41  ;;  %14615 = vmatprep.mubr.msk.bf16.mxu1 %vm3272_vm9, %v15484_v29  ;;  %v15502_v18 = vld [vmem:[#allocation2 + $0xc0] ss:$8 sps:$4 sm:$0xff]   ;;  %v15504_v61 = vld [vmem:[#allocation2 + $0xd0] ss:$8 sps:$4 sm:$0xff]  }
 0x3c4   :  { %v15509_v37 = vld [vmem:[#allocation2 + $0xd8] ss:$8 sps:$4 sm:$0xff]   ;;  %v9205_v28 = vld [vmem:[#allocation2 + $0x10] sm:$0xf]  ;;  %v9211_v40 = vld [vmem:[#allocation2 + $0x28] sm:$0xf] }
 0x3c5   :  { %v15506_v26 = vld [vmem:[#allocation2 + $0xe0] ss:$8 sps:$4 sm:$0xff]   ;;  %v15510_v13 = vld [vmem:[#allocation2 + $0x110] ss:$8 sps:$4 sm:$0xff]   ;;  %v9334_v19 = vshrl.u32 %v9205_v28, 16  ;;  %v9337_v11 = vshll.u32 %v9205_v28, 16 }
 0x3c6   :  { %v15508_v34 = vld [vmem:[#allocation2 + $0x100] ss:$8 sps:$4 sm:$0xff]   ;;  %v15512_v54 = vld [vmem:[#allocation2 + $0x130] ss:$8 sps:$4 sm:$0xff]   ;;  %v9376_v22 = vshrl.u32 %v9211_v40, 16  ;;  %v9379_v17 = vshll.u32 %v9211_v40, 16 }
 0x3c7   :  { %v15511_v62 = vld [vmem:[#allocation2 + $0x120] ss:$8 sps:$4 sm:$0xff]   ;;  %v15513_v33 = vld [vmem:[#allocation2 + $0x150] ss:$8 sps:$4 sm:$0xff]   ;;  %v9336_v39 = vrot.slane %v9334_v19, 4  ;;  %v9339_v42 = vrot.slane %v9337_v11, 5 }
 0x3c8   :  { %v15515_v47 = vld [vmem:[#allocation2 + $0x160] ss:$8 sps:$4 sm:$0xff]   ;;  %v15516_v56 = vld [vmem:[#allocation2 + $0x170] ss:$8 sps:$4 sm:$0xff]   ;;  %v9378_v10 = vrot.slane %v9376_v22, 4  ;;  %v9381_v3 = vrot.slane %v9379_v17, 5 }
 0x3c9   :  { %v15517_v27 = vld [vmem:[#allocation2 + $0x180] ss:$8 sps:$4 sm:$0xff]   ;;  %v15519_v0 = vld [vmem:[#allocation2 + $0x1b0] ss:$8 sps:$4 sm:$0xff]   ;;  %v9340_v41 = vor.u32 %v9339_v42, %v9336_v39 }
 0x3ca   :  { %14412 = vmatmul.mubr.msk.bf16.vlgmr.msra.gmra.mrb[64].mxu0 %vm3272_vm9, %v15489_v51  ;;  %14616 = vmatmul.mubr.msk.bf16.vlgmr.msra.gmra.mrb[40].mxu1 %vm3272_vm9, %v15486_v21  ;;  %v15518_v57 = vld [vmem:[#allocation2 + $0x1a0] ss:$8 sps:$4 sm:$0xff]   ;;  %v9213_v16 = vld [vmem:[#allocation2 + $0x30] sm:$0xf]  ;;  %v9215_v51 = vld [vmem:[#allocation2 + $0x38] sm:$0xf] }
 0x3cb   :  { %14415 = vmatprep.mubr.msk.bf16.mxu0 %vm3272_vm9, %v15491_v20  ;;  %14680 = vmatpush3.bf16.msra.mxu1 %v15736_v7  ;;  %v9209_v63 = vld [vmem:[#allocation2 + $0x20] sm:$0xf]  ;;  %v9390_v12 = vshrl.u32 %v9213_v16, 16  ;;  %v9393_v43 = vshll.u32 %v9213_v16, 16  ;;  %v15521_v20 = vld [vmem:[#allocation2 + $0x1d0] ss:$8 sps:$4 sm:$0xff]  }
 0x3cc   :  { %14619 = vmatprep.mubr.msk.bf16.mxu1 %vm3272_vm9, %v15488_v46  ;;  %14681 = vmatprep.subr.bf16.mxu1 %v15514_v23  ;;  %v15520_v9 = vld [vmem:[#allocation2 + $0x1c0] ss:$8 sps:$4 sm:$0xff]   ;;  %v9362_v60 = vshrl.u32 %v9209_v63, 16  ;;  %v9365_v5 = vshll.u32 %v9209_v63, 16  ;;  %v15522_v21 = vld [vmem:[#allocation2 + $0x1f0] ss:$8 sps:$4 sm:$0xff]   ;;  %v9354_v46 = vor.u32 %v9353_v48, %v9350_v31 }
 0x3cd   :  { %v9210_v7 = vld [vmem:[#allocation2 + $0x24] sm:$0x1]  ;;  %v15524_v19 = vld [vmem:[#allocation2 + $0x210] ss:$8 sps:$4 sm:$0xff]   ;;  %v9221_v42 = vld [vmem:[#allocation2 + $0x60] sm:$0xf] }
 0x3ce   :  { %v9364_v59 = vrot.slane %v9362_v60, 4  ;;  %v9367_v29 = vrot.slane %v9365_v5, 5  ;;  %v9220_v31 = vld [vmem:[#allocation2 + $0x4c] sm:$0x1]  ;;  %v9223_v48 = vld [vmem:[#allocation2 + $0x68] sm:$0xf] }
 0x3cf   :  { %14682 = vmatpush3.bf16.msra.mxu1 %v15514_v23  ;;  %v9343_v23 = vshll.u32 %v9206_v53, 16 }
 0x3d0   :  { %14747 = vmatprep.subr.bf16.mxu1 %v17840_v2 }
 0x3d2   :  { %14416 = vmatmul.mubr.msk.bf16.gmra.mrb[68].mxu0 %vm3272_vm9, %v15493_v52  ;;  %14620 = vmatmul.mubr.msk.bf16.gmra.mrb[44].mxu1 %vm3272_vm9, %v15490_v32  ;;  %v9212_v52 = vld [vmem:[#allocation2 + $0x2c] sm:$0x1]  ;;  %v9217_v32 = vld [vmem:[#allocation2 + $0x40] sm:$0xf] }
 0x3d3   :  { %14419 = vmatprep.mubr.msk.bf16.mxu0 %vm3272_vm9, %v15495_v1  ;;  %14623 = vmatprep.mubr.msk.bf16.mxu1 %vm3272_vm9, %v15492_v58  ;;  %v9382_v1 = vor.u32 %v9381_v3, %v9378_v10  ;;  %v9392_v58 = vrot.slane %v9390_v12, 4 }
 0x3da   :  { %14420 = vmatmul.mubr.msk.bf16.gmra.mrb[72].mxu0 %vm3272_vm9, %v15497_v44  ;;  %14624 = vmatmul.mubr.msk.bf16.gmra.mrb[48].mxu1 %vm3272_vm9, %v15494_v30  ;;  %v9395_v44 = vrot.slane %v9393_v43, 5  ;;  %v9407_v30 = vshll.u32 %v9215_v51, 16  ;;  %v9441_v43 = vshll.u32 %v9220_v31, 16 }
 0x3db   :  { %14423 = vmatprep.mubr.msk.bf16.mxu0 %vm3272_vm9, %v15499_v49  ;;  %14627 = vmatprep.mubr.msk.bf16.mxu1 %vm3272_vm9, %v15496_v50  ;;  %v9404_v49 = vshrl.u32 %v9215_v51, 16  ;;  %v9219_v50 = vld [vmem:[#allocation2 + $0x48] sm:$0xf]  ;;  %v9449_v51 = vshll.u32 %v9221_v42, 16 }
 0x3e2   :  { %14424 = vmatmul.mubr.msk.bf16.gmra.mrb[76].mxu0 %vm3272_vm9, %v15501_v35  ;;  %14628 = vmatmul.mubr.msk.bf16.gmra.mrb[52].mxu1 %vm3272_vm9, %v15498_v6  ;;  %v9341_v35 = vrot.slane %v9340_v41, 4  ;;  %v9368_v6 = vor.u32 %v9367_v29, %v9364_v59  ;;  %v9446_v29 = vshrl.u32 %v9221_v42, 16 }
 0x3e3   :  { %14427 = vmatprep.mubr.msk.bf16.mxu0 %vm3272_vm9, %v15503_v4  ;;  %14631 = vmatprep.mubr.msk.bf16.mxu1 %vm3272_vm9, %v15500_v15  ;;  %v9357_v4 = vshll.u32 %v9208_v45, 16  ;;  %v9345_v15 = vrot.slane %v9343_v23, 5  ;;  %v9227_v45 = vld [vmem:[#allocation2 + $0x78] sm:$0xf] }
 0x3e4   :  { %v9369_v25 = vrot.slane %v9368_v6, 4 }
 0x3e5   :  { %v9359_v28 = vrot.slane %v9357_v4, 5 }
 0x3ea   :  { %14428 = vmatmul.mubr.msk.bf16.gmra.mrb[80].mxu0 %vm3272_vm9, %v15505_v24  ;;  %14632 = vmatmul.mubr.msk.bf16.gmra.mrb[56].mxu1 %vm3272_vm9, %v15502_v18  ;;  %v9385_v24 = vshll.u32 %v9212_v52, 16  ;;  %v9418_v18 = vshrl.u32 %v9217_v32, 16  ;;  %v9463_v52 = vshll.u32 %v9223_v48, 16 }
 0x3eb   :  { %14431 = vmatprep.mubr.msk.bf16.mxu0 %vm3272_vm9, %v15507_v38  ;;  %14635 = vmatprep.mubr.msk.bf16.mxu1 %vm3272_vm9, %v15504_v61  ;;  %v9214_v38 = vld [vmem:[#allocation2 + $0x34] sm:$0x1]  ;;  %v9421_v61 = vshll.u32 %v9217_v32, 16 }
 0x3ec   :  { %v9399_v40 = vshll.u32 %v9214_v38, 16  ;;  %v9387_v11 = vrot.slane %v9385_v24, 5  ;;  %v9420_v36 = vrot.slane %v9418_v18, 4  ;;  %v9448_v38 = vrot.slane %v9446_v29, 4 }
 0x3ed   :  { %v9423_v8 = vrot.slane %v9421_v61, 5  ;;  %v9451_v18 = vrot.slane %v9449_v51, 5 }
 0x3ee   :  { %v9401_v3 = vrot.slane %v9399_v40, 5 }
 0x3ef   :  { %v9424_v59 = vor.u32 %v9423_v8, %v9420_v36  ;;  %v9452_v36 = vor.u32 %v9451_v18, %v9448_v38 }
 0x3f1   :  { %v9425_v24 = vrot.slane %v9424_v59, 4  ;;  %v15528_v59 = vld [vmem:[#allocation2 + $0x260] ss:$8 sps:$4 sm:$0xff]  }
 0x3f2   :  { %14432 = vmatmul.mubr.msk.bf16.gmra.mrb[84].mxu0 %vm3272_vm9, %v15509_v37  ;;  %14636 = vmatmul.mubr.msk.bf16.gmra.mrb[60].mxu1 %vm3272_vm9, %v15506_v26  ;;  %v9355_v37 = vrot.slane %v9354_v46, 4  ;;  %v9371_v26 = vshll.u32 %v9210_v7, 16  ;;  %v9222_v46 = vld [vmem:[#allocation2 + $0x64] sm:$0x1]  ;;  %v9460_v7 = vshrl.u32 %v9223_v48, 16 }
 0x3f3   :  { %14639 = vmatprep.mubr.msk.bf16.mxu1 %vm3272_vm9, %v15508_v34  ;;  %v9216_v34 = vld [vmem:[#allocation2 + $0x3c] sm:$0x1]  ;;  %v9455_v61 = vshll.u32 %v9222_v46, 16 }
 0x3f4   :  { %v9413_v63 = vshll.u32 %v9216_v34, 16  ;;  %v9360_v22 = vsel %vm16444_vm4, %v9355_v37, %v9359_v28  ;;  %v9373_v17 = vrot.slane %v9371_v26, 5  ;;  %v9231_v37 = vld [vmem:[#allocation2 + $0x88] sm:$0xf]  ;;  %v9224_v34 = vld [vmem:[#allocation2 + $0x6c] sm:$0x1] }
 0x3f5   :  { %v9516_v40 = vshrl.u32 %v9231_v37, 16  ;;  %v9469_v8 = vshll.u32 %v9224_v34, 16  ;;  %v9457_v29 = vrot.slane %v9455_v61, 5  ;;  %v9239_v61 = vld [vmem:[#allocation2 + $0xb8] sm:$0xf] }
 0x3f6   :  { %v9374_v10 = vsel %vm16444_vm4, %v9369_v25, %v9373_v17  ;;  %v9415_v41 = vrot.slane %v9413_v63, 5 }
 0x3f7   :  { %v9471_v51 = vrot.slane %v9469_v8, 5 }
 0x3fa   :  { %14640 = vmatmul.mubr.msk.bf16.gmra.mrb[0].mxu1 %vm3272_vm9, %v15510_v13  ;;  %v9432_v13 = vshrl.u32 %v9219_v50, 16 }
 0x3fb   :  { %14643 = vmatprep.mubr.msk.bf16.mxu1 %vm3272_vm9, %v15511_v62  ;;  %v9435_v62 = vshll.u32 %v9219_v50, 16 }
 0x3fd   :  { %v9437_v39 = vrot.slane %v9435_v62, 5  ;;  %v9465_v62 = vrot.slane %v9463_v52, 5  ;;  %v9453_v52 = vrot.slane %v9452_v36, 4 }
 0x3ff   :  { %v9458_v34 = vsel %vm16444_vm4, %v9453_v52, %v9457_v29  ;;  %v9247_v52 = vld [vmem:[#allocation2 + $0xd8] sm:$0xf] }
 0x402   :  { %14644 = vmatmul.mubr.msk.bf16.gmra.mrb[4].mxu1 %vm3272_vm9, %v15512_v54  ;;  %v9383_v54 = vrot.slane %v9382_v1, 4 }
 0x403   :  { %14647 = vmatprep.mubr.msk.bf16.mxu1 %vm3272_vm9, %v15513_v33  ;;  %v9396_v33 = vor.u32 %v9395_v44, %v9392_v58  ;;  %v9488_v58 = vshrl.u32 %v9227_v45, 16  ;;  %v9491_v44 = vshll.u32 %v9227_v45, 16  ;;  %v9518_v45 = vrot.slane %v9516_v40, 4 }
 0x404   :  { %v9388_v5 = vsel %vm16444_vm4, %v9383_v54, %v9387_v11  ;;  %v9233_v11 = vld [vmem:[#allocation2 + $0x90] sm:$0xf] }
 0x405   :  { %v9397_v16 = vrot.slane %v9396_v33, 4  ;;  %v9530_v48 = vshrl.u32 %v9233_v11, 16 }
 0x407   :  { %v9402_v1 = vsel %vm16444_vm4, %v9397_v16, %v9401_v3  ;;  %v15527_v3 = vld [vmem:[#allocation2 + $0x250] ss:$8 sps:$4 sm:$0xff]  }
 0x40a   :  { %14648 = vmatmul.mubr.msk.bf16.gmra.mrb[8].mxu1 %vm3272_vm9, %v15515_v47  ;;  %v9406_v47 = vrot.slane %v9404_v49, 4  ;;  %v9229_v49 = vld [vmem:[#allocation2 + $0x80] sm:$0xf] }
 0x40b   :  { %14651 = vmatprep.mubr.msk.bf16.mxu1 %vm3272_vm9, %v15516_v56  ;;  %v9409_v56 = vrot.slane %v9407_v30, 5  ;;  %v15525_v30 = vld [vmem:[#allocation2 + $0x220] ss:$8 sps:$4 sm:$0xff]   ;;  %v9502_v54 = vshrl.u32 %v9229_v49, 16 }
 0x40d   :  { %v9410_v53 = vor.u32 %v9409_v56, %v9406_v47  ;;  %v9226_v47 = vld [vmem:[#allocation2 + $0x74] sm:$0x1]  ;;  %v9490_v56 = vrot.slane %v9488_v58, 4  ;;  %v9504_v42 = vrot.slane %v9502_v54, 4  ;;  %v9237_v58 = vld [vmem:[#allocation2 + $0xb0] sm:$0xf] }
 0x40f   :  { %v9411_v32 = vrot.slane %v9410_v53, 4  ;;  %v9230_v53 = vld [vmem:[#allocation2 + $0x84] sm:$0x1] }
 0x411   :  { %v9416_v33 = vsel %vm16444_vm4, %v9411_v32, %v9415_v41  ;;  %v9511_v32 = vshll.u32 %v9230_v53, 16  ;;  %v9238_v53 = vld [vmem:[#allocation2 + $0xb4] sm:$0x1] }
 0x412   :  { %14652 = vmatmul.mubr.msk.bf16.gmra.mrb[12].mxu1 %vm3272_vm9, %v15517_v27  ;;  %v15523_v27 = vld [vmem:[#allocation2 + $0x200] ss:$8 sps:$4 sm:$0xff]   ;;  %v17894_v63 = vcombine.low %v9402_v1, %v9416_v33 }
 0x413   :  { %14655 = vmatprep.mubr.msk.bf16.mxu1 %vm3272_vm9, %v15518_v57  ;;  %v9346_v57 = vsel %vm16444_vm4, %v9341_v35, %v9345_v15  ;;  %v9443_v35 = vrot.slane %v9441_v43, 5  ;;  %v15526_v15 = vld [vmem:[#allocation2 + $0x240] ss:$8 sps:$4 sm:$0xff]  }
 0x414   :  { %v17878_v60 = vcombine.low %v9346_v57, %v9360_v22  ;;  %v9505_v57 = vshll.u32 %v9229_v49, 16  ;;  %v9228_v22 = vld [vmem:[#allocation2 + $0x7c] sm:$0x1] }
 0x415   :  { %v9497_v43 = vshll.u32 %v9228_v22, 16  ;;  %v9575_v22 = vshll.u32 %v9239_v61, 16 }
 0x416   :  { %v9507_v31 = vrot.slane %v9505_v57, 5 }
 0x418   :  { %v9508_v49 = vor.u32 %v9507_v31, %v9504_v42 }
 0x41a   :  { %14656 = vmatmul.mubr.msk.bf16.gmra.mrb[16].mxu1 %vm3272_vm9, %v15519_v0  ;;  %v9218_v0 = vld [vmem:[#allocation2 + $0x44] sm:$0x1] }
 0x41b   :  { %14659 = vmatprep.mubr.msk.bf16.mxu1 %vm3272_vm9, %v15520_v9  ;;  %v9434_v9 = vrot.slane %v9432_v13, 4  ;;  %v9427_v12 = vshll.u32 %v9218_v0, 16  ;;  %v9462_v13 = vrot.slane %v9460_v7, 4 }
 0x41d   :  { %v9438_v23 = vor.u32 %v9437_v39, %v9434_v9  ;;  %v9429_v50 = vrot.slane %v9427_v12, 5  ;;  %v9466_v9 = vor.u32 %v9465_v62, %v9462_v13  ;;  %v9483_v39 = vshll.u32 %v9226_v47, 16 }
 0x41e   :  { %v9509_v47 = vrot.slane %v9508_v49, 4 }
 0x41f   :  { %v9439_v26 = vrot.slane %v9438_v23, 4  ;;  %v9430_v0 = vsel %vm16444_vm4, %v9425_v24, %v9429_v50  ;;  %v9467_v1 = vrot.slane %v9466_v9, 4  ;;  %v9532_v50 = vrot.slane %v9530_v48, 4  ;;  %v15529_v9 = vld [vmem:[#allocation2 + $0x270] ss:$8 sps:$4 sm:$0xff]  }
 0x421   :  { %v9444_v17 = vsel %vm16444_vm4, %v9439_v26, %v9443_v35  ;;  %v9561_v26 = vshll.u32 %v9237_v58, 16  ;;  %v9472_v13 = vsel %vm16444_vm4, %v9467_v1, %v9471_v51 }
 0x422   :  { %14660 = vmatmul.mubr.msk.bf16.gmra.mrb[20].mxu1 %vm3272_vm9, %v15521_v20  ;;  %v9225_v20 = vld [vmem:[#allocation2 + $0x70] sm:$0xf]  ;;  %v17900_v7 = vcombine.low %v9430_v0, %v9444_v17  ;;  %v9243_v17 = vld [vmem:[#allocation2 + $0xc8] sm:$0xf] }
 0x423   :  { %14663 = vmatprep.mubr.msk.bf16.mxu1 %vm3272_vm9, %v15522_v21  ;;  %v17886_v21 = vcombine.low %v9374_v10, %v9388_v5  ;;  %v9474_v4 = vshrl.u32 %v9225_v20, 16  ;;  %v9477_v6 = vshll.u32 %v9225_v20, 16  ;;  %v9235_v5 = vld [vmem:[#allocation2 + $0x98] sm:$0xf]  ;;  %v9533_v10 = vshll.u32 %v9233_v11, 16 }
 0x424   :  { %v9232_v20 = vld [vmem:[#allocation2 + $0x8c] sm:$0x1]  ;;  %v9544_v23 = vshrl.u32 %v9235_v5, 16  ;;  %v9547_v46 = vshll.u32 %v9235_v5, 16  ;;  %v9241_v11 = vld [vmem:[#allocation2 + $0xc0] sm:$0xf] }
 0x425   :  { %v9476_v28 = vrot.slane %v9474_v4, 4  ;;  %v9479_v25 = vrot.slane %v9477_v6, 5  ;;  %v9535_v35 = vrot.slane %v9533_v10, 5  ;;  %v9485_v6 = vrot.slane %v9483_v39, 5 }
 0x426   :  { %v9546_v38 = vrot.slane %v9544_v23, 4  ;;  %v9549_v18 = vrot.slane %v9547_v46, 5  ;;  %v9525_v62 = vshll.u32 %v9232_v20, 16  ;;  %v9563_v8 = vrot.slane %v9561_v26, 5 }
 0x427   :  { %v9480_v12 = vor.u32 %v9479_v25, %v9476_v28  ;;  %v9536_v57 = vor.u32 %v9535_v35, %v9532_v50  ;;  %v17912_v39 = vcombine.low %v9458_v34, %v9472_v13  ;;  %v9586_v10 = vshrl.u32 %v9241_v11, 16  ;;  %v9244_v34 = vld [vmem:[#allocation2 + $0xcc] sm:$0x1] }
 0x428   :  { %v9550_v0 = vor.u32 %v9549_v18, %v9546_v38  ;;  %v9527_v5 = vrot.slane %v9525_v62, 5  ;;  %v9603_v29 = vshll.u32 %v9243_v17, 16  ;;  %v9577_v46 = vrot.slane %v9575_v22, 5  ;;  %v9251_v18 = vld [vmem:[#allocation2 + $0xe8] sm:$0xf] }
 0x429   :  { %v9481_v4 = vrot.slane %v9480_v12, 4  ;;  %v9537_v48 = vrot.slane %v9536_v57, 4  ;;  %v9245_v12 = vld [vmem:[#allocation2 + $0xd0] sm:$0xf]  ;;  %v9588_v35 = vrot.slane %v9586_v10, 4  ;;  %v9631_v38 = vshll.u32 %v9247_v52, 16 }
 0x42a   :  { %14664 = vmatmul.mubr.msk.bf16.gmra.mrb[24].mxu1 %vm3272_vm9, %v15523_v27  ;;  %v9493_v27 = vrot.slane %v9491_v44, 5  ;;  %v9551_v51 = vrot.slane %v9550_v0, 4  ;;  %v9617_v49 = vshll.u32 %v9245_v12, 16 }
 0x42b   :  { %14667 = vmatprep.mubr.msk.bf16.mxu1 %vm3272_vm9, %v15524_v19  ;;  %v9519_v19 = vshll.u32 %v9231_v37, 16  ;;  %v9558_v37 = vshrl.u32 %v9237_v58, 16  ;;  %v9486_v28 = vsel %vm16444_vm4, %v9481_v4, %v9485_v6  ;;  %v9242_v58 = vld [vmem:[#allocation2 + $0xc4] sm:$0x1]  ;;  %v9249_v6 = vld [vmem:[#allocation2 + $0xe0] sm:$0xf] }
 0x42c   :  { %v9494_v16 = vor.u32 %v9493_v27, %v9490_v56  ;;  %v9513_v56 = vrot.slane %v9511_v32, 5  ;;  %v9236_v27 = vld [vmem:[#allocation2 + $0x9c] sm:$0x1]  ;;  %v9567_v32 = vshll.u32 %v9238_v53, 16  ;;  %v9595_v13 = vshll.u32 %v9242_v58, 16 }
 0x42d   :  { %v9521_v41 = vrot.slane %v9519_v19, 5  ;;  %v9553_v40 = vshll.u32 %v9236_v27, 16  ;;  %v9572_v19 = vshrl.u32 %v9239_v61, 16  ;;  %v9560_v36 = vrot.slane %v9558_v37, 4  ;;  %v9250_v53 = vld [vmem:[#allocation2 + $0xe4] sm:$0x1] }
 0x42e   :  { %v9495_v44 = vrot.slane %v9494_v16, 4  ;;  %v9514_v31 = vsel %vm16444_vm4, %v9509_v47, %v9513_v56  ;;  %v9645_v47 = vshll.u32 %v9249_v6, 16  ;;  %v15531_v56 = vld [vmem:[#allocation8 + $0x88] sm:$0xff]   ;;  %v9569_v27 = vrot.slane %v9567_v32, 5 }
 0x42f   :  { %v9522_v24 = vor.u32 %v9521_v41, %v9518_v45  ;;  %v9555_v45 = vrot.slane %v9553_v40, 5  ;;  %v9240_v41 = vld [vmem:[#allocation2 + $0xbc] sm:$0x1]  ;;  %v9564_v20 = vor.u32 %v9563_v8, %v9560_v36  ;;  %v9574_v23 = vrot.slane %v9572_v19, 4  ;;  %v9253_v8 = vld [vmem:[#allocation2 + $0x100] sm:$0xf] }
 0x430   :  { %v9581_v50 = vshll.u32 %v9240_v41, 16  ;;  %v9633_v36 = vrot.slane %v9631_v38, 5  ;;  %v9670_v41 = vshrl.u32 %v9253_v8, 16  ;;  %v9252_v58 = vld [vmem:[#allocation2 + $0xec] sm:$0x1] }
 0x431   :  { %v9523_v25 = vrot.slane %v9522_v24, 4  ;;  %v9628_v24 = vshrl.u32 %v9247_v52, 16  ;;  %v9556_v61 = vsel %vm16444_vm4, %v9551_v51, %v9555_v45  ;;  %v17929_v37 = vrot.slane %v9564_v20, 4 }
 0x432   :  { %14668 = vmatmul.mubr.msk.bf16.gmra.mrb[28].mxu1 %vm3272_vm9, %v15525_v30  ;;  %v9234_v30 = vld [vmem:[#allocation2 + $0x94] sm:$0x1]  ;;  %v9578_v26 = vor.u32 %v9577_v46, %v9574_v23  ;;  %v9583_v57 = vrot.slane %v9581_v50, 5 }
 0x433   :  { %14671 = vmatprep.mubr.msk.bf16.mxu1 %vm3272_vm9, %v15526_v15  ;;  %v9499_v15 = vrot.slane %v9497_v43, 5  ;;  %v9539_v54 = vshll.u32 %v9234_v30, 16  ;;  %v9528_v43 = vsel %vm16444_vm4, %v9523_v25, %v9527_v5  ;;  %v9659_v25 = vshll.u32 %v9251_v18, 16 }
 0x434   :  { %v17923_v1 = vcombine.low %v9514_v31, %v9528_v43  ;;  %v9630_v0 = vrot.slane %v9628_v24, 4  ;;  %v17940_v5 = vrot.slane %v9595_v13, 5  ;;  %v9672_v24 = vrot.slane %v9670_v41, 4  ;;  %v9259_v13 = vld [vmem:[#allocation2 + $0x118] sm:$0xf] }
 0x435   :  { %v9500_v33 = vsel %vm16444_vm4, %v9495_v44, %v9499_v15  ;;  %v9541_v16 = vrot.slane %v9539_v54, 5  ;;  %v9614_v44 = vshrl.u32 %v9245_v12, 16  ;;  %v9619_v54 = vrot.slane %v9617_v49, 5 }
 0x436   :  { %v17914_v42 = vcombine.low %v9486_v28, %v9500_v33  ;;  %v9642_v33 = vshrl.u32 %v9249_v6, 16  ;;  %v9656_v28 = vshrl.u32 %v9251_v18, 16  ;;  %v9661_v45 = vrot.slane %v9659_v25, 5  ;;  %v9257_v6 = vld [vmem:[#allocation2 + $0x110] sm:$0xf] }
 0x437   :  { %v9542_v30 = vsel %vm16444_vm4, %v9537_v48, %v9541_v16  ;;  %v9616_v62 = vrot.slane %v9614_v44, 4  ;;  %v9609_v16 = vshll.u32 %v9244_v34, 16  ;;  %v9570_v48 = vsel %vm16444_vm4, %v17929_v37, %v9569_v27  ;;  %v9254_v34 = vld [vmem:[#allocation2 + $0x104] sm:$0x1] }
 0x438   :  { %v9644_v10 = vrot.slane %v9642_v33, 4  ;;  %v9658_v43 = vrot.slane %v9656_v28, 4  ;;  %v9634_v46 = vor.u32 %v9633_v36, %v9630_v0 }
 0x439   :  { %v9611_v32 = vrot.slane %v9609_v16, 5 }
 0x43a   :  { %14672 = vmatmul.mubr.msk.bf16.gmra.mrb[32].mxu1 %vm3272_vm9, %v15527_v3  ;;  %v9589_v3 = vshll.u32 %v9241_v11, 16  ;;  %v9246_v11 = vld [vmem:[#allocation2 + $0xd4] sm:$0x1] }
 0x43b   :  { %14675 = vmatprep.mubr.msk.bf16.mxu1 %vm3272_vm9, %v15528_v59  ;;  %v9600_v59 = vshrl.u32 %v9243_v17, 16  ;;  %v17938_v17 = vcombine.low %v9542_v30, %v9556_v61  ;;  %v9623_v23 = vshll.u32 %v9246_v11, 16 }
 0x43c   :  { %v9591_v4 = vrot.slane %v9589_v3, 5  ;;  %v9647_v3 = vrot.slane %v9645_v47, 5  ;;  %v9698_v47 = vshrl.u32 %v9257_v6, 16 }
 0x43d   :  { %v9602_v15 = vrot.slane %v9600_v59, 4  ;;  %v9673_v59 = vshll.u32 %v9253_v8, 16  ;;  %v9625_v37 = vrot.slane %v9623_v23, 5  ;;  %v9261_v8 = vld [vmem:[#allocation2 + $0x120] sm:$0xf] }
 0x43e   :  { %v9592_v40 = vor.u32 %v9591_v4, %v9588_v35  ;;  %v9648_v35 = vor.u32 %v9647_v3, %v9644_v10  ;;  %v9651_v4 = vshll.u32 %v9250_v53, 16  ;;  %v9258_v53 = vld [vmem:[#allocation2 + $0x114] sm:$0x1]  ;;  %v9700_v3 = vrot.slane %v9698_v47, 4 }
 0x43f   :  { %v9675_v38 = vrot.slane %v9673_v59, 5  ;;  %v9260_v59 = vld [vmem:[#allocation2 + $0x11c] sm:$0x1] }
 0x440   :  { %v9593_v51 = vrot.slane %v9592_v40, 4  ;;  %v9649_v28 = vrot.slane %v9648_v35, 4  ;;  %v9653_v25 = vrot.slane %v9651_v4, 5  ;;  %v9256_v40 = vld [vmem:[#allocation2 + $0x10c] sm:$0x1] }
 0x441   :  { %v9676_v36 = vor.u32 %v9675_v38, %v9672_v24  ;;  %v9721_v24 = vshll.u32 %v9260_v59, 16  ;;  %v9267_v38 = vld [vmem:[#allocation2 + $0x138] sm:$0xf]  ;;  %v9273_v59 = vld [vmem:[#allocation2 + $0x160] sm:$0xf] }
 0x442   :  { %14676 = vmatmul.mubr.msk.bf16.gmra.mrb[36].mxu1 %vm3272_vm9, %v15529_v9  ;;  %v9579_v9 = vrot.slane %v9578_v26, 4  ;;  %v9635_v26 = vrot.slane %v9634_v46, 4  ;;  %v9654_v41 = vsel %vm16444_vm4, %v9649_v28, %v9653_v25 }
 0x443   :  { %14683 = vmatprep.mubr.msk.bf16.mxu1 %vm3272_vm9, %v17878_v60  ;;  %v9605_v60 = vrot.slane %v9603_v29, 5  ;;  %v9677_v46 = vrot.slane %v9676_v36, 4  ;;  %v9266_v36 = vld [vmem:[#allocation2 + $0x134] sm:$0x1] }
 0x444   :  { %v9584_v52 = vsel %vm16444_vm4, %v9579_v9, %v9583_v57 }
 0x445   :  { %v9606_v19 = vor.u32 %v9605_v60, %v9602_v15  ;;  %v9662_v15 = vor.u32 %v9661_v45, %v9658_v43  ;;  %v9665_v60 = vshll.u32 %v9252_v58, 16  ;;  %v17955_v18 = vcombine.low %v9570_v48, %v9584_v52  ;;  %v9263_v43 = vld [vmem:[#allocation2 + $0x128] sm:$0xf]  ;;  %v9265_v58 = vld [vmem:[#allocation2 + $0x130] sm:$0xf] }
 0x446   :  { %v9715_v48 = vshll.u32 %v9259_v13, 16  ;;  %v9693_v52 = vshll.u32 %v9256_v40, 16  ;;  %v9743_v35 = vshll.u32 %v9263_v43, 16 }
 0x447   :  { %v9607_v20 = vrot.slane %v9606_v19, 4  ;;  %v9663_v11 = vrot.slane %v9662_v15, 4  ;;  %v9667_v0 = vrot.slane %v9665_v60, 5 }
 0x448   :  { %v9745_v40 = vrot.slane %v9743_v35, 5 }
 0x449   :  { %v9612_v61 = vsel %vm16444_vm4, %v9607_v20, %v9611_v32  ;;  %v9729_v20 = vshll.u32 %v9261_v8, 16  ;;  %v9668_v23 = vsel %vm16444_vm4, %v9663_v11, %v9667_v0  ;;  %v9707_v32 = vshll.u32 %v9258_v53, 16 }
 0x44a   :  { %14684 = vmatmul.mubr.msk.bf16.vlgmr.msra.gmra.mrb[40].mxu1 %vm3272_vm9, %v17886_v21  ;;  %v17936_v22 = vpop.f32.mrb[88].mxu0  ;;  %v9248_v21 = vld [vmem:[#allocation2 + $0xdc] sm:$0x1]  ;;  %v9723_v0 = vrot.slane %v9721_v24, 5 }
 0x44b   :  { %14748 = vmatpush3.bf16.msra.mxu1 %v17840_v2  ;;  %14687 = vmatprep.mubr.msk.bf16.mxu1 %vm3272_vm9, %v17894_v63  ;;  %18938 = vst [vmem:[#allocation17_spill] sm:$0xff] %v17936_v22  ;;  %v17942_v31 = vpop.f32.mrb[89].mxu0  ;;  %v9620_v2 = vor.u32 %v9619_v54, %v9616_v62  ;;  %v9255_v63 = vld [vmem:[#allocation2 + $0x108] sm:$0xf]  ;;  %v9637_v50 = vshll.u32 %v9248_v21, 16  ;;  %v9679_v21 = vshll.u32 %v9254_v34, 16 }
 0x44c   :  { %18939 = vst [vmem:[#allocation18_spill] sm:$0xff] %v17942_v31  ;;  %14749 = vmatprep.subr.bf16.mxu1 %v15531_v56  ;;  %v17947_v12 = vpop.f32.mrb[90].mxu0  ;;  %v9684_v44 = vshrl.u32 %v9255_v63, 16  ;;  %v9687_v49 = vshll.u32 %v9255_v63, 16  ;;  %v9757_v34 = vshll.u32 %v9265_v58, 16  ;;  %v17996_v47 = vrot.slane %v9707_v32, 5 }
 0x44d   :  { %18940 = vst [vmem:[#allocation19_spill] sm:$0xff] %v17947_v12  ;;  %v17949_v29 = vpop.f32.mrb[91].mxu0  ;;  %v9621_v30 = vrot.slane %v9620_v2, 4  ;;  %v9639_v57 = vrot.slane %v9637_v50, 5  ;;  %v9740_v50 = vshrl.u32 %v9263_v43, 16 }
 0x44e   :  { %18941 = vst [vmem:[#allocation20_spill] sm:$0xff] %v17949_v29  ;;  %v9686_v54 = vrot.slane %v9684_v44, 4  ;;  %v9689_v33 = vrot.slane %v9687_v49, 5  ;;  %v9717_v49 = vrot.slane %v9715_v48, 5  ;;  %v9323_v29 = vld [vmem:[#allocation2 + $0x258] sm:$0xf] }
 0x44f   :  { %14750 = vmatpush3.bf16.msra.mxu1 %v15531_v56  ;;  %v9701_v56 = vshll.u32 %v9257_v6, 16  ;;  %v9640_v2 = vsel %vm16444_vm4, %v9635_v26, %v9639_v57  ;;  %v9681_v6 = vrot.slane %v9679_v21, 5  ;;  %v9731_v26 = vrot.slane %v9729_v20, 5  ;;  %v9329_v31 = vld [vmem:[#allocation2 + $0x270] sm:$0xf] }
 0x450   :  { %v9690_v10 = vor.u32 %v9689_v33, %v9686_v54  ;;  %v17994_v54 = vcombine.low %v9654_v41, %v9668_v23  ;;  %v9695_v33 = vrot.slane %v9693_v52, 5  ;;  %v9742_v25 = vrot.slane %v9740_v50, 4  ;;  %v9275_v52 = vld [vmem:[#allocation2 + $0x168] sm:$0xf] }
 0x451   :  { %v9703_v63 = vrot.slane %v9701_v56, 5  ;;  %v9682_v57 = vsel %vm16444_vm4, %v9677_v46, %v9681_v6  ;;  %v9771_v21 = vshll.u32 %v9267_v38, 16  ;;  %v9763_v46 = vshll.u32 %v9266_v36, 16  ;;  %v9268_v6 = vld [vmem:[#allocation2 + $0x13c] sm:$0x1] }
 0x452   :  { %14688 = vmatmul.mubr.msk.bf16.gmra.mrb[44].mxu1 %vm3272_vm9, %v17900_v7  ;;  %v9598_v7 = vsel %vm16444_vm4, %v9593_v51, %v17940_v5  ;;  %v9712_v5 = vshrl.u32 %v9259_v13, 16  ;;  %v9726_v51 = vshrl.u32 %v9261_v8, 16  ;;  %v9691_v15 = vrot.slane %v9690_v10, 4  ;;  %v9271_v10 = vld [vmem:[#allocation2 + $0x158] sm:$0xf] }
 0x453   :  { %14691 = vmatprep.mubr.msk.bf16.mxu1 %vm3272_vm9, %v17912_v39  ;;  %v9626_v39 = vsel %vm16444_vm4, %v9621_v30, %v9625_v37  ;;  %v17974_v16 = vcombine.low %v9598_v7, %v9612_v61  ;;  %v9262_v30 = vld [vmem:[#allocation2 + $0x124] sm:$0x1]  ;;  %v9704_v60 = vor.u32 %v9703_v63, %v9700_v3  ;;  %v9768_v8 = vshrl.u32 %v9267_v38, 16 }
 0x454   :  { %v17961_v62 = vpop.f32.mrb[92].mxu0  ;;  %v17978_v45 = vcombine.low %v9626_v39, %v9640_v2  ;;  %v9714_v44 = vrot.slane %v9712_v5, 4  ;;  %v9728_v37 = vrot.slane %v9726_v51, 4  ;;  %v9735_v56 = vshll.u32 %v9262_v30, 16  ;;  %v9269_v39 = vld [vmem:[#allocation2 + $0x150] sm:$0xf] }
 0x455   :  { %18942 = vst [vmem:[#allocation21_spill] sm:$0xff] %v17961_v62  ;;  %v17963_v27 = vpop.f32.mrb[93].mxu0  ;;  %v9705_v11 = vrot.slane %v9704_v60, 4  ;;  %v9696_v53 = vsel %vm16444_vm4, %v9691_v15, %v9695_v33  ;;  %v9759_v2 = vrot.slane %v9757_v34, 5  ;;  %v9782_v43 = vshrl.u32 %v9269_v39, 16 }
 0x456   :  { %18943 = vst [vmem:[#allocation22_spill] sm:$0xff] %v17963_v27  ;;  %v17968_v19 = vpop.f32.mrb[94].mxu0  ;;  %v9718_v28 = vor.u32 %v9717_v49, %v9714_v44  ;;  %v9732_v5 = vor.u32 %v9731_v26, %v9728_v37  ;;  %v18004_v3 = vcombine.low %v9682_v57, %v9696_v53  ;;  %v9737_v63 = vrot.slane %v9735_v56, 5 }
 0x457   :  { %18944 = vst [vmem:[#allocation23_spill] sm:$0xff] %v17968_v19  ;;  %v17972_v9 = vpop.f32.mrb[95].mxu0  ;;  %v9785_v41 = vshll.u32 %v9269_v39, 16  ;;  %v9746_v20 = vor.u32 %v9745_v40, %v9742_v25  ;;  %v9773_v44 = vrot.slane %v9771_v21, 5  ;;  %v9796_v49 = vshrl.u32 %v9271_v10, 16 }
 0x458   :  { %18945 = vst [vmem:[#allocation24_spill] sm:$0xff] %v17972_v9  ;;  %v9719_v51 = vrot.slane %v9718_v28, 4  ;;  %v9799_v30 = vshll.u32 %v9271_v10, 16  ;;  %v9733_v35 = vrot.slane %v9732_v5, 4  ;;  %v9813_v60 = vshll.u32 %v9273_v59, 16 }
 0x459   :  { %v9784_v38 = vrot.slane %v9782_v43, 4  ;;  %v9787_v37 = vrot.slane %v9785_v41, 5  ;;  %v9824_v26 = vshrl.u32 %v9275_v52, 16  ;;  %v9710_v34 = vsel %vm16444_vm4, %v9705_v11, %v17996_v47  ;;  %v9270_v25 = vld [vmem:[#allocation2 + $0x154] sm:$0x1] }
 0x45a   :  { %14692 = vmatmul.mubr.msk.bf16.gmra.mrb[48].mxu1 %vm3272_vm9, %v17914_v42  ;;  %v9754_v42 = vshrl.u32 %v9265_v58, 16  ;;  %v9770_v58 = vrot.slane %v9768_v8, 4  ;;  %v9747_v33 = vrot.slane %v9746_v20, 4  ;;  %v9777_v56 = vshll.u32 %v9268_v6, 16  ;;  %v9272_v21 = vld [vmem:[#allocation2 + $0x15c] sm:$0x1] }
 0x45b   :  { %14695 = vmatprep.mubr.msk.bf16.mxu1 %vm3272_vm9, %v17923_v1  ;;  %v9264_v1 = vld [vmem:[#allocation2 + $0x12c] sm:$0x1]  ;;  %v9724_v57 = vsel %vm16444_vm4, %v9719_v51, %v9723_v0  ;;  %v9798_v40 = vrot.slane %v9796_v49, 4  ;;  %v9801_v39 = vrot.slane %v9799_v30, 5  ;;  %v9738_v36 = vsel %vm16444_vm4, %v9733_v35, %v9737_v63  ;;  %v9277_v10 = vld [vmem:[#allocation2 + $0x170] sm:$0xf] }
 0x45c   :  { %v17988_v4 = vpop.f32.mrb[96].mxu0  ;;  %v9756_v48 = vrot.slane %v9754_v42, 4  ;;  %v9749_v23 = vshll.u32 %v9264_v1, 16  ;;  %v9827_v42 = vshll.u32 %v9275_v52, 16  ;;  %v9774_v28 = vor.u32 %v9773_v44, %v9770_v58  ;;  %v9279_v51 = vld [vmem:[#allocation2 + $0x178] sm:$0xf] }
 0x45d   :  { %18946 = vst [vmem:[#allocation25_spill] sm:$0xff] %v17988_v4  ;;  %v17990_v61 = vpop.f32.mrb[97].mxu0  ;;  %v9815_v5 = vrot.slane %v9813_v60, 5  ;;  %v9788_v47 = vor.u32 %v9787_v37, %v9784_v38  ;;  %v9826_v11 = vrot.slane %v9824_v26, 4  ;;  %v18029_v0 = vcombine.low %v9710_v34, %v9724_v57  ;;  %v9276_v30 = vld [vmem:[#allocation2 + $0x16c] sm:$0x1] }
 0x45e   :  { %18947 = vst [vmem:[#allocation26_spill] sm:$0xff] %v17990_v61  ;;  %v17992_v13 = vpop.f32.mrb[98].mxu0  ;;  %v9760_v15 = vor.u32 %v9759_v2, %v9756_v48  ;;  %v9751_v1 = vrot.slane %v9749_v23, 5  ;;  %v9765_v48 = vrot.slane %v9763_v46, 5  ;;  %v9829_v2 = vrot.slane %v9827_v42, 5 }
 0x45f   :  { %18948 = vst [vmem:[#allocation27_spill] sm:$0xff] %v17992_v13  ;;  %v17998_v7 = vpop.f32.mrb[99].mxu0  ;;  %v9779_v41 = vrot.slane %v9777_v56, 5  ;;  %v9791_v63 = vshll.u32 %v9270_v25, 16  ;;  %v9775_v46 = vrot.slane %v9774_v28, 4  ;;  %v9802_v52 = vor.u32 %v9801_v39, %v9798_v40 }
 0x460   :  { %18949 = vst [vmem:[#allocation28_spill] sm:$0xff] %v17998_v7  ;;  %v18025_v8 = vrot.slane %v9760_v15, 4  ;;  %v9752_v43 = vsel %vm16444_vm4, %v9747_v33, %v9751_v1  ;;  %v9805_v58 = vshll.u32 %v9272_v21, 16  ;;  %v9838_v6 = vshrl.u32 %v9277_v10, 16  ;;  %v9278_v37 = vld [vmem:[#allocation2 + $0x174] sm:$0x1] }
 0x461   :  { %v18037_v23 = vcombine.low %v9738_v36, %v9752_v43  ;;  %v9841_v15 = vshll.u32 %v9277_v10, 16  ;;  %v9830_v38 = vor.u32 %v9829_v2, %v9826_v11  ;;  %v9852_v26 = vshrl.u32 %v9279_v51, 16  ;;  %v9283_v39 = vld [vmem:[#allocation2 + $0x188] sm:$0xf]  ;;  %v9285_v43 = vld [vmem:[#allocation2 + $0x1a0] sm:$0xf] }
 0x462   :  { %14696 = vmatmul.mubr.msk.bf16.gmra.mrb[52].mxu1 %vm3272_vm9, %v17938_v17  ;;  %v9810_v17 = vshrl.u32 %v9273_v59, 16  ;;  %v9274_v59 = vld [vmem:[#allocation2 + $0x164] sm:$0x1]  ;;  %v9766_v49 = vsel %vm16444_vm4, %v18025_v8, %v9765_v48  ;;  %v9793_v34 = vrot.slane %v9791_v63, 5  ;;  %v9855_v33 = vshll.u32 %v9279_v51, 16 }
 0x463   :  { %14699 = vmatprep.mubr.msk.bf16.mxu1 %vm3272_vm9, %v17955_v18  ;;  %v9819_v60 = vshll.u32 %v9274_v59, 16  ;;  %v9780_v57 = vsel %vm16444_vm4, %v9775_v46, %v9779_v41  ;;  %v9803_v28 = vrot.slane %v9802_v52, 4  ;;  %v9807_v25 = vrot.slane %v9805_v58, 5  ;;  %v18052_v8 = vld [vmem:[#allocation2 + $0x17c] sm:$0x1] }
 0x464   :  { %v18010_v32 = vpop.f32.mrb[100].mxu0  ;;  %v9812_v53 = vrot.slane %v9810_v17, 4  ;;  %v9833_v40 = vshll.u32 %v9276_v30, 16  ;;  %v18054_v21 = vrot.slane %v9838_v6, 4  ;;  %v18058_v48 = vld [vmem:[#allocation2 + $0x184] sm:$0x1] }
 0x465   :  { %18950 = vst [vmem:[#allocation29_spill] sm:$0xff] %v18010_v32  ;;  %v18012_v50 = vpop.f32.mrb[101].mxu0  ;;  %v18062_v11 = vrot.slane %v9819_v60, 5  ;;  %v18064_v2 = vrot.slane %v9830_v38, 4  ;;  %v18066_v10 = vrot.slane %v9852_v26, 4  ;;  %v18070_v41 = vrot.slane %v9855_v33, 5 }
 0x466   :  { %18951 = vst [vmem:[#allocation30_spill] sm:$0xff] %v18012_v50  ;;  %v18014_v24 = vpop.f32.mrb[102].mxu0  ;;  %v9816_v35 = vor.u32 %v9815_v5, %v9812_v53  ;;  %v18056_v53 = vrot.slane %v9841_v15, 5  ;;  %v9847_v5 = vshll.u32 %v9278_v37, 16  ;;  %v9880_v51 = vshrl.u32 %v9283_v39, 16 }
 0x467   :  { %18952 = vst [vmem:[#allocation31_spill] sm:$0xff] %v18014_v24  ;;  %v18016_v18 = vpop.f32.mrb[103].mxu0  ;;  %v9287_v46 = vld [vmem:[#allocation2 + $0x1a8] sm:$0xf]  ;;  %v18076_v52 = vld [vmem:[#allocation2 + $0x264] sm:$0x1] }
 0x468   :  { %18953 = vst [vmem:[#allocation32_spill] sm:$0xff] %v18016_v18  ;;  %v18050_v36 = vrot.slane %v9816_v35, 4  ;;  %v18086_v30 = vrot.slane %v9833_v40, 5  ;;  %v9883_v35 = vshll.u32 %v9283_v39, 16  ;;  %v18088_v6 = vld [vmem:[#allocation2 + $0x26c] sm:$0x1]  ;;  %v9858_v39 = vor.u32 %v18070_v41, %v18066_v10 }
 0x469   :  { %v18100_v60 = vrot.slane %v9847_v5, 5  ;;  %v18102_v38 = vld [vmem:[#allocation2 + $0x274] sm:$0x1]  ;;  %v10851_v37 = vld [vmem:[#allocation2 + $0x260] sm:$0xe]  ;;  %v9861_v33 = vshll.u32 %v18052_v8, 16 }
 0x46a   :  { %14700 = vmatmul.mubr.msk.bf16.gmra.mrb[56].mxu1 %vm3272_vm9, %v17974_v16  ;;  %v9281_v16 = vld [vmem:[#allocation2 + $0x180] sm:$0xf]  ;;  %v10853_v5 = vld [vmem:[#allocation2 + $0x270] sm:$0xe]  ;;  %v9908_v8 = vshrl.u32 %v9287_v46, 16 }
 0x46b   :  { %14703 = vmatprep.mubr.msk.bf16.mxu1 %vm3272_vm9, %v17978_v45  ;;  %v9789_v45 = vrot.slane %v9788_v47, 4  ;;  %v9866_v1 = vshrl.u32 %v9281_v16, 16  ;;  %v9869_v56 = vshll.u32 %v9281_v16, 16  ;;  %v18082_v16 = vcombine.low %v9766_v49, %v9780_v57  ;;  %v9289_v10 = vld [vmem:[#allocation2 + $0x1b0] sm:$0xf] }
 0x46c   :  { %v18035_v20 = vpop.f32.mrb[104].mxu0  ;;  %v9844_v49 = vor.u32 %v18056_v53, %v18054_v21  ;;  %v9894_v57 = vshrl.u32 %v9285_v43, 16  ;;  %v9882_v21 = vrot.slane %v9880_v51, 4  ;;  %v9897_v53 = vshll.u32 %v9285_v43, 16  ;;  %v9291_v51 = vld [vmem:[#allocation2 + $0x1b8] sm:$0xf] }
 0x46d   :  { %18954 = vst [vmem:[#allocation33_spill] sm:$0xff] %v18035_v20  ;;  %v18039_v44 = vpop.f32.mrb[105].mxu0  ;;  %v9794_v47 = vsel %vm16444_vm4, %v9789_v45, %v9793_v34  ;;  %v18072_v63 = vrot.slane %v9866_v1, 4  ;;  %v18074_v59 = vrot.slane %v9869_v56, 5  ;;  %v9836_v34 = vsel %vm16444_vm4, %v18064_v2, %v18086_v30  ;;  %v9284_v1 = vld [vmem:[#allocation2 + $0x18c] sm:$0x1] }
 0x46e   :  { %18955 = vst [vmem:[#allocation34_spill] sm:$0xff] %v18039_v44  ;;  %v18044_v17 = vpop.f32.mrb[106].mxu0  ;;  %v9875_v56 = vshll.u32 %v18058_v48, 16  ;;  %v11225_v48 = vrot.slane %v18076_v52, 5  ;;  %v10854_v2 = vld [vmem:[#allocation2 + $0x278] sm:$0xe] }
 0x46f   :  { %18956 = vst [vmem:[#allocation35_spill] sm:$0xff] %v18044_v17  ;;  %v18046_v42 = vpop.f32.mrb[107].mxu0  ;;  %v9911_v30 = vshll.u32 %v9287_v46, 16  ;;  %v13573_v43 = vrot.slane %v10853_v5, 9  ;;  %v9290_v44 = vld [vmem:[#allocation2 + $0x1b4] sm:$0x1] }
 0x470   :  { %18957 = vst [vmem:[#allocation36_spill] sm:$0xff] %v18046_v42  ;;  %v9292_v18 = vld [vmem:[#allocation2 + $0x1bc] sm:$0x1]  ;;  %v9317_v50 = vld [vmem:[#allocation2 + $0x240] sm:$0xf] }
 0x472   :  { %14704 = vmatmul.mubr.msk.bf16.gmra.mrb[60].mxu1 %vm3272_vm9, %v17994_v54  ;;  %v9808_v54 = vsel %vm16444_vm4, %v9803_v28, %v9807_v25  ;;  %v18112_v28 = vld [vmem:[#allocation2 + $0x27c] sm:$0x1]  ;;  %v10852_v25 = vld [vmem:[#allocation2 + $0x268] sm:$0xe] }
 0x473   :  { %14707 = vmatprep.mubr.msk.bf16.mxu1 %vm3272_vm9, %v18004_v3  ;;  %v18092_v45 = vcombine.low %v9794_v47, %v9808_v54  ;;  %v9822_v3 = vsel %vm16444_vm4, %v18050_v36, %v18062_v11  ;;  %v9872_v36 = vor.u32 %v18074_v59, %v18072_v63  ;;  %v9885_v47 = vrot.slane %v9883_v35, 5 }
 0x474   :  { %v13571_v11 = vrot.slane %v10851_v37, 9  ;;  %v9889_v54 = vshll.u32 %v9284_v1, 16  ;;  %v11233_v63 = vrot.slane %v18102_v38, 5  ;;  %v9899_v59 = vrot.slane %v9897_v53, 5 }
 0x475   :  { %v18080_v58 = vpop.f32.mrb[108].mxu0  ;;  %v13574_v35 = vrot.slane %v10854_v2, 9  ;;  %v11237_v37 = vrot.slane %v18112_v28, 5  ;;  %v9873_v42 = vrot.slane %v9872_v36, 4 }
 0x476   :  { %18958 = vst [vmem:[#allocation37_spill] sm:$0xff] %v18080_v58  ;;  %v18090_v15 = vpop.f32.mrb[109].mxu0  ;;  %v18126_v41 = vsel %vm17479_vm12, %v13571_v11, %v11225_v48  ;;  %v9922_v11 = vshrl.u32 %v9289_v10, 16  ;;  %v9925_v48 = vshll.u32 %v9289_v10, 16  ;;  %v9288_v10 = vld [vmem:[#allocation2 + $0x1ac] sm:$0x1] }
 0x477   :  { %18959 = vst [vmem:[#allocation38_spill] sm:$0xff] %v18090_v15  ;;  %v18104_v26 = vpop.f32.mrb[110].mxu0  ;;  %v18122_v15 = vrot.slane %v9894_v57, 4  ;;  %v9886_v57 = vor.u32 %v9885_v47, %v9882_v21  ;;  %v9845_v21 = vrot.slane %v9844_v49, 4  ;;  %v9936_v47 = vshrl.u32 %v9291_v51, 16 }
 0x478   :  { %18960 = vst [vmem:[#allocation39_spill] sm:$0xff] %v18104_v26  ;;  %v18114_v40 = vpop.f32.mrb[111].mxu0  ;;  %v13572_v26 = vrot.slane %v10852_v25, 9  ;;  %v9910_v25 = vrot.slane %v9908_v8, 4  ;;  %v9939_v8 = vshll.u32 %v9291_v51, 16  ;;  %v9924_v20 = vrot.slane %v9922_v11, 4 }
 0x479   :  { %18961 = vst [vmem:[#allocation40_spill] sm:$0xff] %v18114_v40  ;;  %v11229_v40 = vrot.slane %v18088_v6, 5  ;;  %v9293_v58 = vld [vmem:[#allocation2 + $0x1c0] sm:$0xf]  ;;  %v9295_v49 = vld [vmem:[#allocation2 + $0x1c8] sm:$0xf] }
 0x47a   :  { %14708 = vmatmul.mubr.msk.bf16.gmra.mrb[0].mxu1 %vm3272_vm9, %v18029_v0  ;;  %v18144_v0 = vsel %vm17479_vm12, %v13573_v43, %v11233_v63  ;;  %v18158_v63 = vcombine.low %v9822_v3, %v9836_v34  ;;  %v9887_v17 = vrot.slane %v9886_v57, 4  ;;  %v9927_v5 = vrot.slane %v9925_v48, 5  ;;  %v18178_v48 = vld [vmem:[#allocation2 + $0x1c4] sm:$0x1] }
 0x47b   :  { %v18133_v46 = vsel %vm17479_vm12, %v13572_v26, %v11229_v40  ;;  %14711 = vmatprep.mubr.msk.bf16.mxu1 %vm3272_vm9, %v18037_v23  ;;  %v9286_v26 = vld [vmem:[#allocation2 + $0x1a4] sm:$0x1]  ;;  %v9913_v40 = vrot.slane %v9911_v30, 5  ;;  %v18150_v23 = vsel %vm17479_vm12, %v13574_v35, %v11237_v37  ;;  %v9863_v30 = vrot.slane %v9861_v33, 5 }
 0x47c   :  { %v9891_v35 = vrot.slane %v9889_v54, 5  ;;  %v9900_v37 = vor.u32 %v9899_v59, %v18122_v15  ;;  %v9941_v3 = vrot.slane %v9939_v8, 5  ;;  %v9950_v34 = vshrl.u32 %v9293_v58, 16 }
 0x47d   :  { %v18138_v1 = vpop.f32.mrb[112].mxu0  ;;  %v9914_v51 = vor.u32 %v9913_v40, %v9910_v25  ;;  %v9850_v33 = vsel %vm16444_vm4, %v9845_v21, %v18100_v60  ;;  %v9967_v36 = vshll.u32 %v9295_v49, 16  ;;  %v9917_v57 = vshll.u32 %v9288_v10, 16  ;;  %v9297_v25 = vld [vmem:[#allocation2 + $0x1d0] sm:$0xf] }
 0x47e   :  { %18962 = vst [vmem:[#allocation41_spill] sm:$0xff] %v18138_v1  ;;  %v18146_v53 = vpop.f32.mrb[113].mxu0  ;;  %v9877_v1 = vrot.slane %v9875_v56, 5  ;;  %v9964_v56 = vshrl.u32 %v9295_v49, 16  ;;  %v9892_v60 = vsel %vm16444_vm4, %v9887_v17, %v9891_v35  ;;  %v9928_v40 = vor.u32 %v9927_v5, %v9924_v20 }
 0x47f   :  { %18963 = vst [vmem:[#allocation42_spill] sm:$0xff] %v18146_v53  ;;  %v18152_v2 = vpop.f32.mrb[114].mxu0  ;;  %v9859_v53 = vrot.slane %v9858_v39, 4  ;;  %v9953_v39 = vshll.u32 %v9293_v58, 16  ;;  %v9945_v11 = vshll.u32 %v9292_v18, 16  ;;  %v9915_v21 = vrot.slane %v9914_v51, 4 }
 0x480   :  { %18964 = vst [vmem:[#allocation43_spill] sm:$0xff] %v18152_v2  ;;  %v18156_v43 = vpop.f32.mrb[115].mxu0  ;;  %v9903_v2 = vshll.u32 %v9286_v26, 16  ;;  %v9878_v58 = vsel %vm16444_vm4, %v9873_v42, %v9877_v1  ;;  %v9952_v8 = vrot.slane %v9950_v34, 4  ;;  %v9299_v1 = vld [vmem:[#allocation2 + $0x1d8] sm:$0xf] }
 0x481   :  { %18965 = vst [vmem:[#allocation44_spill] sm:$0xff] %v18156_v43  ;;  %v9938_v43 = vrot.slane %v9936_v47, 4  ;;  %v9864_v15 = vsel %vm16444_vm4, %v9859_v53, %v9863_v30  ;;  %v9901_v53 = vrot.slane %v9900_v37, 4  ;;  %v9955_v42 = vrot.slane %v9953_v39, 5  ;;  %v18187_v51 = vld [vmem:[#allocation2 + $0x1cc] sm:$0x1] }
 0x482   :  { %14712 = vmatmul.mubr.msk.bf16.gmra.mrb[4].mxu1 %vm3272_vm9, %v18082_v16  ;;  %v9905_v59 = vrot.slane %v9903_v2, 5  ;;  %v9931_v16 = vshll.u32 %v9290_v44, 16  ;;  %v9966_v44 = vrot.slane %v9964_v56, 4  ;;  %v9969_v30 = vrot.slane %v9967_v36, 5  ;;  %v18191_v36 = vld [vmem:[#allocation2 + $0x1d4] sm:$0x1] }
 0x483   :  { %14715 = vmatprep.mubr.msk.bf16.mxu1 %vm3272_vm9, %v18092_v45  ;;  %v9942_v47 = vor.u32 %v9941_v3, %v9938_v43  ;;  %v9978_v10 = vshrl.u32 %v9297_v25, 16  ;;  %v9981_v49 = vshll.u32 %v9297_v25, 16  ;;  %v9919_v17 = vrot.slane %v9917_v57, 5  ;;  %v9301_v3 = vld [vmem:[#allocation2 + $0x1f0] sm:$0xf] }
 0x484   :  { %v9933_v35 = vrot.slane %v9931_v16, 5  ;;  %v9959_v18 = vshll.u32 %v18178_v48, 16  ;;  %v13464_v20 = vcombine.low %v9878_v58, %v9892_v60  ;;  %v9906_v5 = vsel %vm16444_vm4, %v9901_v53, %v9905_v59 }
 0x485   :  { %v18170_v54 = vpop.f32.mrb[116].mxu0  ;;  %v9929_v37 = vrot.slane %v9928_v40, 4  ;;  %v9947_v43 = vrot.slane %v9945_v11, 5  ;;  %v9920_v34 = vsel %vm16444_vm4, %v9915_v21, %v9919_v17  ;;  %v9943_v39 = vrot.slane %v9942_v47, 4  ;;  %v9305_v21 = vld [vmem:[#allocation2 + $0x200] sm:$0xf] }
 0x486   :  { %18966 = vst [vmem:[#allocation45_spill] sm:$0xff] %v18170_v54  ;;  %v18174_v26 = vpop.f32.mrb[117].mxu0  ;;  %v9956_v56 = vor.u32 %v9955_v42, %v9952_v8  ;;  %v9970_v58 = vor.u32 %v9969_v30, %v9966_v44  ;;  %v9980_v57 = vrot.slane %v9978_v10, 4  ;;  %v9983_v59 = vrot.slane %v9981_v49, 5  ;;  %v18208_v49 = vld [vmem:[#allocation2 + $0x1dc] sm:$0x1] }
 0x487   :  { %18967 = vst [vmem:[#allocation46_spill] sm:$0xff] %v18174_v26  ;;  %v18180_v45 = vpop.f32.mrb[118].mxu0  ;;  %v13463_v26 = vcombine.low %v9850_v33, %v9864_v15  ;;  %v9992_v33 = vshrl.u32 %v9299_v1, 16  ;;  %v9303_v15 = vld [vmem:[#allocation2 + $0x1f8] sm:$0xf]  ;;  %v9995_v16 = vshll.u32 %v9299_v1, 16  ;;  %v13465_v25 = vcombine.low %v9906_v5, %v9920_v34 }
 0x488   :  { %18968 = vst [vmem:[#allocation47_spill] sm:$0xff] %v18180_v45  ;;  %v18182_v2 = vpop.f32.mrb[119].mxu0  ;;  %v9961_v53 = vrot.slane %v9959_v18, 5  ;;  %v10006_v40 = vshrl.u32 %v9301_v3, 16  ;;  %v10009_v11 = vshll.u32 %v9301_v3, 16  ;;  %v9973_v8 = vshll.u32 %v18187_v51, 16 }
 0x489   :  { %18969 = vst [vmem:[#allocation48_spill] sm:$0xff] %v18182_v2  ;;  %v9987_v42 = vshll.u32 %v18191_v36, 16  ;;  %v10023_v44 = vshll.u32 %v9303_v15, 16  ;;  %v9948_v1 = vsel %vm16444_vm4, %v9943_v39, %v9947_v43  ;;  %v9957_v10 = vrot.slane %v9956_v56, 4 }
 0x48a   :  { %14716 = vmatmul.mubr.msk.bf16.gmra.mrb[8].mxu1 %vm3272_vm9, %v18158_v63  ;;  %v10020_v63 = vshrl.u32 %v9303_v15, 16  ;;  %v9994_v17 = vrot.slane %v9992_v33, 4  ;;  %v9971_v5 = vrot.slane %v9970_v58, 4  ;;  %v9984_v3 = vor.u32 %v9983_v59, %v9980_v57  ;;  %v9307_v15 = vld [vmem:[#allocation2 + $0x208] sm:$0xf] }
 0x48b   :  { %14719 = vmatprep.mubr.msk.bf16.mxu1 %vm3272_vm9, %v13463_v26  ;;  %v9934_v26 = vsel %vm16444_vm4, %v9929_v37, %v9933_v35  ;;  %v9997_v34 = vrot.slane %v9995_v16, 5  ;;  %v10011_v2 = vrot.slane %v10009_v11, 5  ;;  %v10034_v35 = vshrl.u32 %v9305_v21, 16  ;;  %v9309_v16 = vld [vmem:[#allocation2 + $0x210] sm:$0xf] }
 0x48c   :  { %v10037_v37 = vshll.u32 %v9305_v21, 16  ;;  %v9975_v45 = vrot.slane %v9973_v8, 5  ;;  %v18215_v43 = vrot.slane %v9987_v42, 5  ;;  %v10022_v39 = vrot.slane %v10020_v63, 4  ;;  %v18224_v8 = vld [vmem:[#allocation2 + $0x1fc] sm:$0x1] }
 0x48d   :  { %v18196_v60 = vpop.f32.mrb[120].mxu0  ;;  %v10025_v56 = vrot.slane %v10023_v44, 5  ;;  %v13466_v33 = vcombine.low %v9934_v26, %v9948_v1  ;;  %v9962_v58 = vsel %vm16444_vm4, %v9957_v10, %v9961_v53  ;;  %v10048_v57 = vshrl.u32 %v9307_v15, 16  ;;  %v18232_v26 = vld [vmem:[#allocation2 + $0x204] sm:$0x1] }
 0x48e   :  { %18970 = vst [vmem:[#allocation49_spill] sm:$0xff] %v18196_v60  ;;  %v18198_v47 = vpop.f32.mrb[121].mxu0  ;;  %v18213_v60 = vld [vmem:[#allocation2 + $0x1f4] sm:$0x1]  ;;  %v10051_v59 = vshll.u32 %v9307_v15, 16  ;;  %v18222_v11 = vrot.slane %v9984_v3, 4  ;;  %v9998_v21 = vor.u32 %v9997_v34, %v9994_v17 }
 0x48f   :  { %18971 = vst [vmem:[#allocation50_spill] sm:$0xff] %v18198_v47  ;;  %v18202_v30 = vpop.f32.mrb[122].mxu0  ;;  %v10001_v47 = vshll.u32 %v18208_v49, 16  ;;  %v10015_v42 = vshll.u32 %v18213_v60, 16  ;;  %v10039_v1 = vrot.slane %v10037_v37, 5  ;;  %v10062_v17 = vshrl.u32 %v9309_v16, 16 }
 0x490   :  { %18972 = vst [vmem:[#allocation51_spill] sm:$0xff] %v18202_v30  ;;  %v18210_v18 = vpop.f32.mrb[123].mxu0  ;;  %v10008_v30 = vrot.slane %v10006_v40, 4  ;;  %v9976_v40 = vsel %vm16444_vm4, %v9971_v5, %v9975_v45  ;;  %v10026_v45 = vor.u32 %v10025_v56, %v10022_v39  ;;  %v18236_v5 = vld [vmem:[#allocation2 + $0x20c] sm:$0x1]  ;;  %v10065_v3 = vshll.u32 %v9309_v16, 16 }
 0x491   :  { %18973 = vst [vmem:[#allocation52_spill] sm:$0xff] %v18210_v18  ;;  %v9311_v18 = vld [vmem:[#allocation2 + $0x218] sm:$0xf]  ;;  %v18230_v53 = vrot.slane %v10001_v47, 5  ;;  %v13467_v15 = vcombine.low %v9962_v58, %v9976_v40  ;;  %v10029_v37 = vshll.u32 %v18224_v8, 16 }
 0x492   :  { %14720 = vmatmul.mubr.msk.bf16.gmra.mrb[12].mxu1 %vm3272_vm9, %v13464_v20  ;;  %v10012_v44 = vor.u32 %v10011_v2, %v10008_v30  ;;  %v10036_v20 = vrot.slane %v10034_v35, 4  ;;  %v10076_v34 = vshrl.u32 %v9311_v18, 16  ;;  %v10079_v47 = vshll.u32 %v9311_v18, 16  ;;  %v18247_v39 = vld [vmem:[#allocation2 + $0x214] sm:$0x1] }
 0x493   :  { %14723 = vmatprep.mubr.msk.bf16.mxu1 %vm3272_vm9, %v13465_v25  ;;  %v10050_v25 = vrot.slane %v10048_v57, 4  ;;  %v9990_v2 = vsel %vm16444_vm4, %v18222_v11, %v18215_v43  ;;  %v9999_v30 = vrot.slane %v9998_v21, 4  ;;  %v10017_v35 = vrot.slane %v10015_v42, 5  ;;  %v9313_v56 = vld [vmem:[#allocation2 + $0x220] sm:$0xf] }
 0x494   :  { %v10013_v58 = vrot.slane %v10012_v44, 4  ;;  %v10040_v16 = vor.u32 %v10039_v1, %v10036_v20  ;;  %v10043_v57 = vshll.u32 %v18232_v26, 16  ;;  %v10057_v18 = vshll.u32 %v18236_v5, 16  ;;  %v18255_v1 = vld [vmem:[#allocation2 + $0x21c] sm:$0x1] }
 0x495   :  { %v18228_v63 = vpop.f32.mrb[124].mxu0  ;;  %v10027_v40 = vrot.slane %v10026_v45, 4  ;;  %v10081_v11 = vrot.slane %v10079_v47, 5  ;;  %v10090_v21 = vshrl.u32 %v9313_v56, 16  ;;  %v10093_v42 = vshll.u32 %v9313_v56, 16 }
 0x496   :  { %18974 = vst [vmem:[#allocation53_spill] sm:$0xff] %v18228_v63  ;;  %v18234_v10 = vpop.f32.mrb[125].mxu0  ;;  %v10053_v63 = vrot.slane %v10051_v59, 5  ;;  %v9315_v59 = vld [vmem:[#allocation2 + $0x228] sm:$0xf]  ;;  %v10004_v44 = vsel %vm16444_vm4, %v9999_v30, %v18230_v53  ;;  %v10031_v20 = vrot.slane %v10029_v37, 5  ;;  %v10018_v45 = vsel %vm16444_vm4, %v10013_v58, %v10017_v35 }
 0x497   :  { %18975 = vst [vmem:[#allocation54_spill] sm:$0xff] %v18234_v10  ;;  %v18238_v54 = vpop.f32.mrb[126].mxu0  ;;  %v10078_v10 = vrot.slane %v10076_v34, 4  ;;  %v10104_v32 = vshrl.u32 %v9315_v59, 16  ;;  %v10107_v7 = vshll.u32 %v9315_v59, 16  ;;  %v10121_v34 = vshll.u32 %v9317_v50, 16 }
 0x498   :  { %18976 = vst [vmem:[#allocation55_spill] sm:$0xff] %v18238_v54  ;;  %v18240_v24 = vpop.f32.mrb[127].mxu0  ;;  %v10067_v54 = vrot.slane %v10065_v3, 5  ;;  %v10054_v43 = vor.u32 %v10053_v63, %v10050_v25  ;;  %v18263_v3 = vld [vmem:[#allocation2 + $0x224] sm:$0x1]  ;;  %v10032_v53 = vsel %vm16444_vm4, %v10027_v40, %v10031_v20  ;;  %v10041_v47 = vrot.slane %v10040_v16, 4 }
 0x499   :  { %18977 = vst [vmem:[#allocation56_spill] sm:$0xff] %v18240_v24  ;;  %v10064_v24 = vrot.slane %v10062_v17, 4  ;;  %v10071_v17 = vshll.u32 %v18247_v39, 16  ;;  %v10059_v30 = vrot.slane %v10057_v18, 5  ;;  %v10082_v58 = vor.u32 %v10081_v11, %v10078_v10 }
 0x49a   :  { %14724 = vmatmul.mubr.msk.bf16.gmra.mrb[16].mxu1 %vm3272_vm9, %v13466_v33  ;;  %v10118_v33 = vshrl.u32 %v9317_v50, 16  ;;  %v10055_v35 = vrot.slane %v10054_v43, 4  ;;  %v10092_v59 = vrot.slane %v10090_v21, 4  ;;  %v10095_v13 = vrot.slane %v10093_v42, 5  ;;  %v18275_v43 = vld [vmem:[#allocation2 + $0x22c] sm:$0x1] }
 0x49b   :  { %14727 = vmatprep.mubr.msk.bf16.mxu1 %vm3272_vm9, %v13467_v15  ;;  %v10068_v37 = vor.u32 %v10067_v54, %v10064_v24  ;;  %v9319_v15 = vld [vmem:[#allocation2 + $0x248] sm:$0xf]  ;;  %v10085_v4 = vshll.u32 %v18255_v1, 16  ;;  %v10099_v50 = vshll.u32 %v18263_v3, 16  ;;  %v10106_v9 = vrot.slane %v10104_v32, 4 }
 0x49c   :  { %v10109_v40 = vrot.slane %v10107_v7, 5  ;;  %v10120_v20 = vrot.slane %v10118_v33, 4  ;;  %v10123_v19 = vrot.slane %v10121_v34, 5  ;;  %v10132_v16 = vshrl.u32 %v9319_v15, 16 }
 0x49d   :  { %v18260_v63 = vpop.f32.mrb[64].mxu0  ;;  %v10135_v18 = vshll.u32 %v9319_v15, 16  ;;  %v13468_v24 = vcombine.low %v9990_v2, %v10004_v44  ;;  %v13469_v54 = vcombine.low %v10018_v45, %v10032_v53  ;;  %v10045_v27 = vrot.slane %v10043_v57, 5  ;;  %v18283_v57 = vld [vmem:[#allocation2 + $0x244] sm:$0x1] }
 0x49e   :  { %v18267_v25 = vpop.f32.mrb[65].mxu0  ;;  %v10069_v62 = vrot.slane %v10068_v37, 4  ;;  %v10060_v10 = vsel %vm16444_vm4, %v10055_v35, %v10059_v30  ;;  %v10083_v11 = vrot.slane %v10082_v58, 4  ;;  %v10096_v21 = vor.u32 %v10095_v13, %v10092_v59  ;;  %v18285_v45 = vld [vmem:[#allocation2 + $0x24c] sm:$0x1] }
 0x49f   :  { %v18269_v56 = vpop.f32.mrb[66].mxu0  ;;  %v10113_v42 = vshll.u32 %v18275_v43, 16  ;;  %v10046_v7 = vsel %vm16444_vm4, %v10041_v47, %v10045_v27  ;;  %v10073_v32 = vrot.slane %v10071_v17, 5  ;;  %v10087_v2 = vrot.slane %v10085_v4, 5  ;;  %v9325_v37 = vld [vmem:[#allocation2 + $0x260] sm:$0xf] }
 0x4a0   :  { %v18271_v61 = vpop.f32.mrb[67].mxu0  ;;  %v10110_v44 = vor.u32 %v10109_v40, %v10106_v9  ;;  %v10101_v13 = vrot.slane %v10099_v50, 5  ;;  %v10124_v34 = vor.u32 %v10123_v19, %v10120_v20  ;;  %v10134_v53 = vrot.slane %v10132_v16, 4  ;;  %v9321_v9 = vld [vmem:[#allocation2 + $0x250] sm:$0xf] }
 0x4a1   :  { %v10137_v30 = vrot.slane %v10135_v18, 5  ;;  %v13470_v15 = vcombine.low %v10046_v7, %v10060_v10  ;;  %v10074_v27 = vsel %vm16444_vm4, %v10069_v62, %v10073_v32  ;;  %v10160_v4 = vshrl.u32 %v9323_v29, 16  ;;  %v9327_v40 = vld [vmem:[#allocation2 + $0x268] sm:$0xf] }
 0x4a2   :  { %14728 = vmatmul.mubr.msk.bf16.gmra.mrb[20].mxu1 %vm3272_vm9, %v13468_v24  ;;  %v10163_v47 = vshll.u32 %v9323_v29, 16  ;;  %v10088_v35 = vsel %vm16444_vm4, %v10083_v11, %v10087_v2  ;;  %v10097_v59 = vrot.slane %v10096_v21, 4  ;;  %v10115_v50 = vrot.slane %v10113_v42, 5 }
 0x4a3   :  { %14731 = vmatprep.mubr.msk.bf16.mxu1 %vm3272_vm9, %v13469_v54  ;;  %v10127_v19 = vshll.u32 %v18283_v57, 16  ;;  %v10111_v16 = vrot.slane %v10110_v44, 4  ;;  %v10141_v62 = vshll.u32 %v18285_v45, 16  ;;  %v10174_v18 = vshrl.u32 %v9325_v37, 16 }
 0x4a4   :  { %v10177_v24 = vshll.u32 %v9325_v37, 16  ;;  %v10125_v54 = vrot.slane %v10124_v34, 4  ;;  %v10138_v10 = vor.u32 %v10137_v30, %v10134_v53  ;;  %v10146_v29 = vshrl.u32 %v9321_v9, 16  ;;  %v9331_v37 = vld [vmem:[#allocation2 + $0x278] sm:$0xf] }
 0x4a5   :  { %v18288_v33 = vpop.f32.mrb[68].mxu0  ;;  %v10149_v7 = vshll.u32 %v9321_v9, 16  ;;  %v10162_v32 = vrot.slane %v10160_v4, 4  ;;  %v10165_v11 = vrot.slane %v10163_v47, 5  ;;  %v10188_v2 = vshrl.u32 %v9327_v40, 16 }
 0x4a6   :  { %v18292_v17 = vpop.f32.mrb[69].mxu0  ;;  %v10191_v12 = vshll.u32 %v9327_v40, 16  ;;  %v13471_v21 = vcombine.low %v10074_v27, %v10088_v35  ;;  %v10102_v42 = vsel %vm16444_vm4, %v10097_v59, %v10101_v13  ;;  %v10129_v44 = vrot.slane %v10127_v19, 5  ;;  %v18310_v27 = vld [vmem:[#allocation2 + $0x254] sm:$0x1] }
 0x4a7   :  { %v18296_v58 = vpop.f32.mrb[70].mxu0  ;;  %v10143_v22 = vrot.slane %v10141_v62, 5  ;;  %v10116_v34 = vsel %vm16444_vm4, %v10111_v16, %v10115_v50  ;;  %v10139_v53 = vrot.slane %v10138_v10, 4  ;;  %v10148_v9 = vrot.slane %v10146_v29, 4  ;;  %v18316_v47 = vld [vmem:[#allocation2 + $0x25c] sm:$0x1] }
 0x4a8   :  { %18978 = vst [vmem:[#allocation57_spill] sm:$0xff] %v18296_v58  ;;  %v18299_v20 = vpop.f32.mrb[71].mxu0  ;;  %v10179_v58 = vrot.slane %v10177_v24, 5  ;;  %v10151_v13 = vrot.slane %v10149_v7, 5  ;;  %v10166_v35 = vor.u32 %v10165_v11, %v10162_v32  ;;  %v10190_v59 = vrot.slane %v10188_v2, 4 }
 0x4a9   :  { %18979 = vst [vmem:[#allocation58_spill] sm:$0xff] %v18299_v20  ;;  %v10176_v20 = vrot.slane %v10174_v18, 4  ;;  %v10193_v19 = vrot.slane %v10191_v12, 5  ;;  %v10202_v50 = vshrl.u32 %v9329_v31, 16  ;;  %v10205_v16 = vshll.u32 %v9329_v31, 16 }
 0x4aa   :  { %14732 = vmatmul.mubr.msk.bf16.gmra.mrb[24].mxu1 %vm3272_vm9, %v13470_v15  ;;  %v10130_v15 = vsel %vm16444_vm4, %v10125_v54, %v10129_v44  ;;  %v10216_v62 = vshrl.u32 %v9331_v37, 16  ;;  %v10219_v18 = vshll.u32 %v9331_v37, 16  ;;  %v10155_v10 = vshll.u32 %v18310_v27, 16 }
 0x4ab   :  { %14735 = vmatprep.mubr.msk.bf16.mxu1 %vm3272_vm9, %v13471_v21  ;;  %v10180_v29 = vor.u32 %v10179_v58, %v10176_v20  ;;  %v13472_v7 = vcombine.low %v10102_v42, %v10116_v34  ;;  %v10144_v54 = vsel %vm16444_vm4, %v10139_v53, %v10143_v22  ;;  %v10152_v21 = vor.u32 %v10151_v13, %v10148_v9 }
 0x4ac   :  { %v10169_v32 = vshll.u32 %v18316_v47, 16  ;;  %v13473_v11 = vcombine.low %v10130_v15, %v10144_v54  ;;  %v10167_v12 = vrot.slane %v10166_v35, 4  ;;  %v10183_v2 = vshll.u32 %v18076_v52, 16 }
 0x4ad   :  { %v18308_v30 = vpop.f32.mrb[72].mxu0  ;;  %v10194_v44 = vor.u32 %v10193_v19, %v10190_v59  ;;  %v10204_v31 = vrot.slane %v10202_v50, 4  ;;  %v10218_v37 = vrot.slane %v10216_v62, 4  ;;  %v10197_v58 = vshll.u32 %v18088_v6, 16 }
 0x4ae   :  { %v18314_v4 = vpop.f32.mrb[73].mxu0  ;;  %v10153_v22 = vrot.slane %v10152_v21, 4  ;;  %v10171_v20 = vrot.slane %v10169_v32, 5  ;;  %v10157_v34 = vrot.slane %v10155_v10, 5  ;;  %v10185_v53 = vrot.slane %v10183_v2, 5 }
 0x4af   :  { %18980 = vst [vmem:[#allocation59_spill] sm:$0xff] %v18314_v4  ;;  %v18318_v40 = vpop.f32.mrb[74].mxu0  ;;  %v10221_v4 = vrot.slane %v10219_v18, 5  ;;  %v10195_v9 = vrot.slane %v10194_v44, 4  ;;  %v10225_v6 = vshll.u32 %v18112_v28, 16  ;;  %v10199_v50 = vrot.slane %v10197_v58, 5 }
 0x4b0   :  { %18981 = vst [vmem:[#allocation60_spill] sm:$0xff] %v18318_v40  ;;  %v18320_v24 = vpop.f32.mrb[75].mxu0  ;;  %v10207_v40 = vrot.slane %v10205_v16, 5  ;;  %v10172_v13 = vsel %vm16444_vm4, %v10167_v12, %v10171_v20  ;;  %v10158_v62 = vsel %vm16444_vm4, %v10153_v22, %v10157_v34  ;;  %v10211_v18 = vshll.u32 %v18102_v38, 16  ;;  %v10791_v10 = vld [vmem:[#allocation2 + $0x10] sm:$0xe] }
 0x4b1   :  { %18982 = vst [vmem:[#allocation61_spill] sm:$0xff] %v18320_v24  ;;  %v10181_v24 = vrot.slane %v10180_v29, 4  ;;  %v10222_v59 = vor.u32 %v10221_v4, %v10218_v37  ;;  %v13474_v29 = vcombine.low %v10158_v62, %v10172_v13  ;;  %v10227_v28 = vrot.slane %v10225_v6, 5  ;;  %v10792_v21 = vld [vmem:[#allocation2 + $0x18] sm:$0xe] }
 0x4b2   :  { %14736 = vmatmul.mubr.msk.bf16.gmra.mrb[28].mxu1 %vm3272_vm9, %v13472_v7  ;;  %v10208_v35 = vor.u32 %v10207_v40, %v10204_v31  ;;  %v10200_v7 = vsel %vm16444_vm4, %v10195_v9, %v10199_v50  ;;  %v15737_v32 = vld [vmem:[#allocation2 + $0x14] sm:$0x1]  ;;  %v10213_v12 = vrot.slane %v10211_v18, 5  ;;  %v13512_v38 = vrot.slane %v10792_v21, 9  ;;  %v15738_v44 = vld [vmem:[#allocation2 + $0x1c] sm:$0x1] }
 0x4b3   :  { %14739 = vmatprep.mubr.msk.bf16.mxu1 %vm3272_vm9, %v13473_v11  ;;  %v10186_v19 = vsel %vm16444_vm4, %v10181_v24, %v10185_v53  ;;  %v10223_v54 = vrot.slane %v10222_v59, 4  ;;  %v13511_v24 = vrot.slane %v10791_v10, 9  ;;  %v10985_v11 = vrot.slane %v15737_v32, 5  ;;  %v10794_v9 = vld [vmem:[#allocation2 + $0x28] sm:$0xe] }
 0x4b4   :  { %v13475_v40 = vcombine.low %v10186_v19, %v10200_v7  ;;  %v10209_v4 = vrot.slane %v10208_v35, 4  ;;  %v10989_v31 = vrot.slane %v15738_v44, 5  ;;  %v10795_v13 = vld [vmem:[#allocation2 + $0x30] sm:$0xe]  ;;  %v10793_v6 = vld [vmem:[#allocation2 + $0x20] sm:$0xe] }
 0x4b5   :  { %v18330_v42 = vpop.f32.mrb[76].mxu0  ;;  %v10228_v22 = vsel %vm16444_vm4, %v10223_v54, %v10227_v28  ;;  %v10986_v34 = vsel %vm17479_vm12, %v13511_v24, %v10985_v11  ;;  %v13514_v50 = vrot.slane %v10794_v9, 9  ;;  %v15739_v62 = vld [vmem:[#allocation2 + $0x2c] sm:$0x1]  ;;  %v13515_v10 = vrot.slane %v10795_v13, 9 }
 0x4b6   :  { %v18332_v52 = vpop.f32.mrb[77].mxu0  ;;  %v10214_v58 = vsel %vm16444_vm4, %v10209_v4, %v10213_v12  ;;  %v10990_v59 = vsel %vm17479_vm12, %v13512_v38, %v10989_v31  ;;  %v10997_v18 = vrot.slane %v15739_v62, 5  ;;  %v15533_v4 = vld [vmem:[#allocation9 + $0x8] sm:$0xff]   ;;  %v13513_v54 = vrot.slane %v10793_v6, 9  ;;  %v15741_v28 = vld [vmem:[#allocation2 + $0x24] sm:$0x1] }
 0x4b7   :  { %v18336_v15 = vpop.f32.mrb[78].mxu0  ;;  %v13476_v35 = vcombine.low %v10214_v58, %v10228_v22  ;;  %v13575_v19 = vcombine.low %v10986_v34, %v10990_v59  ;;  %v10993_v21 = vrot.slane %v15741_v28, 5  ;;  %v13516_v32 = vrot.slane %v10796_v14, 9  ;;  %v15742_v11 = vld [vmem:[#allocation2 + $0x3c] sm:$0x1] }
 0x4b8   :  { %v18341_v16 = vpop.f32.mrb[79].mxu0  ;;  %v11005_v12 = vrot.slane %v15742_v11, 5  ;;  %v10998_v44 = vsel %vm17479_vm12, %v13514_v50, %v10997_v18  ;;  %v10797_v58 = vld [vmem:[#allocation2 + $0x40] sm:$0xe]  ;;  %v10798_v9 = vld [vmem:[#allocation2 + $0x48] sm:$0xe] }
 0x4b9   :  { %v10994_v13 = vsel %vm17479_vm12, %v13513_v54, %v10993_v21  ;;  %v15743_v62 = vld [vmem:[#allocation2 + $0x44] sm:$0x1]  ;;  %v13518_v14 = vrot.slane %v10798_v9, 9  ;;  %v15746_v21 = vld [vmem:[#allocation2 + $0x6c] sm:$0x1] }
 0x4ba   :  { %14740 = vmatmul.mubr.msk.bf16.gmra.mrb[32].mxu1 %vm3272_vm9, %v13474_v29  ;;  %v15740_v29 = vld [vmem:[#allocation2 + $0x34] sm:$0x1]  ;;  %v13576_v59 = vcombine.low %v10994_v13, %v10998_v44  ;;  %v11006_v6 = vsel %vm17479_vm12, %v13516_v32, %v11005_v12  ;;  %v11009_v18 = vrot.slane %v15743_v62, 5  ;;  %v15745_v28 = vld [vmem:[#allocation2 + $0x64] sm:$0x1]  ;;  %v11021_v44 = vrot.slane %v15746_v21, 5 }
 0x4bb   :  { %14743 = vmatprep.mubr.msk.bf16.mxu1 %vm3272_vm9, %v13475_v40  ;;  %v11001_v7 = vrot.slane %v15740_v29, 5  ;;  %v15532_v40 = vld [vmem:[#allocation9] sm:$0xff]   ;;  %v15744_v29 = vld [vmem:[#allocation2 + $0x4c] sm:$0x1]  ;;  %v11017_v11 = vrot.slane %v15745_v28, 5 }
 0x4bc   :  { %14815 = vmatprep.subr.bf16.mxu0 %v15532_v40 }
 0x4bd   :  { %v18350_v2 = vpop.f32.mrb[80].mxu0  ;;  %14816 = vmatpush3.bf16.msra.mxu0 %v15532_v40  ;;  %v11002_v22 = vsel %vm17479_vm12, %v13515_v10, %v11001_v7  ;;  %v11013_v40 = vrot.slane %v15744_v29, 5  ;;  %v10800_v10 = vld [vmem:[#allocation2 + $0x68] sm:$0xe] }
 0x4be   :  { %v18352_v37 = vpop.f32.mrb[81].mxu0  ;;  %14817 = vmatprep.subr.bf16.mxu0 %v15533_v4  ;;  %v13577_v50 = vcombine.low %v11002_v22, %v11006_v6  ;;  %v13520_v54 = vrot.slane %v10800_v10, 9  ;;  %v10803_v22 = vld [vmem:[#allocation2 + $0x80] sm:$0xe]  ;;  %v10804_v29 = vld [vmem:[#allocation2 + $0x88] sm:$0xe] }
 0x4bf   :  { %v18358_v20 = vpop.f32.mrb[82].mxu0  ;;  %v11014_v12 = vsel %vm17479_vm12, %v13518_v14, %v11013_v40  ;;  %v15749_v10 = vld [vmem:[#allocation2 + $0x74] sm:$0x1]  ;;  %v13524_v28 = vrot.slane %v10804_v29, 9 }
 0x4c0   :  { %v18362_v53 = vpop.f32.mrb[83].mxu0  ;;  %v11022_v13 = vsel %vm17479_vm12, %v13520_v54, %v11021_v44  ;;  %v10805_v44 = vld [vmem:[#allocation2 + $0x90] sm:$0xe] }
 0x4c1   :  { %14818 = vmatpush3.bf16.msra.mxu0 %v15533_v4  ;;  %v10802_v4 = vld [vmem:[#allocation2 + $0x78] sm:$0xe] }
 0x4c2   :  { %14744 = vmatmul.mubr.msk.bf16.gmra.mrb[36].mxu1 %vm3272_vm9, %v13476_v35  ;;  %v10799_v35 = vld [vmem:[#allocation2 + $0x60] sm:$0xe]  ;;  %v13522_v6 = vrot.slane %v10802_v4, 9  ;;  %v10807_v4 = vld [vmem:[#allocation2 + $0xb0] sm:$0xe] }
 0x4c3   :  { %14751 = vmatprep.mubr.msk.bf16.mxu1 %vm3272_vm9, %v13575_v19  ;;  %v13517_v19 = vrot.slane %v10797_v58, 9  ;;  %v13519_v7 = vrot.slane %v10799_v35, 9  ;;  %v10801_v35 = vld [vmem:[#allocation2 + $0x70] sm:$0xe] }
 0x4c4   :  { %v13521_v40 = vrot.slane %v10801_v35, 9 }
 0x4c5   :  { %v18368_v24 = vpop.f32.mrb[84].mxu0  ;;  %v11010_v32 = vsel %vm17479_vm12, %v13517_v19, %v11009_v18  ;;  %v11018_v58 = vsel %vm17479_vm12, %v13519_v7, %v11017_v11  ;;  %v13523_v19 = vrot.slane %v10803_v22, 9  ;;  %v15748_v18 = vld [vmem:[#allocation2 + $0x84] sm:$0x1]  ;;  %v11025_v7 = vrot.slane %v15749_v10, 5 }
 0x4c6   :  { %v18370_v38 = vpop.f32.mrb[85].mxu0  ;;  %v13578_v9 = vcombine.low %v11010_v32, %v11014_v12  ;;  %v11033_v14 = vrot.slane %v15748_v18, 5  ;;  %v15750_v11 = vld [vmem:[#allocation2 + $0x8c] sm:$0x1]  ;;  %v10806_v12 = vld [vmem:[#allocation2 + $0x98] sm:$0xe] }
 0x4c7   :  { %v18374_v31 = vpop.f32.mrb[86].mxu0  ;;  %v11037_v21 = vrot.slane %v15750_v11, 5  ;;  %v13526_v29 = vrot.slane %v10806_v12, 9  ;;  %v15752_v18 = vld [vmem:[#allocation2 + $0x9c] sm:$0x1] }
 0x4c8   :  { %v18378_v34 = vpop.f32.mrb[87].mxu0  ;;  %v11034_v32 = vsel %vm17479_vm12, %v13523_v19, %v11033_v14  ;;  %v13527_v19 = vrot.slane %v10807_v4, 9  ;;  %v15753_v14 = vld [vmem:[#allocation2 + $0xb4] sm:$0x1]  ;;  %v10809_v4 = vld [vmem:[#allocation2 + $0xc0] sm:$0xe] }
 0x4c9   :  { %v11049_v10 = vrot.slane %v15753_v14, 5 }
 0x4ca   :  { %14752 = vmatmul.mubr.msk.bf16.vlgmr.msra.gmra.mrb[40].mxu1 %vm3272_vm9, %v13576_v59  ;;  %v13579_v59 = vcombine.low %v11018_v58, %v11022_v13  ;;  %v11026_v58 = vsel %vm17479_vm12, %v13521_v40, %v11025_v7  ;;  %v13525_v13 = vrot.slane %v10805_v44, 9  ;;  %v15754_v7 = vld [vmem:[#allocation2 + $0xbc] sm:$0x1]  ;;  %v10810_v44 = vld [vmem:[#allocation2 + $0xc8] sm:$0xe] }
 0x4cb   :  { %14755 = vmatprep.mubr.msk.bf16.mxu1 %vm3272_vm9, %v13577_v50  ;;  %v15747_v50 = vld [vmem:[#allocation2 + $0x7c] sm:$0x1]  ;;  %v11053_v11 = vrot.slane %v15754_v7, 5 }
 0x4cc   :  { %v11029_v62 = vrot.slane %v15747_v50, 5 }
 0x4ce   :  { %v11030_v54 = vsel %vm17479_vm12, %v13522_v6, %v11029_v62  ;;  %v11045_v6 = vrot.slane %v15752_v18, 5  ;;  %v10808_v62 = vld [vmem:[#allocation2 + $0xb8] sm:$0xe] }
 0x4cf   :  { %v13580_v22 = vcombine.low %v11026_v58, %v11030_v54  ;;  %v13528_v40 = vrot.slane %v10808_v62, 9  ;;  %v11050_v54 = vsel %vm17479_vm12, %v13527_v19, %v11049_v10  ;;  %v10812_v18 = vld [vmem:[#allocation2 + $0xd8] sm:$0xe]  ;;  %v15757_v62 = vld [vmem:[#allocation2 + $0xc4] sm:$0x1] }
 0x4d0   :  { %v11057_v19 = vrot.slane %v15757_v62, 5  ;;  %v13532_v14 = vrot.slane %v10812_v18, 9  ;;  %v15758_v10 = vld [vmem:[#allocation2 + $0xdc] sm:$0x1] }
 0x4d1   :  { %v11054_v58 = vsel %vm17479_vm12, %v13528_v40, %v11053_v11  ;;  %v11069_v7 = vrot.slane %v15758_v10, 5  ;;  %v10813_v11 = vld [vmem:[#allocation2 + $0xe0] sm:$0xe] }
 0x4d2   :  { %14756 = vmatmul.mubr.msk.bf16.gmra.mrb[44].mxu1 %vm3272_vm9, %v13578_v9  ;;  %v11038_v9 = vsel %vm17479_vm12, %v13524_v28, %v11037_v21  ;;  %v11046_v21 = vsel %vm17479_vm12, %v13526_v29, %v11045_v6  ;;  %v13529_v6 = vrot.slane %v10809_v4, 9 }
 0x4d3   :  { %14759 = vmatprep.mubr.msk.bf16.mxu1 %vm3272_vm9, %v13579_v59  ;;  %v13581_v35 = vcombine.low %v11034_v32, %v11038_v9  ;;  %v15751_v59 = vld [vmem:[#allocation2 + $0x94] sm:$0x1]  ;;  %v10811_v32 = vld [vmem:[#allocation2 + $0xd0] sm:$0xe]  ;;  %v13530_v9 = vrot.slane %v10810_v44, 9 }
 0x4d4   :  { %v11041_v50 = vrot.slane %v15751_v59, 5  ;;  %v10815_v44 = vld [vmem:[#allocation2 + $0x100] sm:$0xe] }
 0x4d6   :  { %v11042_v28 = vsel %vm17479_vm12, %v13525_v13, %v11041_v50  ;;  %v13531_v13 = vrot.slane %v10811_v32, 9  ;;  %v15756_v50 = vld [vmem:[#allocation2 + $0xd4] sm:$0x1] }
 0x4d7   :  { %v13582_v12 = vcombine.low %v11042_v28, %v11046_v21  ;;  %v11065_v29 = vrot.slane %v15756_v50, 5  ;;  %v10814_v21 = vld [vmem:[#allocation2 + $0xe8] sm:$0xe]  ;;  %v15760_v50 = vld [vmem:[#allocation2 + $0xec] sm:$0x1] }
 0x4d8   :  { %v13534_v18 = vrot.slane %v10814_v21, 9 }
 0x4d9   :  { %v11066_v28 = vsel %vm17479_vm12, %v13531_v13, %v11065_v29  ;;  %v13535_v13 = vrot.slane %v10815_v44, 9  ;;  %v15761_v29 = vld [vmem:[#allocation2 + $0x104] sm:$0x1]  ;;  %v10817_v44 = vld [vmem:[#allocation2 + $0x110] sm:$0xe] }
 0x4da   :  { %14760 = vmatmul.mubr.msk.bf16.gmra.mrb[48].mxu1 %vm3272_vm9, %v13580_v22  ;;  %v13583_v22 = vcombine.low %v11050_v54, %v11054_v58  ;;  %v11058_v54 = vsel %vm17479_vm12, %v13529_v6, %v11057_v19  ;;  %v13533_v58 = vrot.slane %v10813_v11, 9  ;;  %v11081_v62 = vrot.slane %v15761_v29, 5  ;;  %v15762_v19 = vld [vmem:[#allocation2 + $0x10c] sm:$0x1]  ;;  %v10818_v11 = vld [vmem:[#allocation2 + $0x118] sm:$0xe] }
 0x4db   :  { %14763 = vmatprep.mubr.msk.bf16.mxu1 %vm3272_vm9, %v13581_v35  ;;  %v15755_v35 = vld [vmem:[#allocation2 + $0xcc] sm:$0x1]  ;;  %v11085_v10 = vrot.slane %v15762_v19, 5 }
 0x4dc   :  { %v11061_v59 = vrot.slane %v15755_v35, 5 }
 0x4de   :  { %v11062_v40 = vsel %vm17479_vm12, %v13530_v9, %v11061_v59  ;;  %v11077_v9 = vrot.slane %v15760_v50, 5  ;;  %v10816_v59 = vld [vmem:[#allocation2 + $0x108] sm:$0xe] }
 0x4df   :  { %v13584_v32 = vcombine.low %v11058_v54, %v11062_v40  ;;  %v13536_v6 = vrot.slane %v10816_v59, 9  ;;  %v11082_v40 = vsel %vm17479_vm12, %v13535_v13, %v11081_v62  ;;  %v10820_v50 = vld [vmem:[#allocation2 + $0x128] sm:$0xe]  ;;  %v15765_v59 = vld [vmem:[#allocation2 + $0x114] sm:$0x1] }
 0x4e0   :  { %v11089_v13 = vrot.slane %v15765_v59, 5  ;;  %v13540_v29 = vrot.slane %v10820_v50, 9  ;;  %v15766_v62 = vld [vmem:[#allocation2 + $0x12c] sm:$0x1] }
 0x4e1   :  { %v11086_v54 = vsel %vm17479_vm12, %v13536_v6, %v11085_v10  ;;  %v11101_v19 = vrot.slane %v15766_v62, 5  ;;  %v10821_v10 = vld [vmem:[#allocation2 + $0x130] sm:$0xe] }
 0x4e2   :  { %14764 = vmatmul.mubr.msk.bf16.gmra.mrb[52].mxu1 %vm3272_vm9, %v13582_v12  ;;  %v11070_v12 = vsel %vm17479_vm12, %v13532_v14, %v11069_v7  ;;  %v11078_v7 = vsel %vm17479_vm12, %v13534_v18, %v11077_v9  ;;  %v13537_v9 = vrot.slane %v10817_v44, 9 }
 0x4e3   :  { %14767 = vmatprep.mubr.msk.bf16.mxu1 %vm3272_vm9, %v13583_v22  ;;  %v13585_v4 = vcombine.low %v11066_v28, %v11070_v12  ;;  %v15759_v22 = vld [vmem:[#allocation2 + $0xe4] sm:$0x1]  ;;  %v10819_v28 = vld [vmem:[#allocation2 + $0x120] sm:$0xe]  ;;  %v13538_v12 = vrot.slane %v10818_v11, 9 }
 0x4e4   :  { %v11073_v35 = vrot.slane %v15759_v22, 5  ;;  %v10823_v11 = vld [vmem:[#allocation2 + $0x150] sm:$0xe] }
 0x4e6   :  { %v11074_v14 = vsel %vm17479_vm12, %v13533_v58, %v11073_v35  ;;  %v13539_v58 = vrot.slane %v10819_v28, 9  ;;  %v15764_v35 = vld [vmem:[#allocation2 + $0x124] sm:$0x1] }
 0x4e7   :  { %v13586_v21 = vcombine.low %v11074_v14, %v11078_v7  ;;  %v11097_v18 = vrot.slane %v15764_v35, 5  ;;  %v10822_v7 = vld [vmem:[#allocation2 + $0x138] sm:$0xe]  ;;  %v15768_v35 = vld [vmem:[#allocation2 + $0x13c] sm:$0x1] }
 0x4e8   :  { %v13542_v50 = vrot.slane %v10822_v7, 9 }
 0x4e9   :  { %v11098_v14 = vsel %vm17479_vm12, %v13539_v58, %v11097_v18  ;;  %v13543_v58 = vrot.slane %v10823_v11, 9  ;;  %v15769_v18 = vld [vmem:[#allocation2 + $0x154] sm:$0x1]  ;;  %v10825_v11 = vld [vmem:[#allocation2 + $0x160] sm:$0xe] }
 0x4ea   :  { %14768 = vmatmul.mubr.msk.bf16.gmra.mrb[56].mxu1 %vm3272_vm9, %v13584_v32  ;;  %v13587_v32 = vcombine.low %v11082_v40, %v11086_v54  ;;  %v11090_v40 = vsel %vm17479_vm12, %v13537_v9, %v11089_v13  ;;  %v13541_v54 = vrot.slane %v10821_v10, 9  ;;  %v11113_v59 = vrot.slane %v15769_v18, 5  ;;  %v15770_v13 = vld [vmem:[#allocation2 + $0x15c] sm:$0x1]  ;;  %v10826_v10 = vld [vmem:[#allocation2 + $0x168] sm:$0xe] }
 0x4eb   :  { %14771 = vmatprep.mubr.msk.bf16.mxu1 %vm3272_vm9, %v13585_v4  ;;  %v15763_v4 = vld [vmem:[#allocation2 + $0x11c] sm:$0x1]  ;;  %v11117_v62 = vrot.slane %v15770_v13, 5 }
 0x4ec   :  { %v11093_v22 = vrot.slane %v15763_v4, 5 }
 0x4ee   :  { %v11094_v6 = vsel %vm17479_vm12, %v13538_v12, %v11093_v22  ;;  %v11109_v12 = vrot.slane %v15768_v35, 5  ;;  %v10824_v22 = vld [vmem:[#allocation2 + $0x158] sm:$0xe] }
 0x4ef   :  { %v13588_v28 = vcombine.low %v11090_v40, %v11094_v6  ;;  %v13544_v9 = vrot.slane %v10824_v22, 9  ;;  %v11114_v6 = vsel %vm17479_vm12, %v13543_v58, %v11113_v59  ;;  %v10828_v35 = vld [vmem:[#allocation2 + $0x178] sm:$0xe]  ;;  %v15773_v22 = vld [vmem:[#allocation2 + $0x164] sm:$0x1] }
 0x4f0   :  { %v11121_v58 = vrot.slane %v15773_v22, 5  ;;  %v13548_v18 = vrot.slane %v10828_v35, 9  ;;  %v15774_v59 = vld [vmem:[#allocation2 + $0x17c] sm:$0x1] }
 0x4f1   :  { %v11118_v40 = vsel %vm17479_vm12, %v13544_v9, %v11117_v62  ;;  %v11133_v13 = vrot.slane %v15774_v59, 5  ;;  %v10829_v62 = vld [vmem:[#allocation2 + $0x180] sm:$0xe] }
 0x4f2   :  { %14772 = vmatmul.mubr.msk.bf16.gmra.mrb[60].mxu1 %vm3272_vm9, %v13586_v21  ;;  %v11102_v21 = vsel %vm17479_vm12, %v13540_v29, %v11101_v19  ;;  %v11110_v19 = vsel %vm17479_vm12, %v13542_v50, %v11109_v12  ;;  %v13545_v12 = vrot.slane %v10825_v11, 9 }
 0x4f3   :  { %14775 = vmatprep.mubr.msk.bf16.mxu1 %vm3272_vm9, %v13587_v32  ;;  %v13589_v44 = vcombine.low %v11098_v14, %v11102_v21  ;;  %v15767_v32 = vld [vmem:[#allocation2 + $0x134] sm:$0x1]  ;;  %v10827_v14 = vld [vmem:[#allocation2 + $0x170] sm:$0xe]  ;;  %v13546_v21 = vrot.slane %v10826_v10, 9 }
 0x4f4   :  { %v11105_v4 = vrot.slane %v15767_v32, 5  ;;  %v10831_v10 = vld [vmem:[#allocation2 + $0x1a0] sm:$0xe] }
 0x4f6   :  { %v11106_v29 = vsel %vm17479_vm12, %v13541_v54, %v11105_v4  ;;  %v13547_v54 = vrot.slane %v10827_v14, 9  ;;  %v15772_v4 = vld [vmem:[#allocation2 + $0x174] sm:$0x1] }
 0x4f7   :  { %v13590_v7 = vcombine.low %v11106_v29, %v11110_v19  ;;  %v11129_v50 = vrot.slane %v15772_v4, 5  ;;  %v10830_v19 = vld [vmem:[#allocation2 + $0x188] sm:$0xe]  ;;  %v15776_v4 = vld [vmem:[#allocation2 + $0x18c] sm:$0x1] }
 0x4f8   :  { %v13550_v35 = vrot.slane %v10830_v19, 9 }
 0x4f9   :  { %v11130_v29 = vsel %vm17479_vm12, %v13547_v54, %v11129_v50  ;;  %v13551_v54 = vrot.slane %v10831_v10, 9  ;;  %v15777_v50 = vld [vmem:[#allocation2 + $0x1a4] sm:$0x1]  ;;  %v10833_v10 = vld [vmem:[#allocation2 + $0x1b0] sm:$0xe] }
 0x4fa   :  { %14776 = vmatmul.mubr.msk.bf16.gmra.mrb[0].mxu1 %vm3272_vm9, %v13588_v28  ;;  %v13591_v28 = vcombine.low %v11114_v6, %v11118_v40  ;;  %v11122_v6 = vsel %vm17479_vm12, %v13545_v12, %v11121_v58  ;;  %v13549_v40 = vrot.slane %v10829_v62, 9  ;;  %v11145_v22 = vrot.slane %v15777_v50, 5  ;;  %v15778_v58 = vld [vmem:[#allocation2 + $0x1ac] sm:$0x1]  ;;  %v10834_v62 = vld [vmem:[#allocation2 + $0x1b8] sm:$0xe] }
 0x4fb   :  { %14779 = vmatprep.mubr.msk.bf16.mxu1 %vm3272_vm9, %v13589_v44  ;;  %v15771_v44 = vld [vmem:[#allocation2 + $0x16c] sm:$0x1]  ;;  %v11149_v59 = vrot.slane %v15778_v58, 5  ;;  %v11165_v50 = vrot.slane %v18187_v51, 5  ;;  %v11169_v51 = vrot.slane %v18191_v36, 5 }
 0x4fc   :  { %v11125_v32 = vrot.slane %v15771_v44, 5 }
 0x4fe   :  { %v11126_v9 = vsel %vm17479_vm12, %v13546_v21, %v11125_v32  ;;  %v11141_v21 = vrot.slane %v15776_v4, 5  ;;  %v10832_v32 = vld [vmem:[#allocation2 + $0x1a8] sm:$0xe] }
 0x4ff   :  { %v13592_v14 = vcombine.low %v11122_v6, %v11126_v9  ;;  %v13552_v12 = vrot.slane %v10832_v32, 9  ;;  %v11146_v9 = vsel %vm17479_vm12, %v13551_v54, %v11145_v22  ;;  %v10836_v4 = vld [vmem:[#allocation2 + $0x1c8] sm:$0xe] }
 0x500   :  { %v13556_v54 = vrot.slane %v10836_v4, 9 }
 0x501   :  { %v11150_v6 = vsel %vm17479_vm12, %v13552_v12, %v11149_v59  ;;  %v10837_v12 = vld [vmem:[#allocation2 + $0x1d0] sm:$0xe]  ;;  %v10838_v59 = vld [vmem:[#allocation2 + $0x1d8] sm:$0xe] }
 0x502   :  { %14780 = vmatmul.mubr.msk.bf16.gmra.mrb[4].mxu1 %vm3272_vm9, %v13590_v7  ;;  %v11134_v7 = vsel %vm17479_vm12, %v13548_v18, %v11133_v13  ;;  %v11142_v13 = vsel %vm17479_vm12, %v13550_v35, %v11141_v21  ;;  %v13553_v35 = vrot.slane %v10833_v10, 9  ;;  %v15780_v21 = vld [vmem:[#allocation2 + $0x1b4] sm:$0x1]  ;;  %v10840_v10 = vld [vmem:[#allocation2 + $0x1f8] sm:$0xe] }
 0x503   :  { %14783 = vmatprep.mubr.msk.bf16.mxu1 %vm3272_vm9, %v13591_v28  ;;  %v13593_v11 = vcombine.low %v11130_v29, %v11134_v7  ;;  %v15775_v28 = vld [vmem:[#allocation2 + $0x184] sm:$0x1]  ;;  %v10835_v29 = vld [vmem:[#allocation2 + $0x1c0] sm:$0xe]  ;;  %v13554_v7 = vrot.slane %v10834_v62, 9  ;;  %v11153_v32 = vrot.slane %v15780_v21, 5 }
 0x504   :  { %v11137_v44 = vrot.slane %v15775_v28, 5  ;;  %v13557_v62 = vrot.slane %v10837_v12, 9  ;;  %v10841_v21 = vld [vmem:[#allocation2 + $0x200] sm:$0xe]  ;;  %v11193_v12 = vrot.slane %v18247_v39, 5 }
 0x505   :  { %v10847_v39 = vld [vmem:[#allocation2 + $0x240] sm:$0xe] }
 0x506   :  { %v11138_v18 = vsel %vm17479_vm12, %v13549_v40, %v11137_v44  ;;  %v13555_v40 = vrot.slane %v10835_v29, 9  ;;  %v11161_v44 = vrot.slane %v18178_v48, 5  ;;  %v10839_v48 = vld [vmem:[#allocation2 + $0x1f0] sm:$0xe]  ;;  %v11170_v4 = vsel %vm17479_vm12, %v13557_v62, %v11169_v51  ;;  %v10846_v62 = vld [vmem:[#allocation2 + $0x228] sm:$0xe] }
 0x507   :  { %v13594_v19 = vcombine.low %v11138_v18, %v11142_v13  ;;  %v11154_v18 = vsel %vm17479_vm12, %v13553_v35, %v11153_v32 }
 0x508   :  { %v11162_v58 = vsel %vm17479_vm12, %v13555_v40, %v11161_v44  ;;  %v10842_v40 = vld [vmem:[#allocation2 + $0x208] sm:$0xe]  ;;  %v10843_v44 = vld [vmem:[#allocation2 + $0x210] sm:$0xe] }
 0x50a   :  { %14784 = vmatmul.mubr.msk.bf16.gmra.mrb[8].mxu1 %vm3272_vm9, %v13592_v14  ;;  %v13595_v14 = vcombine.low %v11146_v9, %v11150_v6  ;;  %v11166_v9 = vsel %vm17479_vm12, %v13556_v54, %v11165_v50  ;;  %v11173_v6 = vrot.slane %v18208_v49, 5  ;;  %v13562_v54 = vrot.slane %v10842_v40, 9  ;;  %v10844_v50 = vld [vmem:[#allocation2 + $0x218] sm:$0xe] }
 0x50b   :  { %14787 = vmatprep.mubr.msk.bf16.mxu1 %vm3272_vm9, %v13593_v11  ;;  %v15779_v11 = vld [vmem:[#allocation2 + $0x1bc] sm:$0x1]  ;;  %v13597_v29 = vcombine.low %v11162_v58, %v11166_v9  ;;  %v13561_v58 = vrot.slane %v10841_v21, 9  ;;  %v10845_v9 = vld [vmem:[#allocation2 + $0x220] sm:$0xe] }
 0x50c   :  { %v11157_v28 = vrot.slane %v15779_v11, 5  ;;  %v13560_v11 = vrot.slane %v10840_v10, 9  ;;  %v13566_v10 = vrot.slane %v10846_v62, 9  ;;  %v10850_v40 = vld [vmem:[#allocation2 + $0x258] sm:$0xe] }
 0x50d   :  { %v13570_v21 = vrot.slane %v10850_v40, 9 }
 0x50e   :  { %v11158_v22 = vsel %vm17479_vm12, %v13554_v7, %v11157_v28  ;;  %v11177_v7 = vrot.slane %v18213_v60, 5  ;;  %v11181_v28 = vrot.slane %v18224_v8, 5  ;;  %v11189_v8 = vrot.slane %v18236_v5, 5 }
 0x50f   :  { %v13596_v13 = vcombine.low %v11154_v18, %v11158_v22  ;;  %v13563_v22 = vrot.slane %v10843_v44, 9  ;;  %v13564_v18 = vrot.slane %v10844_v50, 9 }
 0x510   :  { %v11182_v60 = vsel %vm17479_vm12, %v13560_v11, %v11181_v28  ;;  %v13567_v11 = vrot.slane %v10847_v39, 9  ;;  %v11209_v28 = vrot.slane %v18283_v57, 5  ;;  %v10849_v57 = vld [vmem:[#allocation2 + $0x250] sm:$0xe] }
 0x511   :  { %v11194_v5 = vsel %vm17479_vm12, %v13563_v22, %v11193_v12  ;;  %v18983_v12 = vcombine.low %v18126_v41, %v18133_v46 }
 0x512   :  { %14788 = vmatmul.mubr.msk.bf16.gmra.mrb[12].mxu1 %vm3272_vm9, %v13594_v19  ;;  %v13558_v19 = vrot.slane %v10838_v59, 9  ;;  %v11185_v59 = vrot.slane %v18232_v26, 5  ;;  %v13565_v26 = vrot.slane %v10845_v9, 9 }
 0x513   :  { %14791 = vmatprep.mubr.msk.bf16.mxu1 %vm3272_vm9, %v13595_v14  ;;  %v13559_v14 = vrot.slane %v10839_v48, 9  ;;  %v11197_v48 = vrot.slane %v18255_v1, 5  ;;  %v11201_v1 = vrot.slane %v18263_v3, 5 }
 0x514   :  { %v11174_v36 = vsel %vm17479_vm12, %v13558_v19, %v11173_v6 }
 0x515   :  { %v11178_v49 = vsel %vm17479_vm12, %v13559_v14, %v11177_v7  ;;  %v13598_v35 = vcombine.low %v11170_v4, %v11174_v36  ;;  %v11198_v19 = vsel %vm17479_vm12, %v13564_v18, %v11197_v48  ;;  %v11205_v14 = vrot.slane %v18275_v43, 5  ;;  %v10848_v7 = vld [vmem:[#allocation2 + $0x248] sm:$0xe]  ;;  %v18548_v18 = vld [vmem:[#allocation11 + $0x3] ss:$0 sm:$0xff] }
 0x516   :  { %v13599_v32 = vcombine.low %v11178_v49, %v11182_v60  ;;  %v13601_v6 = vcombine.low %v11194_v5, %v11198_v19  ;;  %v13568_v4 = vrot.slane %v10848_v7, 9  ;;  %v11213_v36 = vrot.slane %v18285_v45, 5 }
 0x517   :  { %v11202_v49 = vsel %vm17479_vm12, %v13565_v26, %v11201_v1  ;;  %v11206_v3 = vsel %vm17479_vm12, %v13566_v10, %v11205_v14  ;;  %v11210_v43 = vsel %vm17479_vm12, %v13567_v11, %v11209_v28  ;;  %v13569_v45 = vrot.slane %v10849_v57, 9  ;;  %v18985_v28 = vld [vmem:[#allocation57_spill] sm:$0xff] }
 0x518   :  { %v13602_v44 = vcombine.low %v11202_v49, %v11206_v3 }
 0x51a   :  { %14792 = vmatmul.mubr.msk.bf16.gmra.mrb[16].mxu1 %vm3272_vm9, %v13596_v13  ;;  %v11190_v13 = vsel %vm17479_vm12, %v13562_v54, %v11189_v8  ;;  %v11217_v54 = vrot.slane %v18310_v27, 5  ;;  %v18545_v27 = vld [vmem:[#allocation11 + $0x2] ss:$0 sm:$0xff] }
 0x51b   :  { %14795 = vmatprep.mubr.msk.bf16.mxu1 %vm3272_vm9, %v13597_v29  ;;  %v11186_v29 = vsel %vm17479_vm12, %v13561_v58, %v11185_v59 }
 0x51c   :  { %v13600_v51 = vcombine.low %v11186_v29, %v11190_v13  ;;  %v11218_v50 = vsel %vm17479_vm12, %v13569_v45, %v11217_v54 }
 0x522   :  { %14796 = vmatmul.mubr.msk.bf16.gmra.mrb[20].mxu1 %vm3272_vm9, %v13598_v35  ;;  %v11214_v35 = vsel %vm17479_vm12, %v13568_v4, %v11213_v36 }
 0x523   :  { %14799 = vmatprep.mubr.msk.bf16.mxu1 %vm3272_vm9, %v13599_v32  ;;  %v13603_v60 = vcombine.low %v11210_v43, %v11214_v35  ;;  %v11221_v32 = vrot.slane %v18316_v47, 5  ;;  %v18984_v47 = vcombine.low %v18144_v0, %v18150_v23  ;;  %v18986_v43 = vld [vmem:[#allocation58_spill] sm:$0xff] }
 0x525   :  { %v11222_v8 = vsel %vm17479_vm12, %v13570_v21, %v11221_v32 }
 0x526   :  { %v13604_v22 = vcombine.low %v11218_v50, %v11222_v8 }
 0x52a   :  { %14800 = vmatmul.mubr.msk.bf16.gmra.mrb[24].mxu1 %vm3272_vm9, %v13600_v51 }
 0x52b   :  { %14803 = vmatprep.mubr.msk.bf16.mxu1 %vm3272_vm9, %v13601_v6 }
 0x532   :  { %14804 = vmatmul.mubr.msk.bf16.gmra.mrb[28].mxu1 %vm3272_vm9, %v13602_v44 }
 0x533   :  { %14807 = vmatprep.mubr.msk.bf16.mxu1 %vm3272_vm9, %v13603_v60 }
 0x53a   :  { %14808 = vmatmul.mubr.msk.bf16.gmra.mrb[32].mxu1 %vm3272_vm9, %v13604_v22 }
 0x53b   :  { %14811 = vmatprep.mubr.msk.bf16.mxu1 %vm3272_vm9, %v18983_v12  ;;  %v18987_v12 = vld [vmem:[#allocation59_spill] sm:$0xff] }
 0x542   :  { %14812 = vmatmul.mubr.msk.bf16.gmra.mrb[36].mxu1 %vm3272_vm9, %v18984_v47 }
 0x59d   :  { %v14753_v58 = vpop.f32.mrb[40].mxu1 }
 0x59e   :  { %v14887_v59 = vadd.f32 %v14753_v58, %v18260_v63  ;;  %v11482_v55 = vpop.f32.mrb[41].mxu1 }
 0x59f   :  { %v14888_v48 = vadd.f32 %v11482_v55, %v18267_v25  ;;  %v14754_v13 = vpop.f32.mrb[42].mxu1 }
 0x5a0   :  { %v11807_v41 = vmul.f32 %v14887_v59, %v18545_v27  ;;  %v14889_v46 = vadd.f32 %v14754_v13, %v18269_v56  ;;  %v11485_v9 = vpop.f32.mrb[43].mxu1 }
 0x5a1   :  { %v11805_v0 = vmul.f32 %v14888_v48, %v18545_v27  ;;  %v14890_v23 = vadd.f32 %v11485_v9, %v18271_v61  ;;  %v18988_v48 = vld [vmem:[#allocation60_spill] sm:$0xff] }
 0x5a2   :  { %v11875_v5 = vadd.f32 %v18548_v18, %v11807_v41  ;;  %v11808_v62 = vmul.f32 %v14889_v46, %v18545_v27 }
 0x5a3   :  { %v11873_v63 = vadd.f32 %v18548_v18, %v11805_v0  ;;  %v11806_v29 = vmul.f32 %v14890_v23, %v18545_v27  ;;  %v18989_v0 = vld [vmem:[#allocation61_spill] sm:$0xff] }
 0x5a4   :  { %v11876_v25 = vadd.f32 %v18548_v18, %v11808_v62  ;;  %v11939_v19 = vmax.f32 %v11875_v5, 0.0 }
 0x5a5   :  { %v11874_v39 = vadd.f32 %v18548_v18, %v11806_v29  ;;  %v14757_v51 = vpop.f32.mrb[44].mxu1  ;;  %v11937_v1 = vmax.f32 %v11873_v63, 0.0 }
 0x5a6   :  { %v11940_v56 = vmax.f32 %v11876_v25, 0.0  ;;  %v14891_v26 = vadd.f32 %v14757_v51, %v18288_v33  ;;  %v11498_v6 = vpop.f32.mrb[45].mxu1 }
 0x5a7   :  { %v11938_v61 = vmax.f32 %v11874_v39, 0.0  ;;  %v14892_v10 = vadd.f32 %v11498_v6, %v18292_v17  ;;  %v14758_v14 = vpop.f32.mrb[46].mxu1 }
 0x5a8   :  { %v12002_v7 = vpack.c.bf16 %v11940_v56, %v11939_v19  ;;  %v11811_v11 = vmul.f32 %v14891_v26, %v18545_v27  ;;  %v14893_v4 = vadd.f32 %v14758_v14, %v18985_v28  ;;  %v11501_v36 = vpop.f32.mrb[47].mxu1 }
 0x5a9   :  { %v12001_v49 = vpack.c.bf16 %v11938_v61, %v11937_v1  ;;  %v11809_v3 = vmul.f32 %v14892_v10, %v18545_v27  ;;  %v14894_v40 = vadd.f32 %v11501_v36, %v18986_v43 }
 0x5aa   :  { %v11879_v44 = vadd.f32 %v18548_v18, %v11811_v11  ;;  %v11812_v33 = vmul.f32 %v14893_v4, %v18545_v27 }
 0x5ab   :  { %v11877_v35 = vadd.f32 %v18548_v18, %v11809_v3  ;;  %v11810_v17 = vmul.f32 %v14894_v40, %v18545_v27  ;;  %14819 = vmatprep.mubr.msk.bf16.mxu0 %vm3272_vm9, %v12001_v49 }
 0x5ac   :  { %v11880_v57 = vadd.f32 %v18548_v18, %v11812_v33  ;;  %14820 = vmatmul.mubr.msk.bf16.vlgmr.msra.gmra.mrb[128].mxu0 %vm3272_vm9, %v12002_v7  ;;  %v11943_v32 = vmax.f32 %v11879_v44, 0.0 }
 0x5ad   :  { %v11878_v60 = vadd.f32 %v18548_v18, %v11810_v17  ;;  %v14761_v21 = vpop.f32.mrb[48].mxu1  ;;  %v11941_v50 = vmax.f32 %v11877_v35, 0.0 }
 0x5ae   :  { %v11944_v45 = vmax.f32 %v11880_v57, 0.0  ;;  %v14895_v54 = vadd.f32 %v14761_v21, %v18308_v30  ;;  %v11514_v8 = vpop.f32.mrb[49].mxu1 }
 0x5af   :  { %v11942_v22 = vmax.f32 %v11878_v60, 0.0  ;;  %v14896_v47 = vadd.f32 %v11514_v8, %v18987_v12  ;;  %v14762_v58 = vpop.f32.mrb[50].mxu1 }
 0x5b0   :  { %v12004_v59 = vpack.c.bf16 %v11944_v45, %v11943_v32  ;;  %v11815_v55 = vmul.f32 %v14895_v54, %v18545_v27  ;;  %v14897_v13 = vadd.f32 %v14762_v58, %v18988_v48  ;;  %v11517_v41 = vpop.f32.mrb[51].mxu1 }
 0x5b1   :  { %v12003_v46 = vpack.c.bf16 %v11942_v22, %v11941_v50  ;;  %v11813_v9 = vmul.f32 %v14896_v47, %v18545_v27  ;;  %v14898_v23 = vadd.f32 %v11517_v41, %v18989_v0 }
 0x5b2   :  { %v11883_v5 = vadd.f32 %v18548_v18, %v11815_v55  ;;  %v11816_v30 = vmul.f32 %v14897_v13, %v18545_v27 }
 0x5b3   :  { %v11881_v62 = vadd.f32 %v18548_v18, %v11813_v9  ;;  %v11814_v63 = vmul.f32 %v14898_v23, %v18545_v27  ;;  %14823 = vmatprep.mubr.msk.bf16.mxu0 %vm3272_vm9, %v12003_v46 }
 0x5b4   :  { %v11884_v29 = vadd.f32 %v18548_v18, %v11816_v30  ;;  %14824 = vmatmul.mubr.msk.bf16.gmra.mrb[132].mxu0 %vm3272_vm9, %v12004_v59  ;;  %v11947_v51 = vmax.f32 %v11883_v5, 0.0 }
 0x5b5   :  { %v11882_v25 = vadd.f32 %v18548_v18, %v11814_v63  ;;  %v14765_v39 = vpop.f32.mrb[52].mxu1  ;;  %v11945_v6 = vmax.f32 %v11881_v62, 0.0 }
 0x5b6   :  { %v11948_v19 = vmax.f32 %v11884_v29, 0.0  ;;  %v14899_v56 = vadd.f32 %v14765_v39, %v18330_v42  ;;  %v11530_v26 = vpop.f32.mrb[53].mxu1 }
 0x5b7   :  { %v11946_v1 = vmax.f32 %v11882_v25, 0.0  ;;  %v14900_v61 = vadd.f32 %v11530_v26, %v18332_v52  ;;  %v14766_v10 = vpop.f32.mrb[54].mxu1 }
 0x5b8   :  { %v12006_v14 = vpack.c.bf16 %v11948_v19, %v11947_v51  ;;  %v11819_v7 = vmul.f32 %v14899_v56, %v18545_v27  ;;  %v14901_v11 = vadd.f32 %v14766_v10, %v18336_v15  ;;  %v11533_v28 = vpop.f32.mrb[55].mxu1 }
 0x5b9   :  { %v12005_v4 = vpack.c.bf16 %v11946_v1, %v11945_v6  ;;  %v11817_v36 = vmul.f32 %v14900_v61, %v18545_v27  ;;  %v14902_v49 = vadd.f32 %v11533_v28, %v18341_v16  ;;  %v18991_v28 = vld [vmem:[#allocation18_spill] sm:$0xff] }
 0x5ba   :  { %v11887_v3 = vadd.f32 %v18548_v18, %v11819_v7  ;;  %v11820_v42 = vmul.f32 %v14901_v11, %v18545_v27 }
 0x5bb   :  { %v11885_v43 = vadd.f32 %v18548_v18, %v11817_v36  ;;  %v11818_v52 = vmul.f32 %v14902_v49, %v18545_v27  ;;  %14827 = vmatprep.mubr.msk.bf16.mxu0 %vm3272_vm9, %v12005_v4 }
 0x5bc   :  { %v11888_v40 = vadd.f32 %v18548_v18, %v11820_v42  ;;  %14828 = vmatmul.mubr.msk.bf16.gmra.mrb[136].mxu0 %vm3272_vm9, %v12006_v14  ;;  %v11951_v33 = vmax.f32 %v11887_v3, 0.0  ;;  %v18992_v42 = vld [vmem:[#allocation19_spill] sm:$0xff] }
 0x5bd   :  { %v11886_v15 = vadd.f32 %v18548_v18, %v11818_v52  ;;  %v14769_v44 = vpop.f32.mrb[56].mxu1  ;;  %v11949_v57 = vmax.f32 %v11885_v43, 0.0 }
 0x5be   :  { %v11952_v35 = vmax.f32 %v11888_v40, 0.0  ;;  %v14903_v16 = vadd.f32 %v14769_v44, %v18350_v2  ;;  %v11546_v17 = vpop.f32.mrb[57].mxu1  ;;  %v18993_v44 = vld [vmem:[#allocation20_spill] sm:$0xff] }
 0x5bf   :  { %v11950_v60 = vmax.f32 %v11886_v15, 0.0  ;;  %v14904_v21 = vadd.f32 %v11546_v17, %v18352_v37  ;;  %v14770_v32 = vpop.f32.mrb[58].mxu1 }
 0x5c0   :  { %v12008_v45 = vpack.c.bf16 %v11952_v35, %v11951_v33  ;;  %v11823_v54 = vmul.f32 %v14903_v16, %v18545_v27  ;;  %v14905_v8 = vadd.f32 %v14770_v32, %v18358_v20  ;;  %v11549_v50 = vpop.f32.mrb[59].mxu1 }
 0x5c1   :  { %v12007_v22 = vpack.c.bf16 %v11950_v60, %v11949_v57  ;;  %v11821_v12 = vmul.f32 %v14904_v21, %v18545_v27  ;;  %v14906_v47 = vadd.f32 %v11549_v50, %v18362_v53 }
 0x5c2   :  { %v11891_v58 = vadd.f32 %v18548_v18, %v11823_v54  ;;  %v11824_v2 = vmul.f32 %v14905_v8, %v18545_v27  ;;  %v18994_v8 = vld [vmem:[#allocation21_spill] sm:$0xff] }
 0x5c3   :  { %v11889_v59 = vadd.f32 %v18548_v18, %v11821_v12  ;;  %v11822_v37 = vmul.f32 %v14906_v47, %v18545_v27  ;;  %14831 = vmatprep.mubr.msk.bf16.mxu0 %vm3272_vm9, %v12007_v22 }
 0x5c4   :  { %v11892_v55 = vadd.f32 %v18548_v18, %v11824_v2  ;;  %14832 = vmatmul.mubr.msk.bf16.gmra.mrb[140].mxu0 %vm3272_vm9, %v12008_v45  ;;  %v11955_v13 = vmax.f32 %v11891_v58, 0.0  ;;  %v18995_v58 = vld [vmem:[#allocation22_spill] sm:$0xff] }
 0x5c5   :  { %v11890_v20 = vadd.f32 %v18548_v18, %v11822_v37  ;;  %v14773_v48 = vpop.f32.mrb[60].mxu1  ;;  %v11953_v9 = vmax.f32 %v11889_v59, 0.0 }
 0x5c6   :  { %v11956_v41 = vmax.f32 %v11892_v55, 0.0  ;;  %v14907_v53 = vadd.f32 %v14773_v48, %v18368_v24  ;;  %v11562_v46 = vpop.f32.mrb[61].mxu1 }
 0x5c7   :  { %v11954_v0 = vmax.f32 %v11890_v20, 0.0  ;;  %v14908_v23 = vadd.f32 %v11562_v46, %v18370_v38  ;;  %v14774_v5 = vpop.f32.mrb[62].mxu1  ;;  %v18996_v20 = vld [vmem:[#allocation23_spill] sm:$0xff]  ;;  %v18997_v46 = vld [vmem:[#allocation24_spill] sm:$0xff] }
 0x5c8   :  { %v12010_v30 = vpack.c.bf16 %v11956_v41, %v11955_v13  ;;  %v11827_v62 = vmul.f32 %v14907_v53, %v18545_v27  ;;  %v14909_v63 = vadd.f32 %v14774_v5, %v18374_v31  ;;  %v11565_v29 = vpop.f32.mrb[63].mxu1 }
 0x5c9   :  { %v12009_v25 = vpack.c.bf16 %v11954_v0, %v11953_v9  ;;  %v11825_v39 = vmul.f32 %v14908_v23, %v18545_v27  ;;  %v14910_v51 = vadd.f32 %v11565_v29, %v18378_v34  ;;  %v18990_v34 = vld [vmem:[#allocation17_spill] sm:$0xff] }
 0x5ca   :  { %v11895_v19 = vadd.f32 %v18548_v18, %v11827_v62  ;;  %v11828_v24 = vmul.f32 %v14909_v63, %v18545_v27 }
 0x5cb   :  { %v11893_v56 = vadd.f32 %v18548_v18, %v11825_v39  ;;  %v11826_v38 = vmul.f32 %v14910_v51, %v18545_v27  ;;  %14835 = vmatprep.mubr.msk.bf16.mxu0 %vm3272_vm9, %v12009_v25  ;;  %v18998_v51 = vld [vmem:[#allocation25_spill] sm:$0xff] }
 0x5cc   :  { %v11896_v26 = vadd.f32 %v18548_v18, %v11828_v24  ;;  %14836 = vmatmul.mubr.msk.bf16.gmra.mrb[144].mxu0 %vm3272_vm9, %v12010_v30  ;;  %v11959_v1 = vmax.f32 %v11895_v19, 0.0 }
 0x5cd   :  { %v11894_v31 = vadd.f32 %v18548_v18, %v11826_v38  ;;  %v14777_v6 = vpop.f32.mrb[0].mxu1  ;;  %v11957_v7 = vmax.f32 %v11893_v56, 0.0 }
 0x5ce   :  { %v11960_v61 = vmax.f32 %v11896_v26, 0.0  ;;  %v14911_v10 = vadd.f32 %v14777_v6, %v18990_v34  ;;  %v11578_v14 = vpop.f32.mrb[1].mxu1  ;;  %v18999_v26 = vld [vmem:[#allocation26_spill] sm:$0xff]  ;;  %v19000_v34 = vld [vmem:[#allocation27_spill] sm:$0xff] }
 0x5cf   :  { %v11958_v11 = vmax.f32 %v11894_v31, 0.0  ;;  %v14912_v4 = vadd.f32 %v11578_v14, %v18991_v28  ;;  %v14778_v36 = vpop.f32.mrb[2].mxu1  ;;  %v19001_v28 = vld [vmem:[#allocation28_spill] sm:$0xff] }
 0x5d0   :  { %v12012_v49 = vpack.c.bf16 %v11960_v61, %v11959_v1  ;;  %v11831_v3 = vmul.f32 %v14911_v10, %v18545_v27  ;;  %v14913_v43 = vadd.f32 %v14778_v36, %v18992_v42  ;;  %v11581_v52 = vpop.f32.mrb[3].mxu1 }
 0x5d1   :  { %v12011_v40 = vpack.c.bf16 %v11958_v11, %v11957_v7  ;;  %v11829_v15 = vmul.f32 %v14912_v4, %v18545_v27  ;;  %v14914_v33 = vadd.f32 %v11581_v52, %v18993_v44 }
 0x5d2   :  { %v11899_v35 = vadd.f32 %v18548_v18, %v11831_v3  ;;  %v11832_v16 = vmul.f32 %v14913_v43, %v18545_v27 }
 0x5d3   :  { %v11897_v17 = vadd.f32 %v18548_v18, %v11829_v15  ;;  %v11830_v57 = vmul.f32 %v14914_v33, %v18545_v27  ;;  %14839 = vmatprep.mubr.msk.bf16.mxu0 %vm3272_vm9, %v12011_v40  ;;  %v19002_v33 = vld [vmem:[#allocation29_spill] sm:$0xff] }
 0x5d4   :  { %v11900_v60 = vadd.f32 %v18548_v18, %v11832_v16  ;;  %14840 = vmatmul.mubr.msk.bf16.gmra.mrb[148].mxu0 %vm3272_vm9, %v12012_v49  ;;  %v11963_v45 = vmax.f32 %v11899_v35, 0.0 }
 0x5d5   :  { %v11898_v21 = vadd.f32 %v18548_v18, %v11830_v57  ;;  %v14781_v32 = vpop.f32.mrb[4].mxu1  ;;  %v11961_v12 = vmax.f32 %v11897_v17, 0.0 }
 0x5d6   :  { %v11964_v54 = vmax.f32 %v11900_v60, 0.0  ;;  %v14915_v50 = vadd.f32 %v14781_v32, %v18994_v8  ;;  %v11594_v22 = vpop.f32.mrb[5].mxu1  ;;  %v19003_v60 = vld [vmem:[#allocation30_spill] sm:$0xff]  ;;  %v19004_v8 = vld [vmem:[#allocation31_spill] sm:$0xff] }
 0x5d7   :  { %v11962_v47 = vmax.f32 %v11898_v21, 0.0  ;;  %v14916_v2 = vadd.f32 %v11594_v22, %v18995_v58  ;;  %v14782_v59 = vpop.f32.mrb[6].mxu1  ;;  %v19005_v58 = vld [vmem:[#allocation32_spill] sm:$0xff] }
 0x5d8   :  { %v12014_v37 = vpack.c.bf16 %v11964_v54, %v11963_v45  ;;  %v11835_v55 = vmul.f32 %v14915_v50, %v18545_v27  ;;  %v14917_v48 = vadd.f32 %v14782_v59, %v18996_v20  ;;  %v11597_v13 = vpop.f32.mrb[7].mxu1 }
 0x5d9   :  { %v12013_v41 = vpack.c.bf16 %v11962_v47, %v11961_v12  ;;  %v11833_v53 = vmul.f32 %v14916_v2, %v18545_v27  ;;  %v14918_v9 = vadd.f32 %v11597_v13, %v18997_v46 }
 0x5da   :  { %v11903_v0 = vadd.f32 %v18548_v18, %v11835_v55  ;;  %v11836_v23 = vmul.f32 %v14917_v48, %v18545_v27 }
 0x5db   :  { %v11901_v5 = vadd.f32 %v18548_v18, %v11833_v53  ;;  %v11834_v30 = vmul.f32 %v14918_v9, %v18545_v27  ;;  %14843 = vmatprep.mubr.msk.bf16.mxu0 %vm3272_vm9, %v12013_v41  ;;  %v19006_v9 = vld [vmem:[#allocation33_spill] sm:$0xff] }
 0x5dc   :  { %v11904_v62 = vadd.f32 %v18548_v18, %v11836_v23  ;;  %14844 = vmatmul.mubr.msk.bf16.gmra.mrb[152].mxu0 %vm3272_vm9, %v12014_v37  ;;  %v11967_v25 = vmax.f32 %v11903_v0, 0.0 }
 0x5dd   :  { %v11902_v63 = vadd.f32 %v18548_v18, %v11834_v30  ;;  %v14785_v29 = vpop.f32.mrb[8].mxu1  ;;  %v11965_v56 = vmax.f32 %v11901_v5, 0.0 }
 0x5de   :  { %v11968_v39 = vmax.f32 %v11904_v62, 0.0  ;;  %v14919_v19 = vadd.f32 %v14785_v29, %v18998_v51  ;;  %v11610_v24 = vpop.f32.mrb[9].mxu1  ;;  %v19007_v62 = vld [vmem:[#allocation34_spill] sm:$0xff]  ;;  %v19008_v51 = vld [vmem:[#allocation35_spill] sm:$0xff] }
 0x5df   :  { %v11966_v38 = vmax.f32 %v11902_v63, 0.0  ;;  %v14920_v31 = vadd.f32 %v11610_v24, %v18999_v26  ;;  %v14786_v6 = vpop.f32.mrb[10].mxu1  ;;  %v19009_v26 = vld [vmem:[#allocation36_spill] sm:$0xff] }
 0x5e0   :  { %v12016_v1 = vpack.c.bf16 %v11968_v39, %v11967_v25  ;;  %v11839_v61 = vmul.f32 %v14919_v19, %v18545_v27  ;;  %v14921_v10 = vadd.f32 %v14786_v6, %v19000_v34  ;;  %v11613_v14 = vpop.f32.mrb[11].mxu1 }
 0x5e1   :  { %v12015_v7 = vpack.c.bf16 %v11966_v38, %v11965_v56  ;;  %v11837_v11 = vmul.f32 %v14920_v31, %v18545_v27  ;;  %v14922_v4 = vadd.f32 %v11613_v14, %v19001_v28 }
 0x5e2   :  { %v11907_v36 = vadd.f32 %v18548_v18, %v11839_v61  ;;  %v11840_v49 = vmul.f32 %v14921_v10, %v18545_v27 }
 0x5e3   :  { %v11905_v3 = vadd.f32 %v18548_v18, %v11837_v11  ;;  %v11838_v42 = vmul.f32 %v14922_v4, %v18545_v27  ;;  %14847 = vmatprep.mubr.msk.bf16.mxu0 %vm3272_vm9, %v12015_v7  ;;  %v19010_v4 = vld [vmem:[#allocation37_spill] sm:$0xff] }
 0x5e4   :  { %v11908_v43 = vadd.f32 %v18548_v18, %v11840_v49  ;;  %14848 = vmatmul.mubr.msk.bf16.gmra.mrb[156].mxu0 %vm3272_vm9, %v12016_v1  ;;  %v11971_v15 = vmax.f32 %v11907_v36, 0.0 }
 0x5e5   :  { %v11906_v52 = vadd.f32 %v18548_v18, %v11838_v42  ;;  %v14789_v40 = vpop.f32.mrb[12].mxu1  ;;  %v11969_v17 = vmax.f32 %v11905_v3, 0.0 }
 0x5e6   :  { %v11972_v44 = vmax.f32 %v11908_v43, 0.0  ;;  %v14923_v35 = vadd.f32 %v14789_v40, %v19002_v33  ;;  %v11626_v16 = vpop.f32.mrb[13].mxu1  ;;  %v19011_v43 = vld [vmem:[#allocation38_spill] sm:$0xff]  ;;  %v19012_v33 = vld [vmem:[#allocation39_spill] sm:$0xff] }
 0x5e7   :  { %v11970_v57 = vmax.f32 %v11906_v52, 0.0  ;;  %v14924_v21 = vadd.f32 %v11626_v16, %v19003_v60  ;;  %v14790_v32 = vpop.f32.mrb[14].mxu1  ;;  %v19013_v60 = vld [vmem:[#allocation40_spill] sm:$0xff] }
 0x5e8   :  { %v12018_v45 = vpack.c.bf16 %v11972_v44, %v11971_v15  ;;  %v11843_v54 = vmul.f32 %v14923_v35, %v18545_v27  ;;  %v14925_v50 = vadd.f32 %v14790_v32, %v19004_v8  ;;  %v11629_v22 = vpop.f32.mrb[15].mxu1 }
 0x5e9   :  { %v12017_v12 = vpack.c.bf16 %v11970_v57, %v11969_v17  ;;  %v11841_v47 = vmul.f32 %v14924_v21, %v18545_v27  ;;  %v14926_v2 = vadd.f32 %v11629_v22, %v19005_v58 }
 0x5ea   :  { %v11911_v59 = vadd.f32 %v18548_v18, %v11843_v54  ;;  %v11844_v37 = vmul.f32 %v14925_v50, %v18545_v27 }
 0x5eb   :  { %v11909_v55 = vadd.f32 %v18548_v18, %v11841_v47  ;;  %v11842_v20 = vmul.f32 %v14926_v2, %v18545_v27  ;;  %14851 = vmatprep.mubr.msk.bf16.mxu0 %vm3272_vm9, %v12017_v12  ;;  %v19014_v2 = vld [vmem:[#allocation41_spill] sm:$0xff] }
 0x5ec   :  { %v11912_v48 = vadd.f32 %v18548_v18, %v11844_v37  ;;  %14852 = vmatmul.mubr.msk.bf16.gmra.mrb[160].mxu0 %vm3272_vm9, %v12018_v45  ;;  %v11975_v53 = vmax.f32 %v11911_v59, 0.0 }
 0x5ed   :  { %v11910_v13 = vadd.f32 %v18548_v18, %v11842_v20  ;;  %v14793_v41 = vpop.f32.mrb[16].mxu1  ;;  %v11973_v5 = vmax.f32 %v11909_v55, 0.0 }
 0x5ee   :  { %v11976_v46 = vmax.f32 %v11912_v48, 0.0  ;;  %v14927_v0 = vadd.f32 %v14793_v41, %v19006_v9  ;;  %v11642_v23 = vpop.f32.mrb[17].mxu1  ;;  %v19015_v48 = vld [vmem:[#allocation42_spill] sm:$0xff]  ;;  %v19016_v9 = vld [vmem:[#allocation43_spill] sm:$0xff] }
 0x5ef   :  { %v11974_v30 = vmax.f32 %v11910_v13, 0.0  ;;  %v14928_v63 = vadd.f32 %v11642_v23, %v19007_v62  ;;  %v14794_v29 = vpop.f32.mrb[18].mxu1  ;;  %v19017_v62 = vld [vmem:[#allocation44_spill] sm:$0xff] }
 0x5f0   :  { %v12020_v25 = vpack.c.bf16 %v11976_v46, %v11975_v53  ;;  %v11847_v39 = vmul.f32 %v14927_v0, %v18545_v27  ;;  %v14929_v19 = vadd.f32 %v14794_v29, %v19008_v51  ;;  %v11645_v24 = vpop.f32.mrb[19].mxu1 }
 0x5f1   :  { %v12019_v56 = vpack.c.bf16 %v11974_v30, %v11973_v5  ;;  %v11845_v38 = vmul.f32 %v14928_v63, %v18545_v27  ;;  %v14930_v31 = vadd.f32 %v11645_v24, %v19009_v26 }
 0x5f2   :  { %v11915_v6 = vadd.f32 %v18548_v18, %v11847_v39  ;;  %v11848_v1 = vmul.f32 %v14929_v19, %v18545_v27 }
 0x5f3   :  { %v11913_v61 = vadd.f32 %v18548_v18, %v11845_v38  ;;  %v11846_v34 = vmul.f32 %v14930_v31, %v18545_v27  ;;  %14855 = vmatprep.mubr.msk.bf16.mxu0 %vm3272_vm9, %v12019_v56  ;;  %v19018_v31 = vld [vmem:[#allocation45_spill] sm:$0xff] }
 0x5f4   :  { %v11916_v10 = vadd.f32 %v18548_v18, %v11848_v1  ;;  %14856 = vmatmul.mubr.msk.bf16.gmra.mrb[164].mxu0 %vm3272_vm9, %v12020_v25  ;;  %v11979_v11 = vmax.f32 %v11915_v6, 0.0 }
 0x5f5   :  { %v11914_v14 = vadd.f32 %v18548_v18, %v11846_v34  ;;  %v14797_v7 = vpop.f32.mrb[20].mxu1  ;;  %v11977_v3 = vmax.f32 %v11913_v61, 0.0 }
 0x5f6   :  { %v11980_v28 = vmax.f32 %v11916_v10, 0.0  ;;  %v14931_v36 = vadd.f32 %v14797_v7, %v19010_v4  ;;  %v11658_v49 = vpop.f32.mrb[21].mxu1  ;;  %v19019_v10 = vld [vmem:[#allocation46_spill] sm:$0xff]  ;;  %v19020_v4 = vld [vmem:[#allocation47_spill] sm:$0xff] }
 0x5f7   :  { %v11978_v42 = vmax.f32 %v11914_v14, 0.0  ;;  %v14932_v52 = vadd.f32 %v11658_v49, %v19011_v43  ;;  %v14798_v40 = vpop.f32.mrb[22].mxu1  ;;  %v19021_v43 = vld [vmem:[#allocation48_spill] sm:$0xff] }
 0x5f8   :  { %v12022_v15 = vpack.c.bf16 %v11980_v28, %v11979_v11  ;;  %v11851_v44 = vmul.f32 %v14931_v36, %v18545_v27  ;;  %v14933_v35 = vadd.f32 %v14798_v40, %v19012_v33  ;;  %v11661_v16 = vpop.f32.mrb[23].mxu1 }
 0x5f9   :  { %v12021_v17 = vpack.c.bf16 %v11978_v42, %v11977_v3  ;;  %v11849_v57 = vmul.f32 %v14932_v52, %v18545_v27  ;;  %v14934_v21 = vadd.f32 %v11661_v16, %v19013_v60 }
 0x5fa   :  { %v11919_v32 = vadd.f32 %v18548_v18, %v11851_v44  ;;  %v11852_v45 = vmul.f32 %v14933_v35, %v18545_v27 }
 0x5fb   :  { %v11917_v54 = vadd.f32 %v18548_v18, %v11849_v57  ;;  %v11850_v8 = vmul.f32 %v14934_v21, %v18545_v27  ;;  %14859 = vmatprep.mubr.msk.bf16.mxu0 %vm3272_vm9, %v12021_v17  ;;  %v19022_v21 = vld [vmem:[#allocation49_spill] sm:$0xff] }
 0x5fc   :  { %v11920_v50 = vadd.f32 %v18548_v18, %v11852_v45  ;;  %14860 = vmatmul.mubr.msk.bf16.gmra.mrb[168].mxu0 %vm3272_vm9, %v12022_v15  ;;  %v11983_v47 = vmax.f32 %v11919_v32, 0.0 }
 0x5fd   :  { %v11918_v22 = vadd.f32 %v18548_v18, %v11850_v8  ;;  %v14801_v12 = vpop.f32.mrb[24].mxu1  ;;  %v11981_v55 = vmax.f32 %v11917_v54, 0.0 }
 0x5fe   :  { %v11984_v58 = vmax.f32 %v11920_v50, 0.0  ;;  %v14935_v59 = vadd.f32 %v14801_v12, %v19014_v2  ;;  %v11674_v37 = vpop.f32.mrb[25].mxu1  ;;  %v19023_v50 = vld [vmem:[#allocation50_spill] sm:$0xff]  ;;  %v19024_v2 = vld [vmem:[#allocation51_spill] sm:$0xff] }
 0x5ff   :  { %v11982_v20 = vmax.f32 %v11918_v22, 0.0  ;;  %v14936_v13 = vadd.f32 %v11674_v37, %v19015_v48  ;;  %v14802_v41 = vpop.f32.mrb[26].mxu1  ;;  %v19025_v48 = vld [vmem:[#allocation52_spill] sm:$0xff] }
 0x600   :  { %v12024_v53 = vpack.c.bf16 %v11984_v58, %v11983_v47  ;;  %v11855_v46 = vmul.f32 %v14935_v59, %v18545_v27  ;;  %v14937_v0 = vadd.f32 %v14802_v41, %v19016_v9  ;;  %v11677_v23 = vpop.f32.mrb[27].mxu1 }
 0x601   :  { %v12023_v5 = vpack.c.bf16 %v11982_v20, %v11981_v55  ;;  %v11853_v30 = vmul.f32 %v14936_v13, %v18545_v27  ;;  %v14938_v63 = vadd.f32 %v11677_v23, %v19017_v62 }
 0x602   :  { %v11923_v29 = vadd.f32 %v18548_v18, %v11855_v46  ;;  %v11856_v25 = vmul.f32 %v14937_v0, %v18545_v27 }
 0x603   :  { %v11921_v39 = vadd.f32 %v18548_v18, %v11853_v30  ;;  %v11854_v51 = vmul.f32 %v14938_v63, %v18545_v27  ;;  %14863 = vmatprep.mubr.msk.bf16.mxu0 %vm3272_vm9, %v12023_v5  ;;  %v19026_v63 = vld [vmem:[#allocation53_spill] sm:$0xff] }
 0x604   :  { %v11924_v19 = vadd.f32 %v18548_v18, %v11856_v25  ;;  %14864 = vmatmul.mubr.msk.bf16.gmra.mrb[172].mxu0 %vm3272_vm9, %v12024_v53  ;;  %v11987_v38 = vmax.f32 %v11923_v29, 0.0 }
 0x605   :  { %v11922_v24 = vadd.f32 %v18548_v18, %v11854_v51  ;;  %v14805_v56 = vpop.f32.mrb[28].mxu1  ;;  %v11985_v61 = vmax.f32 %v11921_v39, 0.0 }
 0x606   :  { %v11988_v26 = vmax.f32 %v11924_v19, 0.0  ;;  %v14939_v6 = vadd.f32 %v14805_v56, %v19018_v31  ;;  %v11690_v1 = vpop.f32.mrb[29].mxu1  ;;  %v19027_v19 = vld [vmem:[#allocation54_spill] sm:$0xff]  ;;  %v19028_v31 = vld [vmem:[#allocation55_spill] sm:$0xff] }
 0x607   :  { %v11986_v34 = vmax.f32 %v11922_v24, 0.0  ;;  %v14940_v14 = vadd.f32 %v11690_v1, %v19019_v10  ;;  %v14806_v7 = vpop.f32.mrb[30].mxu1  ;;  %v19029_v10 = vld [vmem:[#allocation56_spill] sm:$0xff] }
 0x608   :  { %v12026_v11 = vpack.c.bf16 %v11988_v26, %v11987_v38  ;;  %v11859_v28 = vmul.f32 %v14939_v6, %v18545_v27  ;;  %v14941_v36 = vadd.f32 %v14806_v7, %v19020_v4  ;;  %v11693_v49 = vpop.f32.mrb[31].mxu1 }
 0x609   :  { %v12025_v3 = vpack.c.bf16 %v11986_v34, %v11985_v61  ;;  %v11857_v42 = vmul.f32 %v14940_v14, %v18545_v27  ;;  %v14942_v52 = vadd.f32 %v11693_v49, %v19021_v43 }
 0x60a   :  { %v11927_v40 = vadd.f32 %v18548_v18, %v11859_v28  ;;  %v11860_v15 = vmul.f32 %v14941_v36, %v18545_v27 }
 0x60b   :  { %v11925_v44 = vadd.f32 %v18548_v18, %v11857_v42  ;;  %v11858_v33 = vmul.f32 %v14942_v52, %v18545_v27  ;;  %14867 = vmatprep.mubr.msk.bf16.mxu0 %vm3272_vm9, %v12025_v3 }
 0x60c   :  { %v11928_v35 = vadd.f32 %v18548_v18, %v11860_v15  ;;  %14868 = vmatmul.mubr.msk.bf16.gmra.mrb[176].mxu0 %vm3272_vm9, %v12026_v11  ;;  %v11991_v57 = vmax.f32 %v11927_v40, 0.0 }
 0x60d   :  { %v11926_v16 = vadd.f32 %v18548_v18, %v11858_v33  ;;  %v14809_v17 = vpop.f32.mrb[32].mxu1  ;;  %v11989_v54 = vmax.f32 %v11925_v44, 0.0  ;;  %v18773_v44 = vld [vmem:[#allocation11 + $0x4] ss:$0 sm:$0xff] }
 0x60e   :  { %v11992_v60 = vmax.f32 %v11928_v35, 0.0  ;;  %v14943_v32 = vadd.f32 %v14809_v17, %v19022_v21  ;;  %v11706_v45 = vpop.f32.mrb[33].mxu1 }
 0x60f   :  { %v11990_v8 = vmax.f32 %v11926_v16, 0.0  ;;  %v14944_v22 = vadd.f32 %v11706_v45, %v19023_v50  ;;  %v14810_v12 = vpop.f32.mrb[34].mxu1 }
 0x610   :  { %v12028_v47 = vpack.c.bf16 %v11992_v60, %v11991_v57  ;;  %v11863_v58 = vmul.f32 %v14943_v32, %v18545_v27  ;;  %v14945_v59 = vadd.f32 %v14810_v12, %v19024_v2  ;;  %v11709_v37 = vpop.f32.mrb[35].mxu1  ;;  %v15783_v2 = vld [vmem:[#allocation3 + $0x18] sm:$0xff] }
 0x611   :  { %v12027_v55 = vpack.c.bf16 %v11990_v8, %v11989_v54  ;;  %v11861_v20 = vmul.f32 %v14944_v22, %v18545_v27  ;;  %v14946_v13 = vadd.f32 %v11709_v37, %v19025_v48  ;;  %v15781_v54 = vld [vmem:[#allocation3 + $0x10] sm:$0xff]  ;;  %v15782_v22 = vld [vmem:[#allocation3] sm:$0xff] }
 0x612   :  { %v11931_v41 = vadd.f32 %v18548_v18, %v11863_v58  ;;  %v11864_v53 = vmul.f32 %v14945_v59, %v18545_v27 }
 0x613   :  { %v11929_v46 = vadd.f32 %v18548_v18, %v11861_v20  ;;  %v11862_v9 = vmul.f32 %v14946_v13, %v18545_v27  ;;  %14871 = vmatprep.mubr.msk.bf16.mxu0 %vm3272_vm9, %v12027_v55  ;;  %v15784_v55 = vld [vmem:[#allocation3 + $0x8] sm:$0xff] }
 0x614   :  { %v11932_v0 = vadd.f32 %v18548_v18, %v11864_v53  ;;  %14872 = vmatmul.mubr.msk.bf16.gmra.mrb[180].mxu0 %vm3272_vm9, %v12028_v47  ;;  %v11995_v30 = vmax.f32 %v11931_v41, 0.0 }
 0x615   :  { %v11930_v23 = vadd.f32 %v18548_v18, %v11862_v9  ;;  %v14813_v5 = vpop.f32.mrb[36].mxu1  ;;  %v11993_v39 = vmax.f32 %v11929_v46, 0.0 }
 0x616   :  { %v11996_v62 = vmax.f32 %v11932_v0, 0.0  ;;  %v14947_v29 = vadd.f32 %v14813_v5, %v19026_v63  ;;  %v11722_v25 = vpop.f32.mrb[37].mxu1 }
 0x617   :  { %v11994_v51 = vmax.f32 %v11930_v23, 0.0  ;;  %v14948_v24 = vadd.f32 %v11722_v25, %v19027_v19  ;;  %v14814_v56 = vpop.f32.mrb[38].mxu1 }
 0x618   :  { %v12030_v38 = vpack.c.bf16 %v11996_v62, %v11995_v30  ;;  %v11867_v26 = vmul.f32 %v14947_v29, %v18545_v27  ;;  %v14949_v6 = vadd.f32 %v14814_v56, %v19028_v31  ;;  %v11725_v1 = vpop.f32.mrb[39].mxu1  ;;  %v15785_v29 = vld [vmem:[#allocation3 + $0x30] sm:$0xff] }
 0x619   :  { %v12029_v61 = vpack.c.bf16 %v11994_v51, %v11993_v39  ;;  %v11865_v34 = vmul.f32 %v14948_v24, %v18545_v27  ;;  %v14950_v14 = vadd.f32 %v11725_v1, %v19029_v10  ;;  %v15786_v51 = vld [vmem:[#allocation3 + $0x20] sm:$0xff] }
 0x61a   :  { %v11935_v7 = vadd.f32 %v18548_v18, %v11867_v26  ;;  %v11868_v11 = vmul.f32 %v14949_v6, %v18545_v27  ;;  %v15788_v6 = vld [vmem:[#allocation3 + $0x28] sm:$0xff] }
 0x61b   :  { %v11933_v28 = vadd.f32 %v18548_v18, %v11865_v34  ;;  %v11866_v4 = vmul.f32 %v14950_v14, %v18545_v27  ;;  %14875 = vmatprep.mubr.msk.bf16.mxu0 %vm3272_vm9, %v12029_v61  ;;  %v18775_v27 = vld [vmem:[#allocation11 + $0x5] ss:$0 sm:$0xff] }
 0x61c   :  { %v11936_v36 = vadd.f32 %v18548_v18, %v11868_v11  ;;  %14876 = vmatmul.mubr.msk.bf16.gmra.mrb[184].mxu0 %vm3272_vm9, %v12030_v38  ;;  %v11999_v3 = vmax.f32 %v11935_v7, 0.0  ;;  %v15787_v38 = vld [vmem:[#allocation3 + $0x38] sm:$0xff] }
 0x61d   :  { %v11934_v49 = vadd.f32 %v18548_v18, %v11866_v4  ;;  %v11997_v43 = vmax.f32 %v11933_v28, 0.0 }
 0x61e   :  { %v12000_v42 = vmax.f32 %v11936_v36, 0.0 }
 0x61f   :  { %v11998_v52 = vmax.f32 %v11934_v49, 0.0 }
 0x620   :  { %v12032_v40 = vpack.c.bf16 %v12000_v42, %v11999_v3 }
 0x621   :  { %v12031_v15 = vpack.c.bf16 %v11998_v52, %v11997_v43  ;;  %v15789_v43 = vld [vmem:[#allocation3 + $0x50] sm:$0xff] }
 0x623   :  { %14879 = vmatprep.mubr.msk.bf16.mxu0 %vm3272_vm9, %v12031_v15  ;;  %v15790_v15 = vld [vmem:[#allocation3 + $0x40] sm:$0xff] }
 0x624   :  { %14880 = vmatmul.mubr.msk.bf16.gmra.mrb[188].mxu0 %vm3272_vm9, %v12032_v40 }
 0x67f   :  { %v14821_v33 = vpop.f32.mrb[128].mxu0 }
 0x680   :  { %v12440_v35 = vmul.f32 %v14821_v33, %v18773_v44  ;;  %v12179_v16 = vpop.f32.mrb[129].mxu0 }
 0x681   :  { %v12438_v18 = vmul.f32 %v18773_v44, %v12179_v16  ;;  %v14822_v17 = vpop.f32.mrb[130].mxu0 }
 0x682   :  { %v12508_v57 = vadd.f32 %v18775_v27, %v12440_v35  ;;  %v12441_v60 = vmul.f32 %v14822_v17, %v18773_v44  ;;  %v12182_v21 = vpop.f32.mrb[131].mxu0 }
 0x683   :  { %v12506_v32 = vadd.f32 %v18775_v27, %v12438_v18  ;;  %v12439_v45 = vmul.f32 %v18773_v44, %v12182_v21  ;;  %v15791_v18 = vld [vmem:[#allocation3 + $0x58] sm:$0xff] }
 0x684   :  { %v12572_v8 = vadd.f32 %v15781_v54, %v12508_v57  ;;  %v12509_v50 = vadd.f32 %v18775_v27, %v12441_v60  ;;  %v15792_v60 = vld [vmem:[#allocation3 + $0x48] sm:$0xff] }
 0x685   :  { %v12570_v12 = vadd.f32 %v15782_v22, %v12506_v32  ;;  %v12507_v47 = vadd.f32 %v18775_v27, %v12439_v45 }
 0x686   :  { %v12636_v58 = vmax.f32 %v12572_v8, 0.0  ;;  %v12573_v59 = vadd.f32 %v15783_v2, %v12509_v50 }
 0x687   :  { %v12634_v37 = vmax.f32 %v12570_v12, 0.0  ;;  %v12571_v20 = vadd.f32 %v15784_v55, %v12507_v47  ;;  %v14825_v48 = vpop.f32.mrb[132].mxu0  ;;  %v15793_v55 = vld [vmem:[#allocation3 + $0x70] sm:$0xff] }
 0x688   :  { %12700 = vst [vmem:[#allocation12 + $0x10] sm:$0xff] %v12636_v58  ;;  %v12637_v13 = vmax.f32 %v12573_v59, 0.0  ;;  %v12444_v41 = vmul.f32 %v14825_v48, %v18773_v44  ;;  %v12195_v53 = vpop.f32.mrb[133].mxu0 }
 0x689   :  { %12698 = vst [vmem:[#allocation12] sm:$0xff] %v12634_v37  ;;  %v12635_v46 = vmax.f32 %v12571_v20, 0.0  ;;  %v12442_v9 = vmul.f32 %v18773_v44, %v12195_v53  ;;  %v14826_v0 = vpop.f32.mrb[134].mxu0 }
 0x68a   :  { %12701 = vst [vmem:[#allocation12 + $0x18] sm:$0xff] %v12637_v13  ;;  %v12512_v23 = vadd.f32 %v18775_v27, %v12444_v41  ;;  %v12445_v5 = vmul.f32 %v14826_v0, %v18773_v44  ;;  %v12198_v30 = vpop.f32.mrb[135].mxu0  ;;  %v15794_v13 = vld [vmem:[#allocation3 + $0x60] sm:$0xff] }
 0x68b   :  { %12699 = vst [vmem:[#allocation12 + $0x8] sm:$0xff] %v12635_v46  ;;  %v12510_v62 = vadd.f32 %v18775_v27, %v12442_v9  ;;  %v12443_v63 = vmul.f32 %v18773_v44, %v12198_v30  ;;  %v15795_v9 = vld [vmem:[#allocation3 + $0x78] sm:$0xff] }
 0x68c   :  { %v12576_v25 = vadd.f32 %v15785_v29, %v12512_v23  ;;  %v12513_v39 = vadd.f32 %v18775_v27, %v12445_v5  ;;  %v15796_v5 = vld [vmem:[#allocation3 + $0x68] sm:$0xff] }
 0x68d   :  { %v12574_v19 = vadd.f32 %v15786_v51, %v12510_v62  ;;  %v12511_v24 = vadd.f32 %v18775_v27, %v12443_v63 }
 0x68e   :  { %v12640_v56 = vmax.f32 %v12576_v25, 0.0  ;;  %v12577_v26 = vadd.f32 %v15787_v38, %v12513_v39 }
 0x68f   :  { %v12638_v31 = vmax.f32 %v12574_v19, 0.0  ;;  %v12575_v1 = vadd.f32 %v15788_v6, %v12511_v24  ;;  %v14829_v61 = vpop.f32.mrb[136].mxu0  ;;  %v15797_v6 = vld [vmem:[#allocation3 + $0x90] sm:$0xff] }
 0x690   :  { %12704 = vst [vmem:[#allocation12 + $0x30] sm:$0xff] %v12640_v56  ;;  %v12641_v34 = vmax.f32 %v12577_v26, 0.0  ;;  %v12448_v10 = vmul.f32 %v14829_v61, %v18773_v44  ;;  %v12211_v14 = vpop.f32.mrb[137].mxu0 }
 0x691   :  { %12702 = vst [vmem:[#allocation12 + $0x20] sm:$0xff] %v12638_v31  ;;  %v12639_v7 = vmax.f32 %v12575_v1, 0.0  ;;  %v12446_v11 = vmul.f32 %v18773_v44, %v12211_v14  ;;  %v14830_v28 = vpop.f32.mrb[138].mxu0 }
 0x692   :  { %12705 = vst [vmem:[#allocation12 + $0x38] sm:$0xff] %v12641_v34  ;;  %v12516_v4 = vadd.f32 %v18775_v27, %v12448_v10  ;;  %v12449_v36 = vmul.f32 %v14830_v28, %v18773_v44  ;;  %v12214_v49 = vpop.f32.mrb[139].mxu0  ;;  %v15798_v34 = vld [vmem:[#allocation3 + $0x80] sm:$0xff] }
 0x693   :  { %12703 = vst [vmem:[#allocation12 + $0x28] sm:$0xff] %v12639_v7  ;;  %v12514_v3 = vadd.f32 %v18775_v27, %v12446_v11  ;;  %v12447_v42 = vmul.f32 %v18773_v44, %v12214_v49  ;;  %v15799_v11 = vld [vmem:[#allocation3 + $0x98] sm:$0xff] }
 0x694   :  { %v12580_v52 = vadd.f32 %v15789_v43, %v12516_v4  ;;  %v12517_v40 = vadd.f32 %v18775_v27, %v12449_v36  ;;  %v15800_v36 = vld [vmem:[#allocation3 + $0x88] sm:$0xff] }
 0x695   :  { %v12578_v33 = vadd.f32 %v15790_v15, %v12514_v3  ;;  %v12515_v35 = vadd.f32 %v18775_v27, %v12447_v42 }
 0x696   :  { %v12644_v16 = vmax.f32 %v12580_v52, 0.0  ;;  %v12581_v17 = vadd.f32 %v15791_v18, %v12517_v40 }
 0x697   :  { %v12642_v57 = vmax.f32 %v12578_v33, 0.0  ;;  %v12579_v21 = vadd.f32 %v15792_v60, %v12515_v35  ;;  %v14833_v32 = vpop.f32.mrb[140].mxu0  ;;  %v15801_v60 = vld [vmem:[#allocation3 + $0xb0] sm:$0xff] }
 0x698   :  { %12708 = vst [vmem:[#allocation12 + $0x50] sm:$0xff] %v12644_v16  ;;  %v12645_v45 = vmax.f32 %v12581_v17, 0.0  ;;  %v12452_v54 = vmul.f32 %v14833_v32, %v18773_v44  ;;  %v12227_v8 = vpop.f32.mrb[141].mxu0 }
 0x699   :  { %12706 = vst [vmem:[#allocation12 + $0x40] sm:$0xff] %v12642_v57  ;;  %v12643_v50 = vmax.f32 %v12579_v21, 0.0  ;;  %v12450_v22 = vmul.f32 %v18773_v44, %v12227_v8  ;;  %v14834_v12 = vpop.f32.mrb[142].mxu0 }
 0x69a   :  { %12709 = vst [vmem:[#allocation12 + $0x58] sm:$0xff] %v12645_v45  ;;  %v12520_v47 = vadd.f32 %v18775_v27, %v12452_v54  ;;  %v12453_v58 = vmul.f32 %v14834_v12, %v18773_v44  ;;  %v12230_v2 = vpop.f32.mrb[143].mxu0  ;;  %v15802_v45 = vld [vmem:[#allocation3 + $0xa0] sm:$0xff] }
 0x69b   :  { %12707 = vst [vmem:[#allocation12 + $0x48] sm:$0xff] %v12643_v50  ;;  %v12518_v59 = vadd.f32 %v18775_v27, %v12450_v22  ;;  %v12451_v37 = vmul.f32 %v18773_v44, %v12230_v2  ;;  %v15803_v22 = vld [vmem:[#allocation3 + $0xb8] sm:$0xff] }
 0x69c   :  { %v12584_v20 = vadd.f32 %v15793_v55, %v12520_v47  ;;  %v12521_v48 = vadd.f32 %v18775_v27, %v12453_v58  ;;  %v15804_v58 = vld [vmem:[#allocation3 + $0xa8] sm:$0xff] }
 0x69d   :  { %v12582_v41 = vadd.f32 %v15794_v13, %v12518_v59  ;;  %v12519_v53 = vadd.f32 %v18775_v27, %v12451_v37 }
 0x69e   :  { %v12648_v46 = vmax.f32 %v12584_v20, 0.0  ;;  %v12585_v0 = vadd.f32 %v15795_v9, %v12521_v48 }
 0x69f   :  { %v12646_v23 = vmax.f32 %v12582_v41, 0.0  ;;  %v12583_v30 = vadd.f32 %v15796_v5, %v12519_v53  ;;  %v14837_v62 = vpop.f32.mrb[144].mxu0  ;;  %v15805_v5 = vld [vmem:[#allocation3 + $0xd0] sm:$0xff] }
 0x6a0   :  { %12712 = vst [vmem:[#allocation12 + $0x70] sm:$0xff] %v12648_v46  ;;  %v12649_v63 = vmax.f32 %v12585_v0, 0.0  ;;  %v12456_v29 = vmul.f32 %v14837_v62, %v18773_v44  ;;  %v12243_v25 = vpop.f32.mrb[145].mxu0 }
 0x6a1   :  { %12710 = vst [vmem:[#allocation12 + $0x60] sm:$0xff] %v12646_v23  ;;  %v12647_v39 = vmax.f32 %v12583_v30, 0.0  ;;  %v12454_v51 = vmul.f32 %v18773_v44, %v12243_v25  ;;  %v14838_v19 = vpop.f32.mrb[146].mxu0 }
 0x6a2   :  { %12713 = vst [vmem:[#allocation12 + $0x78] sm:$0xff] %v12649_v63  ;;  %v12524_v24 = vadd.f32 %v18775_v27, %v12456_v29  ;;  %v12457_v56 = vmul.f32 %v14838_v19, %v18773_v44  ;;  %v12246_v38 = vpop.f32.mrb[147].mxu0  ;;  %v15806_v63 = vld [vmem:[#allocation3 + $0xc0] sm:$0xff] }
 0x6a3   :  { %12711 = vst [vmem:[#allocation12 + $0x68] sm:$0xff] %v12647_v39  ;;  %v12522_v26 = vadd.f32 %v18775_v27, %v12454_v51  ;;  %v12455_v31 = vmul.f32 %v18773_v44, %v12246_v38  ;;  %v15807_v51 = vld [vmem:[#allocation3 + $0xd8] sm:$0xff] }
 0x6a4   :  { %v12588_v1 = vadd.f32 %v15797_v6, %v12524_v24  ;;  %v12525_v61 = vadd.f32 %v18775_v27, %v12457_v56  ;;  %v15808_v56 = vld [vmem:[#allocation3 + $0xc8] sm:$0xff] }
 0x6a5   :  { %v12586_v10 = vadd.f32 %v15798_v34, %v12522_v26  ;;  %v12523_v14 = vadd.f32 %v18775_v27, %v12455_v31 }
 0x6a6   :  { %v12652_v7 = vmax.f32 %v12588_v1, 0.0  ;;  %v12589_v28 = vadd.f32 %v15799_v11, %v12525_v61 }
 0x6a7   :  { %v12650_v4 = vmax.f32 %v12586_v10, 0.0  ;;  %v12587_v49 = vadd.f32 %v15800_v36, %v12523_v14  ;;  %v14841_v3 = vpop.f32.mrb[148].mxu0  ;;  %v15809_v36 = vld [vmem:[#allocation3 + $0xf0] sm:$0xff] }
 0x6a8   :  { %12716 = vst [vmem:[#allocation12 + $0x90] sm:$0xff] %v12652_v7  ;;  %v12653_v42 = vmax.f32 %v12589_v28, 0.0  ;;  %v12460_v43 = vmul.f32 %v14841_v3, %v18773_v44  ;;  %v12259_v52 = vpop.f32.mrb[149].mxu0 }
 0x6a9   :  { %12714 = vst [vmem:[#allocation12 + $0x80] sm:$0xff] %v12650_v4  ;;  %v12651_v40 = vmax.f32 %v12587_v49, 0.0  ;;  %v12458_v15 = vmul.f32 %v18773_v44, %v12259_v52  ;;  %v14842_v33 = vpop.f32.mrb[150].mxu0 }
 0x6aa   :  { %12717 = vst [vmem:[#allocation12 + $0x98] sm:$0xff] %v12653_v42  ;;  %v12528_v35 = vadd.f32 %v18775_v27, %v12460_v43  ;;  %v12461_v16 = vmul.f32 %v14842_v33, %v18773_v44  ;;  %v12262_v18 = vpop.f32.mrb[151].mxu0  ;;  %v15810_v42 = vld [vmem:[#allocation3 + $0xe0] sm:$0xff] }
 0x6ab   :  { %12715 = vst [vmem:[#allocation12 + $0x88] sm:$0xff] %v12651_v40  ;;  %v12526_v17 = vadd.f32 %v18775_v27, %v12458_v15  ;;  %v12459_v57 = vmul.f32 %v18773_v44, %v12262_v18  ;;  %v15811_v15 = vld [vmem:[#allocation3 + $0xf8] sm:$0xff] }
 0x6ac   :  { %v12592_v21 = vadd.f32 %v15801_v60, %v12528_v35  ;;  %v12529_v32 = vadd.f32 %v18775_v27, %v12461_v16  ;;  %v15812_v16 = vld [vmem:[#allocation3 + $0xe8] sm:$0xff] }
 0x6ad   :  { %v12590_v54 = vadd.f32 %v15802_v45, %v12526_v17  ;;  %v12527_v8 = vadd.f32 %v18775_v27, %v12459_v57 }
 0x6ae   :  { %v12656_v50 = vmax.f32 %v12592_v21, 0.0  ;;  %v12593_v12 = vadd.f32 %v15803_v22, %v12529_v32 }
 0x6af   :  { %v12654_v47 = vmax.f32 %v12590_v54, 0.0  ;;  %v12591_v2 = vadd.f32 %v15804_v58, %v12527_v8  ;;  %v14845_v59 = vpop.f32.mrb[152].mxu0  ;;  %v15813_v58 = vld [vmem:[#allocation3 + $0x110] sm:$0xff] }
 0x6b0   :  { %12720 = vst [vmem:[#allocation12 + $0xb0] sm:$0xff] %v12656_v50  ;;  %v12657_v37 = vmax.f32 %v12593_v12, 0.0  ;;  %v12464_v55 = vmul.f32 %v14845_v59, %v18773_v44  ;;  %v12275_v20 = vpop.f32.mrb[153].mxu0 }
 0x6b1   :  { %12718 = vst [vmem:[#allocation12 + $0xa0] sm:$0xff] %v12654_v47  ;;  %v12655_v48 = vmax.f32 %v12591_v2, 0.0  ;;  %v12462_v13 = vmul.f32 %v18773_v44, %v12275_v20  ;;  %v14846_v41 = vpop.f32.mrb[154].mxu0 }
 0x6b2   :  { %12721 = vst [vmem:[#allocation12 + $0xb8] sm:$0xff] %v12657_v37  ;;  %v12532_v53 = vadd.f32 %v18775_v27, %v12464_v55  ;;  %v12465_v46 = vmul.f32 %v14846_v41, %v18773_v44  ;;  %v12278_v9 = vpop.f32.mrb[155].mxu0  ;;  %v15814_v37 = vld [vmem:[#allocation3 + $0x100] sm:$0xff] }
 0x6b3   :  { %12719 = vst [vmem:[#allocation12 + $0xa8] sm:$0xff] %v12655_v48  ;;  %v12530_v0 = vadd.f32 %v18775_v27, %v12462_v13  ;;  %v12463_v23 = vmul.f32 %v18773_v44, %v12278_v9  ;;  %v15815_v13 = vld [vmem:[#allocation3 + $0x118] sm:$0xff] }
 0x6b4   :  { %v12596_v30 = vadd.f32 %v15805_v5, %v12532_v53  ;;  %v12533_v62 = vadd.f32 %v18775_v27, %v12465_v46  ;;  %v15816_v46 = vld [vmem:[#allocation3 + $0x108] sm:$0xff] }
 0x6b5   :  { %v12594_v29 = vadd.f32 %v15806_v63, %v12530_v0  ;;  %v12531_v25 = vadd.f32 %v18775_v27, %v12463_v23 }
 0x6b6   :  { %v12660_v39 = vmax.f32 %v12596_v30, 0.0  ;;  %v12597_v19 = vadd.f32 %v15807_v51, %v12533_v62 }
 0x6b7   :  { %v12658_v24 = vmax.f32 %v12594_v29, 0.0  ;;  %v12595_v38 = vadd.f32 %v15808_v56, %v12531_v25  ;;  %v14849_v26 = vpop.f32.mrb[156].mxu0  ;;  %v15817_v56 = vld [vmem:[#allocation3 + $0x130] sm:$0xff] }
 0x6b8   :  { %12724 = vst [vmem:[#allocation12 + $0xd0] sm:$0xff] %v12660_v39  ;;  %v12661_v31 = vmax.f32 %v12597_v19, 0.0  ;;  %v12468_v6 = vmul.f32 %v14849_v26, %v18773_v44  ;;  %v12291_v1 = vpop.f32.mrb[157].mxu0 }
 0x6b9   :  { %12722 = vst [vmem:[#allocation12 + $0xc0] sm:$0xff] %v12658_v24  ;;  %v12659_v61 = vmax.f32 %v12595_v38, 0.0  ;;  %v12466_v34 = vmul.f32 %v18773_v44, %v12291_v1  ;;  %v14850_v10 = vpop.f32.mrb[158].mxu0 }
 0x6ba   :  { %12725 = vst [vmem:[#allocation12 + $0xd8] sm:$0xff] %v12661_v31  ;;  %v12536_v14 = vadd.f32 %v18775_v27, %v12468_v6  ;;  %v12469_v7 = vmul.f32 %v14850_v10, %v18773_v44  ;;  %v12294_v11 = vpop.f32.mrb[159].mxu0  ;;  %v15818_v31 = vld [vmem:[#allocation3 + $0x120] sm:$0xff] }
 0x6bb   :  { %12723 = vst [vmem:[#allocation12 + $0xc8] sm:$0xff] %v12659_v61  ;;  %v12534_v28 = vadd.f32 %v18775_v27, %v12466_v34  ;;  %v12467_v4 = vmul.f32 %v18773_v44, %v12294_v11  ;;  %v15819_v34 = vld [vmem:[#allocation3 + $0x138] sm:$0xff] }
 0x6bc   :  { %v12600_v49 = vadd.f32 %v15809_v36, %v12536_v14  ;;  %v12537_v3 = vadd.f32 %v18775_v27, %v12469_v7  ;;  %v15820_v7 = vld [vmem:[#allocation3 + $0x128] sm:$0xff] }
 0x6bd   :  { %v12598_v43 = vadd.f32 %v15810_v42, %v12534_v28  ;;  %v12535_v52 = vadd.f32 %v18775_v27, %v12467_v4 }
 0x6be   :  { %v12664_v40 = vmax.f32 %v12600_v49, 0.0  ;;  %v12601_v33 = vadd.f32 %v15811_v15, %v12537_v3 }
 0x6bf   :  { %v12662_v35 = vmax.f32 %v12598_v43, 0.0  ;;  %v12599_v18 = vadd.f32 %v15812_v16, %v12535_v52  ;;  %v14853_v17 = vpop.f32.mrb[160].mxu0  ;;  %v15821_v16 = vld [vmem:[#allocation3 + $0x150] sm:$0xff] }
 0x6c0   :  { %12728 = vst [vmem:[#allocation12 + $0xf0] sm:$0xff] %v12664_v40  ;;  %v12665_v57 = vmax.f32 %v12601_v33, 0.0  ;;  %v12472_v60 = vmul.f32 %v14853_v17, %v18773_v44  ;;  %v12307_v21 = vpop.f32.mrb[161].mxu0 }
 0x6c1   :  { %12726 = vst [vmem:[#allocation12 + $0xe0] sm:$0xff] %v12662_v35  ;;  %v12663_v32 = vmax.f32 %v12599_v18, 0.0  ;;  %v12470_v45 = vmul.f32 %v18773_v44, %v12307_v21  ;;  %v14854_v54 = vpop.f32.mrb[162].mxu0 }
 0x6c2   :  { %12729 = vst [vmem:[#allocation12 + $0xf8] sm:$0xff] %v12665_v57  ;;  %v12540_v8 = vadd.f32 %v18775_v27, %v12472_v60  ;;  %v12473_v50 = vmul.f32 %v14854_v54, %v18773_v44  ;;  %v12310_v22 = vpop.f32.mrb[163].mxu0  ;;  %v15822_v57 = vld [vmem:[#allocation3 + $0x140] sm:$0xff] }
 0x6c3   :  { %12727 = vst [vmem:[#allocation12 + $0xe8] sm:$0xff] %v12663_v32  ;;  %v12538_v12 = vadd.f32 %v18775_v27, %v12470_v45  ;;  %v12471_v47 = vmul.f32 %v18773_v44, %v12310_v22  ;;  %v15823_v45 = vld [vmem:[#allocation3 + $0x158] sm:$0xff] }
 0x6c4   :  { %v12604_v2 = vadd.f32 %v15813_v58, %v12540_v8  ;;  %v12541_v59 = vadd.f32 %v18775_v27, %v12473_v50  ;;  %v15824_v50 = vld [vmem:[#allocation3 + $0x148] sm:$0xff] }
 0x6c5   :  { %v12602_v55 = vadd.f32 %v15814_v37, %v12538_v12  ;;  %v12539_v20 = vadd.f32 %v18775_v27, %v12471_v47 }
 0x6c6   :  { %v12668_v48 = vmax.f32 %v12604_v2, 0.0  ;;  %v12605_v41 = vadd.f32 %v15815_v13, %v12541_v59 }
 0x6c7   :  { %v12666_v53 = vmax.f32 %v12602_v55, 0.0  ;;  %v12603_v9 = vadd.f32 %v15816_v46, %v12539_v20  ;;  %v14857_v0 = vpop.f32.mrb[164].mxu0  ;;  %v15825_v46 = vld [vmem:[#allocation3 + $0x170] sm:$0xff] }
 0x6c8   :  { %12732 = vst [vmem:[#allocation12 + $0x110] sm:$0xff] %v12668_v48  ;;  %v12669_v23 = vmax.f32 %v12605_v41, 0.0  ;;  %v12476_v5 = vmul.f32 %v14857_v0, %v18773_v44  ;;  %v12323_v30 = vpop.f32.mrb[165].mxu0 }
 0x6c9   :  { %12730 = vst [vmem:[#allocation12 + $0x100] sm:$0xff] %v12666_v53  ;;  %v12667_v62 = vmax.f32 %v12603_v9, 0.0  ;;  %v12474_v63 = vmul.f32 %v18773_v44, %v12323_v30  ;;  %v14858_v29 = vpop.f32.mrb[166].mxu0 }
 0x6ca   :  { %12733 = vst [vmem:[#allocation12 + $0x118] sm:$0xff] %v12669_v23  ;;  %v12544_v25 = vadd.f32 %v18775_v27, %v12476_v5  ;;  %v12477_v39 = vmul.f32 %v14858_v29, %v18773_v44  ;;  %v12326_v51 = vpop.f32.mrb[167].mxu0  ;;  %v15826_v23 = vld [vmem:[#allocation3 + $0x160] sm:$0xff] }
 0x6cb   :  { %12731 = vst [vmem:[#allocation12 + $0x108] sm:$0xff] %v12667_v62  ;;  %v12542_v19 = vadd.f32 %v18775_v27, %v12474_v63  ;;  %v12475_v24 = vmul.f32 %v18773_v44, %v12326_v51  ;;  %v15827_v63 = vld [vmem:[#allocation3 + $0x178] sm:$0xff] }
 0x6cc   :  { %v12608_v38 = vadd.f32 %v15817_v56, %v12544_v25  ;;  %v12545_v26 = vadd.f32 %v18775_v27, %v12477_v39  ;;  %v15828_v39 = vld [vmem:[#allocation3 + $0x168] sm:$0xff] }
 0x6cd   :  { %v12606_v6 = vadd.f32 %v15818_v31, %v12542_v19  ;;  %v12543_v1 = vadd.f32 %v18775_v27, %v12475_v24 }
 0x6ce   :  { %v12672_v61 = vmax.f32 %v12608_v38, 0.0  ;;  %v12609_v10 = vadd.f32 %v15819_v34, %v12545_v26 }
 0x6cf   :  { %v12670_v14 = vmax.f32 %v12606_v6, 0.0  ;;  %v12607_v11 = vadd.f32 %v15820_v7, %v12543_v1  ;;  %v14861_v28 = vpop.f32.mrb[168].mxu0  ;;  %v15829_v7 = vld [vmem:[#allocation3 + $0x190] sm:$0xff] }
 0x6d0   :  { %12736 = vst [vmem:[#allocation12 + $0x130] sm:$0xff] %v12672_v61  ;;  %v12673_v4 = vmax.f32 %v12609_v10, 0.0  ;;  %v12480_v36 = vmul.f32 %v14861_v28, %v18773_v44  ;;  %v12339_v49 = vpop.f32.mrb[169].mxu0 }
 0x6d1   :  { %12734 = vst [vmem:[#allocation12 + $0x120] sm:$0xff] %v12670_v14  ;;  %v12671_v3 = vmax.f32 %v12607_v11, 0.0  ;;  %v12478_v42 = vmul.f32 %v18773_v44, %v12339_v49  ;;  %v14862_v43 = vpop.f32.mrb[170].mxu0 }
 0x6d2   :  { %12737 = vst [vmem:[#allocation12 + $0x138] sm:$0xff] %v12673_v4  ;;  %v12548_v52 = vadd.f32 %v18775_v27, %v12480_v36  ;;  %v12481_v40 = vmul.f32 %v14862_v43, %v18773_v44  ;;  %v12342_v15 = vpop.f32.mrb[171].mxu0  ;;  %v15830_v4 = vld [vmem:[#allocation3 + $0x180] sm:$0xff] }
 0x6d3   :  { %12735 = vst [vmem:[#allocation12 + $0x128] sm:$0xff] %v12671_v3  ;;  %v12546_v33 = vadd.f32 %v18775_v27, %v12478_v42  ;;  %v12479_v35 = vmul.f32 %v18773_v44, %v12342_v15  ;;  %v15831_v42 = vld [vmem:[#allocation3 + $0x198] sm:$0xff] }
 0x6d4   :  { %v12612_v18 = vadd.f32 %v15821_v16, %v12548_v52  ;;  %v12549_v17 = vadd.f32 %v18775_v27, %v12481_v40  ;;  %v15832_v40 = vld [vmem:[#allocation3 + $0x188] sm:$0xff] }
 0x6d5   :  { %v12610_v60 = vadd.f32 %v15822_v57, %v12546_v33  ;;  %v12547_v21 = vadd.f32 %v18775_v27, %v12479_v35 }
 0x6d6   :  { %v12676_v32 = vmax.f32 %v12612_v18, 0.0  ;;  %v12613_v54 = vadd.f32 %v15823_v45, %v12549_v17 }
 0x6d7   :  { %v12674_v8 = vmax.f32 %v12610_v60, 0.0  ;;  %v12611_v22 = vadd.f32 %v15824_v50, %v12547_v21  ;;  %v14865_v12 = vpop.f32.mrb[172].mxu0  ;;  %v15833_v50 = vld [vmem:[#allocation3 + $0x1b0] sm:$0xff] }
 0x6d8   :  { %12740 = vst [vmem:[#allocation12 + $0x150] sm:$0xff] %v12676_v32  ;;  %v12677_v47 = vmax.f32 %v12613_v54, 0.0  ;;  %v12484_v58 = vmul.f32 %v14865_v12, %v18773_v44  ;;  %v12355_v2 = vpop.f32.mrb[173].mxu0 }
 0x6d9   :  { %12738 = vst [vmem:[#allocation12 + $0x140] sm:$0xff] %v12674_v8  ;;  %v12675_v59 = vmax.f32 %v12611_v22, 0.0  ;;  %v12482_v37 = vmul.f32 %v18773_v44, %v12355_v2  ;;  %v14866_v55 = vpop.f32.mrb[174].mxu0 }
 0x6da   :  { %12741 = vst [vmem:[#allocation12 + $0x158] sm:$0xff] %v12677_v47  ;;  %v12552_v20 = vadd.f32 %v18775_v27, %v12484_v58  ;;  %v12485_v48 = vmul.f32 %v14866_v55, %v18773_v44  ;;  %v12358_v13 = vpop.f32.mrb[175].mxu0  ;;  %v15834_v47 = vld [vmem:[#allocation3 + $0x1a0] sm:$0xff] }
 0x6db   :  { %12739 = vst [vmem:[#allocation12 + $0x148] sm:$0xff] %v12675_v59  ;;  %v12550_v41 = vadd.f32 %v18775_v27, %v12482_v37  ;;  %v12483_v53 = vmul.f32 %v18773_v44, %v12358_v13  ;;  %v15835_v37 = vld [vmem:[#allocation3 + $0x1b8] sm:$0xff] }
 0x6dc   :  { %v12616_v9 = vadd.f32 %v15825_v46, %v12552_v20  ;;  %v12553_v0 = vadd.f32 %v18775_v27, %v12485_v48  ;;  %v15836_v48 = vld [vmem:[#allocation3 + $0x1a8] sm:$0xff] }
 0x6dd   :  { %v12614_v5 = vadd.f32 %v15826_v23, %v12550_v41  ;;  %v12551_v30 = vadd.f32 %v18775_v27, %v12483_v53 }
 0x6de   :  { %v12680_v62 = vmax.f32 %v12616_v9, 0.0  ;;  %v12617_v29 = vadd.f32 %v15827_v63, %v12553_v0 }
 0x6df   :  { %v12678_v25 = vmax.f32 %v12614_v5, 0.0  ;;  %v12615_v51 = vadd.f32 %v15828_v39, %v12551_v30  ;;  %v14869_v19 = vpop.f32.mrb[176].mxu0  ;;  %v15837_v39 = vld [vmem:[#allocation3 + $0x1d0] sm:$0xff] }
 0x6e0   :  { %12744 = vst [vmem:[#allocation12 + $0x170] sm:$0xff] %v12680_v62  ;;  %v12681_v24 = vmax.f32 %v12617_v29, 0.0  ;;  %v12488_v56 = vmul.f32 %v14869_v19, %v18773_v44  ;;  %v12371_v38 = vpop.f32.mrb[177].mxu0 }
 0x6e1   :  { %12742 = vst [vmem:[#allocation12 + $0x160] sm:$0xff] %v12678_v25  ;;  %v12679_v26 = vmax.f32 %v12615_v51, 0.0  ;;  %v12486_v31 = vmul.f32 %v18773_v44, %v12371_v38  ;;  %v14870_v6 = vpop.f32.mrb[178].mxu0 }
 0x6e2   :  { %12745 = vst [vmem:[#allocation12 + $0x178] sm:$0xff] %v12681_v24  ;;  %v12556_v1 = vadd.f32 %v18775_v27, %v12488_v56  ;;  %v12489_v61 = vmul.f32 %v14870_v6, %v18773_v44  ;;  %v12374_v34 = vpop.f32.mrb[179].mxu0  ;;  %v15838_v24 = vld [vmem:[#allocation3 + $0x1c0] sm:$0xff] }
 0x6e3   :  { %12743 = vst [vmem:[#allocation12 + $0x168] sm:$0xff] %v12679_v26  ;;  %v12554_v10 = vadd.f32 %v18775_v27, %v12486_v31  ;;  %v12487_v14 = vmul.f32 %v18773_v44, %v12374_v34  ;;  %v15839_v31 = vld [vmem:[#allocation3 + $0x1d8] sm:$0xff] }
 0x6e4   :  { %v12620_v11 = vadd.f32 %v15829_v7, %v12556_v1  ;;  %v12557_v28 = vadd.f32 %v18775_v27, %v12489_v61  ;;  %v15840_v61 = vld [vmem:[#allocation3 + $0x1c8] sm:$0xff] }
 0x6e5   :  { %v12618_v36 = vadd.f32 %v15830_v4, %v12554_v10  ;;  %v12555_v49 = vadd.f32 %v18775_v27, %v12487_v14 }
 0x6e6   :  { %v12684_v3 = vmax.f32 %v12620_v11, 0.0  ;;  %v12621_v43 = vadd.f32 %v15831_v42, %v12557_v28 }
 0x6e7   :  { %v12682_v52 = vmax.f32 %v12618_v36, 0.0  ;;  %v12619_v15 = vadd.f32 %v15832_v40, %v12555_v49  ;;  %v14873_v33 = vpop.f32.mrb[180].mxu0  ;;  %v15841_v40 = vld [vmem:[#allocation3 + $0x1f0] sm:$0xff] }
 0x6e8   :  { %12748 = vst [vmem:[#allocation12 + $0x190] sm:$0xff] %v12684_v3  ;;  %v12685_v35 = vmax.f32 %v12621_v43, 0.0  ;;  %v12492_v16 = vmul.f32 %v14873_v33, %v18773_v44  ;;  %v12387_v18 = vpop.f32.mrb[181].mxu0 }
 0x6e9   :  { %12746 = vst [vmem:[#allocation12 + $0x180] sm:$0xff] %v12682_v52  ;;  %v12683_v17 = vmax.f32 %v12619_v15, 0.0  ;;  %v12490_v57 = vmul.f32 %v18773_v44, %v12387_v18  ;;  %v14874_v60 = vpop.f32.mrb[182].mxu0 }
 0x6ea   :  { %12749 = vst [vmem:[#allocation12 + $0x198] sm:$0xff] %v12685_v35  ;;  %v12560_v21 = vadd.f32 %v18775_v27, %v12492_v16  ;;  %v12493_v32 = vmul.f32 %v14874_v60, %v18773_v44  ;;  %v12390_v45 = vpop.f32.mrb[183].mxu0  ;;  %v15842_v35 = vld [vmem:[#allocation3 + $0x1e0] sm:$0xff] }
 0x6eb   :  { %12747 = vst [vmem:[#allocation12 + $0x188] sm:$0xff] %v12683_v17  ;;  %v12558_v54 = vadd.f32 %v18775_v27, %v12490_v57  ;;  %v12491_v8 = vmul.f32 %v18773_v44, %v12390_v45  ;;  %v15843_v57 = vld [vmem:[#allocation3 + $0x1f8] sm:$0xff] }
 0x6ec   :  { %v12624_v22 = vadd.f32 %v15833_v50, %v12560_v21  ;;  %v12561_v12 = vadd.f32 %v18775_v27, %v12493_v32  ;;  %v15844_v32 = vld [vmem:[#allocation3 + $0x1e8] sm:$0xff] }
 0x6ed   :  { %v12622_v58 = vadd.f32 %v15834_v47, %v12558_v54  ;;  %v12559_v2 = vadd.f32 %v18775_v27, %v12491_v8 }
 0x6ee   :  { %v12688_v59 = vmax.f32 %v12624_v22, 0.0  ;;  %v12625_v55 = vadd.f32 %v15835_v37, %v12561_v12 }
 0x6ef   :  { %v12686_v20 = vmax.f32 %v12622_v58, 0.0  ;;  %v12623_v13 = vadd.f32 %v15836_v48, %v12559_v2  ;;  %v14877_v41 = vpop.f32.mrb[184].mxu0 }
 0x6f0   :  { %12752 = vst [vmem:[#allocation12 + $0x1b0] sm:$0xff] %v12688_v59  ;;  %v12689_v53 = vmax.f32 %v12625_v55, 0.0  ;;  %v12496_v46 = vmul.f32 %v14877_v41, %v18773_v44  ;;  %v12403_v9 = vpop.f32.mrb[185].mxu0 }
 0x6f1   :  { %12750 = vst [vmem:[#allocation12 + $0x1a0] sm:$0xff] %v12686_v20  ;;  %v12687_v0 = vmax.f32 %v12623_v13, 0.0  ;;  %v12494_v23 = vmul.f32 %v18773_v44, %v12403_v9  ;;  %v14878_v5 = vpop.f32.mrb[186].mxu0 }
 0x6f2   :  { %12753 = vst [vmem:[#allocation12 + $0x1b8] sm:$0xff] %v12689_v53  ;;  %v12564_v30 = vadd.f32 %v18775_v27, %v12496_v46  ;;  %v12497_v62 = vmul.f32 %v14878_v5, %v18773_v44  ;;  %v12406_v63 = vpop.f32.mrb[187].mxu0 }
 0x6f3   :  { %12751 = vst [vmem:[#allocation12 + $0x1a8] sm:$0xff] %v12687_v0  ;;  %v12562_v29 = vadd.f32 %v18775_v27, %v12494_v23  ;;  %v12495_v25 = vmul.f32 %v18773_v44, %v12406_v63 }
 0x6f4   :  { %v12628_v51 = vadd.f32 %v15837_v39, %v12564_v30  ;;  %v12565_v19 = vadd.f32 %v18775_v27, %v12497_v62 }
 0x6f5   :  { %v12626_v56 = vadd.f32 %v15838_v24, %v12562_v29  ;;  %v12563_v38 = vadd.f32 %v18775_v27, %v12495_v25 }
 0x6f6   :  { %v12692_v26 = vmax.f32 %v12628_v51, 0.0  ;;  %v12629_v6 = vadd.f32 %v15839_v31, %v12565_v19 }
 0x6f7   :  { %v12690_v1 = vmax.f32 %v12626_v56, 0.0  ;;  %v12627_v34 = vadd.f32 %v15840_v61, %v12563_v38  ;;  %v14881_v10 = vpop.f32.mrb[188].mxu0 }
 0x6f8   :  { %12756 = vst [vmem:[#allocation12 + $0x1d0] sm:$0xff] %v12692_v26  ;;  %v12693_v14 = vmax.f32 %v12629_v6, 0.0  ;;  %v12500_v7 = vmul.f32 %v14881_v10, %v18773_v44  ;;  %v12419_v11 = vpop.f32.mrb[189].mxu0 }
 0x6f9   :  { %12754 = vst [vmem:[#allocation12 + $0x1c0] sm:$0xff] %v12690_v1  ;;  %v12691_v28 = vmax.f32 %v12627_v34, 0.0  ;;  %v12498_v4 = vmul.f32 %v18773_v44, %v12419_v11  ;;  %v14882_v36 = vpop.f32.mrb[190].mxu0 }
 0x6fa   :  { %12757 = vst [vmem:[#allocation12 + $0x1d8] sm:$0xff] %v12693_v14  ;;  %v12568_v49 = vadd.f32 %v18775_v27, %v12500_v7  ;;  %v12501_v3 = vmul.f32 %v14882_v36, %v18773_v44  ;;  %v12422_v42 = vpop.f32.mrb[191].mxu0 }
 0x6fb   :  { %12755 = vst [vmem:[#allocation12 + $0x1c8] sm:$0xff] %v12691_v28  ;;  %v12566_v43 = vadd.f32 %v18775_v27, %v12498_v4  ;;  %v12499_v52 = vmul.f32 %v18773_v44, %v12422_v42 }
 0x6fc   :  { %v12632_v15 = vadd.f32 %v15841_v40, %v12568_v49  ;;  %v12569_v33 = vadd.f32 %v18775_v27, %v12501_v3 }
 0x6fd   :  { %v12630_v16 = vadd.f32 %v15842_v35, %v12566_v43  ;;  %v12567_v18 = vadd.f32 %v18775_v27, %v12499_v52 }
 0x6fe   :  { %v12696_v17 = vmax.f32 %v12632_v15, 0.0  ;;  %v12633_v60 = vadd.f32 %v15843_v57, %v12569_v33 }
 0x6ff   :  { %v12694_v21 = vmax.f32 %v12630_v16, 0.0  ;;  %v12631_v45 = vadd.f32 %v15844_v32, %v12567_v18 }
 0x700   :  { %12760 = vst [vmem:[#allocation12 + $0x1f0] sm:$0xff] %v12696_v17  ;;  %v12697_v54 = vmax.f32 %v12633_v60, 0.0 }
 0x701   :  { %12758 = vst [vmem:[#allocation12 + $0x1e0] sm:$0xff] %v12694_v21  ;;  %v12695_v44 = vmax.f32 %v12631_v45, 0.0 }
 0x702   :  { %12761 = vst [vmem:[#allocation12 + $0x1f8] sm:$0xff] %v12697_v54 }
 0x703   :  { %12759 = vst [vmem:[#allocation12 + $0x1e8] sm:$0xff] %v12695_v44 }
 0x704   :  { %15966 = shalt.err (!%p15963_p2)
}
 0x705   :  { %s15967_s9 = scalar_lea.hbm %s18925_s5, 8192 }
 0x706   :  { %p15968_p3 = scmp.ne.s32.totalorder %s18925_s5, %s15967_s9  ;;  %p15971_p4 = scmp.lt.u32.totalorder %s15967_s9, %s18925_s5 }
 0x708   :  { %p15973_p5 = pnand %p15971_p4, %p15968_p3 }
 0x70a   :  { %15976 = shalt.err (!%p15973_p5)
}
 0x70b   :  { %12773 = dma.vmem_to_hbm [thread:$0]  %s12768_s29, 8192, %s18925_s5, [#allocation5], %s15990_s3, %s15990_s3, %s15991_s30  }
 0x70c   :  { %15983 = dma.done.wait [#allocation5], 8192  }
 0x70d   :  { %15984 = vsyncadd [#allocation5], 4294959104 }
 0x70e   :  { %12777 = vsyncpa [#allocation4], 1 }
 0x70f   :  { %12778 = vsyncpa [#allocation7], 1 }
 0x710   :  { %12779 = vsyncpa [#allocation10], 1 }
 0x711   :  { %12780 = vsyncpa [#allocation5], 1 }

</bundles_post_ra>
